<compile_context>
chip_gen: v5e
topology: v5e:2x2
jax: 0.10.0
libtpu: 0.0.40
codegen_flags: <defaults>
</compile_context>

<pallas_src>
from functools import partial

import jax
import jax.numpy as jnp
from jax.experimental import pallas as pl
from jax.experimental.pallas import tpu as pltpu

# ----- VectorQuantizerEMA hyperparameters (PyTorch module defaults) ----------
NUM_EMBEDDINGS = 256
EMBEDDING_DIM = 32
COMMITMENT_COST = 6.0
DECAY = 0.99
EPSILON = 1e-5

_AUG = 8  # sublane-aligned augmentation width for the folded ||e||^2 term


def _pick_tile_s(S):
    """Voxels per grid step; prefer big tiles (amortize per-step overhead)."""
    for t in (2048, 1024, 512, 256, 128):
        if S % t == 0:
            return t
    # TODO(synk): pad + mask the last partial tile when S % 128 != 0.
    raise ValueError(f"spatial size D*H*W={S} must be a multiple of 128")


def _vq_kernel(x_ref, eaug_ref, et_ref,
               q_ref, idx_ref, err_ref, cnt_ref, dwt_ref):
    # x_ref    : [C, TS]     one tile of voxels, channel-major, native dtype
    # eaug_ref : [K, C+8]    resident [-2*e | ||e||^2 | zeros] (fp32)
    # et_ref   : [C, K]      resident codebook^T (fp32)
    # q_ref    : [C, TS]     quantized voxels out (x.dtype, lane-dense)
    # idx_ref  : [1, TS]     int32 argmin indices out (lane-dense)
    # err_ref  : [1, TS]     per-voxel ||q - x||^2 out (lane-dense)
    # cnt_ref  : [1, K]      per-batch cluster counts, accumulated over s
    # dwt_ref  : [C, K]      per-batch dw^T = x @ onehot^T, accumulated over s
    s = pl.program_id(1)

    x_t = x_ref[...].astype(jnp.float32)                               # [C, TS]
    ts = x_t.shape[1]
    e_aug = eaug_ref[...]                                              # [K, C+8]
    e_t = et_ref[...]                                                  # [C, K]
    k_num = e_aug.shape[0]

    # dist[k, i] = ||e_k||^2 - 2<e_k, x_i>  (per-voxel ||x_i||^2 dropped: it is
    # a per-column constant that does not change the argmin; the loss is
    # computed exactly from (q - x)^2 below).  Single MXU matmul, no
    # elementwise passes over the [K, TS] array.
    ones_pad = jnp.ones((_AUG, ts), dtype=jnp.float32)
    x_aug = jnp.concatenate([x_t, ones_pad], axis=0)                   # [C+8, TS]
    dist = jnp.dot(e_aug, x_aug, preferred_element_type=jnp.float32)   # [K, TS]

    # argmin over K (sublane axis) with first-occurrence tie-break
    min_d = jnp.min(dist, axis=0, keepdims=True)                       # [1, TS]
    k_iota = jax.lax.broadcasted_iota(jnp.int32, dist.shape, 0)        # [K, TS]
    idx = jnp.min(jnp.where(dist <= min_d, k_iota, k_num),
                  axis=0, keepdims=True)                               # [1, TS]
    onehot = (k_iota == idx).astype(jnp.float32)                       # [K, TS]

    # quantized vectors directly in the channel-major output layout
    quant = jnp.dot(e_t, onehot, preferred_element_type=jnp.float32)   # [C, TS]
    q_ref[...] = quant.astype(q_ref.dtype)
    idx_ref[...] = idx

    # exact commitment-loss partial (matches torch's F.mse_loss numerator)
    diff = quant - x_t
    err_ref[...] = jnp.sum(diff * diff, axis=0, keepdims=True)         # [1, TS]

    # EMA statistics on the MXU, lane-dense [*, K]; accumulated across the
    # spatial axis so they are written to HBM once per batch element.
    ones_row = jnp.ones((1, ts), dtype=jnp.float32)
    cnt_tile = jax.lax.dot_general(ones_row, onehot,
                                   (((1,), (1,)), ((), ())),
                                   preferred_element_type=jnp.float32)  # [1, K]
    dwt_tile = jax.lax.dot_general(x_t, onehot,
                                   (((1,), (1,)), ((), ())),
                                   preferred_element_type=jnp.float32)  # [C, K]

    @pl.when(s == 0)
    def _():
        cnt_ref[...] = jnp.zeros_like(cnt_ref)
        dwt_ref[...] = jnp.zeros_like(dwt_ref)

    cnt_ref[...] += cnt_tile
    dwt_ref[...] += dwt_tile


@partial(jax.jit, static_argnames=("training", "return_dense_encodings"))
def vector_quantizer_ema_forward(x, embedding, ema_cluster_size=None, ema_w=None,
                                 *, commitment_cost=COMMITMENT_COST,
                                 decay=DECAY, epsilon=EPSILON,
                                 training=False, return_dense_encodings=False):
    """x: [B, C, D, H, W] (C == embedding_dim), embedding: [K, C].

    Returns (loss, quantized[B,C,D,H,W], perplexity, encodings); `encodings`
    is the int32 argmin index vector [N] by default (set
    return_dense_encodings=True to get the torch-style dense [N, K] one-hot,
    which costs an extra N x 256 fp32 HBM write).  With training=True an extra
    tuple (new_ema_cluster_size, new_ema_w, new_embedding) is appended — the
    torch module mutates its buffers in place; here the state is functional.
    """
    B, C, D, H, W = x.shape
    K, C2 = embedding.shape
    assert C2 == C, "embedding_dim mismatch"
    S = D * H * W
    N = B * S
    tile_s = _pick_tile_s(S)
    ns = S // tile_s

    # Free reshape only — no transpose or dtype-cast HBM passes over x.
    x_bcs = x.reshape(B, C, S)

    # Hoisted codebook prep (small, resident in VMEM).
    e = embedding.astype(jnp.float32)                      # [K, C]
    e_t = jnp.transpose(e)                                 # [C, K]
    e_sq = jnp.sum(e * e, axis=1, keepdims=True)           # [K, 1]
    e_aug = jnp.concatenate(
        [-2.0 * e, e_sq, jnp.zeros((K, _AUG - 1), jnp.float32)], axis=1)  # [K, C+8]

    grid = (B, ns)

    q_bcs, idx, err, cnt, dwt = pl.pallas_call(
        _vq_kernel,
        out_shape=(
            jax.ShapeDtypeStruct((B, C, S), x.dtype),       # quantized
            jax.ShapeDtypeStruct((B, 1, S), jnp.int32),     # argmin indices
            jax.ShapeDtypeStruct((B, 1, S), jnp.float32),   # per-voxel sq err
            jax.ShapeDtypeStruct((B, 1, K), jnp.float32),   # per-batch counts
            jax.ShapeDtypeStruct((B, C, K), jnp.float32),   # per-batch dw^T
        ),
        grid_spec=pltpu.PrefetchScalarGridSpec(
            num_scalar_prefetch=0,
            grid=grid,
            in_specs=[
                pl.BlockSpec((None, C, tile_s), lambda b, s: (b, 0, s)),
                pl.BlockSpec((K, C + _AUG), lambda b, s: (0, 0)),  # resident
                pl.BlockSpec((C, K), lambda b, s: (0, 0)),         # resident
            ],
            out_specs=(
                pl.BlockSpec((None, C, tile_s), lambda b, s: (b, 0, s)),
                pl.BlockSpec((None, 1, tile_s), lambda b, s: (b, 0, s)),
                pl.BlockSpec((None, 1, tile_s), lambda b, s: (b, 0, s)),
                pl.BlockSpec((None, 1, K), lambda b, s: (b, 0, 0)),  # acc over s
                pl.BlockSpec((None, C, K), lambda b, s: (b, 0, 0)),  # acc over s
            ),
        ),
        compiler_params=pltpu.CompilerParams(
            # s axis carries the cnt/dw^T accumulators -> "arbitrary";
            # B axis is independent -> "parallel" (v7x megacore when B >= 2).
            # TODO(synk): for B == 1 on v7x, a per-tile-partials variant with
            # both axes "parallel" would use both TensorCores.
            dimension_semantics=("parallel", "arbitrary"),
            vmem_limit_bytes=32 * 1024 * 1024),
    )(x_bcs, e_aug, e_t)

    # ---- losses / perplexity (fp32 reductions over small partials) ----------
    sum_sq_err = jnp.sum(err)
    e_latent_loss = sum_sq_err / (N * C)          # == F.mse_loss (mean)
    loss = commitment_cost * e_latent_loss

    counts = jnp.sum(cnt[:, 0, :], axis=0)        # [K] == torch.sum(encodings, 0)
    avg_probs = counts / N
    perplexity = jnp.exp(-jnp.sum(avg_probs * jnp.log(avg_probs + 1e-10)))

    # Straight-through estimator is the identity in the forward pass; output is
    # already channel-major, so only a free reshape back to NCDHW.
    # TODO(synk): no custom_vjp — the .detach()/straight-through gradient
    # semantics of the torch module are not reproduced under jax.grad.
    quantized = q_bcs.reshape(B, C, D, H, W)

    indices = idx.reshape(N)                      # torch's (b, d, h, w) row order
    if return_dense_encodings:
        encodings = jax.nn.one_hot(indices, K, dtype=jnp.float32)  # [N, K]
    else:
        encodings = indices                       # avoid the N x 256 HBM rebuild

    if not training:
        return loss, quantized, perplexity, encodings

    # ---- EMA codebook update (returned functionally) -------------------------
    dw = jnp.transpose(jnp.sum(dwt, axis=0))      # [K, C] == encodings^T @ flat_x
    new_cluster = ema_cluster_size * decay + (1.0 - decay) * counts
    n_tot = jnp.sum(new_cluster)
    new_cluster = (new_cluster + epsilon) / (n_tot + K * epsilon) * n_tot
    new_ema_w = ema_w * decay + (1.0 - decay) * dw
    new_embedding = new_ema_w / new_cluster[:, None]
    return loss, quantized, perplexity, encodings, (new_cluster, new_ema_w,
                                                    new_embedding)


if __name__ == "__main__":
    key = jax.random.PRNGKey(0)
    k_x, k_emb, k_ema = jax.random.split(key, 3)

    # Small shapes: B=2, C=embedding_dim=32, D=4, H=16, W=16 -> S=1024, N=2048.
    B, C, D, H, W = 2, EMBEDDING_DIM, 4, 16, 16
    K = NUM_EMBEDDINGS

    x = jax.random.normal(k_x, (B, C, D, H, W), dtype=jnp.float32)
    embedding = jax.random.normal(k_emb, (K, C), dtype=jnp.float32)   # .normal_()
    ema_cluster_size = jnp.zeros((K,), dtype=jnp.float32)
    ema_w = jax.random.normal(k_ema, (K, C), dtype=jnp.float32)       # .normal_()

    loss, quantized, perplexity, encodings, new_state = (
        vector_quantizer_ema_forward(x, embedding, ema_cluster_size, ema_w,
                                     training=True,
                                     return_dense_encodings=False))
    jax.block_until_ready((loss, quantized, perplexity, encodings, new_state))
    assert quantized.shape == x.shape
    assert encodings.shape == (B * D * H * W,)
    assert bool(jnp.isfinite(loss))
    print("KERNEL_OK")
</pallas_src>

<mosaic_0001>
module attributes {stable_mosaic.version = 11 : i64} {
  func.func @_vq_kernel(%arg0: i32, %arg1: i32, %arg2: memref<1x32x1024xf32, #tpu.memory_space<vmem>>, %arg3: memref<256x40xf32, #tpu.memory_space<vmem>>, %arg4: memref<32x256xf32, #tpu.memory_space<vmem>>, %arg5: memref<1x32x1024xf32, #tpu.memory_space<vmem>>, %arg6: memref<1x1x1024xi32, #tpu.memory_space<vmem>>, %arg7: memref<1x1x1024xf32, #tpu.memory_space<vmem>>, %arg8: memref<1x1x256xf32, #tpu.memory_space<vmem>>, %arg9: memref<1x32x256xf32, #tpu.memory_space<vmem>>) attributes {dimension_semantics = [#tpu.dimension_semantics<parallel>, #tpu.dimension_semantics<arbitrary>], iteration_bounds = array<i64: 2, 1>, scalar_prefetch = 0 : i64, scratch_operands = 0 : i64, tpu.core_type = #tpu.core_type<tc>, window_params = [{transform_indices = @transform_0, window_bounds = array<i64: 1, 32, 1024>}, {pipeline_mode = #tpu.pipeline_mode<synchronous>, transform_indices = @transform_1, window_bounds = array<i64: 256, 40>}, {pipeline_mode = #tpu.pipeline_mode<synchronous>, transform_indices = @transform_2, window_bounds = array<i64: 32, 256>}, {transform_indices = @transform_3, window_bounds = array<i64: 1, 32, 1024>}, {transform_indices = @transform_4, window_bounds = array<i64: 1, 1, 1024>}, {transform_indices = @transform_5, window_bounds = array<i64: 1, 1, 1024>}, {transform_indices = @transform_6, window_bounds = array<i64: 1, 1, 256>}, {transform_indices = @transform_7, window_bounds = array<i64: 1, 32, 256>}]} {
    %c0 = arith.constant 0 : index
    %c0_0 = arith.constant 0 : index
    %c0_1 = arith.constant 0 : index
    %0 = vector.load %arg2[%c0, %c0_0, %c0_1] : memref<1x32x1024xf32, #tpu.memory_space<vmem>>, vector<1x32x1024xf32>
    %1 = vector.shape_cast %0 : vector<1x32x1024xf32> to vector<32x1024xf32>
    %c0_2 = arith.constant 0 : index
    %c0_3 = arith.constant 0 : index
    %2 = vector.load %arg3[%c0_2, %c0_3] : memref<256x40xf32, #tpu.memory_space<vmem>>, vector<256x40xf32>
    %c0_4 = arith.constant 0 : index
    %c0_5 = arith.constant 0 : index
    %3 = vector.load %arg4[%c0_4, %c0_5] : memref<32x256xf32, #tpu.memory_space<vmem>>, vector<32x256xf32>
    %cst = arith.constant 1.000000e+00 : f32
    %4 = vector.broadcast %cst : f32 to vector<8x1024xf32>
    %5 = tpu.concatenate %1, %4 in 0 : vector<32x1024xf32>, vector<8x1024xf32> -> vector<40x1024xf32>
    %cst_6 = arith.constant dense<0.000000e+00> : vector<256x1024xf32>
    %6 = tpu.matmul %2, %5, %cst_6 {dimension_numbers = #tpu.dot_dimension_numbers<[1], [0], [0], [1], [0, 0, 1, 1], [], []>} : vector<256x40xf32>, vector<40x1024xf32>, vector<256x1024xf32> -> vector<256x1024xf32>
    %cst_7 = arith.constant dense<0x7F800000> : vector<1024xf32>
    %7 = vector.multi_reduction <minimumf>, %6, %cst_7 [0] : vector<256x1024xf32> to vector<1024xf32>
    %8 = vector.shape_cast %7 : vector<1024xf32> to vector<1x1024xf32>
    %9 = tpu.iota {dimensions = array<i32: 0>} : vector<256x1024xi32>
    %10 = vector.broadcast %8 : vector<1x1024xf32> to vector<256x1024xf32>
    %11 = arith.cmpf ole, %6, %10 : vector<256x1024xf32>
    %c256_i32 = arith.constant 256 : i32
    %12 = vector.broadcast %c256_i32 : i32 to vector<256x1024xi32>
    %13 = arith.select %11, %9, %12 : vector<256x1024xi1>, vector<256x1024xi32>
    %cst_8 = arith.constant dense<2147483647> : vector<1024xi32>
    %14 = vector.multi_reduction <minsi>, %13, %cst_8 [0] : vector<256x1024xi32> to vector<1024xi32>
    %15 = vector.shape_cast %14 : vector<1024xi32> to vector<1x1024xi32>
    %16 = vector.broadcast %15 : vector<1x1024xi32> to vector<256x1024xi32>
    %17 = arith.cmpi eq, %9, %16 : vector<256x1024xi32>
    %18 = arith.extui %17 : vector<256x1024xi1> to vector<256x1024xi32>
    %19 = arith.sitofp %18 : vector<256x1024xi32> to vector<256x1024xf32>
    %cst_9 = arith.constant dense<0.000000e+00> : vector<32x1024xf32>
    %20 = tpu.matmul %3, %19, %cst_9 {dimension_numbers = #tpu.dot_dimension_numbers<[1], [0], [0], [1], [0, 0, 1, 1], [], []>} : vector<32x256xf32>, vector<256x1024xf32>, vector<32x1024xf32> -> vector<32x1024xf32>
    %c0_10 = arith.constant 0 : index
    %c0_11 = arith.constant 0 : index
    %c0_12 = arith.constant 0 : index
    %21 = vector.load %arg5[%c0_10, %c0_11, %c0_12] : memref<1x32x1024xf32, #tpu.memory_space<vmem>>, vector<1x32x1024xf32>
    %22 = vector.shape_cast %21 : vector<1x32x1024xf32> to vector<32x1024xf32>
    %23 = vector.shape_cast %20 : vector<32x1024xf32> to vector<1x32x1024xf32>
    tpu.vector_store %arg5[%c0_10, %c0_11, %c0_12], %23 {strides = array<i32>} : memref<1x32x1024xf32, #tpu.memory_space<vmem>>, vector<1x32x1024xf32>,
    %c0_13 = arith.constant 0 : index
    %c0_14 = arith.constant 0 : index
    %c0_15 = arith.constant 0 : index
    %24 = vector.load %arg6[%c0_13, %c0_14, %c0_15] : memref<1x1x1024xi32, #tpu.memory_space<vmem>>, vector<1x1x1024xi32>
    %25 = vector.shape_cast %24 : vector<1x1x1024xi32> to vector<1x1024xi32>
    %26 = vector.shape_cast %15 : vector<1x1024xi32> to vector<1x1x1024xi32>
    tpu.vector_store %arg6[%c0_13, %c0_14, %c0_15], %26 {strides = array<i32>} : memref<1x1x1024xi32, #tpu.memory_space<vmem>>, vector<1x1x1024xi32>,
    %27 = arith.subf %20, %1 : vector<32x1024xf32>
    %28 = arith.mulf %27, %27 : vector<32x1024xf32>
    %cst_16 = arith.constant dense<0.000000e+00> : vector<1024xf32>
    %29 = vector.multi_reduction <add>, %28, %cst_16 [0] : vector<32x1024xf32> to vector<1024xf32>
    %30 = vector.shape_cast %29 : vector<1024xf32> to vector<1x1024xf32>
    %c0_17 = arith.constant 0 : index
    %c0_18 = arith.constant 0 : index
    %c0_19 = arith.constant 0 : index
    %31 = vector.load %arg7[%c0_17, %c0_18, %c0_19] : memref<1x1x1024xf32, #tpu.memory_space<vmem>>, vector<1x1x1024xf32>
    %32 = vector.shape_cast %31 : vector<1x1x1024xf32> to vector<1x1024xf32>
    %33 = vector.shape_cast %30 : vector<1x1024xf32> to vector<1x1x1024xf32>
    tpu.vector_store %arg7[%c0_17, %c0_18, %c0_19], %33 {strides = array<i32>} : memref<1x1x1024xf32, #tpu.memory_space<vmem>>, vector<1x1x1024xf32>,
    %cst_20 = arith.constant 1.000000e+00 : f32
    %34 = vector.broadcast %cst_20 : f32 to vector<1x1024xf32>
    %cst_21 = arith.constant dense<0.000000e+00> : vector<1x256xf32>
    %35 = tpu.matmul %34, %19, %cst_21 {dimension_numbers = #tpu.dot_dimension_numbers<[1], [1], [0], [0], [0, 0, 1, 0], [], []>} : vector<1x1024xf32>, vector<256x1024xf32>, vector<1x256xf32> -> vector<1x256xf32>
    %cst_22 = arith.constant dense<0.000000e+00> : vector<32x256xf32>
    %36 = tpu.matmul %1, %19, %cst_22 {dimension_numbers = #tpu.dot_dimension_numbers<[1], [1], [0], [0], [0, 0, 1, 0], [], []>} : vector<32x1024xf32>, vector<256x1024xf32>, vector<32x256xf32> -> vector<32x256xf32>
    %c0_i32 = arith.constant 0 : i32
    %37 = arith.cmpi eq, %arg1, %c0_i32 : i32
    %38 = arith.extui %37 : i1 to i32
    %c0_i32_23 = arith.constant 0 : i32
    %39 = arith.cmpi ne, %38, %c0_i32_23 : i32
    scf.if %39 {
      %cst_36 = arith.constant 0.000000e+00 : f32
      %52 = vector.broadcast %cst_36 : f32 to vector<1x256xf32>
      %c0_37 = arith.constant 0 : index
      %c0_38 = arith.constant 0 : index
      %c0_39 = arith.constant 0 : index
      %53 = vector.load %arg8[%c0_37, %c0_38, %c0_39] : memref<1x1x256xf32, #tpu.memory_space<vmem>>, vector<1x1x256xf32>
      %54 = vector.shape_cast %53 : vector<1x1x256xf32> to vector<1x256xf32>
      %55 = vector.shape_cast %52 : vector<1x256xf32> to vector<1x1x256xf32>
      tpu.vector_store %arg8[%c0_37, %c0_38, %c0_39], %55 {strides = array<i32>} : memref<1x1x256xf32, #tpu.memory_space<vmem>>, vector<1x1x256xf32>,
      %cst_40 = arith.constant 0.000000e+00 : f32
      %56 = vector.broadcast %cst_40 : f32 to vector<32x256xf32>
      %c0_41 = arith.constant 0 : index
      %c0_42 = arith.constant 0 : index
      %c0_43 = arith.constant 0 : index
      %57 = vector.load %arg9[%c0_41, %c0_42, %c0_43] : memref<1x32x256xf32, #tpu.memory_space<vmem>>, vector<1x32x256xf32>
      %58 = vector.shape_cast %57 : vector<1x32x256xf32> to vector<32x256xf32>
      %59 = vector.shape_cast %56 : vector<32x256xf32> to vector<1x32x256xf32>
      tpu.vector_store %arg9[%c0_41, %c0_42, %c0_43], %59 {strides = array<i32>} : memref<1x32x256xf32, #tpu.memory_space<vmem>>, vector<1x32x256xf32>,
    } else {
    }
    %c0_24 = arith.constant 0 : index
    %c0_25 = arith.constant 0 : index
    %c0_26 = arith.constant 0 : index
    %40 = vector.load %arg8[%c0_24, %c0_25, %c0_26] : memref<1x1x256xf32, #tpu.memory_space<vmem>>, vector<1x1x256xf32>
    %41 = vector.shape_cast %40 : vector<1x1x256xf32> to vector<1x256xf32>
    %42 = arith.addf %41, %35 : vector<1x256xf32>
    %c0_27 = arith.constant 0 : index
    %c0_28 = arith.constant 0 : index
    %c0_29 = arith.constant 0 : index
    %43 = vector.load %arg8[%c0_27, %c0_28, %c0_29] : memref<1x1x256xf32, #tpu.memory_space<vmem>>, vector<1x1x256xf32>
    %44 = vector.shape_cast %43 : vector<1x1x256xf32> to vector<1x256xf32>
    %45 = vector.shape_cast %42 : vector<1x256xf32> to vector<1x1x256xf32>
    tpu.vector_store %arg8[%c0_27, %c0_28, %c0_29], %45 {strides = array<i32>} : memref<1x1x256xf32, #tpu.memory_space<vmem>>, vector<1x1x256xf32>,
    %c0_30 = arith.constant 0 : index
    %c0_31 = arith.constant 0 : index
    %c0_32 = arith.constant 0 : index
    %46 = vector.load %arg9[%c0_30, %c0_31, %c0_32] : memref<1x32x256xf32, #tpu.memory_space<vmem>>, vector<1x32x256xf32>
    %47 = vector.shape_cast %46 : vector<1x32x256xf32> to vector<32x256xf32>
    %48 = arith.addf %47, %36 : vector<32x256xf32>
    %c0_33 = arith.constant 0 : index
    %c0_34 = arith.constant 0 : index
    %c0_35 = arith.constant 0 : index
    %49 = vector.load %arg9[%c0_33, %c0_34, %c0_35] : memref<1x32x256xf32, #tpu.memory_space<vmem>>, vector<1x32x256xf32>
    %50 = vector.shape_cast %49 : vector<1x32x256xf32> to vector<32x256xf32>
    %51 = vector.shape_cast %48 : vector<32x256xf32> to vector<1x32x256xf32>
    tpu.vector_store %arg9[%c0_33, %c0_34, %c0_35], %51 {strides = array<i32>} : memref<1x32x256xf32, #tpu.memory_space<vmem>>, vector<1x32x256xf32>,
    return
  }
  func.func @transform_0(%arg0: i32, %arg1: i32) -> (i32, i32, i32) {
    %c0_i32 = arith.constant 0 : i32
    %c0_i32_0 = arith.constant 0 : i32
    return %arg0, %c0_i32, %arg1 : i32, i32, i32
  }
  func.func @transform_1(%arg0: i32, %arg1: i32) -> (i32, i32) {
    %c0_i32 = arith.constant 0 : i32
    %c0_i32_0 = arith.constant 0 : i32
    %c0_i32_1 = arith.constant 0 : i32
    return %c0_i32, %c0_i32_0 : i32, i32
  }
  func.func @transform_2(%arg0: i32, %arg1: i32) -> (i32, i32) {
    %c0_i32 = arith.constant 0 : i32
    %c0_i32_0 = arith.constant 0 : i32
    %c0_i32_1 = arith.constant 0 : i32
    return %c0_i32, %c0_i32_0 : i32, i32
  }
  func.func @transform_3(%arg0: i32, %arg1: i32) -> (i32, i32, i32) {
    %c0_i32 = arith.constant 0 : i32
    %c0_i32_0 = arith.constant 0 : i32
    return %arg0, %c0_i32, %arg1 : i32, i32, i32
  }
  func.func @transform_4(%arg0: i32, %arg1: i32) -> (i32, i32, i32) {
    %c0_i32 = arith.constant 0 : i32
    %c0_i32_0 = arith.constant 0 : i32
    return %arg0, %c0_i32, %arg1 : i32, i32, i32
  }
  func.func @transform_5(%arg0: i32, %arg1: i32) -> (i32, i32, i32) {
    %c0_i32 = arith.constant 0 : i32
    %c0_i32_0 = arith.constant 0 : i32
    return %arg0, %c0_i32, %arg1 : i32, i32, i32
  }
  func.func @transform_6(%arg0: i32, %arg1: i32) -> (i32, i32, i32) {
    %c0_i32 = arith.constant 0 : i32
    %c0_i32_0 = arith.constant 0 : i32
    %c0_i32_1 = arith.constant 0 : i32
    return %arg0, %c0_i32, %c0_i32_0 : i32, i32, i32
  }
  func.func @transform_7(%arg0: i32, %arg1: i32) -> (i32, i32, i32) {
    %c0_i32 = arith.constant 0 : i32
    %c0_i32_0 = arith.constant 0 : i32
    %c0_i32_1 = arith.constant 0 : i32
    return %arg0, %c0_i32, %c0_i32_0 : i32, i32, i32
  }
}

</mosaic_0001>

<bundles_post_ra>
// kernel: vector_quantizer_ema_forward.1
= control target key start
LH: loop header
LB: loop body
LE: loop exit
PB: predicated region body
PF: predicated region fallthrough
CT: control target
= control target key end

     0   :  { %s13838_s0 = inlined_call_operand.vmem [shape: f32[2,32,1024], index: 0, kind: input, shape index: {}]   ;;  %s13839_s1 = inlined_call_operand.vmem [shape: f32[256,40], index: 1, kind: input, shape index: {}]   ;;  %s13840_s2 = inlined_call_operand.vmem [shape: f32[32,256], index: 2, kind: input, shape index: {}]   ;;  %s13841_s3 = inlined_call_operand.vmem [shape: f32[2,32,1024], index: 3, kind: output, shape index: {0}]   ;;  %s13842_s4 = inlined_call_operand.hbm [shape: s32[2,1,1024], index: 4, kind: output, shape index: {1}]   ;;  %s13843_s5 = inlined_call_operand.vmem [shape: f32[2,1,1024], index: 5, kind: output, shape index: {2}]   ;;  %s13844_s6 = inlined_call_operand.vmem [shape: f32[2,1,256], index: 6, kind: output, shape index: {3}]   ;;  %s13845_s7 = inlined_call_operand.vmem [shape: f32[2,32,256], index: 7, kind: output, shape index: {4}]  }
   0x1   :  { %14473 = sst [smem:[#allocation135_spill]] %s13838_s0 }
   0x2   :  { %13 = vsyncpa [#allocation3], 0 }
   0x3   :  { %15 = vsyncpa [#allocation3 + $0x1], 0  ;;  %s6953_s24 = smov 0   ;;  %s6955_s25 = smov 0  }
   0x4   :  { %s6957_s26 = smov 0   ;;  %s6959_s27 = smov 0  }
   0x5   :  { %s6961_s28 = smov 0   ;;  %s6963_s29 = smov 0  }
   0x6 LB: > { %s5391_s30 = sadd.s32 4294967295, %s6909_s29   ;;  %s5392_s8 = sadd.s32 4294967294, %s6909_s29   ;;  %s6909_s29 = sphi %s6963_s29, %s21_s29   ;;  %s6905_s28 = sphi %s6961_s28, %s15616_s28   ;;  %s6901_s27 = sphi %s6959_s27, %s15615_s27   ;;  %s6897_s26 = sphi %s6957_s26, %s15614_s26   ;;  %s6893_s25 = sphi %s6955_s25, %s15613_s25   ;;  %s6889_s24 = sphi %s6953_s24, %s15612_s24  }
   0x7   : > { %s33_s9 = sadd.s32 1, %s6905_s28  ;;  %s140_s10 = sadd.s32 1, %s6897_s26 }
   0x8   : > { %p35_p0 = scmp.ge.s32.totalorder %s33_s9, 2  ;;  %p150_p1 = scmp.ne.s32.totalorder %s6897_s26, %s6893_s25 }
   0x9   : > { %p151_p2 = scmp.eq.s32.totalorder %s5391_s30, 1  ;;  %p156_p3 = scmp.ne.s32.totalorder %s6893_s25, %s6889_s24 }
   0xa   : > { %s15618_s9 = smov (%p35_p0, %s33_s9), 0  ;;  %p157_p5 = scmp.eq.s32.totalorder %s5392_s8, 1 }
   0xb   : > { %p6993_p4 = por %p151_p2, %p150_p1  ;;  %s135_s12 = ssub.s32 %s6905_s28, %s15618_s9 }
   0xc   : > { %p5395_p6 = scmp.ge.s32.totalorder %s6909_s29, 1  ;;  %p138_p7 = scmp.eq.s32.totalorder %s135_s12, 0 }
   0xd   : > { %p7000_p8 = por %p157_p5, %p156_p3  ;;  %p274_p9 = scmp.lt.s32.totalorder %s6909_s29, 3 }
   0xe   : > { %s7006_s14 = scalar_select %p138_p7, %s6897_s26, %s140_s10  }
   0xf   : > { %p275_p10 = pnand %p5395_p6, %p274_p9 }
  0x11   : > { %278 = sbr.rel (%p275_p10) target bundleno = 1644 (0x66c), region = 32 }
  0x16   : > { %p337_p11 = scmp.lt.s32.totalorder %s6901_s27, 1  ;;  %v13846_v0 = vmov 1.0   ;;  %s14476_s0 = sld [smem:[#allocation135_spill]]  ;;  %v7043_v17 = vld [vmem:[%s13839_s1] sm:$0xff]  ;;  %vm447_vm0 = vcmask 326656   ;;  %v7060_v18 = vld [vmem:[%s13839_s1 + $0x8] sm:$0xff] }
  0x17   : > { %555 = vmatpush.msra.mxu0 %v13846_v0  ;;  %668 = vmatpush.msra.mxu1 %v13846_v0  ;;  %v7073_v19 = vld [vmem:[%s13839_s1 + $0x10] sm:$0xff]  ;;  %v7086_v20 = vld [vmem:[%s13839_s1 + $0x18] sm:$0xff]  ;;  %v7099_v21 = vld [vmem:[%s13839_s1 + $0x20] sm:$0xff]  ;;  %s310_s20 = sand.u32 1, %s6893_s25  }
  0x18   : > { %781 = vmatpush.msra.mxu2 %v13846_v0  ;;  %894 = vmatpush.msra.mxu3 %v13846_v0  ;;  %s7014_s15 = scalar_select %p337_p11, %s6901_s27, 1  ;;  %v7112_v22 = vld [vmem:[%s13839_s1 + $0x28] sm:$0xff]  ;;  %v7125_v23 = vld [vmem:[%s13839_s1 + $0x30] sm:$0xff]  ;;  %v7138_v24 = vld [vmem:[%s13839_s1 + $0x38] sm:$0xff] }
  0x19   : > { %v7151_v25 = vld [vmem:[%s13839_s1 + $0x40] sm:$0xff]  ;;  %v7164_v26 = vld [vmem:[%s13839_s1 + $0x48] sm:$0xff]  ;;  %v7177_v27 = vld [vmem:[%s13839_s1 + $0x50] sm:$0xff]  ;;  %s11158_s21 = sshll.u32 %s310_s20, 3 }
  0x1a   : > { %s6689_s16 = sshll.u32 %s7014_s15, 8  ;;  %v7190_v28 = vld [vmem:[%s13839_s1 + $0x58] sm:$0xff]  ;;  %v7203_v29 = vld [vmem:[%s13839_s1 + $0x60] sm:$0xff]  ;;  %v7216_v30 = vld [vmem:[%s13839_s1 + $0x68] sm:$0xff]  ;;  %s312_s22 = scalar_lea.vmem [#allocation2], %s11158_s21 }
  0x1b   : > { %v7229_v31 = vld [vmem:[%s13839_s1 + $0x70] sm:$0xff]  ;;  %v7242_v32 = vld [vmem:[%s13839_s1 + $0x78] sm:$0xff]  ;;  %v7259_v35 = vld [vmem:[%s13839_s1 + $0x80] sm:$0xff]  ;;  %s11320_s18 = scalar_lea.vmem %s13841_s3, %s6689_s16  ;;  %s5402_s23 = sshll.u32 %s7014_s15, 1 }
  0x1c   : > { %s7022_s19 = scalar_lea.vmem %s14476_s0, %s6689_s16  ;;  %14477 = vst [vmem:[#allocation5_spill] sm:$0xff] %v7229_v31  ;;  %v7280_v40 = vld [vmem:[%s13839_s1 + $0x88] sm:$0xff]  ;;  %v7299_v44 = vld [vmem:[%s13839_s1 + $0x90] sm:$0xff]  ;;  %v7320_v49 = vld [vmem:[%s13839_s1 + $0x98] sm:$0xff]  ;;  %s13129_s10 = scalar_lea.vmem %s13844_s6, %s5402_s23 }
  0x1d   : > { %v399_v1 = vld [vmem:[%s7022_s19 + $0xc0] sm:$0xff]  ;;  %v400_v2 = vld [vmem:[%s7022_s19 + $0xc8] sm:$0xff]  ;;  %v401_v3 = vld [vmem:[%s7022_s19 + $0xd0] sm:$0xff]  ;;  %14478 = vst [vmem:[#allocation6_spill] sm:$0xff] %v7242_v32  ;;  %s5185_s8 = sshll.u32 %s312_s22, 4  ;;  %s6851_s23 = scalar_lea.hbm %s13842_s4, 16  ;;  %s5186_s8 = int_to_ptr.vmem [resolvable:$true] %s5185_s8 }
  0x1e   : > { %556 = vmatpush.msra.mxu0 %v399_v1  ;;  %669 = vmatpush.msra.mxu1 %v400_v2  ;;  %v402_v4 = vld [vmem:[%s7022_s19 + $0xd8] sm:$0xff]  ;;  %v391_v5 = vld [vmem:[%s7022_s19 + $0x80] sm:$0xff]  ;;  %v392_v6 = vld [vmem:[%s7022_s19 + $0x88] sm:$0xff]  ;;  %14479 = vst [vmem:[#allocation7_spill] sm:$0xff] %v7259_v35 }
  0x1f   : > { %782 = vmatpush.msra.mxu2 %v401_v3  ;;  %895 = vmatpush.msra.mxu3 %v402_v4  ;;  %v393_v7 = vld [vmem:[%s7022_s19 + $0x90] sm:$0xff]  ;;  %v394_v8 = vld [vmem:[%s7022_s19 + $0x98] sm:$0xff]  ;;  %v383_v9 = vld [vmem:[%s7022_s19 + $0x40] sm:$0xff]  ;;  %14482 = vst [vmem:[#allocation10_spill] sm:$0xff] %v7280_v40 }
  0x20   : > { %557 = vmatpush.msra.mxu0 %v391_v5  ;;  %670 = vmatpush.msra.mxu1 %v392_v6  ;;  %v384_v10 = vld [vmem:[%s7022_s19 + $0x48] sm:$0xff]  ;;  %v385_v11 = vld [vmem:[%s7022_s19 + $0x50] sm:$0xff]  ;;  %v386_v12 = vld [vmem:[%s7022_s19 + $0x58] sm:$0xff]  ;;  %14486 = vst [vmem:[#allocation14_spill] sm:$0xff] %v7299_v44 }
  0x21   : > { %783 = vmatpush.msra.mxu2 %v393_v7  ;;  %896 = vmatpush.msra.mxu3 %v394_v8  ;;  %v375_v13 = vld [vmem:[%s7022_s19] sm:$0xff]  ;;  %v376_v14 = vld [vmem:[%s7022_s19 + $0x8] sm:$0xff]  ;;  %v377_v15 = vld [vmem:[%s7022_s19 + $0x10] sm:$0xff]  ;;  %14491 = vst [vmem:[#allocation19_spill] sm:$0xff] %v7320_v49 }
  0x22   : > { %558 = vmatpush.msra.mxu0 %v383_v9  ;;  %671 = vmatpush.msra.mxu1 %v384_v10  ;;  %v378_v16 = vld [vmem:[%s7022_s19 + $0x18] sm:$0xff]  ;;  %v7341_v54 = vld [vmem:[%s13839_s1 + $0xa0] sm:$0xff]  ;;  %v7362_v59 = vld [vmem:[%s13839_s1 + $0xa8] sm:$0xff] }
  0x23   : > { %784 = vmatpush.msra.mxu2 %v385_v11  ;;  %897 = vmatpush.msra.mxu3 %v386_v12  ;;  %14496 = vst [vmem:[#allocation24_spill] sm:$0xff] %v7341_v54  ;;  %v7383_v1 = vld [vmem:[%s13839_s1 + $0xb0] sm:$0xff]  ;;  %v430_v5 = vld [vmem:[%s13839_s1 + $0xb8] sm:$0xff]  ;;  %v431_v10 = vld [vmem:[%s13839_s1 + $0xc0] sm:$0xff] }
  0x24   : > { %559 = vmatpush.msra.mxu0 %v375_v13  ;;  %672 = vmatpush.msra.mxu1 %v376_v14  ;;  %14499 = vst [vmem:[#allocation27_spill] sm:$0xff] %v7362_v59 }
  0x25   : > { %785 = vmatpush.msra.mxu2 %v377_v15  ;;  %898 = vmatpush.msra.mxu3 %v378_v16  ;;  %14503 = vst [vmem:[#allocation31_spill] sm:$0xff] %v7383_v1  ;;  %v432_v15 = vld [vmem:[%s13839_s1 + $0xc8] sm:$0xff] }
  0x26   : > { %5405 = vmatmul.msk.f32.vlgmr.msra.gmra.mxu0 %vm447_vm0, %v7043_v17  ;;  %5437 = vmatmul.msk.f32.vlgmr.msra.gmra.mxu1 %vm447_vm0, %v7043_v17 }
  0x27   : > { %5469 = vmatmul.msk.f32.vlgmr.msra.gmra.mxu2 %vm447_vm0, %v7043_v17  ;;  %5501 = vmatmul.msk.f32.vlgmr.msra.gmra.mxu3 %vm447_vm0, %v7043_v17 }
  0x28   : > { %1120 = vmatpush.msrb.mxu1 %v13846_v0  ;;  %1007 = vmatpush.msrb.mxu0 %v13846_v0 }
  0x29   : > { %1233 = vmatpush.msrb.mxu2 %v13846_v0  ;;  %1346 = vmatpush.msrb.mxu3 %v13846_v0 }
  0x2e   : > { %5406 = vmatmul.msk.f32.gmra.mxu0 %vm447_vm0, %v7060_v18  ;;  %5438 = vmatmul.msk.f32.gmra.mxu1 %vm447_vm0, %v7060_v18 }
  0x2f   : > { %5470 = vmatmul.msk.f32.gmra.mxu2 %vm447_vm0, %v7060_v18  ;;  %5502 = vmatmul.msk.f32.gmra.mxu3 %vm447_vm0, %v7060_v18 }
  0x36   : > { %5407 = vmatmul.msk.f32.gmra.mxu0 %vm447_vm0, %v7073_v19  ;;  %5439 = vmatmul.msk.f32.gmra.mxu1 %vm447_vm0, %v7073_v19 }
  0x37   : > { %5471 = vmatmul.msk.f32.gmra.mxu2 %vm447_vm0, %v7073_v19  ;;  %5503 = vmatmul.msk.f32.gmra.mxu3 %vm447_vm0, %v7073_v19 }
  0x3e   : > { %5408 = vmatmul.msk.f32.gmra.mxu0 %vm447_vm0, %v7086_v20  ;;  %5440 = vmatmul.msk.f32.gmra.mxu1 %vm447_vm0, %v7086_v20 }
  0x3f   : > { %5472 = vmatmul.msk.f32.gmra.mxu2 %vm447_vm0, %v7086_v20  ;;  %5504 = vmatmul.msk.f32.gmra.mxu3 %vm447_vm0, %v7086_v20 }
  0x46   : > { %5409 = vmatmul.msk.f32.gmra.mxu0 %vm447_vm0, %v7099_v21  ;;  %5441 = vmatmul.msk.f32.gmra.mxu1 %vm447_vm0, %v7099_v21 }
  0x47   : > { %5473 = vmatmul.msk.f32.gmra.mxu2 %vm447_vm0, %v7099_v21  ;;  %5505 = vmatmul.msk.f32.gmra.mxu3 %vm447_vm0, %v7099_v21 }
  0x4e   : > { %5410 = vmatmul.msk.f32.gmra.mxu0 %vm447_vm0, %v7112_v22  ;;  %5442 = vmatmul.msk.f32.gmra.mxu1 %vm447_vm0, %v7112_v22 }
  0x4f   : > { %5474 = vmatmul.msk.f32.gmra.mxu2 %vm447_vm0, %v7112_v22  ;;  %5506 = vmatmul.msk.f32.gmra.mxu3 %vm447_vm0, %v7112_v22 }
  0x56   : > { %5411 = vmatmul.msk.f32.gmra.mxu0 %vm447_vm0, %v7125_v23  ;;  %5443 = vmatmul.msk.f32.gmra.mxu1 %vm447_vm0, %v7125_v23 }
  0x57   : > { %5475 = vmatmul.msk.f32.gmra.mxu2 %vm447_vm0, %v7125_v23  ;;  %5507 = vmatmul.msk.f32.gmra.mxu3 %vm447_vm0, %v7125_v23 }
  0x5e   : > { %5412 = vmatmul.msk.f32.gmra.mxu0 %vm447_vm0, %v7138_v24  ;;  %5444 = vmatmul.msk.f32.gmra.mxu1 %vm447_vm0, %v7138_v24 }
  0x5f   : > { %5476 = vmatmul.msk.f32.gmra.mxu2 %vm447_vm0, %v7138_v24  ;;  %5508 = vmatmul.msk.f32.gmra.mxu3 %vm447_vm0, %v7138_v24 }
  0x66   : > { %5413 = vmatmul.msk.f32.gmra.mxu0 %vm447_vm0, %v7151_v25  ;;  %5445 = vmatmul.msk.f32.gmra.mxu1 %vm447_vm0, %v7151_v25 }
  0x67   : > { %5477 = vmatmul.msk.f32.gmra.mxu2 %vm447_vm0, %v7151_v25  ;;  %5509 = vmatmul.msk.f32.gmra.mxu3 %vm447_vm0, %v7151_v25 }
  0x6e   : > { %5414 = vmatmul.msk.f32.gmra.mxu0 %vm447_vm0, %v7164_v26  ;;  %5446 = vmatmul.msk.f32.gmra.mxu1 %vm447_vm0, %v7164_v26 }
  0x6f   : > { %5478 = vmatmul.msk.f32.gmra.mxu2 %vm447_vm0, %v7164_v26  ;;  %5510 = vmatmul.msk.f32.gmra.mxu3 %vm447_vm0, %v7164_v26 }
  0x76   : > { %5415 = vmatmul.msk.f32.gmra.mxu0 %vm447_vm0, %v7177_v27  ;;  %5447 = vmatmul.msk.f32.gmra.mxu1 %vm447_vm0, %v7177_v27 }
  0x77   : > { %5479 = vmatmul.msk.f32.gmra.mxu2 %vm447_vm0, %v7177_v27  ;;  %5511 = vmatmul.msk.f32.gmra.mxu3 %vm447_vm0, %v7177_v27 }
  0x7e   : > { %5416 = vmatmul.msk.f32.gmra.mxu0 %vm447_vm0, %v7190_v28  ;;  %5448 = vmatmul.msk.f32.gmra.mxu1 %vm447_vm0, %v7190_v28 }
  0x7f   : > { %5480 = vmatmul.msk.f32.gmra.mxu2 %vm447_vm0, %v7190_v28  ;;  %5512 = vmatmul.msk.f32.gmra.mxu3 %vm447_vm0, %v7190_v28 }
  0x86   : > { %5417 = vmatmul.msk.f32.gmra.mxu0 %vm447_vm0, %v7203_v29  ;;  %5449 = vmatmul.msk.f32.gmra.mxu1 %vm447_vm0, %v7203_v29 }
  0x87   : > { %5481 = vmatmul.msk.f32.gmra.mxu2 %vm447_vm0, %v7203_v29  ;;  %5513 = vmatmul.msk.f32.gmra.mxu3 %vm447_vm0, %v7203_v29 }
  0x8e   : > { %5418 = vmatmul.msk.f32.gmra.mxu0 %vm447_vm0, %v7216_v30  ;;  %5450 = vmatmul.msk.f32.gmra.mxu1 %vm447_vm0, %v7216_v30 }
  0x8f   : > { %5482 = vmatmul.msk.f32.gmra.mxu2 %vm447_vm0, %v7216_v30  ;;  %5514 = vmatmul.msk.f32.gmra.mxu3 %vm447_vm0, %v7216_v30 }
  0x96   : > { %5419 = vmatmul.msk.f32.gmra.mxu0 %vm447_vm0, %v7229_v31  ;;  %5451 = vmatmul.msk.f32.gmra.mxu1 %vm447_vm0, %v7229_v31 }
  0x97   : > { %5483 = vmatmul.msk.f32.gmra.mxu2 %vm447_vm0, %v7229_v31  ;;  %5515 = vmatmul.msk.f32.gmra.mxu3 %vm447_vm0, %v7229_v31 }
  0x9e   : > { %5420 = vmatmul.msk.f32.gmra.mxu0 %vm447_vm0, %v7242_v32  ;;  %5452 = vmatmul.msk.f32.gmra.mxu1 %vm447_vm0, %v7242_v32 }
  0x9f   : > { %5484 = vmatmul.msk.f32.gmra.mxu2 %vm447_vm0, %v7242_v32  ;;  %5516 = vmatmul.msk.f32.gmra.mxu3 %vm447_vm0, %v7242_v32  ;;  %v380_v32 = vld [vmem:[%s7022_s19 + $0x28] sm:$0xff] }
  0xa3   : > { %v7252_v33 = vpop.f32.mrf.mxu0  ;;  %v7254_v34 = vpop.f32.mrf.mxu1 }
  0xa6   : > { %5421 = vmatmul.msk.f32.gmra.mxu0 %vm447_vm0, %v7259_v35  ;;  %5453 = vmatmul.msk.f32.gmra.mxu1 %vm447_vm0, %v7259_v35 }
  0xa7   : > { %5485 = vmatmul.msk.f32.gmra.mxu2 %vm447_vm0, %v7259_v35  ;;  %5517 = vmatmul.msk.f32.gmra.mxu3 %vm447_vm0, %v7259_v35  ;;  %v397_v35 = vld [vmem:[%s7022_s19 + $0xb0] sm:$0xff] }
  0xaa   : > { %v7269_v36 = vpop.f32.mrf.mxu2  ;;  %v7271_v37 = vpop.f32.mrf.mxu3 }
  0xab   : > { %14480 = vst [vmem:[#allocation8_spill] sm:$0xff] %v7269_v36  ;;  %v7273_v38 = vpop.f32.mrf.mxu0  ;;  %v7275_v39 = vpop.f32.mrf.mxu1 }
  0xac   : > { %14481 = vst [vmem:[#allocation9_spill] sm:$0xff] %v7271_v37 }
  0xae   : > { %5422 = vmatmul.msk.f32.gmra.mxu0 %vm447_vm0, %v7280_v40  ;;  %5454 = vmatmul.msk.f32.gmra.mxu1 %vm447_vm0, %v7280_v40 }
  0xaf   : > { %5486 = vmatmul.msk.f32.gmra.mxu2 %vm447_vm0, %v7280_v40  ;;  %5518 = vmatmul.msk.f32.gmra.mxu3 %vm447_vm0, %v7280_v40  ;;  %v404_v40 = vld [vmem:[%s7022_s19 + $0xe8] sm:$0xff] }
  0xb0   : > { %1121 = vmatpush.msrb.mxu1 %v404_v40  ;;  %v398_v40 = vld [vmem:[%s7022_s19 + $0xb8] sm:$0xff] }
  0xb2   : > { %v7290_v41 = vpop.f32.mrf.mxu2  ;;  %v7301_v45 = vpop.f32.mrf.mxu3 }
  0xb3   : > { %14483 = vst [vmem:[#allocation11_spill] sm:$0xff] %v7290_v41  ;;  %v7292_v42 = vpop.f32.mrf.mxu0  ;;  %v7294_v43 = vpop.f32.mrf.mxu1 }
  0xb4   : > { %14484 = vst [vmem:[#allocation12_spill] sm:$0xff] %v7292_v42 }
  0xb5   : > { %14485 = vst [vmem:[#allocation13_spill] sm:$0xff] %v7294_v43 }
  0xb6   : > { %14487 = vst [vmem:[#allocation15_spill] sm:$0xff] %v7301_v45  ;;  %5423 = vmatmul.msk.f32.gmra.mxu0 %vm447_vm0, %v7299_v44  ;;  %5455 = vmatmul.msk.f32.gmra.mxu1 %vm447_vm0, %v7299_v44 }
  0xb7   : > { %5487 = vmatmul.msk.f32.gmra.mxu2 %vm447_vm0, %v7299_v44  ;;  %5519 = vmatmul.msk.f32.gmra.mxu3 %vm447_vm0, %v7299_v44  ;;  %v434_v44 = vld [vmem:[%s13839_s1 + $0xd8] sm:$0xff] }
  0xba   : > { %v7311_v46 = vpop.f32.mrf.mxu2  ;;  %v7322_v50 = vpop.f32.mrf.mxu3 }
  0xbb   : > { %14488 = vst [vmem:[#allocation16_spill] sm:$0xff] %v7311_v46  ;;  %v7313_v47 = vpop.f32.mrf.mxu0  ;;  %v7315_v48 = vpop.f32.mrf.mxu1 }
  0xbc   : > { %14489 = vst [vmem:[#allocation17_spill] sm:$0xff] %v7313_v47 }
  0xbd   : > { %14490 = vst [vmem:[#allocation18_spill] sm:$0xff] %v7315_v48 }
  0xbe   : > { %14492 = vst [vmem:[#allocation20_spill] sm:$0xff] %v7322_v50  ;;  %5424 = vmatmul.msk.f32.gmra.mxu0 %vm447_vm0, %v7320_v49  ;;  %5456 = vmatmul.msk.f32.gmra.mxu1 %vm447_vm0, %v7320_v49 }
  0xbf   : > { %5488 = vmatmul.msk.f32.gmra.mxu2 %vm447_vm0, %v7320_v49  ;;  %5520 = vmatmul.msk.f32.gmra.mxu3 %vm447_vm0, %v7320_v49 }
  0xc2   : > { %v7332_v51 = vpop.f32.mrf.mxu2  ;;  %v7351_v55 = vpop.f32.mrf.mxu3 }
  0xc3   : > { %14493 = vst [vmem:[#allocation21_spill] sm:$0xff] %v7332_v51  ;;  %v7334_v52 = vpop.f32.mrf.mxu0  ;;  %v7336_v53 = vpop.f32.mrf.mxu1 }
  0xc4   : > { %14494 = vst [vmem:[#allocation22_spill] sm:$0xff] %v7334_v52 }
  0xc5   : > { %14495 = vst [vmem:[#allocation23_spill] sm:$0xff] %v7336_v53 }
  0xc6   : > { %5425 = vmatmul.msk.f32.gmra.mxu0 %vm447_vm0, %v7341_v54  ;;  %5457 = vmatmul.msk.f32.gmra.mxu1 %vm447_vm0, %v7341_v54  ;;  %14497 = vst [vmem:[#allocation25_spill] sm:$0xff] %v7351_v55  ;;  %v388_v55 = vld [vmem:[%s7022_s19 + $0x68] sm:$0xff] }
  0xc7   : > { %5489 = vmatmul.msk.f32.gmra.mxu2 %vm447_vm0, %v7341_v54  ;;  %5521 = vmatmul.msk.f32.gmra.mxu3 %vm447_vm0, %v7341_v54 }
  0xca   : > { %v7353_v56 = vpop.f32.mrf.mxu2  ;;  %v7372_v60 = vpop.f32.mrf.mxu3 }
  0xcb   : > { %14498 = vst [vmem:[#allocation26_spill] sm:$0xff] %v7353_v56  ;;  %v7355_v57 = vpop.f32.mrf.mxu0  ;;  %v7357_v58 = vpop.f32.mrf.mxu1 }
  0xcc   : > { %14500 = vst [vmem:[#allocation28_spill] sm:$0xff] %v7372_v60 }
  0xce   : > { %5426 = vmatmul.msk.f32.gmra.mxu0 %vm447_vm0, %v7362_v59  ;;  %5458 = vmatmul.msk.f32.gmra.mxu1 %vm447_vm0, %v7362_v59 }
  0xcf   : > { %5490 = vmatmul.msk.f32.gmra.mxu2 %vm447_vm0, %v7362_v59  ;;  %5522 = vmatmul.msk.f32.gmra.mxu3 %vm447_vm0, %v7362_v59 }
  0xd2   : > { %v7374_v61 = vpop.f32.mrf.mxu2  ;;  %v7402_v6 = vpop.f32.mrf.mxu3 }
  0xd3   : > { %14501 = vst [vmem:[#allocation29_spill] sm:$0xff] %v7374_v61  ;;  %v7376_v62 = vpop.f32.mrf.mxu0  ;;  %v7378_v63 = vpop.f32.mrf.mxu1 }
  0xd4   : > { %14502 = vst [vmem:[#allocation30_spill] sm:$0xff] %v7376_v62 }
  0xd5   : > { %14507 = vst [vmem:[#allocation35_spill] sm:$0xff] %v7402_v6  ;;  %v396_v6 = vld [vmem:[%s7022_s19 + $0xa8] sm:$0xff] }
  0xd6   : > { %5427 = vmatmul.msk.f32.gmra.mxu0 %vm447_vm0, %v7383_v1  ;;  %5459 = vmatmul.msk.f32.gmra.mxu1 %vm447_vm0, %v7383_v1 }
  0xd7   : > { %5491 = vmatmul.msk.f32.gmra.mxu2 %vm447_vm0, %v7383_v1  ;;  %5523 = vmatmul.msk.f32.gmra.mxu3 %vm447_vm0, %v7383_v1  ;;  %v433_v1 = vld [vmem:[%s13839_s1 + $0xd0] sm:$0xff] }
  0xd8   : > { %1122 = vmatpush.msrb.mxu1 %v396_v6  ;;  %v379_v6 = vld [vmem:[%s7022_s19 + $0x20] sm:$0xff] }
  0xda   : > { %v7393_v2 = vpop.f32.mrf.mxu2  ;;  %v7417_v11 = vpop.f32.mrf.mxu3  ;;  %1123 = vmatpush.msrb.mxu1 %v388_v55 }
  0xdb   : > { %14504 = vst [vmem:[#allocation32_spill] sm:$0xff] %v7393_v2  ;;  %v7395_v3 = vpop.f32.mrf.mxu0  ;;  %v7397_v4 = vpop.f32.mrf.mxu1 }
  0xdc   : > { %14505 = vst [vmem:[#allocation33_spill] sm:$0xff] %v7395_v3  ;;  %1124 = vmatpush.msrb.mxu1 %v380_v32 }
  0xdd   : > { %14506 = vst [vmem:[#allocation34_spill] sm:$0xff] %v7397_v4 }
  0xde   : > { %5428 = vmatmul.msk.f32.gmra.mxu0 %vm447_vm0, %v430_v5  ;;  %5460 = vmatmul.msk.f32.gmra.mxu1 %vm447_vm0, %v430_v5  ;;  %14511 = vst [vmem:[#allocation39_spill] sm:$0xff] %v7417_v11  ;;  %v395_v11 = vld [vmem:[%s7022_s19 + $0xa0] sm:$0xff] }
  0xdf   : > { %5492 = vmatmul.msk.f32.gmra.mxu2 %vm447_vm0, %v430_v5  ;;  %5524 = vmatmul.msk.f32.gmra.mxu3 %vm447_vm0, %v430_v5 }
  0xe2   : > { %v7408_v7 = vpop.f32.mrf.mxu2  ;;  %v7436_v16 = vpop.f32.mrf.mxu3 }
  0xe3   : > { %14508 = vst [vmem:[#allocation36_spill] sm:$0xff] %v7408_v7  ;;  %v7410_v8 = vpop.f32.mrf.mxu0  ;;  %v7412_v9 = vpop.f32.mrf.mxu1 }
  0xe4   : > { %14509 = vst [vmem:[#allocation37_spill] sm:$0xff] %v7410_v8 }
  0xe5   : > { %14510 = vst [vmem:[#allocation38_spill] sm:$0xff] %v7412_v9 }
  0xe6   : > { %5429 = vmatmul.msk.f32.gmra.mxu0 %vm447_vm0, %v431_v10  ;;  %5461 = vmatmul.msk.f32.gmra.mxu1 %vm447_vm0, %v431_v10  ;;  %14513 = vst [vmem:[#allocation41_spill] sm:$0xff] %v7436_v16  ;;  %v406_v16 = vld [vmem:[%s7022_s19 + $0xf8] sm:$0xff] }
  0xe7   : > { %5493 = vmatmul.msk.f32.gmra.mxu2 %vm447_vm0, %v431_v10  ;;  %5525 = vmatmul.msk.f32.gmra.mxu3 %vm447_vm0, %v431_v10 }
  0xe8   : > { %1347 = vmatpush.msrb.mxu3 %v406_v16  ;;  %v387_v16 = vld [vmem:[%s7022_s19 + $0x60] sm:$0xff] }
  0xea   : > { %v7423_v12 = vpop.f32.mrf.mxu2  ;;  %1348 = vmatpush.msrb.mxu3 %v398_v40 }
  0xeb   : > { %14512 = vst [vmem:[#allocation40_spill] sm:$0xff] %v7423_v12  ;;  %v7425_v13 = vpop.f32.mrf.mxu0  ;;  %v7427_v14 = vpop.f32.mrf.mxu1 }
  0xee   : > { %5430 = vmatmul.msk.f32.gmra.mxu0 %vm447_vm0, %v432_v15  ;;  %5462 = vmatmul.msk.f32.gmra.mxu1 %vm447_vm0, %v432_v15 }
  0xef   : > { %5494 = vmatmul.msk.f32.gmra.mxu2 %vm447_vm0, %v432_v15  ;;  %5526 = vmatmul.msk.f32.gmra.mxu3 %vm447_vm0, %v432_v15  ;;  %v7451_v15 = vpop.f32.mrf.mxu3 }
  0xf0   : > { %14516 = vst [vmem:[#allocation44_spill] sm:$0xff] %v7451_v15  ;;  %v405_v15 = vld [vmem:[%s7022_s19 + $0xf0] sm:$0xff] }
  0xf1   : > { %1234 = vmatpush.msrb.mxu2 %v405_v15 }
  0xf2   : > { %v7438_v5 = vpop.f32.mrf.mxu2 }
  0xf3   : > { %14514 = vst [vmem:[#allocation42_spill] sm:$0xff] %v7438_v5  ;;  %v7440_v10 = vpop.f32.mrf.mxu0  ;;  %v7442_v0 = vpop.f32.mrf.mxu1  ;;  %1235 = vmatpush.msrb.mxu2 %v397_v35  ;;  %v381_v5 = vld [vmem:[%s7022_s19 + $0x30] sm:$0xff]  ;;  %v382_v35 = vld [vmem:[%s7022_s19 + $0x38] sm:$0xff] }
  0xf4   : > { %14515 = vst [vmem:[#allocation43_spill] sm:$0xff] %v7442_v0 }
  0xf6   : > { %5431 = vmatmul.msk.f32.gmra.mxu0 %vm447_vm0, %v433_v1  ;;  %5463 = vmatmul.msk.f32.gmra.mxu1 %vm447_vm0, %v433_v1 }
  0xf7   : > { %5495 = vmatmul.msk.f32.gmra.mxu2 %vm447_vm0, %v433_v1  ;;  %5527 = vmatmul.msk.f32.gmra.mxu3 %vm447_vm0, %v433_v1  ;;  %v403_v1 = vld [vmem:[%s7022_s19 + $0xe0] sm:$0xff] }
  0xf8   : > { %1008 = vmatpush.msrb.mxu0 %v403_v1 }
  0xfa   : > { %v7453_v59 = vpop.f32.mrf.mxu2  ;;  %1009 = vmatpush.msrb.mxu0 %v395_v11  ;;  %v390_v11 = vld [vmem:[%s7022_s19 + $0x78] sm:$0xff] }
  0xfb   : > { %14517 = vst [vmem:[#allocation45_spill] sm:$0xff] %v7453_v59  ;;  %v7455_v54 = vpop.f32.mrf.mxu0  ;;  %v7457_v49 = vpop.f32.mrf.mxu1  ;;  %1349 = vmatpush.msrb.mxu3 %v390_v11 }
  0xfc   : > { %14518 = vst [vmem:[#allocation46_spill] sm:$0xff] %v7457_v49  ;;  %v7486_v59 = vpop.f32.mrf.mxu3  ;;  %1010 = vmatpush.msrb.mxu0 %v387_v16  ;;  %v436_v16 = vld [vmem:[%s13839_s1 + $0xe8] sm:$0xff] }
  0xfd   : > { %14521 = vst [vmem:[#allocation49_spill] sm:$0xff] %v7486_v59  ;;  %1350 = vmatpush.msrb.mxu3 %v382_v35  ;;  %v438_v59 = vld [vmem:[%s13839_s1 + $0xf8] sm:$0xff] }
  0xfe   : > { %5432 = vmatmul.msk.f32.gmra.mxu0 %vm447_vm0, %v434_v44  ;;  %5464 = vmatmul.msk.f32.gmra.mxu1 %vm447_vm0, %v434_v44 }
  0xff   : > { %5496 = vmatmul.msk.f32.gmra.mxu2 %vm447_vm0, %v434_v44  ;;  %5528 = vmatmul.msk.f32.gmra.mxu3 %vm447_vm0, %v434_v44  ;;  %v435_v44 = vld [vmem:[%s13839_s1 + $0xe0] sm:$0xff] }
 0x100   : > { %1011 = vmatpush.msrb.mxu0 %v379_v6  ;;  %v437_v6 = vld [vmem:[%s13839_s1 + $0xf0] sm:$0xff] }
 0x102   : > { %v7473_v60 = vpop.f32.mrf.mxu2 }
 0x103   : > { %14519 = vst [vmem:[#allocation47_spill] sm:$0xff] %v7473_v60  ;;  %v7479_v1 = vpop.f32.mrf.mxu0  ;;  %v7481_v15 = vpop.f32.mrf.mxu1  ;;  %v389_v60 = vld [vmem:[%s7022_s19 + $0x70] sm:$0xff] }
 0x104   : > { %14520 = vst [vmem:[#allocation48_spill] sm:$0xff] %v7481_v15  ;;  %1236 = vmatpush.msrb.mxu2 %v389_v60  ;;  %v7506_v11 = vpop.f32.mrf.mxu3 }
 0x105   : > { %14524 = vst [vmem:[#allocation52_spill] sm:$0xff] %v7506_v11 }
 0x106   : > { %5433 = vmatmul.msk.f32.gmra.mxu0 %vm447_vm0, %v435_v44  ;;  %5465 = vmatmul.msk.f32.gmra.mxu1 %vm447_vm0, %v435_v44 }
 0x107   : > { %5497 = vmatmul.msk.f32.gmra.mxu2 %vm447_vm0, %v435_v44  ;;  %5529 = vmatmul.msk.f32.gmra.mxu3 %vm447_vm0, %v435_v44 }
 0x108   : > { %1237 = vmatpush.msrb.mxu2 %v381_v5 }
 0x10a   : > { %v7497_v55 = vpop.f32.mrf.mxu2 }
 0x10b   : > { %14522 = vst [vmem:[#allocation50_spill] sm:$0xff] %v7497_v55  ;;  %v7499_v60 = vpop.f32.mrf.mxu0  ;;  %v7501_v40 = vpop.f32.mrf.mxu1 }
 0x10c   : > { %14523 = vst [vmem:[#allocation51_spill] sm:$0xff] %v7501_v40  ;;  %v7525_v35 = vpop.f32.mrf.mxu3 }
 0x10d   : > { %14527 = vst [vmem:[#allocation55_spill] sm:$0xff] %v7525_v35 }
 0x10e   : > { %5434 = vmatmul.msk.f32.gmra.mxu0 %vm447_vm0, %v436_v16  ;;  %5466 = vmatmul.msk.f32.gmra.mxu1 %vm447_vm0, %v436_v16 }
 0x10f   : > { %5498 = vmatmul.msk.f32.gmra.mxu2 %vm447_vm0, %v436_v16  ;;  %5530 = vmatmul.msk.f32.gmra.mxu3 %vm447_vm0, %v436_v16 }
 0x112   : > { %v7512_v32 = vpop.f32.mrf.mxu2 }
 0x113   : > { %14525 = vst [vmem:[#allocation53_spill] sm:$0xff] %v7512_v32  ;;  %v7514_v5 = vpop.f32.mrf.mxu0  ;;  %v7516_v44 = vpop.f32.mrf.mxu1 }
 0x114   : > { %14526 = vst [vmem:[#allocation54_spill] sm:$0xff] %v7516_v44 }
 0x116   : > { %5435 = vmatmul.msk.f32.gmra.mxu0 %vm447_vm0, %v437_v6  ;;  %5467 = vmatmul.msk.f32.gmra.mxu1 %vm447_vm0, %v437_v6 }
 0x117   : > { %5499 = vmatmul.msk.f32.gmra.mxu2 %vm447_vm0, %v437_v6  ;;  %5531 = vmatmul.msk.f32.gmra.mxu3 %vm447_vm0, %v437_v6  ;;  %v7540_v6 = vpop.f32.mrf.mxu3 }
 0x118   : > { %14530 = vst [vmem:[#allocation58_spill] sm:$0xff] %v7540_v6 }
 0x11a   : > { %v7534_v32 = vpop.f32.mrf.mxu2 }
 0x11b   : > { %v7527_v16 = vpop.f32.mrf.mxu0  ;;  %v7529_v11 = vpop.f32.mrf.mxu1  ;;  %14529 = vst [vmem:[#allocation57_spill] sm:$0xff] %v7534_v32 }
 0x11c   : > { %14528 = vst [vmem:[#allocation56_spill] sm:$0xff] %v7529_v11 }
 0x11e   : > { %5436 = vmatmul.msk.f32.gmra.mxu0 %vm447_vm0, %v438_v59  ;;  %5468 = vmatmul.msk.f32.gmra.mxu1 %vm447_vm0, %v438_v59 }
 0x11f   : > { %5500 = vmatmul.msk.f32.gmra.mxu2 %vm447_vm0, %v438_v59  ;;  %5532 = vmatmul.msk.f32.gmra.mxu3 %vm447_vm0, %v438_v59  ;;  %v7560_v32 = vpop.f32.mrf.mxu3 }
 0x120   : > { %14534 = vst [vmem:[#allocation62_spill] sm:$0xff] %v7560_v32 }
 0x122   : > { %v7546_v50 = vpop.f32.mrf.mxu2 }
 0x123   : > { %v7542_v35 = vpop.f32.mrf.mxu0  ;;  %v7544_v55 = vpop.f32.mrf.mxu1  ;;  %14532 = vst [vmem:[#allocation60_spill] sm:$0xff] %v7546_v50 }
 0x124   : > { %14531 = vst [vmem:[#allocation59_spill] sm:$0xff] %v7544_v55 }
 0x126   : > { %5533 = vmatmul.msk.f32.vlgmr.msrb.gmra.mxu0 %vm447_vm0, %v7043_v17  ;;  %5565 = vmatmul.msk.f32.vlgmr.msrb.gmra.mxu1 %vm447_vm0, %v7043_v17 }
 0x127   : > { %5597 = vmatmul.msk.f32.vlgmr.msrb.gmra.mxu2 %vm447_vm0, %v7043_v17  ;;  %5629 = vmatmul.msk.f32.vlgmr.msrb.gmra.mxu3 %vm447_vm0, %v7043_v17  ;;  %v7576_v7 = vpop.f32.mrf.mxu3 }
 0x128   : > { %14537 = vst [vmem:[#allocation65_spill] sm:$0xff] %v7576_v7 }
 0x12a   : > { %v7570_v50 = vpop.f32.mrf.mxu2 }
 0x12b   : > { %v7556_v59 = vpop.f32.mrf.mxu0  ;;  %v7558_v6 = vpop.f32.mrf.mxu1  ;;  %14535 = vst [vmem:[#allocation63_spill] sm:$0xff] %v7570_v50 }
 0x12c   : > { %14533 = vst [vmem:[#allocation61_spill] sm:$0xff] %v7558_v6 }
 0x12e   : > { %5534 = vmatmul.msk.f32.gmra.mxu0 %vm447_vm0, %v7060_v18  ;;  %5566 = vmatmul.msk.f32.gmra.mxu1 %vm447_vm0, %v7060_v18 }
 0x12f   : > { %5598 = vmatmul.msk.f32.gmra.mxu2 %vm447_vm0, %v7060_v18  ;;  %5630 = vmatmul.msk.f32.gmra.mxu3 %vm447_vm0, %v7060_v18  ;;  %v7600_v7 = vpop.f32.mrf.mxu3 }
 0x130   : > { %14540 = vst [vmem:[#allocation68_spill] sm:$0xff] %v7600_v7 }
 0x132   : > { %v7586_v18 = vpop.f32.mrf.mxu2 }
 0x133   : > { %v7572_v17 = vpop.f32.mrf.mxu0  ;;  %v7574_v12 = vpop.f32.mrf.mxu1  ;;  %14538 = vst [vmem:[#allocation66_spill] sm:$0xff] %v7586_v18 }
 0x134   : > { %14536 = vst [vmem:[#allocation64_spill] sm:$0xff] %v7574_v12 }
 0x136   : > { %5535 = vmatmul.msk.f32.gmra.mxu0 %vm447_vm0, %v7073_v19  ;;  %5567 = vmatmul.msk.f32.gmra.mxu1 %vm447_vm0, %v7073_v19 }
 0x137   : > { %5599 = vmatmul.msk.f32.gmra.mxu2 %vm447_vm0, %v7073_v19  ;;  %5631 = vmatmul.msk.f32.gmra.mxu3 %vm447_vm0, %v7073_v19 }
 0x13a   : > { %v7606_v37 = vpop.f32.mrf.mxu2 }
 0x13b   : > { %v7588_v32 = vpop.f32.mrf.mxu0  ;;  %v7590_v50 = vpop.f32.mrf.mxu1  ;;  %14542 = vst [vmem:[#allocation70_spill] sm:$0xff] %v7606_v37 }
 0x13c   : > { %14539 = vst [vmem:[#allocation67_spill] sm:$0xff] %v7590_v50 }
 0x13e   : > { %5536 = vmatmul.msk.f32.gmra.mxu0 %vm447_vm0, %v7086_v20  ;;  %5568 = vmatmul.msk.f32.gmra.mxu1 %vm447_vm0, %v7086_v20 }
 0x13f   : > { %5600 = vmatmul.msk.f32.gmra.mxu2 %vm447_vm0, %v7086_v20  ;;  %5632 = vmatmul.msk.f32.gmra.mxu3 %vm447_vm0, %v7086_v20  ;;  %v7616_v20 = vpop.f32.mrf.mxu3 }
 0x140   : > { %14543 = vst [vmem:[#allocation71_spill] sm:$0xff] %v7616_v20 }
 0x142   : > { %v7626_v37 = vpop.f32.mrf.mxu2 }
 0x143   : > { %v7602_v19 = vpop.f32.mrf.mxu0  ;;  %v7604_v18 = vpop.f32.mrf.mxu1  ;;  %14545 = vst [vmem:[#allocation73_spill] sm:$0xff] %v7626_v37 }
 0x144   : > { %14541 = vst [vmem:[#allocation69_spill] sm:$0xff] %v7604_v18 }
 0x146   : > { %5537 = vmatmul.msk.f32.gmra.mxu0 %vm447_vm0, %v7099_v21  ;;  %5569 = vmatmul.msk.f32.gmra.mxu1 %vm447_vm0, %v7099_v21 }
 0x147   : > { %5601 = vmatmul.msk.f32.gmra.mxu2 %vm447_vm0, %v7099_v21  ;;  %5633 = vmatmul.msk.f32.gmra.mxu3 %vm447_vm0, %v7099_v21  ;;  %v7636_v2 = vpop.f32.mrf.mxu3 }
 0x148   : > { %14547 = vst [vmem:[#allocation75_spill] sm:$0xff] %v7636_v2 }
 0x14a   : > { %v7646_v37 = vpop.f32.mrf.mxu2 }
 0x14b   : > { %v7618_v7 = vpop.f32.mrf.mxu0  ;;  %v7620_v45 = vpop.f32.mrf.mxu1  ;;  %14548 = vst [vmem:[#allocation76_spill] sm:$0xff] %v7646_v37 }
 0x14c   : > { %14544 = vst [vmem:[#allocation72_spill] sm:$0xff] %v7620_v45 }
 0x14e   : > { %5538 = vmatmul.msk.f32.gmra.mxu0 %vm447_vm0, %v7112_v22  ;;  %5570 = vmatmul.msk.f32.gmra.mxu1 %vm447_vm0, %v7112_v22 }
 0x14f   : > { %5602 = vmatmul.msk.f32.gmra.mxu2 %vm447_vm0, %v7112_v22  ;;  %5634 = vmatmul.msk.f32.gmra.mxu3 %vm447_vm0, %v7112_v22  ;;  %v7656_v2 = vpop.f32.mrf.mxu3 }
 0x150   : > { %14551 = vst [vmem:[#allocation79_spill] sm:$0xff] %v7656_v2 }
 0x153   : > { %v7632_v21 = vpop.f32.mrf.mxu0  ;;  %v7634_v20 = vpop.f32.mrf.mxu1 }
 0x154   : > { %14546 = vst [vmem:[#allocation74_spill] sm:$0xff] %v7634_v20 }
 0x156   : > { %5539 = vmatmul.msk.f32.gmra.mxu0 %vm447_vm0, %v7125_v23  ;;  %5571 = vmatmul.msk.f32.gmra.mxu1 %vm447_vm0, %v7125_v23 }
 0x157   : > { %5603 = vmatmul.msk.f32.gmra.mxu2 %vm447_vm0, %v7125_v23  ;;  %5635 = vmatmul.msk.f32.gmra.mxu3 %vm447_vm0, %v7125_v23  ;;  %v1448_v23 = vmin.f32 %v7252_v33, %v7273_v38 }
 0x159   : > { %v1449_v37 = vmin.f32 %v1448_v23, %v7292_v42  ;;  %v7682_v23 = vpop.f32.mrf.mxu3 }
 0x15a   : > { %14555 = vst [vmem:[#allocation83_spill] sm:$0xff] %v7682_v23 }
 0x15b   : > { %v7648_v22 = vpop.f32.mrf.mxu0  ;;  %v7650_v45 = vpop.f32.mrf.mxu1  ;;  %v1450_v18 = vmin.f32 %v1449_v37, %v7313_v47 }
 0x15c   : > { %14549 = vst [vmem:[#allocation77_spill] sm:$0xff] %v7648_v22 }
 0x15d   : > { %14550 = vst [vmem:[#allocation78_spill] sm:$0xff] %v7650_v45  ;;  %v7665_v45 = vpop.f32.mrf.mxu2  ;;  %v1451_v2 = vmin.f32 %v1450_v18, %v7334_v52 }
 0x15e   : > { %5540 = vmatmul.msk.f32.gmra.mxu0 %vm447_vm0, %v7138_v24  ;;  %5572 = vmatmul.msk.f32.gmra.mxu1 %vm447_vm0, %v7138_v24  ;;  %14552 = vst [vmem:[#allocation80_spill] sm:$0xff] %v7665_v45 }
 0x15f   : > { %5604 = vmatmul.msk.f32.gmra.mxu2 %vm447_vm0, %v7138_v24  ;;  %5636 = vmatmul.msk.f32.gmra.mxu3 %vm447_vm0, %v7138_v24  ;;  %v1452_v24 = vmin.f32 %v1451_v2, %v7355_v57  ;;  %v1485_v2 = vmin.f32 %v7254_v34, %v7275_v39 }
 0x161   : > { %v1453_v37 = vmin.f32 %v1452_v24, %v7376_v62 }
 0x163   : > { %v7667_v20 = vpop.f32.mrf.mxu0  ;;  %v7670_v31 = vpop.f32.mrf.mxu1  ;;  %v1454_v18 = vmin.f32 %v1453_v37, %v7395_v3  ;;  %v1486_v37 = vmin.f32 %v1485_v2, %v7294_v43 }
 0x164   : > { %14553 = vst [vmem:[#allocation81_spill] sm:$0xff] %v7667_v20 }
 0x165   : > { %14554 = vst [vmem:[#allocation82_spill] sm:$0xff] %v7670_v31  ;;  %v7688_v52 = vpop.f32.mrf.mxu2  ;;  %v1455_v42 = vmin.f32 %v1454_v18, %v7410_v8  ;;  %v7706_v18 = vpop.f32.mrf.mxu3  ;;  %v1487_v3 = vmin.f32 %v1486_v37, %v7315_v48 }
 0x166   : > { %5541 = vmatmul.msk.f32.gmra.mxu0 %vm447_vm0, %v7151_v25  ;;  %5573 = vmatmul.msk.f32.gmra.mxu1 %vm447_vm0, %v7151_v25  ;;  %14557 = vst [vmem:[#allocation85_spill] sm:$0xff] %v7688_v52 }
 0x167   : > { %5605 = vmatmul.msk.f32.gmra.mxu2 %vm447_vm0, %v7151_v25  ;;  %5637 = vmatmul.msk.f32.gmra.mxu3 %vm447_vm0, %v7151_v25  ;;  %v1456_v25 = vmin.f32 %v1455_v42, %v7425_v13  ;;  %14559 = vst [vmem:[#allocation87_spill] sm:$0xff] %v7706_v18 }
 0x169   : > { %v1457_v24 = vmin.f32 %v1456_v25, %v7440_v10 }
 0x16b   : > { %v7685_v47 = vpop.f32.mrf.mxu0  ;;  %v7691_v45 = vpop.f32.mrf.mxu1  ;;  %v1458_v23 = vmin.f32 %v1457_v24, %v7455_v54 }
 0x16c   : > { %14556 = vst [vmem:[#allocation84_spill] sm:$0xff] %v7685_v47 }
 0x16d   : > { %14558 = vst [vmem:[#allocation86_spill] sm:$0xff] %v7691_v45  ;;  %v1459_v62 = vmin.f32 %v1458_v23, %v7479_v1  ;;  %v7718_v42 = vpop.f32.mrf.mxu2  ;;  %v7734_v43 = vpop.f32.mrf.mxu3 }
 0x16e   : > { %5542 = vmatmul.msk.f32.gmra.mxu0 %vm447_vm0, %v7164_v26  ;;  %5574 = vmatmul.msk.f32.gmra.mxu1 %vm447_vm0, %v7164_v26  ;;  %14561 = vst [vmem:[#allocation89_spill] sm:$0xff] %v7718_v42 }
 0x16f   : > { %5606 = vmatmul.msk.f32.gmra.mxu2 %vm447_vm0, %v7164_v26  ;;  %5638 = vmatmul.msk.f32.gmra.mxu3 %vm447_vm0, %v7164_v26  ;;  %v1488_v26 = vmin.f32 %v1487_v3, %v7336_v53  ;;  %v1460_v25 = vmin.f32 %v1459_v62, %v7499_v60  ;;  %14564 = vst [vmem:[#allocation92_spill] sm:$0xff] %v7734_v43 }
 0x171   : > { %v1489_v23 = vmin.f32 %v1488_v26, %v7357_v58  ;;  %v1461_v24 = vmin.f32 %v1460_v25, %v7514_v5 }
 0x173   : > { %v7708_v8 = vpop.f32.mrf.mxu0  ;;  %v7725_v2 = vpop.f32.mrf.mxu1  ;;  %v1490_v37 = vmin.f32 %v1489_v23, %v7378_v63  ;;  %v1462_v3 = vmin.f32 %v1461_v24, %v7527_v16 }
 0x174   : > { %14560 = vst [vmem:[#allocation88_spill] sm:$0xff] %v7708_v8 }
 0x175   : > { %14562 = vst [vmem:[#allocation90_spill] sm:$0xff] %v7725_v2  ;;  %v1491_v53 = vmin.f32 %v1490_v37, %v7397_v4  ;;  %v7748_v23 = vpop.f32.mrf.mxu2 }
 0x176   : > { %5543 = vmatmul.msk.f32.gmra.mxu0 %vm447_vm0, %v7177_v27  ;;  %5575 = vmatmul.msk.f32.gmra.mxu1 %vm447_vm0, %v7177_v27  ;;  %14565 = vst [vmem:[#allocation93_spill] sm:$0xff] %v7748_v23 }
 0x177   : > { %5607 = vmatmul.msk.f32.gmra.mxu2 %vm447_vm0, %v7177_v27  ;;  %5639 = vmatmul.msk.f32.gmra.mxu3 %vm447_vm0, %v7177_v27  ;;  %v1463_v27 = vmin.f32 %v1462_v3, %v7542_v35  ;;  %v1492_v62 = vmin.f32 %v1491_v53, %v7412_v9 }
 0x179   : > { %v1464_v26 = vmin.f32 %v1463_v27, %v7556_v59  ;;  %v1493_v25 = vmin.f32 %v1492_v62, %v7427_v14  ;;  %v7764_v62 = vpop.f32.mrf.mxu3 }
 0x17a   : > { %14568 = vst [vmem:[#allocation96_spill] sm:$0xff] %v7764_v62 }
 0x17b   : > { %v7730_v48 = vpop.f32.mrf.mxu0  ;;  %v1465_v24 = vmin.f32 %v1464_v26, %v7572_v17  ;;  %v7751_v37 = vpop.f32.mrf.mxu1  ;;  %v1494_v3 = vmin.f32 %v1493_v25, %v7442_v0  ;;  %v1522_v26 = vmin.f32 %v7269_v36, %v7290_v41 }
 0x17c   : > { %14563 = vst [vmem:[#allocation91_spill] sm:$0xff] %v7730_v48 }
 0x17d   : > { %14566 = vst [vmem:[#allocation94_spill] sm:$0xff] %v7751_v37  ;;  %v1466_v53 = vmin.f32 %v1465_v24, %v7588_v32  ;;  %v1495_v9 = vmin.f32 %v1494_v3, %v7457_v49  ;;  %v1523_v49 = vmin.f32 %v1522_v26, %v7311_v46 }
 0x17e   : > { %5544 = vmatmul.msk.f32.gmra.mxu0 %vm447_vm0, %v7190_v28  ;;  %5576 = vmatmul.msk.f32.gmra.mxu1 %vm447_vm0, %v7190_v28 }
 0x17f   : > { %5608 = vmatmul.msk.f32.gmra.mxu2 %vm447_vm0, %v7190_v28  ;;  %5640 = vmatmul.msk.f32.gmra.mxu3 %vm447_vm0, %v7190_v28  ;;  %v1467_v28 = vmin.f32 %v1466_v53, %v7602_v19  ;;  %v1496_v27 = vmin.f32 %v1495_v9, %v7481_v15  ;;  %v7776_v9 = vpop.f32.mrf.mxu2  ;;  %v1524_v26 = vmin.f32 %v1523_v49, %v7332_v51  ;;  %v14576_v51 = vld [vmem:[#allocation5_spill] sm:$0xff] }
 0x180   : > { %14569 = vst [vmem:[#allocation97_spill] sm:$0xff] %v7776_v9 }
 0x181   : > { %v1468_v25 = vmin.f32 %v1467_v28, %v7618_v7  ;;  %v1497_v24 = vmin.f32 %v1496_v27, %v7501_v40 }
 0x183   : > { %v7754_v4 = vpop.f32.mrf.mxu0  ;;  %v1469_v3 = vmin.f32 %v1468_v25, %v7632_v21  ;;  %v1498_v53 = vmin.f32 %v1497_v24, %v7516_v44  ;;  %v7798_v24 = vpop.f32.mrf.mxu3 }
 0x184   : > { %14567 = vst [vmem:[#allocation95_spill] sm:$0xff] %v7754_v4 }
 0x185   : > { %v1470_v0 = vmin.f32 %v1469_v3, %v7648_v22  ;;  %v1499_v41 = vmin.f32 %v1498_v53, %v7529_v11  ;;  %14572 = vst [vmem:[#allocation100_spill] sm:$0xff] %v7798_v24  ;;  %v14639_v11 = vld [vmem:[#allocation68_spill] sm:$0xff] }
 0x186   : > { %5545 = vmatmul.msk.f32.gmra.mxu0 %vm447_vm0, %v7203_v29  ;;  %5577 = vmatmul.msk.f32.gmra.mxu1 %vm447_vm0, %v7203_v29 }
 0x187   : > { %5609 = vmatmul.msk.f32.gmra.mxu2 %vm447_vm0, %v7203_v29  ;;  %5641 = vmatmul.msk.f32.gmra.mxu3 %vm447_vm0, %v7203_v29  ;;  %v7782_v29 = vpop.f32.mrf.mxu1  ;;  %v1471_v28 = vmin.f32 %v1470_v0, %v7667_v20  ;;  %v1500_v27 = vmin.f32 %v1499_v41, %v7544_v55  ;;  %v1525_v41 = vmin.f32 %v1524_v26, %v7353_v56  ;;  %v7807_v20 = vpop.f32.mrf.mxu2 }
 0x188   : > { %14571 = vst [vmem:[#allocation99_spill] sm:$0xff] %v7782_v29 }
 0x189   : > { %v1472_v25 = vmin.f32 %v1471_v28, %v7685_v47  ;;  %v1501_v0 = vmin.f32 %v1500_v27, %v7558_v6  ;;  %14574 = vst [vmem:[#allocation102_spill] sm:$0xff] %v7807_v20  ;;  %v1526_v49 = vmin.f32 %v1525_v41, %v7374_v61  ;;  %v14581_v61 = vld [vmem:[#allocation9_spill] sm:$0xff] }
 0x18b   : > { %v7778_v15 = vpop.f32.mrf.mxu0  ;;  %v1473_v3 = vmin.f32 %v1472_v25, %v7708_v8  ;;  %v1502_v53 = vmin.f32 %v1501_v0, %v7574_v12  ;;  %v14577_v25 = vld [vmem:[#allocation69_spill] sm:$0xff]  ;;  %v14578_v0 = vld [vmem:[#allocation32_spill] sm:$0xff]  ;;  %v7830_v47 = vpop.f32.mrf.mxu3 }
 0x18c   : > { %14570 = vst [vmem:[#allocation98_spill] sm:$0xff] %v7778_v15 }
 0x18d   : > { %v1474_v36 = vmin.f32 %v1473_v3, %v7730_v48  ;;  %v1527_v3 = vmin.f32 %v1526_v49, %v14578_v0  ;;  %v14582_v48 = vld [vmem:[#allocation36_spill] sm:$0xff]  ;;  %14584 = vst [vmem:[#allocation5_spill] sm:$0xff] %v7830_v47 }
 0x18e   : > { %5546 = vmatmul.msk.f32.gmra.mxu0 %vm447_vm0, %v7216_v30  ;;  %5578 = vmatmul.msk.f32.gmra.mxu1 %vm447_vm0, %v7216_v30 }
 0x18f   : > { %5610 = vmatmul.msk.f32.gmra.mxu2 %vm447_vm0, %v7216_v30  ;;  %5642 = vmatmul.msk.f32.gmra.mxu3 %vm447_vm0, %v7216_v30  ;;  %v1503_v30 = vmin.f32 %v1502_v53, %v7590_v50  ;;  %v1475_v28 = vmin.f32 %v1474_v36, %v7754_v4  ;;  %v7811_v27 = vpop.f32.mrf.mxu1  ;;  %v14579_v53 = vld [vmem:[#allocation72_spill] sm:$0xff]  ;;  %v14580_v4 = vld [vmem:[#allocation15_spill] sm:$0xff]  ;;  %v1528_v8 = vmin.f32 %v1527_v3, %v14582_v48  ;;  %v14590_v3 = vld [vmem:[#allocation6_spill] sm:$0xff] }
 0x190   : > { %14575 = vst [vmem:[#allocation103_spill] sm:$0xff] %v7811_v27  ;;  %v1559_v56 = vmin.f32 %v14581_v61, %v14580_v4 }
 0x191   : > { %v1504_v26 = vmin.f32 %v1503_v30, %v14577_v25  ;;  %v1476_v36 = vmin.f32 %v1475_v28, %v7778_v15  ;;  %v14583_v30 = vld [vmem:[#allocation74_spill] sm:$0xff] }
 0x192   : > { %v14587_v28 = vld [vmem:[#allocation78_spill] sm:$0xff] }
 0x193   : > { %v7802_v46 = vpop.f32.mrf.mxu0  ;;  %v1505_v41 = vmin.f32 %v1504_v26, %v14579_v53  ;;  %v14588_v26 = vld [vmem:[#allocation20_spill] sm:$0xff]  ;;  %v14589_v53 = vld [vmem:[#allocation42_spill] sm:$0xff] }
 0x194   : > { %14573 = vst [vmem:[#allocation101_spill] sm:$0xff] %v7802_v46  ;;  %v1477_v50 = vmin.f32 %v1476_v36, %v7802_v46  ;;  %v1560_v0 = vmin.f32 %v1559_v56, %v14588_v26  ;;  %v14594_v26 = vld [vmem:[#allocation25_spill] sm:$0xff] }
 0x195   : > { %v1506_v25 = vmin.f32 %v1505_v41, %v14583_v30  ;;  %v7844_v41 = vpop.f32.mrf.mxu2  ;;  %v14598_v30 = vld [vmem:[#allocation28_spill] sm:$0xff] }
 0x196   : > { %5547 = vmatmul.msk.f32.gmra.mxu0 %vm447_vm0, %v14576_v51  ;;  %5579 = vmatmul.msk.f32.gmra.mxu1 %vm447_vm0, %v14576_v51  ;;  %14591 = vst [vmem:[#allocation6_spill] sm:$0xff] %v7844_v41 }
 0x197   : > { %5611 = vmatmul.msk.f32.gmra.mxu2 %vm447_vm0, %v14576_v51  ;;  %5643 = vmatmul.msk.f32.gmra.mxu3 %vm447_vm0, %v14576_v51  ;;  %v14586_v51 = vld [vmem:[#allocation40_spill] sm:$0xff]  ;;  %v1507_v15 = vmin.f32 %v1506_v25, %v14587_v28  ;;  %v7858_v28 = vpop.f32.mrf.mxu3 }
 0x198   : > { %v1529_v6 = vmin.f32 %v1528_v8, %v14586_v51  ;;  %v7851_v8 = vpop.f32.mrf.mxu1  ;;  %v14596_v51 = vld [vmem:[#allocation50_spill] sm:$0xff]  ;;  %14597 = vst [vmem:[#allocation106_spill] sm:$0xff] %v7858_v28  ;;  %v14642_v28 = vld [vmem:[#allocation71_spill] sm:$0xff] }
 0x199   : > { %v1508_v36 = vmin.f32 %v1507_v15, %v7670_v31  ;;  %14593 = vst [vmem:[#allocation105_spill] sm:$0xff] %v7851_v8 }
 0x19a   : > { %v1530_v4 = vmin.f32 %v1529_v6, %v14589_v53  ;;  %v14595_v53 = vld [vmem:[#allocation47_spill] sm:$0xff] }
 0x19b   : > { %v7832_v12 = vpop.f32.mrf.mxu0  ;;  %v1509_v25 = vmin.f32 %v1508_v36, %v7691_v45  ;;  %v14602_v36 = vld [vmem:[#allocation57_spill] sm:$0xff] }
 0x19c   : > { %14585 = vst [vmem:[#allocation104_spill] sm:$0xff] %v7832_v12  ;;  %v1478_v49 = vmin.f32 %v1477_v50, %v7832_v12  ;;  %v14592_v50 = vld [vmem:[#allocation45_spill] sm:$0xff]  ;;  %v1561_v12 = vmin.f32 %v1560_v0, %v14594_v26  ;;  %v14604_v26 = vld [vmem:[#allocation60_spill] sm:$0xff] }
 0x19d   : > { %v1531_v56 = vmin.f32 %v1530_v4, %v14592_v50  ;;  %v1510_v15 = vmin.f32 %v1509_v25, %v7725_v2  ;;  %v14599_v50 = vld [vmem:[#allocation53_spill] sm:$0xff] }
 0x19e   : > { %v1479_v61 = vrot.slane %v1478_v49, 4  ;;  %5548 = vmatmul.msk.f32.gmra.mxu0 %vm447_vm0, %v14590_v3  ;;  %5580 = vmatmul.msk.f32.gmra.mxu1 %vm447_vm0, %v14590_v3  ;;  %v1562_v4 = vmin.f32 %v1561_v12, %v14598_v30 }
 0x19f   : > { %5612 = vmatmul.msk.f32.gmra.mxu2 %vm447_vm0, %v14590_v3  ;;  %5644 = vmatmul.msk.f32.gmra.mxu3 %vm447_vm0, %v14590_v3  ;;  %v1532_v46 = vmin.f32 %v1531_v56, %v14595_v53  ;;  %v1511_v3 = vmin.f32 %v1510_v15, %v7751_v37  ;;  %v14603_v15 = vld [vmem:[#allocation39_spill] sm:$0xff] }
 0x1a0   : > { %v1480_v6 = vmin.f32 %v1478_v49, %v1479_v61  ;;  %v14600_v61 = vld [vmem:[#allocation7_spill] sm:$0xff] }
 0x1a1   : > { %v1533_v48 = vmin.f32 %v1532_v46, %v14596_v51  ;;  %v1512_v0 = vmin.f32 %v1511_v3, %v7782_v29  ;;  %v14601_v46 = vld [vmem:[#allocation35_spill] sm:$0xff]  ;;  %v7879_v3 = vpop.f32.mrf.mxu1  ;;  %v13958_v51 = vlaneseq  ;;  %v14606_v29 = vld [vmem:[#allocation41_spill] sm:$0xff] }
 0x1a2   : > { %v1481_v31 = vrot.slane %v1480_v6, 2  ;;  %v1563_v49 = vmin.f32 %v1562_v4, %v14601_v46  ;;  %14605 = vst [vmem:[#allocation7_spill] sm:$0xff] %v7879_v3  ;;  %v14607_v37 = vld [vmem:[#allocation63_spill] sm:$0xff] }
 0x1a3   : > { %v1534_v55 = vmin.f32 %v1533_v48, %v14599_v50  ;;  %v7874_v48 = vpop.f32.mrf.mxu2  ;;  %v1513_v25 = vmin.f32 %v1512_v0, %v7811_v27  ;;  %v14610_v27 = vld [vmem:[#allocation10_spill] sm:$0xff] }
 0x1a4   : > { %v1482_v56 = vmin.f32 %v1480_v6, %v1481_v31  ;;  %v1564_v30 = vmin.f32 %v1563_v49, %v14603_v15  ;;  %v7890_v49 = vshrl.u32 %v13958_v51, 7 }
 0x1a5   : > { %v1535_v12 = vmin.f32 %v1534_v55, %v14602_v36  ;;  %v1514_v53 = vmin.f32 %v1513_v25, %v7851_v8  ;;  %v14608_v55 = vld [vmem:[#allocation44_spill] sm:$0xff]  ;;  %v14609_v36 = vld [vmem:[#allocation66_spill] sm:$0xff] }
 0x1a6   : > { %5549 = vmatmul.msk.f32.gmra.mxu0 %vm447_vm0, %v14600_v61  ;;  %5581 = vmatmul.msk.f32.gmra.mxu1 %vm447_vm0, %v14600_v61  ;;  %v1483_v46 = vrot.slane %v1482_v56, 1  ;;  %14611 = vst [vmem:[#allocation10_spill] sm:$0xff] %v7890_v49  ;;  %v14614_v25 = vld [vmem:[#allocation70_spill] sm:$0xff]  ;;  %v7967_v2 = vadd.s32 88, %v7890_v49  ;;  %v7970_v45 = vadd.s32 96, %v7890_v49 }
 0x1a7   : > { %5613 = vmatmul.msk.f32.gmra.mxu2 %vm447_vm0, %v14600_v61  ;;  %5645 = vmatmul.msk.f32.gmra.mxu3 %vm447_vm0, %v14600_v61  ;;  %v1536_v50 = vmin.f32 %v1535_v12, %v14604_v26  ;;  %v1565_v61 = vmin.f32 %v1564_v30, %v14606_v29  ;;  %v1515_v31 = vmin.f32 %v1514_v53, %v7879_v3  ;;  %v7892_v12 = vpop.f32.mrf.mxu3  ;;  %v14613_v30 = vld [vmem:[#allocation49_spill] sm:$0xff]  ;;  %v7953_v26 = vadd.s32 72, %v7890_v49 }
 0x1a8   : > { %14612 = vst [vmem:[#allocation107_spill] sm:$0xff] %v7892_v12  ;;  %v7898_v53 = vmin.f32 %v1482_v56, %v1483_v46  ;;  %v14619_v46 = vld [vmem:[#allocation76_spill] sm:$0xff]  ;;  %v7956_v3 = vadd.s32 80, %v7890_v49 }
 0x1a9   : > { %v1537_v4 = vmin.f32 %v1536_v50, %v14607_v37  ;;  %v1566_v6 = vmin.f32 %v1565_v61, %v14608_v55  ;;  %v1516_v61 = vrot.slane %v1515_v31, 4  ;;  %v14616_v55 = vld [vmem:[#allocation73_spill] sm:$0xff]  ;;  %14632 = vst [vmem:[#allocation114_spill] sm:$0xff] %v7953_v26 }
 0x1aa   : > { %vm1777_vm1 = vcmp.le.f32.partialorder %v7252_v33, %v7898_v53  ;;  %vm1785_vm2 = vcmp.le.f32.partialorder %v7273_v38, %v7898_v53  ;;  %v7931_v33 = vadd.s32 40, %v7890_v49  ;;  %v7934_v38 = vadd.s32 48, %v7890_v49  ;;  %14633 = vst [vmem:[#allocation115_spill] sm:$0xff] %v7956_v3 }
 0x1ab   : > { %v1538_v0 = vmin.f32 %v1537_v4, %v14609_v36  ;;  %v1567_v50 = vmin.f32 %v1566_v6, %v14613_v30  ;;  %v14615_v4 = vld [vmem:[#allocation52_spill] sm:$0xff]  ;;  %v7907_v36 = vadd.s32 8, %v7890_v49  ;;  %v7909_v37 = vpop.f32.mrf.mxu2  ;;  %v14618_v6 = vld [vmem:[#allocation55_spill] sm:$0xff]  ;;  %v14623_v30 = vld [vmem:[#allocation58_spill] sm:$0xff]  ;;  %14638 = vst [vmem:[#allocation117_spill] sm:$0xff] %v7970_v45  ;;  %vm1817_vm8 = vcmp.le.f32.partialorder %v7355_v57, %v7898_v53 }
 0x1ac   : > { %14627 = vst [vmem:[#allocation112_spill] sm:$0xff] %v7934_v38 }
 0x1ad   : > { %v1539_v29 = vmin.f32 %v1538_v0, %v14614_v25  ;;  %v1568_v51 = vmin.f32 %v1567_v50, %v14615_v4  ;;  %14617 = vst [vmem:[#allocation108_spill] sm:$0xff] %v7907_v36  ;;  %v1517_v50 = vmin.f32 %v1515_v31, %v1516_v61  ;;  %v7924_v4 = vadd.s32 32, %v7890_v49 }
 0x1ae   : > { %5550 = vmatmul.msk.f32.gmra.mxu0 %vm447_vm0, %v14610_v27  ;;  %5582 = vmatmul.msk.f32.gmra.mxu1 %vm447_vm0, %v14610_v27  ;;  %v2033_v31 = vsel %vm1777_vm1, %v7890_v49, 256  ;;  %v2041_v61 = vsel %vm1785_vm2, %v7907_v36, 256  ;;  %v7950_v25 = vadd.s32 64, %v7890_v49  ;;  %vm1849_vm1 = vcmp.le.f32.partialorder %v7425_v13, %v7898_v53 }
 0x1af   : > { %5614 = vmatmul.msk.f32.gmra.mxu2 %vm447_vm0, %v14610_v27  ;;  %5646 = vmatmul.msk.f32.gmra.mxu3 %vm447_vm0, %v14610_v27  ;;  %v1540_v15 = vmin.f32 %v1539_v29, %v14616_v55  ;;  %v1569_v0 = vmin.f32 %v1568_v51, %v14618_v6  ;;  %v7918_v27 = vadd.s32 16, %v7890_v49  ;;  %v7921_v29 = vadd.s32 24, %v7890_v49  ;;  %14622 = vst [vmem:[#allocation111_spill] sm:$0xff] %v7924_v4  ;;  %v14624_v6 = vld [vmem:[#allocation80_spill] sm:$0xff]  ;;  %v7958_v8 = vpop.f32.mrf.mxu3 }
 0x1b0   : > { %v14630_v55 = vld [vmem:[#allocation12_spill] sm:$0xff]  ;;  %14634 = vst [vmem:[#allocation116_spill] sm:$0xff] %v7958_v8  ;;  %vm2289_vm5 = vcmp.lt.s32.totalorder %v2033_v31, %v2041_v61 }
 0x1b1   : > { %v1541_v56 = vmin.f32 %v1540_v15, %v14619_v46  ;;  %14620 = vst [vmem:[#allocation109_spill] sm:$0xff] %v7918_v27  ;;  %v1570_v51 = vmin.f32 %v1569_v0, %v14623_v30  ;;  %v14625_v46 = vld [vmem:[#allocation14_spill] sm:$0xff]  ;;  %v7941_v0 = vadd.s32 56, %v7890_v49  ;;  %vm1793_vm3 = vcmp.le.f32.partialorder %v14630_v55, %v7898_v53 }
 0x1b2   : > { %14621 = vst [vmem:[#allocation110_spill] sm:$0xff] %v7921_v29  ;;  %v2049_v22 = vsel %vm1793_vm3, %v7918_v27, 256  ;;  %v2290_v8 = vsel %vm2289_vm5, %v2033_v31, %v2041_v61  ;;  %v14643_v61 = vld [vmem:[#allocation19_spill] sm:$0xff]  ;;  %vm1857_vm3 = vcmp.le.f32.partialorder %v7440_v10, %v7898_v53 }
 0x1b3   : > { %v1542_v15 = vmin.f32 %v1541_v56, %v14624_v6  ;;  %14626 = vst [vmem:[#allocation14_spill] sm:$0xff] %v7931_v33  ;;  %v14629_v56 = vld [vmem:[#allocation62_spill] sm:$0xff]  ;;  %vm2291_vm7 = vcmp.lt.s32.totalorder %v2290_v8, %v2049_v22 }
 0x1b4   : > { %14628 = vst [vmem:[#allocation113_spill] sm:$0xff] %v7941_v0  ;;  %v1571_v30 = vmin.f32 %v1570_v51, %v14629_v56  ;;  %v1518_v51 = vrot.slane %v1517_v50, 2 }
 0x1b5   : > { %v1543_v6 = vmin.f32 %v1542_v15, %v7688_v52  ;;  %14631 = vst [vmem:[#allocation12_spill] sm:$0xff] %v7950_v25  ;;  %v14635_v15 = vld [vmem:[#allocation65_spill] sm:$0xff] }
 0x1b6   : > { %5551 = vmatmul.msk.f32.gmra.mxu0 %vm447_vm0, %v14625_v46  ;;  %5583 = vmatmul.msk.f32.gmra.mxu1 %vm447_vm0, %v14625_v46  ;;  %v1572_v55 = vmin.f32 %v1571_v30, %v14635_v15  ;;  %v14636_v52 = vld [vmem:[#allocation17_spill] sm:$0xff]  ;;  %v14640_v30 = vld [vmem:[#allocation22_spill] sm:$0xff]  ;;  %v1519_v44 = vmin.f32 %v1517_v50, %v1518_v51 }
 0x1b7   : > { %5615 = vmatmul.msk.f32.gmra.mxu2 %vm447_vm0, %v14625_v46  ;;  %5647 = vmatmul.msk.f32.gmra.mxu3 %vm447_vm0, %v14625_v46  ;;  %v1544_v56 = vmin.f32 %v1543_v6, %v7718_v42  ;;  %vm1801_vm4 = vcmp.le.f32.partialorder %v14636_v52, %v7898_v53  ;;  %14637 = vst [vmem:[#allocation17_spill] sm:$0xff] %v7967_v2  ;;  %v7978_v52 = vadd.s32 104, %v7890_v49  ;;  %v7980_v6 = vpop.f32.mrf.mxu2  ;;  %v14647_v51 = vld [vmem:[#allocation30_spill] sm:$0xff] }
 0x1b8   : > { %v1573_v12 = vmin.f32 %v1572_v55, %v14639_v11  ;;  %vm1809_vm6 = vcmp.le.f32.partialorder %v14640_v30, %v7898_v53  ;;  %v2057_v15 = vsel %vm1801_vm4, %v7921_v29, 256  ;;  %v2292_v42 = vsel %vm2291_vm7, %v2290_v8, %v2049_v22 }
 0x1b9   : > { %v1545_v46 = vmin.f32 %v1544_v56, %v7748_v23  ;;  %14641 = vst [vmem:[#allocation22_spill] sm:$0xff] %v7978_v52  ;;  %vm2293_vm9 = vcmp.lt.s32.totalorder %v2292_v42, %v2057_v15  ;;  %v7990_v56 = vadd.s32 112, %v7890_v49  ;;  %v7993_v55 = vadd.s32 120, %v7890_v49 }
 0x1ba   : > { %v1574_v40 = vmin.f32 %v1573_v12, %v14642_v28  ;;  %v2065_v22 = vsel %vm1809_vm6, %v7924_v4, 256  ;;  %v2294_v8 = vsel %vm2293_vm9, %v2292_v42, %v2057_v15  ;;  %v14646_v12 = vld [vmem:[#allocation75_spill] sm:$0xff]  ;;  %vm1825_vm10 = vcmp.le.f32.partialorder %v14647_v51, %v7898_v53  ;;  %v14650_v51 = vld [vmem:[#allocation33_spill] sm:$0xff] }
 0x1bb   : > { %v1546_v31 = vmin.f32 %v1545_v46, %v7776_v9  ;;  %14644 = vst [vmem:[#allocation19_spill] sm:$0xff] %v7990_v56  ;;  %vm2295_vm11 = vcmp.lt.s32.totalorder %v2294_v8, %v2065_v22  ;;  %v8005_v46 = vadd.s32 128, %v7890_v49  ;;  %v2073_v30 = vsel %vm1817_vm8, %v7931_v33, 256 }
 0x1bc   : > { %14645 = vst [vmem:[#allocation118_spill] sm:$0xff] %v7993_v55  ;;  %v1575_v50 = vmin.f32 %v1574_v40, %v14646_v12  ;;  %v2296_v42 = vsel %vm2295_vm11, %v2294_v8, %v2065_v22  ;;  %v1520_v15 = vrot.slane %v1519_v44, 1  ;;  %v14649_v40 = vld [vmem:[#allocation79_spill] sm:$0xff]  ;;  %vm1833_vm12 = vcmp.le.f32.partialorder %v14650_v51, %v7898_v53 }
 0x1bd   : > { %v1547_v57 = vmin.f32 %v1546_v31, %v7807_v20  ;;  %14648 = vst [vmem:[#allocation30_spill] sm:$0xff] %v8005_v46  ;;  %vm2297_vm13 = vcmp.lt.s32.totalorder %v2296_v42, %v2073_v30  ;;  %v8015_v28 = vadd.s32 136, %v7890_v49  ;;  %v8018_v11 = vadd.s32 144, %v7890_v49  ;;  %v8020_v20 = vpop.f32.mrf.mxu3 }
 0x1be   : > { %5552 = vmatmul.msk.f32.gmra.mxu0 %vm447_vm0, %v14643_v61  ;;  %5584 = vmatmul.msk.f32.gmra.mxu1 %vm447_vm0, %v14643_v61  ;;  %v1576_v12 = vmin.f32 %v1575_v50, %v14649_v40  ;;  %14653 = vst [vmem:[#allocation120_spill] sm:$0xff] %v8020_v20  ;;  %v2081_v22 = vsel %vm1825_vm10, %v7934_v38, 256  ;;  %v2298_v8 = vsel %vm2297_vm13, %v2296_v42, %v2073_v30  ;;  %v8028_v51 = vadd.s32 152, %v7890_v49 }
 0x1bf   : > { %5616 = vmatmul.msk.f32.gmra.mxu2 %vm447_vm0, %v14643_v61  ;;  %5648 = vmatmul.msk.f32.gmra.mxu3 %vm447_vm0, %v14643_v61  ;;  %v1548_v31 = vmin.f32 %v1547_v57, %v7844_v41  ;;  %14651 = vst [vmem:[#allocation33_spill] sm:$0xff] %v8015_v28  ;;  %v14654_v61 = vld [vmem:[#allocation83_spill] sm:$0xff]  ;;  %v14655_v57 = vld [vmem:[#allocation37_spill] sm:$0xff]  ;;  %vm2299_vm15 = vcmp.lt.s32.totalorder %v2298_v8, %v2081_v22  ;;  %v2089_v40 = vsel %vm1833_vm12, %v7941_v0, 256  ;;  %v8040_v42 = vadd.s32 160, %v7890_v49 }
 0x1c0   : > { %14652 = vst [vmem:[#allocation119_spill] sm:$0xff] %v8018_v11  ;;  %v1577_v9 = vmin.f32 %v1576_v12, %v14654_v61  ;;  %vm1841_vm14 = vcmp.le.f32.partialorder %v14655_v57, %v7898_v53  ;;  %v2300_v41 = vsel %vm2299_vm15, %v2298_v8, %v2081_v22  ;;  %v8031_v23 = vmin.f32 %v1519_v44, %v1520_v15  ;;  %v14657_v12 = vld [vmem:[#allocation24_spill] sm:$0xff]  ;;  %v8046_v22 = vpop.f32.mrf.mxu2 }
 0x1c1   : > { %v1549_v50 = vmin.f32 %v1548_v31, %v7874_v48  ;;  %14656 = vst [vmem:[#allocation37_spill] sm:$0xff] %v8028_v51  ;;  %vm2301_vm2 = vcmp.lt.s32.totalorder %v2300_v41, %v2089_v40  ;;  %v8043_v31 = vadd.s32 168, %v7890_v49  ;;  %v2097_v44 = vsel %vm1841_vm14, %v7950_v25, 256 }
 0x1c2   : > { %v1578_v20 = vmin.f32 %v1577_v9, %v7706_v18  ;;  %14658 = vst [vmem:[#allocation24_spill] sm:$0xff] %v8040_v42  ;;  %v2302_v15 = vsel %vm2301_vm2, %v2300_v41, %v2089_v40  ;;  %v2105_v8 = vsel %vm1849_vm1, %v7953_v26, 256  ;;  %vm1778_vm5 = vcmp.le.f32.partialorder %v7254_v34, %v8031_v23 }
 0x1c3   : > { %v1550_v30 = vmin.f32 %v1549_v50, %v7909_v37  ;;  %14659 = vst [vmem:[#allocation121_spill] sm:$0xff] %v8043_v31  ;;  %vm2303_vm4 = vcmp.lt.s32.totalorder %v2302_v15, %v2097_v44  ;;  %vm1786_vm6 = vcmp.le.f32.partialorder %v7275_v39, %v8031_v23  ;;  %vm1865_vm7 = vcmp.le.f32.partialorder %v7455_v54, %v7898_v53 }
 0x1c4   : > { %v1579_v13 = vmin.f32 %v1578_v20, %v7734_v43  ;;  %v2304_v50 = vsel %vm2303_vm4, %v2302_v15, %v2097_v44  ;;  %v8064_v20 = vadd.s32 176, %v7890_v49  ;;  %v8075_v34 = vadd.s32 184, %v7890_v49 }
 0x1c5   : > { %v1551_v9 = vmin.f32 %v1550_v30, %v7980_v6  ;;  %vm2305_vm8 = vcmp.lt.s32.totalorder %v2304_v50, %v2105_v8  ;;  %v2113_v39 = vsel %vm1857_vm3, %v7956_v3, 256  ;;  %vm1873_vm9 = vcmp.le.f32.partialorder %v7479_v1, %v7898_v53 }
 0x1c6   : > { %5553 = vmatmul.msk.f32.gmra.mxu0 %vm447_vm0, %v14657_v12  ;;  %5585 = vmatmul.msk.f32.gmra.mxu1 %vm447_vm0, %v14657_v12  ;;  %14660 = vst [vmem:[#allocation122_spill] sm:$0xff] %v8064_v20  ;;  %v8072_v41 = vmin.f32 %v1579_v13, %v7764_v62  ;;  %v2306_v40 = vsel %vm2305_vm8, %v2304_v50, %v2105_v8  ;;  %v2034_v57 = vsel %vm1778_vm5, %v7890_v49, 256  ;;  %v2042_v54 = vsel %vm1786_vm6, %v7907_v36, 256  ;;  %v14663_v13 = vld [vmem:[#allocation13_spill] sm:$0xff] }
 0x1c7   : > { %5617 = vmatmul.msk.f32.gmra.mxu2 %vm447_vm0, %v14657_v12  ;;  %5649 = vmatmul.msk.f32.gmra.mxu3 %vm447_vm0, %v14657_v12  ;;  %v8069_v10 = vmin.f32 %v1551_v9, %v8046_v22  ;;  %14661 = vst [vmem:[#allocation123_spill] sm:$0xff] %v8075_v34  ;;  %vm2307_vm10 = vcmp.lt.s32.totalorder %v2306_v40, %v2113_v39  ;;  %v8084_v12 = vpop.f32.mrf.mxu3  ;;  %v2121_v44 = vsel %vm1865_vm7, %v7967_v2, 256  ;;  %v14664_v9 = vld [vmem:[#allocation27_spill] sm:$0xff]  ;;  %v2129_v8 = vsel %vm1873_vm9, %v7970_v45, 256 }
 0x1c8   : > { %v1581_v30 = vmin.f32 %v8072_v41, %v7798_v24  ;;  %14662 = vst [vmem:[#allocation124_spill] sm:$0xff] %v8084_v12  ;;  %v2308_v15 = vsel %vm2307_vm10, %v2306_v40, %v2113_v39  ;;  %vm1794_vm11 = vcmp.le.f32.partialorder %v14663_v13, %v8031_v23  ;;  %vm1881_vm12 = vcmp.le.f32.partialorder %v7499_v60, %v7898_v53  ;;  %v14665_v39 = vld [vmem:[#allocation18_spill] sm:$0xff]  ;;  %v14714_v24 = vld [vmem:[#allocation21_spill] sm:$0xff] }
 0x1c9   : > { %vm1889_vm13 = vcmp.le.f32.partialorder %v7514_v5, %v7898_v53  ;;  %vm2309_vm14 = vcmp.lt.s32.totalorder %v2308_v15, %v2121_v44  ;;  %v1553_v1 = vrot.slane %v8069_v10, 4  ;;  %vm1802_vm15 = vcmp.le.f32.partialorder %v14665_v39, %v8031_v23 }
 0x1ca   : > { %v2310_v50 = vsel %vm2309_vm14, %v2308_v15, %v2121_v44  ;;  %vm2360_vm1 = vcmp.lt.s32.totalorder %v2034_v57, %v2042_v54  ;;  %vm1897_vm2 = vcmp.le.f32.partialorder %v7527_v16, %v7898_v53  ;;  %v2050_v60 = vsel %vm1794_vm11, %v7918_v27, 256  ;;  %v14666_v15 = vld [vmem:[#allocation23_spill] sm:$0xff] }
 0x1cb   : > { %vm2311_vm3 = vcmp.lt.s32.totalorder %v2310_v50, %v2129_v8  ;;  %v2361_v40 = vsel %vm2360_vm1, %v2034_v57, %v2042_v54  ;;  %v2137_v13 = vsel %vm1881_vm12, %v7978_v52, 256  ;;  %vm1810_vm4 = vcmp.le.f32.partialorder %v14666_v15, %v8031_v23 }
 0x1cc   : > { %v2312_v44 = vsel %vm2311_vm3, %v2310_v50, %v2129_v8  ;;  %vm2362_vm5 = vcmp.lt.s32.totalorder %v2361_v40, %v2050_v60  ;;  %vm1905_vm6 = vcmp.le.f32.partialorder %v7542_v35, %v7898_v53  ;;  %v2058_v39 = vsel %vm1802_vm15, %v7921_v29, 256 }
 0x1cd   : > { %vm2313_vm7 = vcmp.lt.s32.totalorder %v2312_v44, %v2137_v13  ;;  %v2363_v57 = vsel %vm2362_vm5, %v2361_v40, %v2050_v60  ;;  %v2145_v54 = vsel %vm1889_vm13, %v7990_v56, 256  ;;  %vm1818_vm8 = vcmp.le.f32.partialorder %v7357_v58, %v8031_v23 }
 0x1ce   : > { %5554 = vmatmul.msk.f32.gmra.mxu0 %vm447_vm0, %v14664_v9  ;;  %5586 = vmatmul.msk.f32.gmra.mxu1 %vm447_vm0, %v14664_v9  ;;  %v2314_v8 = vsel %vm2313_vm7, %v2312_v44, %v2137_v13  ;;  %vm2364_vm9 = vcmp.lt.s32.totalorder %v2363_v57, %v2058_v39  ;;  %vm1913_vm10 = vcmp.le.f32.partialorder %v7556_v59, %v7898_v53  ;;  %v2153_v60 = vsel %vm1897_vm2, %v7993_v55, 256  ;;  %v14667_v13 = vld [vmem:[#allocation31_spill] sm:$0xff] }
 0x1cf   : > { %5618 = vmatmul.msk.f32.gmra.mxu2 %vm447_vm0, %v14664_v9  ;;  %5650 = vmatmul.msk.f32.gmra.mxu3 %vm447_vm0, %v14664_v9  ;;  %vm2315_vm11 = vcmp.lt.s32.totalorder %v2314_v8, %v2145_v54  ;;  %v2066_v9 = vsel %vm1810_vm4, %v7924_v4, 256  ;;  %v2365_v50 = vsel %vm2364_vm9, %v2363_v57, %v2058_v39  ;;  %vm1826_vm12 = vcmp.le.f32.partialorder %v7378_v63, %v8031_v23  ;;  %v8134_v44 = vpop.f32.mrf.mxu3  ;;  %v14669_v39 = vld [vmem:[#allocation34_spill] sm:$0xff]  ;;  %v6749_v57 = vld [vmem:[%s13839_s1 + $0xb0] sm:$0xff] }
 0x1d0   : > { %v2316_v40 = vsel %vm2315_vm11, %v2314_v8, %v2145_v54  ;;  %vm2366_vm13 = vcmp.lt.s32.totalorder %v2365_v50, %v2066_v9  ;;  %vm1921_vm14 = vcmp.le.f32.partialorder %v7572_v17, %v7898_v53  ;;  %v2074_v58 = vsel %vm1818_vm8, %v7931_v33, 256  ;;  %14668 = vst [vmem:[#allocation13_spill] sm:$0xff] %v8134_v44  ;;  %v14671_v17 = vld [vmem:[#allocation43_spill] sm:$0xff] }
 0x1d1   : > { %vm2317_vm15 = vcmp.lt.s32.totalorder %v2316_v40, %v2153_v60  ;;  %v2367_v5 = vsel %vm2366_vm13, %v2365_v50, %v2066_v9  ;;  %v2161_v16 = vsel %vm1905_vm6, %v8005_v46, 256  ;;  %vm1834_vm1 = vcmp.le.f32.partialorder %v14669_v39, %v8031_v23  ;;  %v14670_v50 = vld [vmem:[#allocation38_spill] sm:$0xff] }
 0x1d2   : > { %v2318_v15 = vsel %vm2317_vm15, %v2316_v40, %v2153_v60  ;;  %vm2368_vm2 = vcmp.lt.s32.totalorder %v2367_v5, %v2074_v58  ;;  %vm1929_vm3 = vcmp.le.f32.partialorder %v7588_v32, %v7898_v53  ;;  %v2082_v35 = vsel %vm1826_vm12, %v7934_v38, 256 }
 0x1d3   : > { %vm2319_vm4 = vcmp.lt.s32.totalorder %v2318_v15, %v2161_v16  ;;  %v2369_v54 = vsel %vm2368_vm2, %v2367_v5, %v2074_v58  ;;  %v2169_v8 = vsel %vm1913_vm10, %v8015_v28, 256  ;;  %vm1842_vm5 = vcmp.le.f32.partialorder %v14670_v50, %v8031_v23 }
 0x1d4   : > { %v2320_v9 = vsel %vm2319_vm4, %v2318_v15, %v2161_v16  ;;  %vm2370_vm6 = vcmp.lt.s32.totalorder %v2369_v54, %v2082_v35  ;;  %vm1937_vm7 = vcmp.le.f32.partialorder %v7602_v19, %v7898_v53  ;;  %v2090_v63 = vsel %vm1834_vm1, %v7941_v0, 256 }
 0x1d5   : > { %vm2321_vm8 = vcmp.lt.s32.totalorder %v2320_v9, %v2169_v8  ;;  %v2371_v60 = vsel %vm2370_vm6, %v2369_v54, %v2082_v35  ;;  %v2177_v59 = vsel %vm1921_vm14, %v8018_v11, 256  ;;  %vm1850_vm9 = vcmp.le.f32.partialorder %v7427_v14, %v8031_v23  ;;  %v14672_v35 = vld [vmem:[#allocation46_spill] sm:$0xff] }
 0x1d6   : > { %5555 = vmatmul.msk.f32.gmra.mxu0 %vm447_vm0, %v14667_v13  ;;  %5587 = vmatmul.msk.f32.gmra.mxu1 %vm447_vm0, %v6749_v57  ;;  %v2322_v40 = vsel %vm2321_vm8, %v2320_v9, %v2169_v8  ;;  %vm2372_vm10 = vcmp.lt.s32.totalorder %v2371_v60, %v2090_v63  ;;  %vm1945_vm11 = vcmp.le.f32.partialorder %v7618_v7, %v7898_v53  ;;  %v2098_v58 = vsel %vm1842_vm5, %v7950_v25, 256 }
 0x1d7   : > { %5619 = vmatmul.msk.f32.gmra.mxu2 %vm447_vm0, %v6749_v57  ;;  %5651 = vmatmul.msk.f32.gmra.mxu3 %vm447_vm0, %v6749_v57  ;;  %vm2323_vm12 = vcmp.lt.s32.totalorder %v2322_v40, %v2177_v59  ;;  %v2373_v5 = vsel %vm2372_vm10, %v2371_v60, %v2090_v63  ;;  %v2185_v13 = vsel %vm1929_vm3, %v8028_v51, 256  ;;  %vm1858_vm13 = vcmp.le.f32.partialorder %v14671_v17, %v8031_v23  ;;  %v6750_v57 = vld [vmem:[%s13839_s1 + $0xb8] sm:$0xff]  ;;  %v14674_v60 = vld [vmem:[#allocation51_spill] sm:$0xff] }
 0x1d8   : > { %v2324_v16 = vsel %vm2323_vm12, %v2322_v40, %v2177_v59  ;;  %vm2374_vm14 = vcmp.lt.s32.totalorder %v2373_v5, %v2098_v58  ;;  %v2193_v14 = vsel %vm1937_vm7, %v8040_v42, 256  ;;  %v2106_v15 = vsel %vm1850_vm9, %v7953_v26, 256 }
 0x1d9   : > { %vm2325_vm15 = vcmp.lt.s32.totalorder %v2324_v16, %v2185_v13  ;;  %v2375_v39 = vsel %vm2374_vm14, %v2373_v5, %v2098_v58  ;;  %vm1866_vm1 = vcmp.le.f32.partialorder %v14672_v35, %v8031_v23  ;;  %v1554_v19 = vmin.f32 %v8069_v10, %v1553_v1  ;;  %v14673_v10 = vld [vmem:[#allocation48_spill] sm:$0xff]  ;;  %v8208_v1 = vpop.f32.mrf.mxu3  ;;  %v14676_v58 = vld [vmem:[#allocation106_spill] sm:$0xff] }
 0x1da   : > { %v2326_v32 = vsel %vm2325_vm15, %v2324_v16, %v2185_v13  ;;  %vm2376_vm2 = vcmp.lt.s32.totalorder %v2375_v39, %v2106_v15  ;;  %v1582_v54 = vmin.f32 %v1581_v30, %v7830_v47  ;;  %v2114_v8 = vsel %vm1858_vm13, %v7956_v3, 256  ;;  %v14707_v47 = vld [vmem:[#allocation82_spill] sm:$0xff] }
 0x1db   : > { %vm2327_vm3 = vcmp.lt.s32.totalorder %v2326_v32, %v2193_v14  ;;  %v2377_v9 = vsel %vm2376_vm2, %v2375_v39, %v2106_v15  ;;  %v2201_v50 = vsel %vm1945_vm11, %v8043_v31, 256  ;;  %vm1874_vm4 = vcmp.le.f32.partialorder %v14673_v10, %v8031_v23  ;;  %v14679_v15 = vld [vmem:[#allocation107_spill] sm:$0xff] }
 0x1dc   : > { %v2328_v63 = vsel %vm2327_vm3, %v2326_v32, %v2193_v14  ;;  %vm2378_vm5 = vcmp.lt.s32.totalorder %v2377_v9, %v2114_v8  ;;  %vm1953_vm6 = vcmp.le.f32.partialorder %v7632_v21, %v7898_v53  ;;  %v2122_v41 = vsel %vm1866_vm1, %v7967_v2, 256  ;;  %v14678_v14 = vld [vmem:[#allocation54_spill] sm:$0xff] }
 0x1dd   : > { %vm2329_vm7 = vcmp.lt.s32.totalorder %v2328_v63, %v2201_v50  ;;  %v2379_v7 = vsel %vm2378_vm5, %v2377_v9, %v2114_v8  ;;  %vm1882_vm8 = vcmp.le.f32.partialorder %v14674_v60, %v8031_v23  ;;  %v1555_v59 = vrot.slane %v1554_v19, 2  ;;  %v14682_v9 = vld [vmem:[#allocation116_spill] sm:$0xff] }
 0x1de   : > { %5556 = vmatmul.msk.f32.gmra.mxu0 %vm447_vm0, %v6750_v57  ;;  %5588 = vmatmul.msk.f32.gmra.mxu1 %vm447_vm0, %v6750_v57  ;;  %v2330_v30 = vsel %vm2329_vm7, %v2328_v63, %v2201_v50  ;;  %vm2380_vm9 = vcmp.lt.s32.totalorder %v2379_v7, %v2122_v41  ;;  %v8220_v40 = vadd.s32 192, %v7890_v49  ;;  %v1583_v5 = vmin.f32 %v1582_v54, %v14676_v58  ;;  %v14681_v54 = vld [vmem:[#allocation56_spill] sm:$0xff]  ;;  %v14683_v63 = vld [vmem:[#allocation77_spill] sm:$0xff] }
 0x1df   : > { %5620 = vmatmul.msk.f32.gmra.mxu2 %vm447_vm0, %v6750_v57  ;;  %5652 = vmatmul.msk.f32.gmra.mxu3 %vm447_vm0, %v6750_v57  ;;  %v2130_v21 = vsel %vm1874_vm4, %v7970_v45, 256  ;;  %v2381_v13 = vsel %vm2380_vm9, %v2379_v7, %v2122_v41  ;;  %v8225_v16 = vadd.s32 200, %v7890_v49  ;;  %v2209_v17 = vsel %vm1953_vm6, %v8064_v20, 256  ;;  %v14698_v58 = vld [vmem:[#allocation88_spill] sm:$0xff] }
 0x1e0   : > { %14675 = vst [vmem:[#allocation27_spill] sm:$0xff] %v8220_v40  ;;  %vm1890_vm10 = vcmp.le.f32.partialorder %v14678_v14, %v8031_v23  ;;  %vm2382_vm11 = vcmp.lt.s32.totalorder %v2381_v13, %v2130_v21  ;;  %v1584_v39 = vmin.f32 %v1583_v5, %v14679_v15  ;;  %vm2331_vm12 = vcmp.lt.s32.totalorder %v2330_v30, %v2209_v17  ;;  %v14685_v5 = vld [vmem:[#allocation59_spill] sm:$0xff] }
 0x1e1   : > { %14677 = vst [vmem:[#allocation18_spill] sm:$0xff] %v8225_v16  ;;  %v2138_v57 = vsel %vm1882_vm8, %v7978_v52, 256  ;;  %v2383_v32 = vsel %vm2382_vm11, %v2381_v13, %v2130_v21  ;;  %v8233_v35 = vadd.s32 208, %v7890_v49  ;;  %vm1898_vm13 = vcmp.le.f32.partialorder %v14681_v54, %v8031_v23 }
 0x1e2   : > { %vm2384_vm14 = vcmp.lt.s32.totalorder %v2383_v32, %v2138_v57  ;;  %v1556_v8 = vmin.f32 %v1554_v19, %v1555_v59  ;;  %v1585_v50 = vmin.f32 %v1584_v39, %v14682_v9  ;;  %vm1961_vm15 = vcmp.le.f32.partialorder %v14683_v63, %v7898_v53  ;;  %v14687_v19 = vld [vmem:[#allocation120_spill] sm:$0xff]  ;;  %v8269_v9 = vpop.f32.mrf.mxu0 }
 0x1e3   : > { %14680 = vst [vmem:[#allocation23_spill] sm:$0xff] %v8233_v35  ;;  %v2146_v10 = vsel %vm1890_vm10, %v7990_v56, 256  ;;  %v2385_v41 = vsel %vm2384_vm14, %v2383_v32, %v2138_v57  ;;  %v8242_v7 = vadd.s32 216, %v7890_v49  ;;  %v2332_v60 = vsel %vm2331_vm12, %v2330_v30, %v2209_v17  ;;  %v14688_v57 = vld [vmem:[#allocation61_spill] sm:$0xff] }
 0x1e4   : > { %vm1906_vm1 = vcmp.le.f32.partialorder %v14685_v5, %v8031_v23  ;;  %vm2386_vm2 = vcmp.lt.s32.totalorder %v2385_v41, %v2146_v10  ;;  %v8247_v21 = vadd.s32 224, %v7890_v49  ;;  %v1586_v59 = vmin.f32 %v1585_v50, %v14687_v19  ;;  %v14693_v5 = vld [vmem:[#allocation84_spill] sm:$0xff]  ;;  %14694 = vst [vmem:[#allocation46_spill] sm:$0xff] %v8269_v9 }
 0x1e5   : > { %14684 = vst [vmem:[#allocation31_spill] sm:$0xff] %v8242_v7  ;;  %v2154_v13 = vsel %vm1898_vm13, %v7993_v55, 256  ;;  %v2387_v14 = vsel %vm2386_vm2, %v2385_v41, %v2146_v10  ;;  %v2217_v39 = vsel %vm1961_vm15, %v8075_v34, 256  ;;  %vm1914_vm3 = vcmp.le.f32.partialorder %v14688_v57, %v8031_v23  ;;  %v14691_v10 = vld [vmem:[#allocation64_spill] sm:$0xff]  ;;  %v14692_v41 = vld [vmem:[#allocation81_spill] sm:$0xff] }
 0x1e6   : > { %14686 = vst [vmem:[#allocation34_spill] sm:$0xff] %v8247_v21  ;;  %vm2388_vm4 = vcmp.lt.s32.totalorder %v2387_v14, %v2154_v13  ;;  %v1557_v32 = vrot.slane %v1556_v8, 1  ;;  %v8255_v30 = vadd.s32 232, %v7890_v49  ;;  %vm2333_vm5 = vcmp.lt.s32.totalorder %v2332_v60, %v2217_v39 }
 0x1e7   : > { %v2162_v17 = vsel %vm1906_vm1, %v8005_v46, 256  ;;  %v2389_v54 = vsel %vm2388_vm4, %v2387_v14, %v2154_v13  ;;  %v1587_v63 = vmin.f32 %v1586_v59, %v8084_v12  ;;  %v8260_v50 = vadd.s32 240, %v7890_v49  ;;  %v8271_v13 = vpop.f32.mrf.mxu1  ;;  %v6751_v59 = vld [vmem:[%s13839_s1 + $0xc0] sm:$0xff] }
 0x1e8   : > { %14689 = vst [vmem:[#allocation38_spill] sm:$0xff] %v8255_v30  ;;  %vm1922_vm6 = vcmp.le.f32.partialorder %v14691_v10, %v8031_v23  ;;  %vm2390_vm7 = vcmp.lt.s32.totalorder %v2389_v54, %v2162_v17  ;;  %vm1969_vm8 = vcmp.le.f32.partialorder %v14692_v41, %v7898_v53  ;;  %vm1977_vm9 = vcmp.le.f32.partialorder %v14693_v5, %v7898_v53  ;;  %v14696_v12 = vld [vmem:[#allocation67_spill] sm:$0xff]  ;;  %v14703_v41 = vld [vmem:[#allocation74_spill] sm:$0xff] }
 0x1e9   : > { %14690 = vst [vmem:[#allocation43_spill] sm:$0xff] %v8260_v50  ;;  %v2170_v57 = vsel %vm1914_vm3, %v8015_v28, 256  ;;  %v2391_v19 = vsel %vm2390_vm7, %v2389_v54, %v2162_v17  ;;  %5557 = vmatmul.msk.f32.gmra.mxu0 %vm447_vm0, %v6751_v59  ;;  %5589 = vmatmul.msk.f32.gmra.mxu1 %vm447_vm0, %v6751_v59  ;;  %v2334_v14 = vsel %vm2333_vm5, %v2332_v60, %v2217_v39  ;;  %v8285_v54 = vadd.s32 248, %v7890_v49 }
 0x1ea   : > { %14695 = vst [vmem:[#allocation48_spill] sm:$0xff] %v8271_v13  ;;  %vm1930_vm10 = vcmp.le.f32.partialorder %v14696_v12, %v8031_v23  ;;  %vm2392_vm11 = vcmp.lt.s32.totalorder %v2391_v19, %v2170_v57  ;;  %v8281_v15 = vmin.f32 %v1556_v8, %v1557_v32  ;;  %v1588_v17 = vmin.f32 %v1587_v63, %v8134_v44  ;;  %v14699_v8 = vld [vmem:[#allocation69_spill] sm:$0xff]  ;;  %v14701_v32 = vld [vmem:[#allocation8_spill] sm:$0xff]  ;;  %v14702_v63 = vld [vmem:[#allocation11_spill] sm:$0xff] }
 0x1eb   : > { %14697 = vst [vmem:[#allocation51_spill] sm:$0xff] %v8285_v54  ;;  %v2178_v13 = vsel %vm1922_vm6, %v8018_v11, 256  ;;  %v2393_v9 = vsel %vm2392_vm11, %v2391_v19, %v2170_v57  ;;  %vm1985_vm12 = vcmp.le.f32.partialorder %v14698_v58, %v7898_v53  ;;  %v2225_v12 = vsel %vm1969_vm8, %v8220_v40, 256  ;;  %v14700_v58 = vld [vmem:[#allocation72_spill] sm:$0xff]  ;;  %v14706_v44 = vld [vmem:[#allocation78_spill] sm:$0xff] }
 0x1ec   : > { %vm1938_vm13 = vcmp.le.f32.partialorder %v14699_v8, %v8031_v23  ;;  %vm2394_vm14 = vcmp.lt.s32.totalorder %v2393_v9, %v2178_v13  ;;  %v2233_v60 = vsel %vm1977_vm9, %v8225_v16, 256  ;;  %vm2335_vm15 = vcmp.lt.s32.totalorder %v2334_v14, %v2225_v12 }
 0x1ed   : > { %v2186_v19 = vsel %vm1930_vm10, %v8028_v51, 256  ;;  %v2395_v39 = vsel %vm2394_vm14, %v2393_v9, %v2178_v13  ;;  %vm1946_vm1 = vcmp.le.f32.partialorder %v14700_v58, %v8031_v23  ;;  %vm1779_vm3 = vcmp.le.f32.partialorder %v14701_v32, %v8281_v15  ;;  %v8316_v9 = vpop.f32.mrf.mxu2  ;;  %v8318_v13 = vpop.f32.mrf.mxu3  ;;  %5621 = vmatmul.msk.f32.gmra.mxu2 %vm447_vm0, %v6751_v59  ;;  %5653 = vmatmul.msk.f32.gmra.mxu3 %vm447_vm0, %v6751_v59  ;;  %v6752_v58 = vld [vmem:[%s13839_s1 + $0xc8] sm:$0xff]  ;;  %v14710_v32 = vld [vmem:[#allocation86_spill] sm:$0xff] }
 0x1ee   : > { %vm2396_vm2 = vcmp.lt.s32.totalorder %v2395_v39, %v2186_v19  ;;  %vm1787_vm4 = vcmp.le.f32.partialorder %v14702_v63, %v8281_v15  ;;  %v8311_v10 = vsel %vm1985_vm12, %v8233_v35, 256  ;;  %vm1954_vm5 = vcmp.le.f32.partialorder %v14703_v41, %v8031_v23  ;;  %14704 = vst [vmem:[#allocation54_spill] sm:$0xff] %v8316_v9  ;;  %v14712_v63 = vld [vmem:[#allocation16_spill] sm:$0xff] }
 0x1ef   : > { %v2194_v5 = vsel %vm1938_vm13, %v8040_v42, 256  ;;  %v2397_v57 = vsel %vm2396_vm2, %v2395_v39, %v2186_v19  ;;  %14705 = vst [vmem:[#allocation56_spill] sm:$0xff] %v8318_v13  ;;  %v2336_v8 = vsel %vm2335_vm15, %v2334_v14, %v2225_v12  ;;  %vm1962_vm6 = vcmp.le.f32.partialorder %v14706_v44, %v8031_v23  ;;  %v8338_v14 = vpop.f32.mrf.mxu0  ;;  %v8340_v12 = vpop.f32.mrf.mxu1  ;;  %v14715_v44 = vld [vmem:[#allocation26_spill] sm:$0xff] }
 0x1f0   : > { %vm1970_vm7 = vcmp.le.f32.partialorder %v14707_v47, %v8031_v23  ;;  %vm2398_vm8 = vcmp.lt.s32.totalorder %v2397_v57, %v2194_v5  ;;  %v2202_v19 = vsel %vm1946_vm1, %v8043_v31, 256  ;;  %v2035_v13 = vsel %vm1779_vm3, %v7890_v49, 256  ;;  %14708 = vst [vmem:[#allocation77_spill] sm:$0xff] %v8338_v14 }
 0x1f1   : > { %v2399_v39 = vsel %vm2398_vm8, %v2397_v57, %v2194_v5  ;;  %v2043_v59 = vsel %vm1787_vm4, %v7907_v36, 256  ;;  %14709 = vst [vmem:[#allocation59_spill] sm:$0xff] %v8340_v12  ;;  %5558 = vmatmul.msk.f32.gmra.mxu0 %vm447_vm0, %v6752_v58  ;;  %5590 = vmatmul.msk.f32.gmra.mxu1 %vm447_vm0, %v6752_v58  ;;  %vm1978_vm9 = vcmp.le.f32.partialorder %v14710_v32, %v8031_v23  ;;  %v14711_v5 = vld [vmem:[#allocation90_spill] sm:$0xff]  ;;  %v14713_v57 = vld [vmem:[#allocation91_spill] sm:$0xff]  ;;  %v2210_v9 = vsel %vm1954_vm5, %v8064_v20, 256 }
 0x1f2   : > { %vm1986_vm10 = vcmp.le.f32.partialorder %v14711_v5, %v8031_v23  ;;  %vm2400_vm11 = vcmp.lt.s32.totalorder %v2399_v39, %v2202_v19  ;;  %vm1795_vm12 = vcmp.le.f32.partialorder %v14712_v63, %v8281_v15  ;;  %vm1993_vm13 = vcmp.le.f32.partialorder %v14713_v57, %v7898_v53  ;;  %v14729_v57 = vld [vmem:[#allocation101_spill] sm:$0xff] }
 0x1f3   : > { %vm2337_vm14 = vcmp.lt.s32.totalorder %v2336_v8, %v2233_v60  ;;  %v2218_v12 = vsel %vm1962_vm6, %v8075_v34, 256  ;;  %v2401_v14 = vsel %vm2400_vm11, %v2399_v39, %v2202_v19  ;;  %vm1803_vm1 = vcmp.le.f32.partialorder %v14714_v24, %v8281_v15 }
 0x1f4   : > { %vm2402_vm15 = vcmp.lt.s32.totalorder %v2401_v14, %v2210_v9  ;;  %vm2431_vm2 = vcmp.lt.s32.totalorder %v2035_v13, %v2043_v59  ;;  %v1589_v63 = vmin.f32 %v1588_v17, %v8208_v1  ;;  %v2226_v62 = vsel %vm1970_vm7, %v8220_v40, 256 }
 0x1f5   : > { %v2403_v41 = vsel %vm2402_vm15, %v2401_v14, %v2210_v9  ;;  %v2051_v43 = vsel %vm1795_vm12, %v7918_v27, 256  ;;  %v2432_v18 = vsel %vm2431_vm2, %v2035_v13, %v2043_v59  ;;  %v2338_v61 = vsel %vm2337_vm14, %v2336_v8, %v2233_v60  ;;  %v8378_v39 = vpop.f32.mrf.mxu2  ;;  %v8380_v9 = vpop.f32.mrf.mxu3  ;;  %5622 = vmatmul.msk.f32.gmra.mxu2 %vm447_vm0, %v6752_v58  ;;  %5654 = vmatmul.msk.f32.gmra.mxu3 %vm447_vm0, %v6752_v58  ;;  %v14718_v60 = vld [vmem:[#allocation29_spill] sm:$0xff]  ;;  %v14721_v58 = vld [vmem:[#allocation95_spill] sm:$0xff] }
 0x1f6   : > { %vm2404_vm3 = vcmp.lt.s32.totalorder %v2403_v41, %v2218_v12  ;;  %vm1811_vm4 = vcmp.le.f32.partialorder %v14715_v44, %v8281_v15  ;;  %vm2433_vm5 = vcmp.lt.s32.totalorder %v2432_v18, %v2051_v43  ;;  %v2234_v24 = vsel %vm1978_vm9, %v8225_v16, 256  ;;  %14716 = vst [vmem:[#allocation61_spill] sm:$0xff] %v8378_v39  ;;  %v14736_v39 = vld [vmem:[#allocation47_spill] sm:$0xff] }
 0x1f7   : > { %v2405_v17 = vsel %vm2404_vm3, %v2403_v41, %v2218_v12  ;;  %v2059_v19 = vsel %vm1803_vm1, %v7921_v29, 256  ;;  %v2434_v47 = vsel %vm2433_vm5, %v2432_v18, %v2051_v43  ;;  %14717 = vst [vmem:[#allocation64_spill] sm:$0xff] %v8380_v9  ;;  %vm1819_vm7 = vcmp.le.f32.partialorder %v14718_v60, %v8281_v15  ;;  %v8391_v59 = vpop.f32.mrf.mxu0  ;;  %v8393_v14 = vpop.f32.mrf.mxu1  ;;  %v6753_v12 = vld [vmem:[%s13839_s1 + $0xd0] sm:$0xff] }
 0x1f8   : > { %vm2406_vm6 = vcmp.lt.s32.totalorder %v2405_v17, %v2226_v62  ;;  %vm2435_vm8 = vcmp.lt.s32.totalorder %v2434_v47, %v2059_v19  ;;  %v1590_v13 = vrot.slane %v1589_v63, 4  ;;  %vm2339_vm9 = vcmp.lt.s32.totalorder %v2338_v61, %v8311_v10  ;;  %14719 = vst [vmem:[#allocation81_spill] sm:$0xff] %v8391_v59  ;;  %v14763_v59 = vld [vmem:[#allocation97_spill] sm:$0xff] }
 0x1f9   : > { %v2407_v8 = vsel %vm2406_vm6, %v2405_v17, %v2226_v62  ;;  %v2067_v43 = vsel %vm1811_vm4, %v7924_v4, 256  ;;  %v2436_v18 = vsel %vm2435_vm8, %v2434_v47, %v2059_v19  ;;  %14720 = vst [vmem:[#allocation84_spill] sm:$0xff] %v8393_v14  ;;  %5559 = vmatmul.msk.f32.gmra.mxu0 %vm447_vm0, %v6753_v12  ;;  %vm2001_vm11 = vcmp.le.f32.partialorder %v14721_v58, %v7898_v53  ;;  %v14722_v62 = vld [vmem:[#allocation32_spill] sm:$0xff] }
 0x1fa   : > { %vm2408_vm12 = vcmp.lt.s32.totalorder %v2407_v8, %v2234_v24  ;;  %vm1827_vm14 = vcmp.le.f32.partialorder %v14722_v62, %v8281_v15  ;;  %vm2437_vm15 = vcmp.lt.s32.totalorder %v2436_v18, %v2067_v43  ;;  %5591 = vmatmul.msk.f32.gmra.mxu1 %vm447_vm0, %v6753_v12  ;;  %v2242_v32 = vsel %vm1986_vm10, %v8233_v35, 256  ;;  %v14723_v47 = vld [vmem:[#allocation36_spill] sm:$0xff]  ;;  %v14724_v62 = vld [vmem:[#allocation94_spill] sm:$0xff] }
 0x1fb   : > { %v2409_v41 = vsel %vm2408_vm12, %v2407_v8, %v2234_v24  ;;  %v2075_v44 = vsel %vm1819_vm7, %v7931_v33, 256  ;;  %v2438_v17 = vsel %vm2437_vm15, %v2436_v18, %v2067_v43  ;;  %v2340_v19 = vsel %vm2339_vm9, %v2338_v61, %v8311_v10  ;;  %v14725_v61 = vld [vmem:[#allocation40_spill] sm:$0xff]  ;;  %v14726_v10 = vld [vmem:[#allocation98_spill] sm:$0xff] }
 0x1fc   : > { %vm2410_vm1 = vcmp.lt.s32.totalorder %v2409_v41, %v2242_v32  ;;  %vm1835_vm2 = vcmp.le.f32.partialorder %v14723_v47, %v8281_v15  ;;  %vm2439_vm3 = vcmp.lt.s32.totalorder %v2438_v17, %v2075_v44  ;;  %vm1994_vm4 = vcmp.le.f32.partialorder %v14724_v62, %v8031_v23  ;;  %v6754_v62 = vld [vmem:[%s13839_s1 + $0xd8] sm:$0xff] }
 0x1fd   : > { %v2083_v5 = vsel %vm1827_vm14, %v7934_v38, 256  ;;  %v2440_v24 = vsel %vm2439_vm3, %v2438_v17, %v2075_v44  ;;  %v1591_v8 = vmin.f32 %v1589_v63, %v1590_v13  ;;  %v2249_v60 = vsel %vm1993_vm13, %v8242_v7, 256  ;;  %v8429_v9 = vpop.f32.mrf.mxu2  ;;  %v8431_v63 = vpop.f32.mrf.mxu3  ;;  %5623 = vmatmul.msk.f32.gmra.mxu2 %vm447_vm0, %v6753_v12  ;;  %5655 = vmatmul.msk.f32.gmra.mxu3 %vm447_vm0, %v6753_v12 }
 0x1fe   : > { %v2411_v43 = vsel %vm2410_vm1, %v2409_v41, %v2242_v32  ;;  %vm1843_vm10 = vcmp.le.f32.partialorder %v14725_v61, %v8281_v15  ;;  %vm2441_vm5 = vcmp.lt.s32.totalorder %v2440_v24, %v2083_v5  ;;  %vm2009_vm6 = vcmp.le.f32.partialorder %v14726_v10, %v7898_v53  ;;  %14727 = vst [vmem:[#allocation67_spill] sm:$0xff] %v8429_v9  ;;  %v14730_v32 = vld [vmem:[#allocation42_spill] sm:$0xff]  ;;  %v14733_v61 = vld [vmem:[#allocation104_spill] sm:$0xff] }
 0x1ff   : > { %vm2341_vm7 = vcmp.lt.s32.totalorder %v2340_v19, %v2249_v60  ;;  %v2091_v18 = vsel %vm1835_vm2, %v7941_v0, 256  ;;  %v2442_v47 = vsel %vm2441_vm5, %v2440_v24, %v2083_v5  ;;  %14728 = vst [vmem:[#allocation88_spill] sm:$0xff] %v8431_v63  ;;  %vm2017_vm13 = vcmp.le.f32.partialorder %v14729_v57, %v7898_v53  ;;  %v8444_v5 = vpop.f32.mrf.mxu0  ;;  %v8446_v24 = vpop.f32.mrf.mxu1  ;;  %v14734_v63 = vld [vmem:[#allocation45_spill] sm:$0xff] }
 0x200   : > { %v2250_v13 = vsel %vm1994_vm4, %v8242_v7, 256  ;;  %vm1851_vm8 = vcmp.le.f32.partialorder %v14730_v32, %v8281_v15  ;;  %vm2443_vm9 = vcmp.lt.s32.totalorder %v2442_v47, %v2091_v18  ;;  %v2099_v41 = vsel %vm1843_vm10, %v7950_v25, 256  ;;  %14731 = vst [vmem:[#allocation69_spill] sm:$0xff] %v8444_v5 }
 0x201   : > { %vm2412_vm12 = vcmp.lt.s32.totalorder %v2411_v43, %v2250_v13  ;;  %v2444_v44 = vsel %vm2443_vm9, %v2442_v47, %v2091_v18  ;;  %v1592_v17 = vrot.slane %v1591_v8, 2  ;;  %14732 = vst [vmem:[#allocation72_spill] sm:$0xff] %v8446_v24  ;;  %5560 = vmatmul.msk.f32.gmra.mxu0 %vm447_vm0, %v6754_v62  ;;  %vm2025_vm14 = vcmp.le.f32.partialorder %v14733_v61, %v7898_v53  ;;  %v14735_v47 = vld [vmem:[#allocation99_spill] sm:$0xff]  ;;  %v14742_v53 = vld [vmem:[#allocation105_spill] sm:$0xff] }
 0x202   : > { %v2342_v12 = vsel %vm2341_vm7, %v2340_v19, %v2249_v60  ;;  %vm1859_vm15 = vcmp.le.f32.partialorder %v14734_v63, %v8281_v15  ;;  %vm2445_vm1 = vcmp.lt.s32.totalorder %v2444_v44, %v2099_v41  ;;  %5592 = vmatmul.msk.f32.gmra.mxu1 %vm447_vm0, %v6754_v62  ;;  %v2257_v18 = vsel %vm2001_vm11, %v8247_v21, 256 }
 0x203   : > { %vm2002_vm2 = vcmp.le.f32.partialorder %v14735_v47, %v8031_v23  ;;  %v2107_v9 = vsel %vm1851_vm8, %v7953_v26, 256  ;;  %v2446_v19 = vsel %vm2445_vm1, %v2444_v44, %v2099_v41  ;;  %v2265_v60 = vsel %vm2009_vm6, %v8255_v30, 256  ;;  %v14737_v41 = vld [vmem:[#allocation50_spill] sm:$0xff]  ;;  %v14740_v44 = vld [vmem:[#allocation103_spill] sm:$0xff] }
 0x204   : > { %v2413_v63 = vsel %vm2412_vm12, %v2411_v43, %v2250_v13  ;;  %vm1867_vm3 = vcmp.le.f32.partialorder %v14736_v39, %v8281_v15  ;;  %vm2447_vm11 = vcmp.lt.s32.totalorder %v2446_v19, %v2107_v9  ;;  %vm2343_vm4 = vcmp.lt.s32.totalorder %v2342_v12, %v2257_v18 }
 0x205   : > { %v2115_v58 = vsel %vm1859_vm15, %v7956_v3, 256  ;;  %v2448_v47 = vsel %vm2447_vm11, %v2446_v19, %v2107_v9  ;;  %v1593_v24 = vmin.f32 %v1591_v8, %v1592_v17  ;;  %v8480_v32 = vsel %vm2017_vm13, %v8260_v50, 256  ;;  %v8492_v43 = vpop.f32.mrf.mxu2  ;;  %v8494_v57 = vpop.f32.mrf.mxu3  ;;  %5624 = vmatmul.msk.f32.gmra.mxu2 %vm447_vm0, %v6754_v62  ;;  %v14741_v17 = vld [vmem:[#allocation53_spill] sm:$0xff]  ;;  %5656 = vmatmul.msk.f32.gmra.mxu3 %vm447_vm0, %v6754_v62 }
 0x206   : > { %v2258_v10 = vsel %vm2002_vm2, %v8247_v21, 256  ;;  %vm1875_vm10 = vcmp.le.f32.partialorder %v14737_v41, %v8281_v15  ;;  %vm2449_vm5 = vcmp.lt.s32.totalorder %v2448_v47, %v2115_v58  ;;  %v8489_v39 = vsel %vm2025_vm14, %v8285_v54, 256  ;;  %14738 = vst [vmem:[#allocation8_spill] sm:$0xff] %v8492_v43 }
 0x207   : > { %vm2414_vm6 = vcmp.lt.s32.totalorder %v2413_v63, %v2258_v10  ;;  %v2123_v9 = vsel %vm1867_vm3, %v7967_v2, 256  ;;  %v2450_v8 = vsel %vm2449_vm5, %v2448_v47, %v2115_v58  ;;  %14739 = vst [vmem:[#allocation11_spill] sm:$0xff] %v8494_v57  ;;  %v2344_v13 = vsel %vm2343_vm4, %v2342_v12, %v2257_v18  ;;  %v8505_v47 = vpop.f32.mrf.mxu0  ;;  %v8507_v41 = vpop.f32.mrf.mxu1  ;;  %v6755_v12 = vld [vmem:[%s13839_s1 + $0xe0] sm:$0xff]  ;;  %v14746_v57 = vld [vmem:[#allocation57_spill] sm:$0xff] }
 0x208   : > { %vm2010_vm7 = vcmp.le.f32.partialorder %v14740_v44, %v8031_v23  ;;  %vm1883_vm13 = vcmp.le.f32.partialorder %v14741_v17, %v8281_v15  ;;  %vm2451_vm8 = vcmp.lt.s32.totalorder %v2450_v8, %v2123_v9  ;;  %vm2018_vm9 = vcmp.le.f32.partialorder %v14742_v53, %v8031_v23  ;;  %14743 = vst [vmem:[#allocation74_spill] sm:$0xff] %v8505_v47  ;;  %v14745_v18 = vld [vmem:[#allocation7_spill] sm:$0xff] }
 0x209   : > { %v2131_v61 = vsel %vm1875_vm10, %v7970_v45, 256  ;;  %v2452_v19 = vsel %vm2451_vm8, %v2450_v8, %v2123_v9  ;;  %v1594_v58 = vrot.slane %v1593_v24, 1  ;;  %14744 = vst [vmem:[#allocation78_spill] sm:$0xff] %v8507_v41  ;;  %5561 = vmatmul.msk.f32.gmra.mxu0 %vm447_vm0, %v6755_v12  ;;  %vm2026_vm12 = vcmp.le.f32.partialorder %v14745_v18, %v8031_v23 }
 0x20a   : > { %v2415_v62 = vsel %vm2414_vm6, %v2413_v63, %v2258_v10  ;;  %vm1891_vm14 = vcmp.le.f32.partialorder %v14746_v57, %v8281_v15  ;;  %vm2453_vm15 = vcmp.lt.s32.totalorder %v2452_v19, %v2131_v61  ;;  %5593 = vmatmul.msk.f32.gmra.mxu1 %vm447_vm0, %v6755_v12  ;;  %vm2345_vm1 = vcmp.lt.s32.totalorder %v2344_v13, %v2265_v60  ;;  %v14747_v10 = vld [vmem:[#allocation60_spill] sm:$0xff]  ;;  %v14748_v57 = vld [vmem:[#allocation63_spill] sm:$0xff] }
 0x20b   : > { %v2266_v9 = vsel %vm2010_vm7, %v8255_v30, 256  ;;  %v2139_v8 = vsel %vm1883_vm13, %v7978_v52, 256  ;;  %v2454_v43 = vsel %vm2453_vm15, %v2452_v19, %v2131_v61  ;;  %v2274_v63 = vsel %vm2018_vm9, %v8260_v50, 256  ;;  %v14749_v61 = vld [vmem:[#allocation66_spill] sm:$0xff] }
 0x20c   : > { %vm1899_vm2 = vcmp.le.f32.partialorder %v14747_v10, %v8281_v15  ;;  %vm1907_vm3 = vcmp.le.f32.partialorder %v14748_v57, %v8281_v15  ;;  %vm2455_vm11 = vcmp.lt.s32.totalorder %v2454_v43, %v2139_v8  ;;  %vm2416_vm4 = vcmp.lt.s32.totalorder %v2415_v62, %v2266_v9  ;;  %v14750_v19 = vld [vmem:[#allocation70_spill] sm:$0xff]  ;;  %v14751_v10 = vld [vmem:[#allocation73_spill] sm:$0xff]  ;;  %v6756_v57 = vld [vmem:[%s13839_s1 + $0xe8] sm:$0xff] }
 0x20d   : > { %v2147_v44 = vsel %vm1891_vm14, %v7990_v56, 256  ;;  %v2456_v41 = vsel %vm2455_vm11, %v2454_v43, %v2139_v8  ;;  %v8536_v14 = vmin.f32 %v1593_v24, %v1594_v58  ;;  %v2346_v17 = vsel %vm2345_vm1, %v2344_v13, %v2265_v60  ;;  %v8551_v60 = vpop.f32.mrf.mxu2  ;;  %v8553_v13 = vpop.f32.mrf.mxu3  ;;  %5625 = vmatmul.msk.f32.gmra.mxu2 %vm447_vm0, %v6755_v12  ;;  %v14754_v58 = vld [vmem:[#allocation76_spill] sm:$0xff]  ;;  %5657 = vmatmul.msk.f32.gmra.mxu3 %vm447_vm0, %v6755_v12  ;;  %v14755_v8 = vld [vmem:[#allocation9_spill] sm:$0xff] }
 0x20e   : > { %v8542_v53 = vsel %vm2026_vm12, %v8285_v54, 256  ;;  %vm1915_vm10 = vcmp.le.f32.partialorder %v14749_v61, %v8281_v15  ;;  %vm2457_vm5 = vcmp.lt.s32.totalorder %v2456_v41, %v2147_v44  ;;  %vm1923_vm6 = vcmp.le.f32.partialorder %v14750_v19, %v8281_v15  ;;  %14752 = vst [vmem:[#allocation82_spill] sm:$0xff] %v8551_v60  ;;  %v14759_v12 = vld [vmem:[#allocation80_spill] sm:$0xff] }
 0x20f   : > { %vm1931_vm7 = vcmp.le.f32.partialorder %v14751_v10, %v8281_v15  ;;  %v2155_v24 = vsel %vm1899_vm2, %v7993_v55, 256  ;;  %v2458_v43 = vsel %vm2457_vm5, %v2456_v41, %v2147_v44  ;;  %14753 = vst [vmem:[#allocation86_spill] sm:$0xff] %v8553_v13  ;;  %v2417_v23 = vsel %vm2416_vm4, %v2415_v62, %v2266_v9  ;;  %v14756_v44 = vld [vmem:[#allocation15_spill] sm:$0xff]  ;;  %v8568_v62 = vpop.f32.mrf.mxu0  ;;  %v8570_v9 = vpop.f32.mrf.mxu1  ;;  %v14762_v13 = vld [vmem:[#allocation93_spill] sm:$0xff]  ;;  %v14765_v10 = vld [vmem:[#allocation102_spill] sm:$0xff] }
 0x210   : > { %vm1939_vm13 = vcmp.le.f32.partialorder %v14754_v58, %v8281_v15  ;;  %v2163_v18 = vsel %vm1907_vm3, %v8005_v46, 256  ;;  %vm2459_vm8 = vcmp.lt.s32.totalorder %v2458_v43, %v2155_v24  ;;  %vm2347_vm9 = vcmp.lt.s32.totalorder %v2346_v17, %v8480_v32  ;;  %14757 = vst [vmem:[#allocation90_spill] sm:$0xff] %v8568_v62 }
 0x211   : > { %v2460_v41 = vsel %vm2459_vm8, %v2458_v43, %v2155_v24  ;;  %vm1780_vm12 = vcmp.le.f32.partialorder %v14755_v8, %v8536_v14  ;;  %vm1788_vm14 = vcmp.le.f32.partialorder %v14756_v44, %v8536_v14  ;;  %14758 = vst [vmem:[#allocation16_spill] sm:$0xff] %v8570_v9  ;;  %5562 = vmatmul.msk.f32.gmra.mxu0 %vm447_vm0, %v6756_v57  ;;  %v14760_v24 = vld [vmem:[#allocation85_spill] sm:$0xff]  ;;  %v2171_v60 = vsel %vm1915_vm10, %v8015_v28, 256 }
 0x212   : > { %vm1947_vm15 = vcmp.le.f32.partialorder %v14759_v12, %v8281_v15  ;;  %vm1955_vm1 = vcmp.le.f32.partialorder %v14760_v24, %v8281_v15  ;;  %v14761_v43 = vld [vmem:[#allocation89_spill] sm:$0xff]  ;;  %vm2461_vm3 = vcmp.lt.s32.totalorder %v2460_v41, %v2163_v18  ;;  %5594 = vmatmul.msk.f32.gmra.mxu1 %vm447_vm0, %v6756_v57  ;;  %vm2418_vm11 = vcmp.lt.s32.totalorder %v2417_v23, %v2274_v63 }
 0x213   : > { %vm1963_vm2 = vcmp.le.f32.partialorder %v14761_v43, %v8281_v15  ;;  %vm1971_vm4 = vcmp.le.f32.partialorder %v14762_v13, %v8281_v15  ;;  %v2462_v9 = vsel %vm2461_vm3, %v2460_v41, %v2163_v18  ;;  %v2348_v62 = vsel %vm2347_vm9, %v2346_v17, %v8480_v32  ;;  %v14764_v18 = vld [vmem:[#allocation20_spill] sm:$0xff]  ;;  %v14766_v44 = vld [vmem:[#allocation25_spill] sm:$0xff] }
 0x214   : > { %vm2463_vm5 = vcmp.lt.s32.totalorder %v2462_v9, %v2171_v60  ;;  %v2036_v47 = vsel %vm1780_vm12, %v7890_v49, 256  ;;  %v2044_v5 = vsel %vm1788_vm14, %v7907_v36, 256  ;;  %vm1979_vm8 = vcmp.le.f32.partialorder %v14763_v59, %v8281_v15  ;;  %v6757_v24 = vld [vmem:[%s13839_s1 + $0xf0] sm:$0xff]  ;;  %v14779_v59 = vld [vmem:[#allocation44_spill] sm:$0xff] }
 0x215   : > { %v2179_v61 = vsel %vm1923_vm6, %v8018_v11, 256  ;;  %v2187_v32 = vsel %vm1931_vm7, %v8028_v51, 256  ;;  %v2464_v17 = vsel %vm2463_vm5, %v2462_v9, %v2171_v60  ;;  %vm1796_vm10 = vcmp.le.f32.partialorder %v14764_v18, %v8536_v14 }
 0x216   : > { %v2419_v41 = vsel %vm2418_vm11, %v2417_v23, %v2274_v63  ;;  %v2195_v8 = vsel %vm1939_vm13, %v8040_v42, 256  ;;  %v2203_v19 = vsel %vm1947_vm15, %v8043_v31, 256  ;;  %vm2465_vm6 = vcmp.lt.s32.totalorder %v2464_v17, %v2179_v61  ;;  %v8625_v63 = vpop.f32.mrf.mxu2  ;;  %v8627_v23 = vpop.f32.mrf.mxu3  ;;  %5626 = vmatmul.msk.f32.gmra.mxu2 %vm447_vm0, %v6756_v57  ;;  %5658 = vmatmul.msk.f32.gmra.mxu3 %vm447_vm0, %v6756_v57 }
 0x217   : > { %vm2349_vm9 = vcmp.lt.s32.totalorder %v2348_v62, %v8489_v39  ;;  %vm1987_vm7 = vcmp.le.f32.partialorder %v14765_v10, %v8281_v15  ;;  %v2466_v60 = vsel %vm2465_vm6, %v2464_v17, %v2179_v61  ;;  %vm1804_vm12 = vcmp.le.f32.partialorder %v14766_v44, %v8536_v14  ;;  %14767 = vst [vmem:[#allocation91_spill] sm:$0xff] %v8625_v63  ;;  %v14769_v17 = vld [vmem:[#allocation28_spill] sm:$0xff]  ;;  %v8639_v18 = vpop.f32.mrf.mxu0 }
 0x218   : > { %vm2502_vm14 = vcmp.lt.s32.totalorder %v2036_v47, %v2044_v5  ;;  %14768 = vst [vmem:[#allocation21_spill] sm:$0xff] %v8627_v23  ;;  %v2211_v58 = vsel %vm1955_vm1, %v8064_v20, 256  ;;  %vm2467_vm13 = vcmp.lt.s32.totalorder %v2466_v60, %v2187_v32  ;;  %v2052_v9 = vsel %vm1796_vm10, %v7918_v27, 256  ;;  %v8641_v23 = vpop.f32.mrf.mxu1 }
 0x219   : > { %v2503_v12 = vsel %vm2502_vm14, %v2036_v47, %v2044_v5  ;;  %vm2420_vm15 = vcmp.lt.s32.totalorder %v2419_v41, %v8542_v53  ;;  %v2468_v61 = vsel %vm2467_vm13, %v2466_v60, %v2187_v32  ;;  %vm1812_vm3 = vcmp.le.f32.partialorder %v14769_v17, %v8536_v14  ;;  %14770 = vst [vmem:[#allocation26_spill] sm:$0xff] %v8641_v23  ;;  %v14771_v47 = vld [vmem:[#allocation6_spill] sm:$0xff] }
 0x21a   : > { %vm2504_vm11 = vcmp.lt.s32.totalorder %v2503_v12, %v2052_v9  ;;  %5563 = vmatmul.msk.f32.gmra.mxu0 %vm447_vm0, %v6757_v24  ;;  %v2350_v5 = vsel %vm2349_vm9, %v2348_v62, %v8489_v39  ;;  %vm1995_vm1 = vcmp.le.f32.partialorder %v14771_v47, %v8281_v15  ;;  %vm2469_vm5 = vcmp.lt.s32.totalorder %v2468_v61, %v2195_v8  ;;  %v14772_v39 = vld [vmem:[#allocation35_spill] sm:$0xff] }
 0x21b   : > { %v2060_v57 = vsel %vm1804_vm12, %v7921_v29, 256  ;;  %v2505_v32 = vsel %vm2504_vm11, %v2503_v12, %v2052_v9  ;;  %5595 = vmatmul.msk.f32.gmra.mxu1 %vm447_vm0, %v6757_v24  ;;  %v2219_v60 = vsel %vm1963_vm2, %v8075_v34, 256  ;;  %v2470_v63 = vsel %vm2469_vm5, %v2468_v61, %v2195_v8  ;;  %v14773_v8 = vld [vmem:[#allocation39_spill] sm:$0xff] }
 0x21c   : > { %vm1820_vm10 = vcmp.le.f32.partialorder %v14772_v39, %v8536_v14  ;;  %vm2506_vm6 = vcmp.lt.s32.totalorder %v2505_v32, %v2060_v57  ;;  %v2421_v62 = vsel %vm2420_vm15, %v2419_v41, %v8542_v53  ;;  %vm2471_vm9 = vcmp.lt.s32.totalorder %v2470_v63, %v2203_v19 }
 0x21d   : > { %v2068_v44 = vsel %vm1812_vm3, %v7924_v4, 256  ;;  %v2507_v9 = vsel %vm2506_vm6, %v2505_v32, %v2060_v57  ;;  %v2351_v12 = vrot.slane %v2350_v5, 4  ;;  %vm2003_vm2 = vcmp.le.f32.partialorder %v7874_v48, %v8281_v15 }
 0x21e   : > { %v2472_v43 = vsel %vm2471_vm9, %v2470_v63, %v2203_v19  ;;  %vm1828_vm12 = vcmp.le.f32.partialorder %v14773_v8, %v8536_v14  ;;  %vm2508_vm14 = vcmp.lt.s32.totalorder %v2507_v9, %v2068_v44  ;;  %v2227_v53 = vsel %vm1971_vm4, %v8220_v40, 256  ;;  %v14774_v19 = vld [vmem:[#allocation41_spill] sm:$0xff]  ;;  %v8683_v63 = vpop.f32.mrf.mxu2  ;;  %v8685_v32 = vpop.f32.mrf.mxu3  ;;  %5627 = vmatmul.msk.f32.gmra.mxu2 %vm447_vm0, %v6757_v24  ;;  %5659 = vmatmul.msk.f32.gmra.mxu3 %vm447_vm0, %v6757_v24  ;;  %v6758_v24 = vld [vmem:[%s13839_s1 + $0xf8] sm:$0xff] }
 0x21f   : > { %vm2473_vm13 = vcmp.lt.s32.totalorder %v2472_v43, %v2211_v58  ;;  %v2076_v41 = vsel %vm1820_vm10, %v7931_v33, 256  ;;  %v2509_v61 = vsel %vm2508_vm14, %v2507_v9, %v2068_v44  ;;  %v2422_v17 = vrot.slane %v2421_v62, 4  ;;  %14775 = vst [vmem:[#allocation29_spill] sm:$0xff] %v8683_v63 }
 0x220   : > { %vm2011_vm15 = vcmp.le.f32.partialorder %v7909_v37, %v8281_v15  ;;  %v2474_v57 = vsel %vm2473_vm13, %v2472_v43, %v2211_v58  ;;  %vm1836_vm3 = vcmp.le.f32.partialorder %v14774_v19, %v8536_v14  ;;  %vm2510_vm11 = vcmp.lt.s32.totalorder %v2509_v61, %v2076_v41  ;;  %14776 = vst [vmem:[#allocation95_spill] sm:$0xff] %v8685_v32  ;;  %v8705_v43 = vpop.f32.mrf.mxu0  ;;  %v8707_v32 = vpop.f32.mrf.mxu1 }
 0x221   : > { %v2235_v13 = vsel %vm1979_vm8, %v8225_v16, 256  ;;  %vm2475_vm4 = vcmp.lt.s32.totalorder %v2474_v57, %v2219_v60  ;;  %v2084_v58 = vsel %vm1828_vm12, %v7934_v38, 256  ;;  %v2511_v39 = vsel %vm2510_vm11, %v2509_v61, %v2076_v41  ;;  %14780 = vst [vmem:[#allocation32_spill] sm:$0xff] %v8705_v43 }
 0x222   : > { %vm8697_vm5 = vcmp.lt.s32.totalorder %v2350_v5, %v2351_v12  ;;  %vm2019_vm10 = vcmp.le.f32.partialorder %v7980_v6, %v8281_v15  ;;  %v2476_v9 = vsel %vm2475_vm4, %v2474_v57, %v2219_v60  ;;  %vm1844_vm8 = vcmp.le.f32.partialorder %v14779_v59, %v8536_v14  ;;  %5564 = vmatmul.msk.f32.gmra.mxu0 %vm447_vm0, %v6758_v24  ;;  %v14781_v57 = vld [vmem:[#allocation49_spill] sm:$0xff]  ;;  %v14783_v59 = vld [vmem:[#allocation55_spill] sm:$0xff] }
 0x223   : > { %vm2512_vm6 = vcmp.lt.s32.totalorder %v2511_v39, %v2084_v58  ;;  %v2243_v8 = vsel %vm1987_vm7, %v8233_v35, 256  ;;  %vm2477_vm9 = vcmp.lt.s32.totalorder %v2476_v9, %v2227_v53  ;;  %v2092_v60 = vsel %vm1836_vm3, %v7941_v0, 256  ;;  %5596 = vmatmul.msk.f32.gmra.mxu1 %vm447_vm0, %v6758_v24 }
 0x224   : > { %v2513_v41 = vsel %vm2512_vm6, %v2511_v39, %v2084_v58  ;;  %vm2423_vm12 = vcmp.lt.s32.totalorder %v2421_v62, %v2422_v17  ;;  %v2478_v61 = vsel %vm2477_vm9, %v2476_v9, %v2227_v53  ;;  %vm1852_vm14 = vcmp.le.f32.partialorder %v14781_v57, %v8536_v14  ;;  %v14782_v39 = vld [vmem:[#allocation52_spill] sm:$0xff] }
 0x225   : > { %vm2514_vm13 = vcmp.lt.s32.totalorder %v2513_v41, %v2092_v60  ;;  %v2353_v63 = vsel %vm8697_vm5, %v2350_v5, %v2351_v12  ;;  %vm2479_vm11 = vcmp.lt.s32.totalorder %v2478_v61, %v2235_v13  ;;  %v2100_v10 = vsel %vm1844_vm8, %v7950_v25, 256 }
 0x226   : > { %v2515_v19 = vsel %vm2514_vm13, %v2513_v41, %v2092_v60  ;;  %v2251_v58 = vsel %vm1995_vm1, %v8242_v7, 256  ;;  %v2480_v53 = vsel %vm2479_vm11, %v2478_v61, %v2235_v13  ;;  %vm1860_vm7 = vcmp.le.f32.partialorder %v14782_v39, %v8536_v14  ;;  %v8739_v60 = vpop.f32.mrf.mxu2  ;;  %5628 = vmatmul.msk.f32.gmra.mxu2 %vm447_vm0, %v6758_v24  ;;  %v8747_v13 = vpop.f32.mrf.mxu3  ;;  %5660 = vmatmul.msk.f32.gmra.mxu3 %vm447_vm0, %v6758_v24  ;;  %v14785_v61 = vld [vmem:[#allocation58_spill] sm:$0xff] }
 0x227   : > { %vm2516_vm3 = vcmp.lt.s32.totalorder %v2515_v19, %v2100_v10  ;;  %v2424_v9 = vsel %vm2423_vm12, %v2421_v62, %v2422_v17  ;;  %vm2481_vm4 = vcmp.lt.s32.totalorder %v2480_v53, %v2243_v8  ;;  %v2108_v5 = vsel %vm1852_vm14, %v7953_v26, 256  ;;  %14784 = vst [vmem:[#allocation36_spill] sm:$0xff] %v8747_v13  ;;  %v14787_v39 = vld [vmem:[#allocation62_spill] sm:$0xff]  ;;  %v14815_v13 = vld [vmem:[#allocation124_spill] sm:$0xff] }
 0x228   : > { %v2517_v12 = vsel %vm2516_vm3, %v2515_v19, %v2100_v10  ;;  %v2354_v44 = vrot.slane %v2353_v63, 2  ;;  %v2482_v57 = vsel %vm2481_vm4, %v2480_v53, %v2243_v8  ;;  %vm1868_vm5 = vcmp.le.f32.partialorder %v14783_v59, %v8536_v14  ;;  %v8752_v10 = vpop.f32.mrf.mxu0  ;;  %v8754_v19 = vpop.f32.mrf.mxu1  ;;  %v14788_v59 = vld [vmem:[#allocation65_spill] sm:$0xff] }
 0x229   : > { %vm2518_vm8 = vcmp.lt.s32.totalorder %v2517_v12, %v2108_v5  ;;  %v2259_v47 = vsel %vm2003_vm2, %v8247_v21, 256  ;;  %vm2483_vm1 = vcmp.lt.s32.totalorder %v2482_v57, %v2251_v58  ;;  %v2116_v62 = vsel %vm1860_vm7, %v7956_v3, 256  ;;  %14786 = vst [vmem:[#allocation94_spill] sm:$0xff] %v8752_v10 }
 0x22a   : > { %v2519_v17 = vsel %vm2518_vm8, %v2517_v12, %v2108_v5  ;;  %v2425_v8 = vrot.slane %v2424_v9, 2  ;;  %v2484_v41 = vsel %vm2483_vm1, %v2482_v57, %v2251_v58  ;;  %vm1876_vm6 = vcmp.le.f32.partialorder %v14785_v61, %v8536_v14 }
 0x22b   : > { %vm2520_vm9 = vcmp.lt.s32.totalorder %v2519_v17, %v2116_v62  ;;  %v2267_v48 = vsel %vm2011_vm15, %v8255_v30, 256  ;;  %vm2485_vm2 = vcmp.lt.s32.totalorder %v2484_v41, %v2259_v47  ;;  %v2124_v24 = vsel %vm1868_vm5, %v7967_v2, 256 }
 0x22c   : > { %v2521_v58 = vsel %vm2520_vm9, %v2519_v17, %v2116_v62  ;;  %vm2355_vm0 = vcmp.lt.s32.totalorder %v2353_v63, %v2354_v44  ;;  %v2486_v53 = vsel %vm2485_vm2, %v2484_v41, %v2259_v47  ;;  %vm1884_vm12 = vcmp.le.f32.partialorder %v14787_v39, %v8536_v14  ;;  %v14789_v41 = vld [vmem:[#allocation68_spill] sm:$0xff] }
 0x22d   : > { %vm2522_vm14 = vcmp.lt.s32.totalorder %v2521_v58, %v2124_v24  ;;  %v2275_v5 = vsel %vm2019_vm10, %v8260_v50, 256  ;;  %vm2487_vm13 = vcmp.lt.s32.totalorder %v2486_v53, %v2267_v48  ;;  %v2132_v37 = vsel %vm1876_vm6, %v7970_v45, 256 }
 0x22e   : > { %v2523_v12 = vsel %vm2522_vm14, %v2521_v58, %v2124_v24  ;;  %vm2426_vm15 = vcmp.lt.s32.totalorder %v2424_v9, %v2425_v8  ;;  %v2488_v57 = vsel %vm2487_vm13, %v2486_v53, %v2267_v48  ;;  %vm1892_vm11 = vcmp.le.f32.partialorder %v14788_v59, %v8536_v14  ;;  %v14790_v53 = vld [vmem:[#allocation71_spill] sm:$0xff] }
 0x22f   : > { %vm2524_vm7 = vcmp.lt.s32.totalorder %v2523_v12, %v2132_v37  ;;  %v2356_v47 = vsel %vm2355_vm0, %v2353_v63, %v2354_v44  ;;  %vm2489_vm3 = vcmp.lt.s32.totalorder %v2488_v57, %v2275_v5  ;;  %v2140_v62 = vsel %vm1884_vm12, %v7978_v52, 256 }
 0x230   : > { %v2525_v17 = vsel %vm2524_vm7, %v2523_v12, %v2132_v37  ;;  %vm1900_vm4 = vcmp.le.f32.partialorder %v14789_v41, %v8536_v14  ;;  %v2427_v6 = vsel %vm2426_vm15, %v2424_v9, %v2425_v8  ;;  %vm2027_vm10 = vcmp.le.f32.partialorder %v8046_v22, %v8281_v15  ;;  %v8781_v63 = vpop.f32.mrf.mxu0  ;;  %v8783_v44 = vpop.f32.mrf.mxu1  ;;  %v14793_v22 = vld [vmem:[#allocation75_spill] sm:$0xff] }
 0x231   : > { %vm2526_vm5 = vcmp.lt.s32.totalorder %v2525_v17, %v2140_v62  ;;  %v2148_v61 = vsel %vm1892_vm11, %v7990_v56, 256  ;;  %v2357_v24 = vrot.slane %v2356_v47, 1  ;;  %v2490_v58 = vsel %vm2489_vm3, %v2488_v57, %v2275_v5  ;;  %14791 = vst [vmem:[#allocation40_spill] sm:$0xff] %v8781_v63  ;;  %v14794_v12 = vld [vmem:[#allocation79_spill] sm:$0xff] }
 0x232   : > { %v2527_v48 = vsel %vm2526_vm5, %v2525_v17, %v2140_v62  ;;  %vm1908_vm8 = vcmp.le.f32.partialorder %v14790_v53, %v8536_v14  ;;  %14792 = vst [vmem:[#allocation98_spill] sm:$0xff] %v8783_v44  ;;  %v2156_v39 = vsel %vm1900_vm4, %v7993_v55, 256  ;;  %v2428_v9 = vrot.slane %v2427_v6, 1  ;;  %v14795_v17 = vld [vmem:[#allocation83_spill] sm:$0xff]  ;;  %v8798_v53 = vpop.f32.mrf.mxu2 }
 0x233   : > { %vm2528_vm1 = vcmp.lt.s32.totalorder %v2527_v48, %v2148_v61  ;;  %v2283_v8 = vsel %vm2027_vm10, %v8285_v54, 256  ;;  %vm1916_vm6 = vcmp.le.f32.partialorder %v14793_v22, %v8536_v14  ;;  %v2164_v15 = vsel %vm1908_vm8, %v8005_v46, 256  ;;  %14797 = vst [vmem:[#allocation42_spill] sm:$0xff] %v8798_v53  ;;  %v14800_v22 = vld [vmem:[#allocation96_spill] sm:$0xff] }
 0x234   : > { %v2529_v37 = vsel %vm2528_vm1, %v2527_v48, %v2148_v61  ;;  %vm2491_vm2 = vcmp.lt.s32.totalorder %v2490_v58, %v2283_v8  ;;  %vm2358_vm0 = vcmp.lt.s32.totalorder %v2356_v47, %v2357_v24  ;;  %vm1924_vm12 = vcmp.le.f32.partialorder %v14794_v12, %v8536_v14  ;;  %v14804_v12 = vld [vmem:[#allocation100_spill] sm:$0xff] }
 0x235   : > { %vm2530_vm9 = vcmp.lt.s32.totalorder %v2529_v37, %v2156_v39  ;;  %v2172_v57 = vsel %vm1916_vm6, %v8015_v28, 256  ;;  %vm2429_vm13 = vcmp.lt.s32.totalorder %v2427_v6, %v2428_v9  ;;  %v2492_v62 = vsel %vm2491_vm2, %v2490_v58, %v2283_v8 }
 0x236   : > { %v2531_v5 = vsel %vm2530_vm9, %v2529_v37, %v2156_v39  ;;  %vm1932_vm15 = vcmp.le.f32.partialorder %v14795_v17, %v8536_v14  ;;  %v8795_v41 = vsel %vm2358_vm0, %v2356_v47, %v2357_v24  ;;  %v2180_v61 = vsel %vm1924_vm12, %v8018_v11, 256  ;;  %v14798_v39 = vld [vmem:[#allocation87_spill] sm:$0xff]  ;;  %v14799_v37 = vld [vmem:[#allocation92_spill] sm:$0xff] }
 0x237   : > { %vm2532_vm14 = vcmp.lt.s32.totalorder %v2531_v5, %v2164_v15  ;;  %14796 = vst [vmem:[#allocation101_spill] sm:$0xff] %v8795_v41  ;;  %vm1940_vm7 = vcmp.le.f32.partialorder %v14798_v39, %v8536_v14  ;;  %vm1948_vm3 = vcmp.le.f32.partialorder %v14799_v37, %v8536_v14  ;;  %vm1956_vm4 = vcmp.le.f32.partialorder %v14800_v22, %v8536_v14 }
 0x238   : > { %v2533_v59 = vsel %vm2532_vm14, %v2531_v5, %v2164_v15  ;;  %v8806_v58 = vpop.f32.mrf.mxu0  ;;  %v8808_v8 = vpop.f32.mrf.mxu1  ;;  %v8810_v47 = vsel %vm2429_vm13, %v2427_v6, %v2428_v9  ;;  %v2493_v24 = vrot.slane %v2492_v62, 4  ;;  %v2188_v15 = vsel %vm1932_vm15, %v8028_v51, 256  ;;  %v14807_v6 = vld [vmem:[#allocation107_spill] sm:$0xff] }
 0x239   : > { %vm2534_vm11 = vcmp.lt.s32.totalorder %v2533_v59, %v2172_v57  ;;  %14801 = vst [vmem:[#allocation104_spill] sm:$0xff] %v8806_v58  ;;  %vm1964_vm10 = vcmp.le.f32.partialorder %v14804_v12, %v8536_v14  ;;  %v2196_v17 = vsel %vm1940_vm7, %v8040_v42, 256  ;;  %vm14329_vm9 = vcmp.eq.s32.totalorder %v7993_v55, %v8795_v41 }
 0x23a   : > { %v2535_v48 = vsel %vm2534_vm11, %v2533_v59, %v2172_v57  ;;  %14802 = vst [vmem:[#allocation45_spill] sm:$0xff] %v8808_v8  ;;  %v14805_v57 = vld [vmem:[#allocation5_spill] sm:$0xff]  ;;  %v14806_v59 = vld [vmem:[#allocation106_spill] sm:$0xff]  ;;  %vm14031_vm2 = vcmp.eq.s32.totalorder %v8285_v54, %v8795_v41  ;;  %vm1988_vm0 = vcmp.le.f32.partialorder %v14807_v6, %v8536_v14  ;;  %v2204_v9 = vsel %vm1948_vm3, %v8043_v31, 256 }
 0x23b   : > { %vm2536_vm5 = vcmp.lt.s32.totalorder %v2535_v48, %v2180_v61  ;;  %14803 = vst [vmem:[#allocation99_spill] sm:$0xff] %v8810_v47  ;;  %vm1972_vm8 = vcmp.le.f32.partialorder %v14805_v57, %v8536_v14  ;;  %vm1980_vm1 = vcmp.le.f32.partialorder %v14806_v59, %v8536_v14  ;;  %vm14328_vm14 = vcmp.eq.s32.totalorder %v7993_v55, %v8810_v47 }
 0x23c   : > { %v2537_v5 = vsel %vm2536_vm5, %v2535_v48, %v2180_v61  ;;  %v14808_v61 = vmov 1.0   ;;  %vm8840_vm13 = vcmp.lt.s32.totalorder %v2492_v62, %v2493_v24  ;;  %vm14026_vm15 = vcmp.eq.s32.totalorder %v8285_v54, %v8810_v47  ;;  %v8900_v48 = vpop.f32.mrf.mxu2 }
 0x23d   : > { %vm2538_vm6 = vcmp.lt.s32.totalorder %v2537_v5, %v2188_v15  ;;  %5917 = vmatpush.msk.msra.mxu0 %vm14329_vm9, %v14808_v61  ;;  %5933 = vmatpush.msk.msra.mxu1 %vm14031_vm2, %v14808_v61  ;;  %vm14323_vm11 = vcmp.eq.s32.totalorder %v7990_v56, %v8795_v41  ;;  %vm14027_vm3 = vcmp.eq.s32.totalorder %v8260_v50, %v8795_v41  ;;  %v2228_v12 = vsel %vm1972_vm8, %v8220_v40, 256 }
 0x23e   : > { %v2539_v39 = vsel %vm2538_vm6, %v2537_v5, %v2188_v15  ;;  %5949 = vmatpush.msk.msra.mxu2 %vm14328_vm14, %v14808_v61  ;;  %5965 = vmatpush.msk.msra.mxu3 %vm14026_vm15, %v14808_v61  ;;  %vm14304_vm5 = vcmp.eq.s32.totalorder %v7990_v56, %v8810_v47  ;;  %v14811_v15 = vld [vmem:[#allocation116_spill] sm:$0xff]  ;;  %v2212_v5 = vsel %vm1956_vm4, %v8064_v20, 256  ;;  %vm14294_vm4 = vcmp.eq.s32.totalorder %v7978_v52, %v8795_v41 }
 0x23f   : > { %vm2540_vm12 = vcmp.lt.s32.totalorder %v2539_v39, %v2196_v17  ;;  %5918 = vmatpush.msk.msra.mxu0 %vm14323_vm11, %v14808_v61  ;;  %vm1996_vm6 = vcmp.le.f32.partialorder %v14811_v15, %v8536_v14  ;;  %5934 = vmatpush.msk.msra.mxu1 %vm14027_vm3, %v14808_v61  ;;  %14814 = vst [vmem:[#allocation50_spill] sm:$0xff] %v8900_v48  ;;  %v2236_v57 = vsel %vm1980_vm1, %v8225_v16, 256 }
 0x240   : > { %v2541_v37 = vsel %vm2540_vm12, %v2539_v39, %v2196_v17  ;;  %5950 = vmatpush.msk.msra.mxu2 %vm14304_vm5, %v14808_v61  ;;  %vm14029_vm12 = vcmp.eq.s32.totalorder %v8260_v50, %v8810_v47  ;;  %v2495_v39 = vsel %vm8840_vm13, %v2492_v62, %v2493_v24  ;;  %v8886_v22 = vpop.f32.mrf.mxu0  ;;  %v2220_v62 = vsel %vm1964_vm10, %v8075_v34, 256 }
 0x241   : > { %vm2542_vm7 = vcmp.lt.s32.totalorder %v2541_v37, %v2204_v9  ;;  %5966 = vmatpush.msk.msra.mxu3 %vm14029_vm12, %v14808_v61  ;;  %14812 = vst [vmem:[#allocation47_spill] sm:$0xff] %v8886_v22  ;;  %5919 = vmatpush.msk.msra.mxu0 %vm14294_vm4, %v14808_v61  ;;  %vm14032_vm13 = vcmp.eq.s32.totalorder %v7978_v52, %v8810_v47 }
 0x242   : > { %v2543_v17 = vsel %vm2542_vm7, %v2541_v37, %v2204_v9  ;;  %v8888_v9 = vpop.f32.mrf.mxu1  ;;  %vm14030_vm7 = vcmp.eq.s32.totalorder %v8255_v30, %v8795_v41  ;;  %v14813_v37 = vld [vmem:[#allocation120_spill] sm:$0xff]  ;;  %vm2012_vm12 = vcmp.le.f32.partialorder %v14815_v13, %v8536_v14  ;;  %5951 = vmatpush.msk.msra.mxu2 %vm14032_vm13, %v14808_v61  ;;  %vm14034_vm8 = vcmp.eq.s32.totalorder %v8247_v21, %v8795_v41 }
 0x243   : > { %vm2544_vm15 = vcmp.lt.s32.totalorder %v2543_v17, %v2212_v5  ;;  %vm2004_vm3 = vcmp.le.f32.partialorder %v14813_v37, %v8536_v14  ;;  %5935 = vmatpush.msk.msra.mxu1 %vm14030_vm7, %v14808_v61  ;;  %vm14036_vm7 = vcmp.eq.s32.totalorder %v7970_v45, %v8795_v41  ;;  %vm14035_vm2 = vcmp.eq.s32.totalorder %v7970_v45, %v8810_v47 }
 0x244   : > { %v2545_v24 = vsel %vm2544_vm15, %v2543_v17, %v2212_v5  ;;  %vm14033_vm15 = vcmp.eq.s32.totalorder %v8255_v30, %v8810_v47  ;;  %v2496_v5 = vrot.slane %v2495_v39, 2  ;;  %5920 = vmatpush.msk.msra.mxu0 %vm14036_vm7, %v14808_v61  ;;  %5952 = vmatpush.msk.msra.mxu2 %vm14035_vm2, %v14808_v61  ;;  %vm14039_vm2 = vcmp.eq.s32.totalorder %v7967_v2, %v8810_v47 }
 0x245   : > { %vm2546_vm10 = vcmp.lt.s32.totalorder %v2545_v24, %v2220_v62  ;;  %5967 = vmatpush.msk.msra.mxu3 %vm14033_vm15, %v14808_v61  ;;  %5936 = vmatpush.msk.msra.mxu1 %vm14034_vm8, %v14808_v61  ;;  %vm14040_vm15 = vcmp.eq.s32.totalorder %v7967_v2, %v8795_v41  ;;  %vm14038_vm8 = vcmp.eq.s32.totalorder %v8242_v7, %v8795_v41  ;;  %v2260_v15 = vsel %vm2004_vm3, %v8247_v21, 256 }
 0x246   : > { %v2547_v17 = vsel %vm2546_vm10, %v2545_v24, %v2220_v62  ;;  %vm14037_vm10 = vcmp.eq.s32.totalorder %v8247_v21, %v8810_v47  ;;  %5921 = vmatpush.msk.msra.mxu0 %vm14040_vm15, %v14808_v61  ;;  %5953 = vmatpush.msk.msra.mxu2 %vm14039_vm2, %v14808_v61  ;;  %vm14041_vm1 = vcmp.eq.s32.totalorder %v8242_v7, %v8810_v47  ;;  %v2244_v24 = vsel %vm1988_vm0, %v8233_v35, 256 }
 0x247   : > { %vm2548_vm13 = vcmp.lt.s32.totalorder %v2547_v17, %v2228_v12  ;;  %5968 = vmatpush.msk.msra.mxu3 %vm14037_vm10, %v14808_v61  ;;  %5937 = vmatpush.msk.msra.mxu1 %vm14038_vm8, %v14808_v61  ;;  %vm8978_vm10 = vcmp.lt.s32.totalorder %v2495_v39, %v2496_v5  ;;  %vm14043_vm8 = vcmp.eq.s32.totalorder %v8233_v35, %v8795_v41  ;;  %v2268_v37 = vsel %vm2012_vm12, %v8255_v30, 256 }
 0x248   : > { %v2549_v62 = vsel %vm2548_vm13, %v2547_v17, %v2228_v12  ;;  %vm14045_vm13 = vcmp.eq.s32.totalorder %v7956_v3, %v8795_v41  ;;  %v14818_v17 = vld [vmem:[#allocation13_spill] sm:$0xff]  ;;  %vm14094_vm0 = vcmp.eq.s32.totalorder %v7956_v3, %v8810_v47  ;;  %v9006_v6 = vpop.f32.mrf.mxu0  ;;  %v9028_v53 = vsel %vm8978_vm10, %v2495_v39, %v2496_v5  ;;  %v9042_v39 = vpop.f32.mrf.mxu2 }
 0x249   : > { %vm2550_vm7 = vcmp.lt.s32.totalorder %v2549_v62, %v2236_v57  ;;  %5969 = vmatpush.msk.msra.mxu3 %vm14041_vm1, %v14808_v61  ;;  %5922 = vmatpush.msk.msra.mxu0 %vm14045_vm13, %v14808_v61  ;;  %vm2020_vm2 = vcmp.le.f32.partialorder %v14818_v17, %v8536_v14  ;;  %14819 = vst [vmem:[#allocation103_spill] sm:$0xff] %v9006_v6 }
 0x24a   : > { %v2551_v12 = vsel %vm2550_vm7, %v2549_v62, %v2236_v57  ;;  %5938 = vmatpush.msk.msra.mxu1 %vm14043_vm8, %v14808_v61  ;;  %vm14046_vm7 = vcmp.eq.s32.totalorder %v8233_v35, %v8810_v47  ;;  %v9008_v57 = vpop.f32.mrf.mxu1  ;;  %vm2028_vm1 = vcmp.le.f32.partialorder %v8208_v1, %v8536_v14  ;;  %v2252_v62 = vsel %vm1996_vm6, %v8242_v7, 256  ;;  %5954 = vmatpush.msk.msra.mxu2 %vm14094_vm0, %v14808_v61 }
 0x24b   : > { %vm2552_vm15 = vcmp.lt.s32.totalorder %v2551_v12, %v2244_v24  ;;  %14820 = vst [vmem:[#allocation53_spill] sm:$0xff] %v9008_v57  ;;  %5970 = vmatpush.msk.msra.mxu3 %vm14046_vm7, %v14808_v61  ;;  %vm14091_vm8 = vcmp.eq.s32.totalorder %v7953_v26, %v8795_v41  ;;  %vm14047_vm6 = vcmp.eq.s32.totalorder %v8225_v16, %v8795_v41  ;;  %v2276_v13 = vsel %vm2020_vm2, %v8260_v50, 256 }
 0x24c   : > { %v2553_v48 = vsel %vm2552_vm15, %v2551_v12, %v2244_v24  ;;  %5923 = vmatpush.msk.msra.mxu0 %vm14091_vm8, %v14808_v61  ;;  %vm14050_vm15 = vcmp.eq.s32.totalorder %v7953_v26, %v8810_v47  ;;  %14821 = vst [vmem:[#allocation105_spill] sm:$0xff] %v9042_v39  ;;  %5939 = vmatpush.msk.msra.mxu1 %vm14047_vm6, %v14808_v61  ;;  %v2284_v24 = vsel %vm2028_vm1, %v8285_v54, 256 }
 0x24d   : > { %vm2554_vm13 = vcmp.lt.s32.totalorder %v2553_v48, %v2252_v62  ;;  %5955 = vmatpush.msk.msra.mxu2 %vm14050_vm15, %v14808_v61  ;;  %vm14048_vm10 = vcmp.eq.s32.totalorder %v8225_v16, %v8810_v47  ;;  %vm14049_vm7 = vcmp.eq.s32.totalorder %v7950_v25, %v8795_v41  ;;  %vm14089_vm6 = vcmp.eq.s32.totalorder %v7950_v25, %v8810_v47 }
 0x24e   : > { %v2555_v59 = vsel %vm2554_vm13, %v2553_v48, %v2252_v62  ;;  %5971 = vmatpush.msk.msra.mxu3 %vm14048_vm10, %v14808_v61  ;;  %5924 = vmatpush.msk.msra.mxu0 %vm14049_vm7, %v14808_v61  ;;  %vm14054_vm13 = vcmp.eq.s32.totalorder %v8220_v40, %v8795_v41  ;;  %vm14051_vm10 = vcmp.eq.s32.totalorder %v8220_v40, %v8810_v47  ;;  %v2499_v62 = vrot.slane %v9028_v53, 1 }
 0x24f   : > { %vm2556_vm3 = vcmp.lt.s32.totalorder %v2555_v59, %v2260_v15  ;;  %5940 = vmatpush.msk.msra.mxu1 %vm14054_vm13, %v14808_v61  ;;  %5956 = vmatpush.msk.msra.mxu2 %vm14089_vm6, %v14808_v61  ;;  %vm14087_vm7 = vcmp.eq.s32.totalorder %v7941_v0, %v8795_v41  ;;  %vm14052_vm12 = vcmp.eq.s32.totalorder %v8075_v34, %v8795_v41 }
 0x250   : > { %v2557_v48 = vsel %vm2556_vm3, %v2555_v59, %v2260_v15  ;;  %5972 = vmatpush.msk.msra.mxu3 %vm14051_vm10, %v14808_v61  ;;  %5925 = vmatpush.msk.msra.mxu0 %vm14087_vm7, %v14808_v61  ;;  %vm14085_vm3 = vcmp.eq.s32.totalorder %v7941_v0, %v8810_v47  ;;  %vm14053_vm10 = vcmp.eq.s32.totalorder %v8075_v34, %v8810_v47  ;;  %v9122_v12 = vpop.f32.mrf.mxu0  ;;  %v9149_v15 = vpop.f32.mrf.mxu3 }
 0x251   : > { %vm2558_vm15 = vcmp.lt.s32.totalorder %v2557_v48, %v2268_v37  ;;  %5941 = vmatpush.msk.msra.mxu1 %vm14052_vm12, %v14808_v61  ;;  %5957 = vmatpush.msk.msra.mxu2 %vm14085_vm3, %v14808_v61  ;;  %vm14055_vm12 = vcmp.eq.s32.totalorder %v8064_v20, %v8795_v41  ;;  %14822 = vst [vmem:[#allocation7_spill] sm:$0xff] %v9122_v12 }
 0x252   : > { %v2559_v5 = vsel %vm2558_vm15, %v2557_v48, %v2268_v37  ;;  %5973 = vmatpush.msk.msra.mxu3 %vm14053_vm10, %v14808_v61  ;;  %vm14061_vm15 = vcmp.eq.s32.totalorder %v7934_v38, %v8795_v41  ;;  %v9124_v17 = vpop.f32.mrf.mxu1  ;;  %vm14056_vm1 = vcmp.eq.s32.totalorder %v7934_v38, %v8810_v47  ;;  %vm14057_vm10 = vcmp.eq.s32.totalorder %v8064_v20, %v8810_v47  ;;  %v9176_v48 = vpop.f32.mrf.mxu2 }
 0x253   : > { %vm2560_vm2 = vcmp.lt.s32.totalorder %v2559_v5, %v2276_v13  ;;  %14823 = vst [vmem:[#allocation57_spill] sm:$0xff] %v9124_v17  ;;  %5926 = vmatpush.msk.msra.mxu0 %vm14061_vm15, %v14808_v61  ;;  %5942 = vmatpush.msk.msra.mxu1 %vm14055_vm12, %v14808_v61  ;;  %vm14059_vm12 = vcmp.eq.s32.totalorder %v8043_v31, %v8795_v41 }
 0x254   : > { %v2561_v1 = vsel %vm2560_vm2, %v2559_v5, %v2276_v13  ;;  %5958 = vmatpush.msk.msra.mxu2 %vm14056_vm1, %v14808_v61  ;;  %5974 = vmatpush.msk.msra.mxu3 %vm14057_vm10, %v14808_v61  ;;  %vm14058_vm2 = vcmp.eq.s32.totalorder %v7931_v33, %v8795_v41  ;;  %14824 = vst [vmem:[#allocation60_spill] sm:$0xff] %v9149_v15 }
 0x255   : > { %vm2562_vm13 = vcmp.lt.s32.totalorder %v2561_v1, %v2284_v24  ;;  %5927 = vmatpush.msk.msra.mxu0 %vm14058_vm2, %v14808_v61  ;;  %vm14060_vm1 = vcmp.eq.s32.totalorder %v7931_v33, %v8810_v47  ;;  %5943 = vmatpush.msk.msra.mxu1 %vm14059_vm12, %v14808_v61  ;;  %vm14063_vm10 = vcmp.eq.s32.totalorder %v7924_v4, %v8795_v41 }
 0x256   : > { %v2563_v14 = vsel %vm2562_vm13, %v2561_v1, %v2284_v24  ;;  %5959 = vmatpush.msk.msra.mxu2 %vm14060_vm1, %v14808_v61  ;;  %vm14062_vm13 = vcmp.eq.s32.totalorder %v8043_v31, %v8810_v47  ;;  %vm9172_vm2 = vcmp.lt.s32.totalorder %v9028_v53, %v2499_v62  ;;  %14827 = vst [vmem:[#allocation63_spill] sm:$0xff] %v9176_v48 }
 0x257   : > { %v2564_v59 = vrot.slane %v2563_v14, 4  ;;  %5975 = vmatpush.msk.msra.mxu3 %vm14062_vm13, %v14808_v61  ;;  %5928 = vmatpush.msk.msra.mxu0 %vm14063_vm10, %v14808_v61  ;;  %vm14064_vm12 = vcmp.eq.s32.totalorder %v8040_v42, %v8795_v41  ;;  %vm14065_vm1 = vcmp.eq.s32.totalorder %v7924_v4, %v8810_v47  ;;  %vm14066_vm13 = vcmp.eq.s32.totalorder %v8040_v42, %v8810_v47 }
 0x258   : > { %5944 = vmatpush.msk.msra.mxu1 %vm14064_vm12, %v14808_v61  ;;  %5960 = vmatpush.msk.msra.mxu2 %vm14065_vm1, %v14808_v61  ;;  %vm14069_vm10 = vcmp.eq.s32.totalorder %v7921_v29, %v8795_v41  ;;  %vm14067_vm12 = vcmp.eq.s32.totalorder %v8028_v51, %v8795_v41  ;;  %vm14068_vm1 = vcmp.eq.s32.totalorder %v7921_v29, %v8810_v47  ;;  %v9226_v24 = vpop.f32.mrf.mxu0 }
 0x259   : > { %vm2565_vm15 = vcmp.lt.s32.totalorder %v2563_v14, %v2564_v59  ;;  %5976 = vmatpush.msk.msra.mxu3 %vm14066_vm13, %v14808_v61  ;;  %5929 = vmatpush.msk.msra.mxu0 %vm14069_vm10, %v14808_v61  ;;  %vm14083_vm13 = vcmp.eq.s32.totalorder %v7918_v27, %v8795_v41  ;;  %14828 = vst [vmem:[#allocation66_spill] sm:$0xff] %v9226_v24 }
 0x25a   : > { %v2566_v13 = vsel %vm2565_vm15, %v2563_v14, %v2564_v59  ;;  %5945 = vmatpush.msk.msra.mxu1 %vm14067_vm12, %v14808_v61  ;;  %5961 = vmatpush.msk.msra.mxu2 %vm14068_vm1, %v14808_v61  ;;  %vm14070_vm15 = vcmp.eq.s32.totalorder %v8028_v51, %v8810_v47  ;;  %v9228_v1 = vpop.f32.mrf.mxu1  ;;  %v9233_v14 = vsel %vm9172_vm2, %v9028_v53, %v2499_v62  ;;  %v9283_v59 = vpop.f32.mrf.mxu3 }
 0x25b   : > { %v2567_v5 = vrot.slane %v2566_v13, 2  ;;  %14829 = vst [vmem:[#allocation70_spill] sm:$0xff] %v9228_v1  ;;  %5977 = vmatpush.msk.msra.mxu3 %vm14070_vm15, %v14808_v61  ;;  %5930 = vmatpush.msk.msra.mxu0 %vm14083_vm13, %v14808_v61  ;;  %vm14071_vm12 = vcmp.eq.s32.totalorder %v8018_v11, %v8795_v41  ;;  %vm14072_vm1 = vcmp.eq.s32.totalorder %v7918_v27, %v8810_v47 }
 0x25c   : > { %14830 = vst [vmem:[#allocation73_spill] sm:$0xff] %v9233_v14  ;;  %5946 = vmatpush.msk.msra.mxu1 %vm14071_vm12, %v14808_v61  ;;  %5962 = vmatpush.msk.msra.mxu2 %vm14072_vm1, %v14808_v61  ;;  %vm14073_vm2 = vcmp.eq.s32.totalorder %v8018_v11, %v8810_v47  ;;  %vm14076_vm15 = vcmp.eq.s32.totalorder %v7907_v36, %v8795_v41 }
 0x25d   : > { %vm2568_vm10 = vcmp.lt.s32.totalorder %v2566_v13, %v2567_v5  ;;  %5978 = vmatpush.msk.msra.mxu3 %vm14073_vm2, %v14808_v61  ;;  %5931 = vmatpush.msk.msra.mxu0 %vm14076_vm15, %v14808_v61  ;;  %vm14074_vm12 = vcmp.eq.s32.totalorder %v8015_v28, %v8795_v41  ;;  %vm14075_vm1 = vcmp.eq.s32.totalorder %v7907_v36, %v8810_v47 }
 0x25e   : > { %v2569_v53 = vsel %vm2568_vm10, %v2566_v13, %v2567_v5  ;;  %5947 = vmatpush.msk.msra.mxu1 %vm14074_vm12, %v14808_v61  ;;  %5963 = vmatpush.msk.msra.mxu2 %vm14075_vm1, %v14808_v61  ;;  %vm14077_vm10 = vcmp.eq.s32.totalorder %v8015_v28, %v8810_v47  ;;  %vm14078_vm2 = vcmp.eq.s32.totalorder %v7890_v49, %v8795_v41  ;;  %v9311_v13 = vpop.f32.mrf.mxu2 }
 0x25f   : > { %v2570_v62 = vrot.slane %v2569_v53, 1  ;;  %14831 = vst [vmem:[#allocation76_spill] sm:$0xff] %v9283_v59  ;;  %5979 = vmatpush.msk.msra.mxu3 %vm14077_vm10, %v14808_v61  ;;  %5932 = vmatpush.msk.msra.mxu0 %vm14078_vm2, %v14808_v61  ;;  %vm14079_vm12 = vcmp.eq.s32.totalorder %v8005_v46, %v8795_v41  ;;  %vm14080_vm1 = vcmp.eq.s32.totalorder %v7890_v49, %v8810_v47 }
 0x260   : > { %5948 = vmatpush.msk.msra.mxu1 %vm14079_vm12, %v14808_v61  ;;  %5964 = vmatpush.msk.msra.mxu2 %vm14080_vm1, %v14808_v61  ;;  %vm14081_vm10 = vcmp.eq.s32.totalorder %v8005_v46, %v8810_v47  ;;  %vm14325_vm2 = vcmp.eq.s32.totalorder %v7993_v55, %v9233_v14  ;;  %14833 = vst [vmem:[#allocation15_spill] sm:$0xff] %v9311_v13  ;;  %v9331_v5 = vpop.f32.mrf.mxu0 }
 0x261   : > { %vm2571_vm15 = vcmp.lt.s32.totalorder %v2569_v53, %v2570_v62  ;;  %5980 = vmatpush.msk.msra.mxu3 %vm14081_vm10, %v14808_v61  ;;  %5981 = vmatpush.msk.msrb.mxu0 %vm14325_vm2, %v14808_v61  ;;  %vm14082_vm12 = vcmp.eq.s32.totalorder %v8285_v54, %v9233_v14  ;;  %14834 = vst [vmem:[#allocation80_spill] sm:$0xff] %v9331_v5 }
 0x262   : > { %v9309_v37 = vsel %vm2571_vm15, %v2569_v53, %v2570_v62  ;;  %5997 = vmatpush.msk.msrb.mxu1 %vm14082_vm12, %v14808_v61  ;;  %v9333_v53 = vpop.f32.mrf.mxu1  ;;  %vm14303_vm10 = vcmp.eq.s32.totalorder %v7990_v56, %v9233_v14  ;;  %vm14086_vm12 = vcmp.eq.s32.totalorder %v8260_v50, %v9233_v14  ;;  %vm14293_vm3 = vcmp.eq.s32.totalorder %v7978_v52, %v9233_v14  ;;  %v9407_v62 = vpop.f32.mrf.mxu3 }
 0x263   : > { %14832 = vst [vmem:[#allocation9_spill] sm:$0xff] %v9309_v37  ;;  %vm14324_vm15 = vcmp.eq.s32.totalorder %v7993_v55, %v9309_v37  ;;  %vm14084_vm1 = vcmp.eq.s32.totalorder %v8285_v54, %v9309_v37  ;;  %5982 = vmatpush.msk.msrb.mxu0 %vm14303_vm10, %v14808_v61  ;;  %vm14295_vm13 = vcmp.eq.s32.totalorder %v7990_v56, %v9309_v37 }
 0x264   : > { %14835 = vst [vmem:[#allocation85_spill] sm:$0xff] %v9333_v53  ;;  %6013 = vmatpush.msk.msrb.mxu2 %vm14324_vm15, %v14808_v61  ;;  %6029 = vmatpush.msk.msrb.mxu3 %vm14084_vm1, %v14808_v61  ;;  %vm14088_vm1 = vcmp.eq.s32.totalorder %v8260_v50, %v9309_v37  ;;  %vm14292_vm7 = vcmp.eq.s32.totalorder %v7978_v52, %v9309_v37 }
 0x265   : > { %5998 = vmatpush.msk.msrb.mxu1 %vm14086_vm12, %v14808_v61  ;;  %vm14090_vm12 = vcmp.eq.s32.totalorder %v8255_v30, %v9233_v14  ;;  %5983 = vmatpush.msk.msrb.mxu0 %vm14293_vm3, %v14808_v61  ;;  %vm14271_vm6 = vcmp.eq.s32.totalorder %v7970_v45, %v9233_v14  ;;  %vm14095_vm8 = vcmp.eq.s32.totalorder %v7970_v45, %v9309_v37 }
 0x266   : > { %6014 = vmatpush.msk.msrb.mxu2 %vm14295_vm13, %v14808_v61  ;;  %6030 = vmatpush.msk.msrb.mxu3 %vm14088_vm1, %v14808_v61  ;;  %vm14092_vm1 = vcmp.eq.s32.totalorder %v8255_v30, %v9309_v37  ;;  %14836 = vst [vmem:[#allocation89_spill] sm:$0xff] %v9407_v62  ;;  %vm14103_vm0 = vcmp.eq.s32.totalorder %v8242_v7, %v9233_v14  ;;  %v9437_v54 = vpop.f32.mrf.mxu2 }
 0x267   : > { %5999 = vmatpush.msk.msrb.mxu1 %vm14090_vm12, %v14808_v61  ;;  %vm14093_vm12 = vcmp.eq.s32.totalorder %v8247_v21, %v9233_v14  ;;  %5984 = vmatpush.msk.msrb.mxu0 %vm14271_vm6, %v14808_v61  ;;  %14839 = vst [vmem:[#allocation20_spill] sm:$0xff] %v9437_v54 }
 0x268   : > { %6015 = vmatpush.msk.msrb.mxu2 %vm14292_vm7, %v14808_v61  ;;  %6031 = vmatpush.msk.msrb.mxu3 %vm14092_vm1, %v14808_v61  ;;  %vm14096_vm1 = vcmp.eq.s32.totalorder %v8247_v21, %v9309_v37  ;;  %v9433_v41 = vpop.f32.mrf.mxu0 }
 0x269   : > { %6000 = vmatpush.msk.msrb.mxu1 %vm14093_vm12, %v14808_v61  ;;  %vm14104_vm12 = vcmp.eq.s32.totalorder %v7967_v2, %v9233_v14  ;;  %14837 = vst [vmem:[#allocation93_spill] sm:$0xff] %v9433_v41 }
 0x26a   : > { %6016 = vmatpush.msk.msrb.mxu2 %vm14095_vm8, %v14808_v61  ;;  %6032 = vmatpush.msk.msrb.mxu3 %vm14096_vm1, %v14808_v61  ;;  %vm14105_vm8 = vcmp.eq.s32.totalorder %v7967_v2, %v9309_v37  ;;  %vm14106_vm1 = vcmp.eq.s32.totalorder %v8242_v7, %v9309_v37  ;;  %v9435_v47 = vpop.f32.mrf.mxu1  ;;  %v9551_v21 = vpop.f32.mrf.mxu3 }
 0x26b   : > { %5985 = vmatpush.msk.msrb.mxu0 %vm14104_vm12, %v14808_v61  ;;  %6001 = vmatpush.msk.msrb.mxu1 %vm14103_vm0, %v14808_v61  ;;  %14838 = vst [vmem:[#allocation97_spill] sm:$0xff] %v9435_v47  ;;  %vm14107_vm0 = vcmp.eq.s32.totalorder %v7956_v3, %v9233_v14  ;;  %vm14108_vm12 = vcmp.eq.s32.totalorder %v8233_v35, %v9233_v14 }
 0x26c   : > { %6017 = vmatpush.msk.msrb.mxu2 %vm14105_vm8, %v14808_v61  ;;  %6033 = vmatpush.msk.msrb.mxu3 %vm14106_vm1, %v14808_v61  ;;  %vm14109_vm8 = vcmp.eq.s32.totalorder %v7956_v3, %v9309_v37  ;;  %vm14110_vm1 = vcmp.eq.s32.totalorder %v8233_v35, %v9309_v37  ;;  %14841 = vst [vmem:[#allocation25_spill] sm:$0xff] %v9551_v21  ;;  %v14863_v21 = vld [vmem:[#allocation69_spill] sm:$0xff] }
 0x26d   : > { %5986 = vmatpush.msk.msrb.mxu0 %vm14107_vm0, %v14808_v61  ;;  %6002 = vmatpush.msk.msrb.mxu1 %vm14108_vm12, %v14808_v61  ;;  %vm14111_vm0 = vcmp.eq.s32.totalorder %v7953_v26, %v9233_v14  ;;  %vm14112_vm12 = vcmp.eq.s32.totalorder %v8225_v16, %v9233_v14 }
 0x26e   : > { %6018 = vmatpush.msk.msrb.mxu2 %vm14109_vm8, %v14808_v61  ;;  %6034 = vmatpush.msk.msrb.mxu3 %vm14110_vm1, %v14808_v61  ;;  %vm14113_vm8 = vcmp.eq.s32.totalorder %v7953_v26, %v9309_v37  ;;  %vm14114_vm1 = vcmp.eq.s32.totalorder %v8225_v16, %v9309_v37  ;;  %v9565_v7 = vpop.f32.mrf.mxu2  ;;  %v14858_v26 = vld [vmem:[#allocation77_spill] sm:$0xff] }
 0x26f   : > { %5987 = vmatpush.msk.msrb.mxu0 %vm14111_vm0, %v14808_v61  ;;  %6003 = vmatpush.msk.msrb.mxu1 %vm14112_vm12, %v14808_v61  ;;  %vm14115_vm0 = vcmp.eq.s32.totalorder %v7950_v25, %v9233_v14  ;;  %vm14116_vm12 = vcmp.eq.s32.totalorder %v8220_v40, %v9233_v14  ;;  %14842 = vst [vmem:[#allocation28_spill] sm:$0xff] %v9565_v7 }
 0x270   : > { %6019 = vmatpush.msk.msrb.mxu2 %vm14113_vm8, %v14808_v61  ;;  %6035 = vmatpush.msk.msrb.mxu3 %vm14114_vm1, %v14808_v61  ;;  %vm14117_vm8 = vcmp.eq.s32.totalorder %v7950_v25, %v9309_v37  ;;  %vm14118_vm1 = vcmp.eq.s32.totalorder %v8220_v40, %v9309_v37  ;;  %v9535_v50 = vpop.f32.mrf.mxu0 }
 0x271   : > { %5988 = vmatpush.msk.msrb.mxu0 %vm14115_vm0, %v14808_v61  ;;  %6004 = vmatpush.msk.msrb.mxu1 %vm14116_vm12, %v14808_v61  ;;  %vm14122_vm0 = vcmp.eq.s32.totalorder %v7941_v0, %v9233_v14  ;;  %vm14121_vm12 = vcmp.eq.s32.totalorder %v8075_v34, %v9233_v14 }
 0x272   : > { %6020 = vmatpush.msk.msrb.mxu2 %vm14117_vm8, %v14808_v61  ;;  %6036 = vmatpush.msk.msrb.mxu3 %vm14118_vm1, %v14808_v61  ;;  %vm14128_vm8 = vcmp.eq.s32.totalorder %v7941_v0, %v9309_v37  ;;  %vm14127_vm1 = vcmp.eq.s32.totalorder %v8075_v34, %v9309_v37  ;;  %v9549_v30 = vpop.f32.mrf.mxu1  ;;  %v9679_v40 = vpop.f32.mrf.mxu3  ;;  %v14861_v0 = vld [vmem:[#allocation81_spill] sm:$0xff] }
 0x273   : > { %5989 = vmatpush.msk.msrb.mxu0 %vm14122_vm0, %v14808_v61  ;;  %6005 = vmatpush.msk.msrb.mxu1 %vm14121_vm12, %v14808_v61  ;;  %vm14132_vm12 = vcmp.eq.s32.totalorder %v7934_v38, %v9233_v14  ;;  %vm14131_vm0 = vcmp.eq.s32.totalorder %v8064_v20, %v9233_v14  ;;  %14840 = vst [vmem:[#allocation102_spill] sm:$0xff] %v9549_v30 }
 0x274   : > { %6021 = vmatpush.msk.msrb.mxu2 %vm14128_vm8, %v14808_v61  ;;  %6037 = vmatpush.msk.msrb.mxu3 %vm14127_vm1, %v14808_v61  ;;  %vm14133_vm1 = vcmp.eq.s32.totalorder %v7934_v38, %v9309_v37  ;;  %vm14134_vm8 = vcmp.eq.s32.totalorder %v8064_v20, %v9309_v37  ;;  %14844 = vst [vmem:[#allocation35_spill] sm:$0xff] %v9679_v40 }
 0x275   : > { %5990 = vmatpush.msk.msrb.mxu0 %vm14132_vm12, %v14808_v61  ;;  %6006 = vmatpush.msk.msrb.mxu1 %vm14131_vm0, %v14808_v61  ;;  %vm14135_vm0 = vcmp.eq.s32.totalorder %v7931_v33, %v9233_v14  ;;  %vm14136_vm12 = vcmp.eq.s32.totalorder %v8043_v31, %v9233_v14 }
 0x276   : > { %6022 = vmatpush.msk.msrb.mxu2 %vm14133_vm1, %v14808_v61  ;;  %6038 = vmatpush.msk.msrb.mxu3 %vm14134_vm8, %v14808_v61  ;;  %vm14137_vm1 = vcmp.eq.s32.totalorder %v7931_v33, %v9309_v37  ;;  %vm14138_vm8 = vcmp.eq.s32.totalorder %v8043_v31, %v9309_v37  ;;  %v9693_v34 = vpop.f32.mrf.mxu2 }
 0x277   : > { %5991 = vmatpush.msk.msrb.mxu0 %vm14135_vm0, %v14808_v61  ;;  %6007 = vmatpush.msk.msrb.mxu1 %vm14136_vm12, %v14808_v61  ;;  %vm14139_vm0 = vcmp.eq.s32.totalorder %v7924_v4, %v9233_v14  ;;  %vm14140_vm12 = vcmp.eq.s32.totalorder %v8040_v42, %v9233_v14  ;;  %14845 = vst [vmem:[#allocation39_spill] sm:$0xff] %v9693_v34 }
 0x278   : > { %6023 = vmatpush.msk.msrb.mxu2 %vm14137_vm1, %v14808_v61  ;;  %6039 = vmatpush.msk.msrb.mxu3 %vm14138_vm8, %v14808_v61  ;;  %vm14141_vm1 = vcmp.eq.s32.totalorder %v7924_v4, %v9309_v37  ;;  %vm14142_vm8 = vcmp.eq.s32.totalorder %v8040_v42, %v9309_v37  ;;  %v9639_v35 = vpop.f32.mrf.mxu0 }
 0x279   : > { %5992 = vmatpush.msk.msrb.mxu0 %vm14139_vm0, %v14808_v61  ;;  %6008 = vmatpush.msk.msrb.mxu1 %vm14140_vm12, %v14808_v61  ;;  %vm14146_vm0 = vcmp.eq.s32.totalorder %v7921_v29, %v9233_v14  ;;  %vm14145_vm12 = vcmp.eq.s32.totalorder %v8028_v51, %v9233_v14 }
 0x27a   : > { %6024 = vmatpush.msk.msrb.mxu2 %vm14141_vm1, %v14808_v61  ;;  %6040 = vmatpush.msk.msrb.mxu3 %vm14142_vm8, %v14808_v61  ;;  %vm14147_vm1 = vcmp.eq.s32.totalorder %v7921_v29, %v9309_v37  ;;  %vm14148_vm8 = vcmp.eq.s32.totalorder %v8028_v51, %v9309_v37  ;;  %v9677_v16 = vpop.f32.mrf.mxu1  ;;  %v9731_v31 = vpop.f32.mrf.mxu3 }
 0x27b   : > { %5993 = vmatpush.msk.msrb.mxu0 %vm14146_vm0, %v14808_v61  ;;  %6009 = vmatpush.msk.msrb.mxu1 %vm14145_vm12, %v14808_v61  ;;  %vm14149_vm12 = vcmp.eq.s32.totalorder %v7918_v27, %v9233_v14  ;;  %vm14150_vm0 = vcmp.eq.s32.totalorder %v8018_v11, %v9233_v14  ;;  %14843 = vst [vmem:[#allocation6_spill] sm:$0xff] %v9677_v16 }
 0x27c   : > { %6025 = vmatpush.msk.msrb.mxu2 %vm14147_vm1, %v14808_v61  ;;  %6041 = vmatpush.msk.msrb.mxu3 %vm14148_vm8, %v14808_v61  ;;  %vm14156_vm1 = vcmp.eq.s32.totalorder %v7918_v27, %v9309_v37  ;;  %vm14155_vm8 = vcmp.eq.s32.totalorder %v8018_v11, %v9309_v37  ;;  %14847 = vst [vmem:[#allocation44_spill] sm:$0xff] %v9731_v31 }
 0x27d   : > { %5994 = vmatpush.msk.msrb.mxu0 %vm14149_vm12, %v14808_v61  ;;  %6010 = vmatpush.msk.msrb.mxu1 %vm14150_vm0, %v14808_v61  ;;  %vm14160_vm12 = vcmp.eq.s32.totalorder %v7907_v36, %v9233_v14  ;;  %vm14159_vm0 = vcmp.eq.s32.totalorder %v8015_v28, %v9233_v14 }
 0x27e   : > { %6026 = vmatpush.msk.msrb.mxu2 %vm14156_vm1, %v14808_v61  ;;  %6042 = vmatpush.msk.msrb.mxu3 %vm14155_vm8, %v14808_v61  ;;  %vm14161_vm8 = vcmp.eq.s32.totalorder %v7907_v36, %v9309_v37  ;;  %vm14162_vm1 = vcmp.eq.s32.totalorder %v8015_v28, %v9309_v37  ;;  %v9733_v42 = vpop.f32.mrf.mxu2 }
 0x27f   : > { %5995 = vmatpush.msk.msrb.mxu0 %vm14160_vm12, %v14808_v61  ;;  %6011 = vmatpush.msk.msrb.mxu1 %vm14159_vm0, %v14808_v61  ;;  %vm14270_vm0 = vcmp.eq.s32.totalorder %v7890_v49, %v9233_v14  ;;  %vm14268_vm12 = vcmp.eq.s32.totalorder %v8005_v46, %v9233_v14  ;;  %14848 = vst [vmem:[#allocation49_spill] sm:$0xff] %v9733_v42 }
 0x280   : > { %6027 = vmatpush.msk.msrb.mxu2 %vm14161_vm8, %v14808_v61  ;;  %6043 = vmatpush.msk.msrb.mxu3 %vm14162_vm1, %v14808_v61  ;;  %vm14269_vm8 = vcmp.eq.s32.totalorder %v7890_v49, %v9309_v37  ;;  %vm14267_vm1 = vcmp.eq.s32.totalorder %v8005_v46, %v9309_v37  ;;  %v9727_v20 = vpop.f32.mrf.mxu0 }
 0x281   : > { %5996 = vmatpush.msk.msrb.mxu0 %vm14270_vm0, %v14808_v61  ;;  %6012 = vmatpush.msk.msrb.mxu1 %vm14268_vm12, %v14808_v61 }
 0x282   : > { %6028 = vmatpush.msk.msrb.mxu2 %vm14269_vm8, %v14808_v61  ;;  %6044 = vmatpush.msk.msrb.mxu3 %vm14267_vm1, %v14808_v61  ;;  %v9729_v14 = vpop.f32.mrf.mxu1  ;;  %v9739_v28 = vpop.f32.mrf.mxu3 }
 0x283   : > { %14846 = vst [vmem:[#allocation41_spill] sm:$0xff] %v9729_v14 }
 0x284   : > { %14850 = vst [vmem:[#allocation55_spill] sm:$0xff] %v9739_v28  ;;  %v14859_v28 = vld [vmem:[#allocation46_spill] sm:$0xff] }
 0x285   : > { %v1596_v25 = vmin.f32 %v14859_v28, %v14858_v26 }
 0x286   : > { %v9743_v56 = vpop.f32.mrf.mxu2 }
 0x287   : > { %14852 = vst [vmem:[#allocation62_spill] sm:$0xff] %v9743_v56  ;;  %v1597_v40 = vmin.f32 %v1596_v25, %v14861_v0 }
 0x288   : > { %v9735_v51 = vpop.f32.mrf.mxu0 }
 0x289   : > { %v1598_v33 = vmin.f32 %v1597_v40, %v14863_v21 }
 0x28a   : > { %v9737_v11 = vpop.f32.mrf.mxu1  ;;  %v9749_v46 = vpop.f32.mrf.mxu3 }
 0x28b   : > { %14849 = vst [vmem:[#allocation52_spill] sm:$0xff] %v9737_v11 }
 0x28c   : > { %14854 = vst [vmem:[#allocation68_spill] sm:$0xff] %v9749_v46  ;;  %v14864_v46 = vld [vmem:[#allocation74_spill] sm:$0xff] }
 0x28d   : > { %v1599_v62 = vmin.f32 %v1598_v33, %v14864_v46 }
 0x28e   : > { %v9751_v52 = vpop.f32.mrf.mxu2 }
 0x28f   : > { %14855 = vst [vmem:[#allocation71_spill] sm:$0xff] %v9751_v52  ;;  %v14865_v52 = vld [vmem:[#allocation90_spill] sm:$0xff] }
 0x290   : > { %v9741_v55 = vpop.f32.mrf.mxu0  ;;  %v1600_v4 = vmin.f32 %v1599_v62, %v14865_v52 }
 0x291   : > { %14851 = vst [vmem:[#allocation58_spill] sm:$0xff] %v9741_v55 }
 0x292   : > { %v9747_v61 = vpop.f32.mrf.mxu1  ;;  %v9757_v3 = vpop.f32.mrf.mxu3 }
 0x293   : > { %14853 = vst [vmem:[#allocation65_spill] sm:$0xff] %v9747_v61 }
 0x294   : > { %14857 = vst [vmem:[#allocation79_spill] sm:$0xff] %v9757_v3  ;;  %v1601_v3 = vmin.f32 %v1600_v4, %v8639_v18 }
 0x296   : > { %v9761_v31 = vpop.f32.mrf.mxu2  ;;  %v1602_v25 = vmin.f32 %v1601_v3, %v8705_v43 }
 0x297   : > { %14860 = vst [vmem:[#allocation83_spill] sm:$0xff] %v9761_v31 }
 0x298   : > { %v9745_v37 = vpop.f32.mrf.mxu0  ;;  %v1603_v31 = vmin.f32 %v1602_v25, %v8752_v10 }
 0x29a   : > { %v9755_v2 = vpop.f32.mrf.mxu1  ;;  %v9771_v59 = vpop.f32.mrf.mxu3  ;;  %v1604_v40 = vmin.f32 %v1603_v31, %v8781_v63 }
 0x29b   : > { %14866 = vst [vmem:[#allocation92_spill] sm:$0xff] %v9771_v59 }
 0x29c   : > { %v1605_v33 = vmin.f32 %v1604_v40, %v8806_v58 }
 0x29e   : > { %v9774_v29 = vpop.f32.mrf.mxu2  ;;  %v1606_v4 = vmin.f32 %v1605_v33, %v8886_v22  ;;  %v14875_v33 = vld [vmem:[#allocation59_spill] sm:$0xff]  ;;  %v14876_v22 = vld [vmem:[#allocation48_spill] sm:$0xff] }
 0x29f   : > { %14867 = vst [vmem:[#allocation96_spill] sm:$0xff] %v9774_v29 }
 0x2a0   : > { %v9753_v45 = vpop.f32.mrf.mxu0  ;;  %v1607_v29 = vmin.f32 %v1606_v4, %v9006_v6 }
 0x2a1   : > { %14856 = vst [vmem:[#allocation75_spill] sm:$0xff] %v9753_v45 }
 0x2a2   : > { %v9769_v56 = vpop.f32.mrf.mxu1  ;;  %v9784_v62 = vpop.f32.mrf.mxu3  ;;  %v1608_v3 = vmin.f32 %v1607_v29, %v9122_v12  ;;  %v14877_v29 = vld [vmem:[#allocation84_spill] sm:$0xff] }
 0x2a3   : > { %14869 = vst [vmem:[#allocation5_spill] sm:$0xff] %v9784_v62 }
 0x2a4   : > { %v1609_v25 = vmin.f32 %v1608_v3, %v9226_v24  ;;  %v14878_v24 = vld [vmem:[#allocation72_spill] sm:$0xff] }
 0x2a6   : > { %v9789_v59 = vpop.f32.mrf.mxu2  ;;  %v1610_v31 = vmin.f32 %v1609_v25, %v9331_v5 }
 0x2a7   : > { %14871 = vst [vmem:[#allocation107_spill] sm:$0xff] %v9789_v59  ;;  %v1633_v59 = vmin.f32 %v14876_v22, %v14875_v33 }
 0x2a8   : > { %v9764_v38 = vpop.f32.mrf.mxu0  ;;  %v1611_v62 = vmin.f32 %v1610_v31, %v9433_v41 }
 0x2a9   : > { %14862 = vst [vmem:[#allocation87_spill] sm:$0xff] %v9764_v38  ;;  %v1634_v12 = vmin.f32 %v1633_v59, %v14877_v29 }
 0x2aa   : > { %v9782_v46 = vpop.f32.mrf.mxu1  ;;  %v9799_v58 = vpop.f32.mrf.mxu3  ;;  %v1612_v4 = vmin.f32 %v1611_v62, %v9535_v50 }
 0x2ab   : > { %14873 = vst [vmem:[#allocation120_spill] sm:$0xff] %v9799_v58  ;;  %v1635_v6 = vmin.f32 %v1634_v12, %v14878_v24  ;;  %v14880_v58 = vld [vmem:[#allocation78_spill] sm:$0xff] }
 0x2ac   : > { %v1613_v3 = vmin.f32 %v1612_v4, %v9639_v35 }
 0x2ad   : > { %v1636_v43 = vmin.f32 %v1635_v6, %v14880_v58 }
 0x2ae   : > { %v9802_v63 = vpop.f32.mrf.mxu2  ;;  %v1614_v5 = vmin.f32 %v1613_v3, %v9727_v20 }
 0x2af   : > { %14874 = vst [vmem:[#allocation124_spill] sm:$0xff] %v9802_v63  ;;  %v14881_v63 = vld [vmem:[#allocation16_spill] sm:$0xff] }
 0x2b0   : > { %v9776_v42 = vpop.f32.mrf.mxu0  ;;  %v1615_v31 = vmin.f32 %v1614_v5, %v9735_v51  ;;  %v1637_v33 = vmin.f32 %v1636_v43, %v14881_v63 }
 0x2b1   : > { %14868 = vst [vmem:[#allocation100_spill] sm:$0xff] %v9776_v42 }
 0x2b2   : > { %v9797_v40 = vpop.f32.mrf.mxu1  ;;  %v9818_v22 = vpop.f32.mrf.mxu3  ;;  %v1616_v59 = vmin.f32 %v1615_v31, %v9741_v55  ;;  %v1638_v12 = vmin.f32 %v1637_v33, %v8641_v23 }
 0x2b3   : > { %14882 = vst [vmem:[#allocation77_spill] sm:$0xff] %v9818_v22 }
 0x2b4   : > { %v1617_v4 = vmin.f32 %v1616_v59, %v9745_v37  ;;  %v1639_v3 = vmin.f32 %v1638_v12, %v8707_v32 }
 0x2b6   : > { %v9821_v62 = vpop.f32.mrf.mxu2  ;;  %v1618_v6 = vmin.f32 %v1617_v4, %v9753_v45  ;;  %v1640_v5 = vmin.f32 %v1639_v3, %v8754_v19 }
 0x2b7   : > { %14883 = vst [vmem:[#allocation46_spill] sm:$0xff] %v9821_v62 }
 0x2b8   : > { %v9786_v52 = vpop.f32.mrf.mxu0  ;;  %v1619_v43 = vmin.f32 %v1618_v6, %v9764_v38  ;;  %v1641_v63 = vmin.f32 %v1640_v5, %v8783_v44 }
 0x2b9   : > { %14870 = vst [vmem:[#allocation106_spill] sm:$0xff] %v9786_v52 }
 0x2ba   : > { %v9815_v41 = vpop.f32.mrf.mxu1  ;;  %v1620_v31 = vmin.f32 %v1619_v43, %v9776_v42  ;;  %v1642_v33 = vmin.f32 %v1641_v63, %v8808_v8  ;;  %v9836_v23 = vpop.f32.mrf.mxu3  ;;  %v14888_v42 = vld [vmem:[#allocation61_spill] sm:$0xff]  ;;  %v14889_v63 = vld [vmem:[#allocation54_spill] sm:$0xff] }
 0x2bb   : > { %14885 = vst [vmem:[#allocation69_spill] sm:$0xff] %v9836_v23  ;;  %v1670_v38 = vmin.f32 %v14889_v63, %v14888_v42  ;;  %v14895_v63 = vld [vmem:[#allocation8_spill] sm:$0xff] }
 0x2bc   : > { %v1621_v12 = vmin.f32 %v1620_v31, %v9786_v52  ;;  %v1643_v4 = vmin.f32 %v1642_v33, %v8888_v9 }
 0x2be   : > { %v9838_v59 = vpop.f32.mrf.mxu2  ;;  %v1644_v6 = vmin.f32 %v1643_v4, %v9008_v57 }
 0x2bf   : > { %14886 = vst [vmem:[#allocation84_spill] sm:$0xff] %v9838_v59 }
 0x2c0   : > { %v9794_v10 = vpop.f32.mrf.mxu0  ;;  %v1645_v43 = vmin.f32 %v1644_v6, %v9124_v17 }
 0x2c1   : > { %14872 = vst [vmem:[#allocation116_spill] sm:$0xff] %v9794_v10  ;;  %v1622_v3 = vmin.f32 %v1621_v12, %v9794_v10 }
 0x2c2   : > { %v9833_v55 = vpop.f32.mrf.mxu1  ;;  %v1646_v44 = vmin.f32 %v1645_v43, %v9228_v1  ;;  %v9856_v12 = vpop.f32.mrf.mxu3 }
 0x2c3   : > { %14891 = vst [vmem:[#allocation126_spill] sm:$0xff] %v9856_v12 }
 0x2c4   : > { %v1647_v52 = vmin.f32 %v1646_v44, %v9333_v53  ;;  %v14896_v53 = vld [vmem:[#allocation82_spill] sm:$0xff] }
 0x2c6   : > { %v9861_v6 = vpop.f32.mrf.mxu2 }
 0x2c7   : > { %14894 = vst [vmem:[#allocation128_spill] sm:$0xff] %v9861_v6 }
 0x2c8   : > { %v9810_v25 = vpop.f32.mrf.mxu0 }
 0x2c9   : > { %14879 = vst [vmem:[#allocation13_spill] sm:$0xff] %v9810_v25  ;;  %v1623_v5 = vmin.f32 %v1622_v3, %v9810_v25  ;;  %v14893_v3 = vld [vmem:[#allocation67_spill] sm:$0xff] }
 0x2ca   : > { %v9852_v31 = vpop.f32.mrf.mxu1  ;;  %v1671_v25 = vmin.f32 %v1670_v38, %v14893_v3 }
 0x2cb   : > { %14890 = vst [vmem:[#allocation125_spill] sm:$0xff] %v9852_v31 }
 0x2cc   : > { %v1672_v1 = vmin.f32 %v1671_v25, %v14895_v63 }
 0x2ce   : > { %v1673_v10 = vmin.f32 %v1672_v1, %v14896_v53 }
 0x2d0   : > { %v9826_v24 = vpop.f32.mrf.mxu0 }
 0x2d1   : > { %14884 = vst [vmem:[#allocation81_spill] sm:$0xff] %v9826_v24  ;;  %v1624_v8 = vmin.f32 %v1623_v5, %v9826_v24  ;;  %v1648_v5 = vmin.f32 %v1647_v52, %v9435_v47  ;;  %v14899_v52 = vld [vmem:[#allocation91_spill] sm:$0xff]  ;;  %v9876_v47 = vpop.f32.mrf.mxu2 }
 0x2d2   : > { %v9870_v17 = vpop.f32.mrf.mxu1  ;;  %14900 = vst [vmem:[#allocation131_spill] sm:$0xff] %v9876_v47 }
 0x2d3   : > { %v1649_v43 = vmin.f32 %v1648_v5, %v9549_v30  ;;  %14897 = vst [vmem:[#allocation129_spill] sm:$0xff] %v9870_v17 }
 0x2d5   : > { %v1650_v44 = vmin.f32 %v1649_v43, %v9677_v16  ;;  %v14903_v43 = vld [vmem:[#allocation29_spill] sm:$0xff]  ;;  %v14905_v16 = vld [vmem:[#allocation42_spill] sm:$0xff] }
 0x2d8   : > { %v9842_v45 = vpop.f32.mrf.mxu0 }
 0x2d9   : > { %14887 = vst [vmem:[#allocation78_spill] sm:$0xff] %v9842_v45  ;;  %v1625_v33 = vmin.f32 %v1624_v8, %v9842_v45  ;;  %v1651_v45 = vmin.f32 %v1650_v44, %v9729_v14 }
 0x2da   : > { %v9889_v57 = vpop.f32.mrf.mxu1 }
 0x2db   : > { %v1652_v3 = vmin.f32 %v1651_v45, %v9737_v11  ;;  %v14904_v11 = vld [vmem:[#allocation88_spill] sm:$0xff]  ;;  %14907 = vst [vmem:[#allocation29_spill] sm:$0xff] %v9889_v57 }
 0x2dd   : > { %v1653_v25 = vmin.f32 %v1652_v3, %v9747_v61  ;;  %v14906_v3 = vld [vmem:[#allocation50_spill] sm:$0xff] }
 0x2df   : > { %v1654_v1 = vmin.f32 %v1653_v25, %v9755_v2 }
 0x2e0   : > { %v9858_v4 = vpop.f32.mrf.mxu0 }
 0x2e1   : > { %14892 = vst [vmem:[#allocation127_spill] sm:$0xff] %v9858_v4  ;;  %v1626_v42 = vmin.f32 %v1625_v33, %v9858_v4  ;;  %v9873_v33 = vpop.f32.mrf.mxu3  ;;  %v1674_v4 = vmin.f32 %v1673_v10, %v14899_v52  ;;  %v1655_v45 = vmin.f32 %v1654_v1, %v9769_v56 }
 0x2e2   : > { %14898 = vst [vmem:[#allocation130_spill] sm:$0xff] %v9873_v33 }
 0x2e3   : > { %v1627_v24 = vrot.slane %v1626_v42, 4  ;;  %v1675_v44 = vmin.f32 %v1674_v4, %v14903_v43  ;;  %v1656_v30 = vmin.f32 %v1655_v45, %v9782_v46 }
 0x2e5   : > { %v1628_v8 = vmin.f32 %v1626_v42, %v1627_v24  ;;  %v14901_v42 = vld [vmem:[#allocation64_spill] sm:$0xff]  ;;  %v1676_v53 = vmin.f32 %v1675_v44, %v8739_v60  ;;  %v1657_v4 = vmin.f32 %v1656_v30, %v9797_v40  ;;  %v9896_v44 = vpop.f32.mrf.mxu2 }
 0x2e6   : > { %v14902_v24 = vld [vmem:[#allocation56_spill] sm:$0xff] }
 0x2e7   : > { %v1629_v38 = vrot.slane %v1628_v8, 2  ;;  %v1707_v5 = vmin.f32 %v14902_v24, %v14901_v42  ;;  %v1677_v10 = vmin.f32 %v1676_v53, %v14905_v16  ;;  %v1658_v53 = vmin.f32 %v1657_v4, %v9815_v41 }
 0x2e9   : > { %v1630_v63 = vmin.f32 %v1628_v8, %v1629_v38  ;;  %v1708_v14 = vmin.f32 %v1707_v5, %v14904_v11  ;;  %v1678_v61 = vmin.f32 %v1677_v10, %v14906_v3  ;;  %v9891_v42 = vpop.f32.mrf.mxu3  ;;  %v14909_v8 = vld [vmem:[#allocation11_spill] sm:$0xff]  ;;  %v1659_v45 = vmin.f32 %v1658_v53, %v9833_v55  ;;  %v14910_v10 = vld [vmem:[#allocation86_spill] sm:$0xff] }
 0x2ea   : > { %14908 = vst [vmem:[#allocation132_spill] sm:$0xff] %v9891_v42  ;;  %v14948_v3 = vld [vmem:[#allocation103_spill] sm:$0xff] }
 0x2eb   : > { %v1631_v52 = vrot.slane %v1630_v63, 1  ;;  %v1709_v38 = vmin.f32 %v1708_v14, %v14909_v8  ;;  %v1679_v25 = vmin.f32 %v1678_v61, %v9042_v39  ;;  %v1660_v30 = vmin.f32 %v1659_v45, %v9852_v31  ;;  %v14911_v61 = vld [vmem:[#allocation21_spill] sm:$0xff]  ;;  %v14932_v31 = vld [vmem:[#allocation96_spill] sm:$0xff] }
 0x2ec   : > { %v14942_v39 = vld [vmem:[#allocation104_spill] sm:$0xff] }
 0x2ed   : > { %v9898_v5 = vmin.f32 %v1630_v63, %v1631_v52  ;;  %v1680_v1 = vmin.f32 %v1679_v25, %v9176_v48  ;;  %v1710_v11 = vmin.f32 %v1709_v38, %v14910_v10  ;;  %v1661_v52 = vmin.f32 %v1660_v30, %v9870_v17  ;;  %v14912_v25 = vld [vmem:[#allocation95_spill] sm:$0xff]  ;;  %v14916_v10 = vld [vmem:[#allocation49_spill] sm:$0xff] }
 0x2ef   : > { %v1681_v24 = vmin.f32 %v1680_v1, %v9311_v13  ;;  %vm1781_vm1 = vcmp.le.f32.partialorder %v14859_v28, %v9898_v5  ;;  %vm1789_vm12 = vcmp.le.f32.partialorder %v14858_v26, %v9898_v5  ;;  %v1711_v14 = vmin.f32 %v1710_v11, %v14911_v61  ;;  %v9919_v28 = vpop.f32.mrf.mxu1  ;;  %v9926_v61 = vpop.f32.mrf.mxu2 }
 0x2f0   : > { %v2037_v4 = vsel %vm1781_vm1, %v7890_v49, 256  ;;  %v2045_v38 = vsel %vm1789_vm12, %v7907_v36, 256  ;;  %vm1797_vm8 = vcmp.le.f32.partialorder %v14861_v0, %v9898_v5  ;;  %14913 = vst [vmem:[#allocation133_spill] sm:$0xff] %v9919_v28  ;;  %v1662_v11 = vmin.f32 %v1661_v52, %v9889_v57  ;;  %v14917_v52 = vld [vmem:[#allocation74_spill] sm:$0xff]  ;;  %v14919_v57 = vld [vmem:[#allocation76_spill] sm:$0xff] }
 0x2f1   : > { %v1682_v63 = vmin.f32 %v1681_v24, %v9437_v54  ;;  %v1712_v53 = vmin.f32 %v1711_v14, %v14912_v25  ;;  %v9921_v26 = vpop.f32.mrf.mxu3  ;;  %v14915_v24 = vld [vmem:[#allocation36_spill] sm:$0xff]  ;;  %vm1805_vm12 = vcmp.le.f32.partialorder %v14863_v21, %v9898_v5  ;;  %vm2573_vm1 = vcmp.lt.s32.totalorder %v2037_v4, %v2045_v38  ;;  %v14920_v21 = vld [vmem:[#allocation62_spill] sm:$0xff] }
 0x2f2   : > { %14914 = vst [vmem:[#allocation134_spill] sm:$0xff] %v9921_v26  ;;  %v2053_v14 = vsel %vm1797_vm8, %v7918_v27, 256  ;;  %v1663_v0 = vmin.f32 %v1662_v11, %v9919_v28  ;;  %vm1813_vm0 = vcmp.le.f32.partialorder %v14917_v52, %v9898_v5  ;;  %v14924_v28 = vld [vmem:[#allocation71_spill] sm:$0xff] }
 0x2f3   : > { %v1683_v1 = vmin.f32 %v1682_v63, %v9565_v7  ;;  %v1713_v45 = vmin.f32 %v1712_v53, %v14915_v24  ;;  %v2574_v63 = vsel %vm2573_vm1, %v2037_v4, %v2045_v38  ;;  %v14918_v53 = vld [vmem:[#allocation110_spill] sm:$0xff]  ;;  %v14922_v4 = vld [vmem:[#allocation111_spill] sm:$0xff] }
 0x2f4   : > { %vm2575_vm6 = vcmp.lt.s32.totalorder %v2574_v63, %v2053_v14  ;;  %v14921_v7 = vld [vmem:[#allocation90_spill] sm:$0xff]  ;;  %v2069_v38 = vsel %vm1813_vm0, %v14922_v4, 256 }
 0x2f5   : > { %v1684_v30 = vmin.f32 %v1683_v1, %v9693_v34  ;;  %v1714_v25 = vmin.f32 %v1713_v45, %v9149_v15  ;;  %v2061_v1 = vsel %vm1805_vm12, %v14918_v53, 256  ;;  %v2576_v24 = vsel %vm2575_vm6, %v2574_v63, %v2053_v14  ;;  %v14925_v14 = vld [vmem:[#allocation14_spill] sm:$0xff] }
 0x2f6   : > { %vm1821_vm8 = vcmp.le.f32.partialorder %v14921_v7, %v9898_v5  ;;  %vm2577_vm1 = vcmp.lt.s32.totalorder %v2576_v24, %v2061_v1  ;;  %v1664_v45 = vrot.slane %v1663_v0, 4  ;;  %vm1829_vm12 = vcmp.le.f32.partialorder %v8639_v18, %v9898_v5 }
 0x2f7   : > { %v1685_v8 = vmin.f32 %v1684_v30, %v14916_v10  ;;  %v1715_v17 = vmin.f32 %v1714_v25, %v14919_v57  ;;  %v2578_v11 = vsel %vm2577_vm1, %v2576_v24, %v2061_v1  ;;  %v14923_v30 = vld [vmem:[#allocation89_spill] sm:$0xff]  ;;  %v2077_v25 = vsel %vm1821_vm8, %v14925_v14, 256  ;;  %v14928_v10 = vld [vmem:[#allocation32_spill] sm:$0xff]  ;;  %v9956_v13 = vpop.f32.mrf.mxu2 }
 0x2f8   : > { %vm2579_vm6 = vcmp.lt.s32.totalorder %v2578_v11, %v2069_v38  ;;  %vm1837_vm0 = vcmp.le.f32.partialorder %v14928_v10, %v9898_v5  ;;  %14933 = vst [vmem:[#allocation110_spill] sm:$0xff] %v9956_v13 }
 0x2f9   : > { %v1686_v34 = vmin.f32 %v1685_v8, %v14920_v21  ;;  %v1716_v15 = vmin.f32 %v1715_v17, %v14923_v30  ;;  %v2580_v63 = vsel %vm2579_vm6, %v2578_v11, %v2069_v38  ;;  %v14926_v8 = vld [vmem:[#allocation25_spill] sm:$0xff]  ;;  %v14927_v21 = vld [vmem:[#allocation83_spill] sm:$0xff]  ;;  %v9951_v24 = vpop.f32.mrf.mxu3  ;;  %v14930_v17 = vld [vmem:[#allocation112_spill] sm:$0xff]  ;;  %v1665_v30 = vmin.f32 %v1663_v0, %v1664_v45 }
 0x2fa   : > { %vm2581_vm1 = vcmp.lt.s32.totalorder %v2580_v63, %v2077_v25  ;;  %14929 = vst [vmem:[#allocation74_spill] sm:$0xff] %v9951_v24  ;;  %v2085_v1 = vsel %vm1829_vm12, %v14930_v17, 256  ;;  %v14935_v38 = vld [vmem:[#allocation113_spill] sm:$0xff] }
 0x2fb   : > { %v1687_v52 = vmin.f32 %v1686_v34, %v14924_v28  ;;  %v1717_v57 = vmin.f32 %v1716_v15, %v14926_v8  ;;  %v2582_v34 = vsel %vm2581_vm1, %v2580_v63, %v2077_v25  ;;  %v14931_v28 = vld [vmem:[#allocation35_spill] sm:$0xff]  ;;  %v14934_v15 = vld [vmem:[#allocation94_spill] sm:$0xff]  ;;  %v2093_v11 = vsel %vm1837_vm0, %v14935_v38, 256  ;;  %v14938_v25 = vld [vmem:[#allocation40_spill] sm:$0xff] }
 0x2fc   : > { %vm1845_vm8 = vcmp.le.f32.partialorder %v14934_v15, %v9898_v5  ;;  %vm2583_vm6 = vcmp.lt.s32.totalorder %v2582_v34, %v2085_v1  ;;  %vm1853_vm12 = vcmp.le.f32.partialorder %v14938_v25, %v9898_v5  ;;  %v1666_v63 = vrot.slane %v1665_v30, 2 }
 0x2fd   : > { %v1688_v7 = vmin.f32 %v1687_v52, %v14927_v21  ;;  %v1718_v18 = vmin.f32 %v1717_v57, %v14931_v28  ;;  %v2584_v10 = vsel %vm2583_vm6, %v2582_v34, %v2085_v1  ;;  %v14936_v52 = vld [vmem:[#allocation44_spill] sm:$0xff]  ;;  %v14937_v21 = vld [vmem:[#allocation107_spill] sm:$0xff]  ;;  %vm1861_vm0 = vcmp.le.f32.partialorder %v14942_v39, %v9898_v5  ;;  %v14943_v1 = vld [vmem:[#allocation114_spill] sm:$0xff] }
 0x2fe   : > { %vm2585_vm1 = vcmp.lt.s32.totalorder %v2584_v10, %v2093_v11  ;;  %v14939_v57 = vld [vmem:[#allocation12_spill] sm:$0xff]  ;;  %v2109_v34 = vsel %vm1853_vm12, %v14943_v1, 256  ;;  %vm1877_vm12 = vcmp.le.f32.partialorder %v14948_v3, %v9898_v5 }
 0x2ff   : > { %v1689_v54 = vmin.f32 %v1688_v7, %v14932_v31  ;;  %v1719_v8 = vmin.f32 %v1718_v18, %v14936_v52  ;;  %v2101_v0 = vsel %vm1845_vm8, %v14939_v57, 256  ;;  %v2586_v45 = vsel %vm2585_vm1, %v2584_v10, %v2093_v11  ;;  %v14940_v7 = vld [vmem:[#allocation55_spill] sm:$0xff]  ;;  %v14941_v31 = vld [vmem:[#allocation124_spill] sm:$0xff]  ;;  %v9985_v16 = vpop.f32.mrf.mxu2 }
 0x300   : > { %vm2587_vm6 = vcmp.lt.s32.totalorder %v2586_v45, %v2101_v0  ;;  %v14946_v11 = vld [vmem:[#allocation115_spill] sm:$0xff]  ;;  %14952 = vst [vmem:[#allocation111_spill] sm:$0xff] %v9985_v16 }
 0x301   : > { %v1690_v48 = vmin.f32 %v1689_v54, %v14937_v21  ;;  %v1720_v28 = vmin.f32 %v1719_v8, %v14940_v7  ;;  %v2588_v18 = vsel %vm2587_vm6, %v2586_v45, %v2101_v0  ;;  %v14944_v54 = vld [vmem:[#allocation68_spill] sm:$0xff]  ;;  %v14945_v21 = vld [vmem:[#allocation47_spill] sm:$0xff]  ;;  %v2117_v10 = vsel %vm1861_vm0, %v14946_v11, 256  ;;  %v9980_v0 = vpop.f32.mrf.mxu3 }
 0x302   : > { %vm1869_vm8 = vcmp.le.f32.partialorder %v14945_v21, %v9898_v5  ;;  %vm2589_vm1 = vcmp.lt.s32.totalorder %v2588_v18, %v2109_v34  ;;  %v1667_v7 = vmin.f32 %v1665_v30, %v1666_v63  ;;  %14949 = vst [vmem:[#allocation90_spill] sm:$0xff] %v9980_v0  ;;  %v14953_v30 = vld [vmem:[#allocation7_spill] sm:$0xff] }
 0x303   : > { %v1691_v15 = vmin.f32 %v1690_v48, %v14941_v31  ;;  %v1721_v52 = vmin.f32 %v1720_v28, %v14944_v54  ;;  %v2590_v8 = vsel %vm2589_vm1, %v2588_v18, %v2109_v34  ;;  %v14947_v48 = vld [vmem:[#allocation79_spill] sm:$0xff]  ;;  %v14950_v28 = vld [vmem:[#allocation17_spill] sm:$0xff]  ;;  %v14951_v54 = vld [vmem:[#allocation92_spill] sm:$0xff]  ;;  %vm1885_vm0 = vcmp.le.f32.partialorder %v14953_v30, %v9898_v5 }
 0x304   : > { %vm2591_vm6 = vcmp.lt.s32.totalorder %v2590_v8, %v2117_v10  ;;  %v2125_v45 = vsel %vm1869_vm8, %v14950_v28, 256  ;;  %v1668_v3 = vrot.slane %v1667_v7, 1  ;;  %v14955_v18 = vld [vmem:[#allocation5_spill] sm:$0xff] }
 0x305   : > { %v1692_v25 = vmin.f32 %v1691_v15, %v9821_v62  ;;  %v1722_v31 = vmin.f32 %v1721_v52, %v14947_v48  ;;  %v2592_v15 = vsel %vm2591_vm6, %v2590_v8, %v2117_v10  ;;  %v14954_v52 = vld [vmem:[#allocation117_spill] sm:$0xff]  ;;  %v14956_v10 = vld [vmem:[#allocation66_spill] sm:$0xff] }
 0x306   : > { %vm2593_vm1 = vcmp.lt.s32.totalorder %v2592_v15, %v2125_v45  ;;  %v2133_v63 = vsel %vm1877_vm12, %v14954_v52, 256  ;;  %vm1893_vm8 = vcmp.le.f32.partialorder %v14956_v10, %v9898_v5 }
 0x307   : > { %v1693_v39 = vmin.f32 %v1692_v25, %v9838_v59  ;;  %v1723_v21 = vmin.f32 %v1722_v31, %v14951_v54  ;;  %v2594_v34 = vsel %vm2593_vm1, %v2592_v15, %v2125_v45  ;;  %v14957_v31 = vld [vmem:[#allocation22_spill] sm:$0xff]  ;;  %v14958_v54 = vld [vmem:[#allocation120_spill] sm:$0xff]  ;;  %v14960_v45 = vld [vmem:[#allocation19_spill] sm:$0xff] }
 0x308   : > { %vm2595_vm6 = vcmp.lt.s32.totalorder %v2594_v34, %v2133_v63  ;;  %v2141_v8 = vsel %vm1885_vm0, %v14957_v31, 256  ;;  %v14959_v59 = vld [vmem:[#allocation80_spill] sm:$0xff]  ;;  %v2149_v15 = vsel %vm1893_vm8, %v14960_v45, 256  ;;  %vm1917_vm8 = vcmp.le.f32.partialorder %v9535_v50, %v9898_v5 }
 0x309   : > { %v1694_v62 = vmin.f32 %v1693_v39, %v9861_v6  ;;  %v1724_v25 = vmin.f32 %v1723_v21, %v14955_v18  ;;  %v2596_v39 = vsel %vm2595_vm6, %v2594_v34, %v2133_v63  ;;  %vm1901_vm12 = vcmp.le.f32.partialorder %v14959_v59, %v9898_v5  ;;  %v14962_v63 = vld [vmem:[#allocation118_spill] sm:$0xff] }
 0x30a   : > { %vm2597_vm1 = vcmp.lt.s32.totalorder %v2596_v39, %v2141_v8  ;;  %v10000_v18 = vmin.f32 %v1667_v7, %v1668_v3  ;;  %v2157_v34 = vsel %vm1901_vm12, %v14962_v63, 256  ;;  %v10011_v7 = vpop.f32.mrf.mxu3 }
 0x30b   : > { %v1695_v48 = vmin.f32 %v1694_v62, %v9876_v47  ;;  %v1725_v6 = vmin.f32 %v1724_v25, %v14958_v54  ;;  %v2598_v21 = vsel %vm2597_vm1, %v2596_v39, %v2141_v8  ;;  %v14961_v47 = vld [vmem:[#allocation93_spill] sm:$0xff]  ;;  %14963 = vst [vmem:[#allocation14_spill] sm:$0xff] %v10011_v7  ;;  %v14965_v39 = vld [vmem:[#allocation48_spill] sm:$0xff] }
 0x30c   : > { %vm1909_vm0 = vcmp.le.f32.partialorder %v14961_v47, %v9898_v5  ;;  %vm2599_vm6 = vcmp.lt.s32.totalorder %v2598_v21, %v2149_v15  ;;  %vm1782_vm7 = vcmp.le.f32.partialorder %v14965_v39, %v10000_v18  ;;  %v14966_v47 = vld [vmem:[#allocation59_spill] sm:$0xff]  ;;  %vm1798_vm13 = vcmp.le.f32.partialorder %v14877_v29, %v10000_v18 }
 0x30d   : > { %v1696_v30 = vmin.f32 %v1695_v48, %v9896_v44  ;;  %v1726_v62 = vmin.f32 %v1725_v6, %v9818_v22  ;;  %v2600_v48 = vsel %vm2599_vm6, %v2598_v21, %v2149_v15  ;;  %v14964_v6 = vld [vmem:[#allocation30_spill] sm:$0xff]  ;;  %vm1790_vm12 = vcmp.le.f32.partialorder %v14966_v47, %v10000_v18  ;;  %v10021_v15 = vpop.f32.mrf.mxu2  ;;  %v14968_v21 = vld [vmem:[#allocation33_spill] sm:$0xff] }
 0x30e   : > { %vm2601_vm1 = vcmp.lt.s32.totalorder %v2600_v48, %v2157_v34  ;;  %v2165_v3 = vsel %vm1909_vm0, %v14964_v6, 256  ;;  %vm1925_vm6 = vcmp.le.f32.partialorder %v9639_v35, %v9898_v5  ;;  %14967 = vst [vmem:[#allocation32_spill] sm:$0xff] %v10021_v15  ;;  %vm1933_vm0 = vcmp.le.f32.partialorder %v9727_v20, %v9898_v5  ;;  %v14969_v35 = vld [vmem:[#allocation119_spill] sm:$0xff] }
 0x30f   : > { %v1697_v10 = vmin.f32 %v1696_v30, %v9926_v61  ;;  %v1727_v25 = vmin.f32 %v1726_v62, %v9836_v23  ;;  %v2602_v8 = vsel %vm2601_vm1, %v2600_v48, %v2157_v34  ;;  %v2173_v62 = vsel %vm1917_vm8, %v14968_v21, 256 }
 0x310   : > { %vm2603_vm3 = vcmp.lt.s32.totalorder %v2602_v8, %v2165_v3  ;;  %vm1941_vm1 = vcmp.le.f32.partialorder %v9735_v51, %v9898_v5  ;;  %v2038_v34 = vsel %vm1782_vm7, %v7890_v49, 256  ;;  %v2046_v48 = vsel %vm1790_vm12, %v7907_v36, 256  ;;  %v14971_v51 = vld [vmem:[#allocation72_spill] sm:$0xff] }
 0x311   : > { %v1698_v59 = vmin.f32 %v1697_v10, %v9956_v13  ;;  %v1728_v30 = vmin.f32 %v1727_v25, %v9856_v12  ;;  %v2604_v10 = vsel %vm2603_vm3, %v2602_v8, %v2165_v3  ;;  %v2181_v25 = vsel %vm1925_vm6, %v14969_v35, 256  ;;  %v14970_v3 = vld [vmem:[#allocation37_spill] sm:$0xff]  ;;  %v14972_v12 = vld [vmem:[#allocation24_spill] sm:$0xff] }
 0x312   : > { %vm2605_vm4 = vcmp.lt.s32.totalorder %v2604_v10, %v2173_v62  ;;  %v2189_v8 = vsel %vm1933_vm0, %v14970_v3, 256  ;;  %vm1806_vm3 = vcmp.le.f32.partialorder %v14971_v51, %v10000_v18  ;;  %vm2644_vm7 = vcmp.lt.s32.totalorder %v2038_v34, %v2046_v48 }
 0x313   : > { %v1699_v50 = vmin.f32 %v1698_v59, %v9985_v16  ;;  %v2606_v39 = vsel %vm2605_vm4, %v2604_v10, %v2173_v62  ;;  %v1729_v20 = vmin.f32 %v1728_v30, %v9873_v33  ;;  %v2197_v23 = vsel %vm1941_vm1, %v14972_v12, 256  ;;  %v14973_v30 = vld [vmem:[#allocation58_spill] sm:$0xff]  ;;  %v14975_v33 = vld [vmem:[#allocation16_spill] sm:$0xff]  ;;  %v15005_v16 = vld [vmem:[#allocation65_spill] sm:$0xff] }
 0x314   : > { %vm2607_vm8 = vcmp.lt.s32.totalorder %v2606_v39, %v2181_v25  ;;  %v2054_v62 = vsel %vm1798_vm13, %v7918_v27, 256  ;;  %v2645_v10 = vsel %vm2644_vm7, %v2038_v34, %v2046_v48  ;;  %vm1814_vm4 = vcmp.le.f32.partialorder %v14880_v58, %v10000_v18 }
 0x315   : > { %v1700_v59 = vmin.f32 %v1699_v50, %v10021_v15  ;;  %v2608_v47 = vsel %vm2607_vm8, %v2606_v39, %v2181_v25  ;;  %vm2646_vm6 = vcmp.lt.s32.totalorder %v2645_v10, %v2054_v62  ;;  %vm1949_vm0 = vcmp.le.f32.partialorder %v14973_v30, %v9898_v5  ;;  %v10046_v39 = vpop.f32.mrf.mxu3  ;;  %v14977_v30 = vld [vmem:[#allocation26_spill] sm:$0xff] }
 0x316   : > { %vm2609_vm12 = vcmp.lt.s32.totalorder %v2608_v47, %v2189_v8  ;;  %v2062_v50 = vsel %vm1806_vm3, %v14918_v53, 256  ;;  %v2647_v25 = vsel %vm2646_vm6, %v2645_v10, %v2054_v62  ;;  %14974 = vst [vmem:[#allocation112_spill] sm:$0xff] %v10046_v39  ;;  %vm1822_vm13 = vcmp.le.f32.partialorder %v14975_v33, %v10000_v18 }
 0x317   : > { %v2610_v22 = vsel %vm2609_vm12, %v2608_v47, %v2189_v8  ;;  %v1701_v29 = vrot.slane %v1700_v59, 4  ;;  %vm2648_vm1 = vcmp.lt.s32.totalorder %v2647_v25, %v2062_v50  ;;  %v1730_v34 = vmin.f32 %v1729_v20, %v9891_v42  ;;  %v14976_v8 = vld [vmem:[#allocation121_spill] sm:$0xff] }
 0x318   : > { %vm2611_vm8 = vcmp.lt.s32.totalorder %v2610_v22, %v2197_v23  ;;  %v2070_v58 = vsel %vm1814_vm4, %v14922_v4, 256  ;;  %v2649_v48 = vsel %vm2648_vm1, %v2647_v25, %v2062_v50  ;;  %v2205_v47 = vsel %vm1949_vm0, %v14976_v8, 256 }
 0x319   : > { %v2612_v51 = vsel %vm2611_vm8, %v2610_v22, %v2197_v23  ;;  %vm1830_vm7 = vcmp.le.f32.partialorder %v14977_v30, %v10000_v18  ;;  %vm2650_vm12 = vcmp.lt.s32.totalorder %v2649_v48, %v2070_v58  ;;  %v1702_v54 = vmin.f32 %v1700_v59, %v1701_v29  ;;  %v14981_v30 = vld [vmem:[#allocation45_spill] sm:$0xff] }
 0x31a   : > { %v1731_v62 = vmin.f32 %v1730_v34, %v9921_v26  ;;  %vm2613_vm3 = vcmp.lt.s32.totalorder %v2612_v51, %v2205_v47  ;;  %v2078_v23 = vsel %vm1822_vm13, %v14925_v14, 256  ;;  %v2651_v22 = vsel %vm2650_vm12, %v2649_v48, %v2070_v58  ;;  %v14978_v34 = vld [vmem:[#allocation122_spill] sm:$0xff] }
 0x31b   : > { %vm1838_vm6 = vcmp.le.f32.partialorder %v8707_v32, %v10000_v18  ;;  %vm2652_vm8 = vcmp.lt.s32.totalorder %v2651_v22, %v2078_v23  ;;  %vm1957_vm4 = vcmp.le.f32.partialorder %v9745_v37, %v9898_v5  ;;  %v2086_v20 = vsel %vm1830_vm7, %v14930_v17, 256  ;;  %v14979_v48 = vld [vmem:[#allocation98_spill] sm:$0xff] }
 0x31c   : > { %v1732_v33 = vmin.f32 %v1731_v62, %v9951_v24  ;;  %v2653_v10 = vsel %vm2652_vm8, %v2651_v22, %v2078_v23  ;;  %v2614_v50 = vsel %vm2613_vm3, %v2612_v51, %v2205_v47  ;;  %vm1846_vm0 = vcmp.le.f32.partialorder %v8754_v19, %v10000_v18  ;;  %v14982_v22 = vld [vmem:[#allocation75_spill] sm:$0xff] }
 0x31d   : > { %vm2654_vm1 = vcmp.lt.s32.totalorder %v2653_v10, %v2086_v20  ;;  %v1703_v59 = vrot.slane %v1702_v54, 2  ;;  %v2094_v25 = vsel %vm1838_vm6, %v14935_v38, 256  ;;  %v2213_v58 = vsel %vm1957_vm4, %v14978_v34, 256  ;;  %v10072_v19 = vpop.f32.mrf.mxu3 }
 0x31e   : > { %v1733_v29 = vmin.f32 %v1732_v33, %v9980_v0  ;;  %v2655_v32 = vsel %vm2654_vm1, %v2653_v10, %v2086_v20  ;;  %vm1854_vm13 = vcmp.le.f32.partialorder %v14979_v48, %v10000_v18  ;;  %vm2615_vm7 = vcmp.lt.s32.totalorder %v2614_v50, %v2213_v58  ;;  %14980 = vst [vmem:[#allocation94_spill] sm:$0xff] %v10072_v19  ;;  %v14984_v48 = vld [vmem:[#allocation53_spill] sm:$0xff]  ;;  %v15002_v0 = vld [vmem:[#allocation6_spill] sm:$0xff] }
 0x31f   : > { %vm2656_vm12 = vcmp.lt.s32.totalorder %v2655_v32, %v2094_v25  ;;  %v2102_v51 = vsel %vm1846_vm0, %v14939_v57, 256  ;;  %vm1862_vm3 = vcmp.le.f32.partialorder %v14981_v30, %v10000_v18  ;;  %v1704_v62 = vmin.f32 %v1702_v54, %v1703_v59  ;;  %v14983_v54 = vld [vmem:[#allocation123_spill] sm:$0xff]  ;;  %v14988_v30 = vld [vmem:[#allocation57_spill] sm:$0xff] }
 0x320   : > { %v1734_v37 = vmin.f32 %v1733_v29, %v10011_v7  ;;  %v2657_v47 = vsel %vm2656_vm12, %v2655_v32, %v2094_v25  ;;  %vm1965_vm6 = vcmp.le.f32.partialorder %v14982_v22, %v9898_v5  ;;  %v2110_v33 = vsel %vm1854_vm13, %v14943_v1, 256  ;;  %v14990_v22 = vld [vmem:[#allocation13_spill] sm:$0xff] }
 0x321   : > { %vm2658_vm8 = vcmp.lt.s32.totalorder %v2657_v47, %v2102_v51  ;;  %v2616_v10 = vsel %vm2615_vm7, %v2614_v50, %v2213_v58  ;;  %vm1870_vm4 = vcmp.le.f32.partialorder %v8888_v9, %v10000_v18  ;;  %v2118_v25 = vsel %vm1862_vm3, %v14946_v11, 256  ;;  %v14986_v58 = vld [vmem:[#allocation100_spill] sm:$0xff] }
 0x322   : > { %v1735_v23 = vmin.f32 %v1734_v37, %v10046_v39  ;;  %v2659_v20 = vsel %vm2658_vm8, %v2657_v47, %v2102_v51  ;;  %v2221_v59 = vsel %vm1965_vm6, %v14983_v54, 256  ;;  %vm1878_vm1 = vcmp.le.f32.partialorder %v14984_v48, %v10000_v18  ;;  %v14985_v51 = vld [vmem:[#allocation87_spill] sm:$0xff]  ;;  %v14987_v47 = vld [vmem:[#allocation106_spill] sm:$0xff] }
 0x323   : > { %vm2660_vm0 = vcmp.lt.s32.totalorder %v2659_v20, %v2110_v33  ;;  %v1705_v37 = vrot.slane %v1704_v62, 1  ;;  %vm1973_vm13 = vcmp.le.f32.partialorder %v14985_v51, %v9898_v5  ;;  %vm2617_vm7 = vcmp.lt.s32.totalorder %v2616_v10, %v2221_v59  ;;  %v14994_v39 = vld [vmem:[#allocation23_spill] sm:$0xff] }
 0x324   : > { %v10083_v29 = vmin.f32 %v1735_v23, %v10072_v19  ;;  %v2661_v32 = vsel %vm2660_vm0, %v2659_v20, %v2110_v33  ;;  %v2126_v9 = vsel %vm1870_vm4, %v14950_v28, 256  ;;  %vm1981_vm8 = vcmp.le.f32.partialorder %v14986_v58, %v9898_v5  ;;  %v14989_v23 = vld [vmem:[#allocation116_spill] sm:$0xff]  ;;  %v14992_v58 = vld [vmem:[#allocation27_spill] sm:$0xff] }
 0x325   : > { %vm2662_vm12 = vcmp.lt.s32.totalorder %v2661_v32, %v2118_v25  ;;  %vm1989_vm3 = vcmp.le.f32.partialorder %v14987_v47, %v9898_v5  ;;  %vm1886_vm6 = vcmp.le.f32.partialorder %v14988_v30, %v10000_v18  ;;  %vm1997_vm10 = vcmp.le.f32.partialorder %v14989_v23, %v9898_v5  ;;  %v14993_v30 = vld [vmem:[#allocation18_spill] sm:$0xff] }
 0x326   : > { %v2663_v50 = vsel %vm2662_vm12, %v2661_v32, %v2118_v25  ;;  %vm2005_vm5 = vcmp.le.f32.partialorder %v14990_v22, %v9898_v5  ;;  %v2134_v33 = vsel %vm1878_vm1, %v14954_v52, 256  ;;  %v2618_v25 = vsel %vm2617_vm7, %v2616_v10, %v2221_v59  ;;  %v14991_v32 = vld [vmem:[#allocation70_spill] sm:$0xff]  ;;  %v14995_v10 = vld [vmem:[#allocation31_spill] sm:$0xff] }
 0x327   : > { %vm2664_vm0 = vcmp.lt.s32.totalorder %v2663_v50, %v2126_v9  ;;  %vm1894_vm4 = vcmp.le.f32.partialorder %v14991_v32, %v10000_v18  ;;  %v10105_v48 = vmin.f32 %v1704_v62, %v1705_v37  ;;  %v2229_v47 = vsel %vm1973_vm13, %v14992_v58, 256  ;;  %v14997_v62 = vld [vmem:[#allocation34_spill] sm:$0xff]  ;;  %v14998_v32 = vld [vmem:[#allocation97_spill] sm:$0xff] }
 0x328   : > { %v2665_v20 = vsel %vm2664_vm0, %v2663_v50, %v2126_v9  ;;  %v2237_v23 = vsel %vm1981_vm8, %v14993_v30, 256  ;;  %v2142_v19 = vsel %vm1886_vm6, %v14957_v31, 256  ;;  %v10114_v7 = vsel %vm1989_vm3, %v14994_v39, 256  ;;  %v14996_v9 = vld [vmem:[#allocation85_spill] sm:$0xff] }
 0x329   : > { %vm2666_vm12 = vcmp.lt.s32.totalorder %v2665_v20, %v2134_v33  ;;  %v10117_v59 = vsel %vm1997_vm10, %v14995_v10, 256  ;;  %vm1902_vm1 = vcmp.le.f32.partialorder %v14996_v9, %v10000_v18  ;;  %v10122_v37 = vsel %vm2005_vm5, %v14997_v62, 256  ;;  %v15001_v9 = vld [vmem:[#allocation102_spill] sm:$0xff] }
 0x32a   : > { %v2667_v22 = vsel %vm2666_vm12, %v2665_v20, %v2134_v33  ;;  %vm2619_vm0 = vcmp.lt.s32.totalorder %v2618_v25, %v2229_v47  ;;  %v2150_v51 = vsel %vm1894_vm4, %v14960_v45, 256  ;;  %vm1910_vm13 = vcmp.le.f32.partialorder %v14998_v32, %v10000_v18  ;;  %v14999_v33 = vld [vmem:[#allocation54_spill] sm:$0xff]  ;;  %v15000_v20 = vld [vmem:[#allocation61_spill] sm:$0xff]  ;;  %v15004_v32 = vld [vmem:[#allocation52_spill] sm:$0xff] }
 0x32b   : > { %vm2668_vm7 = vcmp.lt.s32.totalorder %v2667_v22, %v2142_v19  ;;  %vm1783_vm3 = vcmp.le.f32.partialorder %v14999_v33, %v10105_v48  ;;  %vm1791_vm10 = vcmp.le.f32.partialorder %v15000_v20, %v10105_v48  ;;  %vm1918_vm6 = vcmp.le.f32.partialorder %v15001_v9, %v10000_v18 }
 0x32c   : > { %v2669_v50 = vsel %vm2668_vm7, %v2667_v22, %v2142_v19  ;;  %vm1926_vm5 = vcmp.le.f32.partialorder %v15002_v0, %v10000_v18  ;;  %v2158_v24 = vsel %vm1902_vm1, %v14962_v63, 256  ;;  %v2620_v19 = vsel %vm2619_vm0, %v2618_v25, %v2229_v47  ;;  %v15003_v22 = vld [vmem:[#allocation41_spill] sm:$0xff]  ;;  %v15006_v25 = vld [vmem:[#allocation67_spill] sm:$0xff]  ;;  %v15007_v47 = vld [vmem:[#allocation8_spill] sm:$0xff] }
 0x32d   : > { %vm2670_vm8 = vcmp.lt.s32.totalorder %v2669_v50, %v2150_v51  ;;  %vm1934_vm4 = vcmp.le.f32.partialorder %v15003_v22, %v10000_v18  ;;  %vm1942_vm12 = vcmp.le.f32.partialorder %v15004_v32, %v10000_v18  ;;  %v2166_v33 = vsel %vm1910_vm13, %v14964_v6, 256  ;;  %v10189_v32 = vpop.f32.mrf.mxu3 }
 0x32e   : > { %v2671_v26 = vsel %vm2670_vm8, %v2669_v50, %v2150_v51  ;;  %v2039_v42 = vsel %vm1783_vm3, %v7890_v49, 256  ;;  %v2047_v15 = vsel %vm1791_vm10, %v7907_v36, 256  ;;  %vm1950_vm11 = vcmp.le.f32.partialorder %v15005_v16, %v10000_v18 }
 0x32f   : > { %vm2672_vm7 = vcmp.lt.s32.totalorder %v2671_v26, %v2158_v24  ;;  %vm1958_vm1 = vcmp.le.f32.partialorder %v9755_v2, %v10000_v18  ;;  %vm1799_vm8 = vcmp.le.f32.partialorder %v15006_v25, %v10105_v48  ;;  %vm2621_vm15 = vcmp.lt.s32.totalorder %v2620_v19, %v2237_v23 }
 0x330   : > { %v2673_v20 = vsel %vm2672_vm7, %v2671_v26, %v2158_v24  ;;  %vm1966_vm2 = vcmp.le.f32.partialorder %v9769_v56, %v10000_v18  ;;  %v2174_v26 = vsel %vm1918_vm6, %v14968_v21, 256  ;;  %vm1974_vm13 = vcmp.le.f32.partialorder %v9782_v46, %v10000_v18  ;;  %v15011_v56 = vld [vmem:[#allocation50_spill] sm:$0xff] }
 0x331   : > { %vm2674_vm0 = vcmp.lt.s32.totalorder %v2673_v20, %v2166_v33  ;;  %vm1807_vm10 = vcmp.le.f32.partialorder %v15007_v47, %v10105_v48  ;;  %vm2715_vm7 = vcmp.lt.s32.totalorder %v2039_v42, %v2047_v15  ;;  %v2182_v51 = vsel %vm1926_vm5, %v14969_v35, 256 }
 0x332   : > { %v2675_v24 = vsel %vm2674_vm0, %v2673_v20, %v2166_v33  ;;  %v2055_v25 = vsel %vm1799_vm8, %v7918_v27, 256  ;;  %v2716_v13 = vsel %vm2715_vm7, %v2039_v42, %v2047_v15  ;;  %v2622_v9 = vsel %vm2621_vm15, %v2620_v19, %v2237_v23  ;;  %v15008_v33 = vld [vmem:[#allocation82_spill] sm:$0xff]  ;;  %v15009_v15 = vld [vmem:[#allocation91_spill] sm:$0xff] }
 0x333   : > { %vm2676_vm3 = vcmp.lt.s32.totalorder %v2675_v24, %v2174_v26  ;;  %vm1815_vm0 = vcmp.le.f32.partialorder %v15008_v33, %v10105_v48  ;;  %vm2717_vm14 = vcmp.lt.s32.totalorder %v2716_v13, %v2055_v25  ;;  %vm1982_vm9 = vcmp.le.f32.partialorder %v9797_v40, %v10000_v18 }
 0x334   : > { %v2677_v50 = vsel %vm2676_vm3, %v2675_v24, %v2174_v26  ;;  %v2190_v20 = vsel %vm1934_vm4, %v14970_v3, 256  ;;  %v2063_v26 = vsel %vm1807_vm10, %v14918_v53, 256  ;;  %v2718_v24 = vsel %vm2717_vm14, %v2716_v13, %v2055_v25 }
 0x335   : > { %vm2678_vm6 = vcmp.lt.s32.totalorder %v2677_v50, %v2182_v51  ;;  %v2198_v42 = vsel %vm1942_vm12, %v14972_v12, 256  ;;  %vm1823_vm5 = vcmp.le.f32.partialorder %v15009_v15, %v10105_v48  ;;  %vm2719_vm8 = vcmp.lt.s32.totalorder %v2718_v24, %v2063_v26 }
 0x336   : > { %v2679_v0 = vsel %vm2678_vm6, %v2677_v50, %v2182_v51  ;;  %vm2623_vm3 = vcmp.lt.s32.totalorder %v2622_v9, %v10114_v7  ;;  %vm1990_vm7 = vcmp.le.f32.partialorder %v9815_v41, %v10000_v18  ;;  %v2071_v19 = vsel %vm1815_vm0, %v14922_v4, 256  ;;  %v15014_v41 = vld [vmem:[#allocation15_spill] sm:$0xff] }
 0x337   : > { %vm2680_vm15 = vcmp.lt.s32.totalorder %v2679_v0, %v2190_v20  ;;  %v2720_v22 = vsel %vm2719_vm8, %v2718_v24, %v2063_v26  ;;  %v2206_v13 = vsel %vm1950_vm11, %v14976_v8, 256  ;;  %vm1831_vm4 = vcmp.le.f32.partialorder %v14903_v43, %v10105_v48 }
 0x338   : > { %v2681_v23 = vsel %vm2680_vm15, %v2679_v0, %v2190_v20  ;;  %vm2721_vm12 = vcmp.lt.s32.totalorder %v2720_v22, %v2071_v19  ;;  %v2214_v47 = vsel %vm1958_vm1, %v14978_v34, 256  ;;  %v2079_v50 = vsel %vm1823_vm5, %v14925_v14, 256 }
 0x339   : > { %vm2682_vm14 = vcmp.lt.s32.totalorder %v2681_v23, %v2198_v42  ;;  %v2722_v25 = vsel %vm2721_vm12, %v2720_v22, %v2071_v19  ;;  %v2624_v33 = vsel %vm2623_vm3, %v2622_v9, %v10114_v7  ;;  %vm1998_vm11 = vcmp.le.f32.partialorder %v9833_v55, %v10000_v18  ;;  %v15010_v9 = vld [vmem:[#allocation42_spill] sm:$0xff]  ;;  %v15012_v19 = vld [vmem:[#allocation105_spill] sm:$0xff]  ;;  %v10228_v22 = vld [vmem:[%s13840_s2] sm:$0xff] }
 0x33a   : > { %v2683_v51 = vsel %vm2682_vm14, %v2681_v23, %v2198_v42  ;;  %vm1839_vm6 = vcmp.le.f32.partialorder %v8739_v60, %v10105_v48  ;;  %vm2723_vm0 = vcmp.lt.s32.totalorder %v2722_v25, %v2079_v50  ;;  %v2087_v43 = vsel %vm1831_vm4, %v14930_v17, 256  ;;  %3699 = vmatmul.f32.vlgmr.msra.gmra.mxu2 %v10228_v22  ;;  %3641 = vmatmul.f32.vlgmr.msra.gmra.mxu0 %v10228_v22  ;;  %v15017_v55 = vld [vmem:[#allocation125_spill] sm:$0xff] }
 0x33b   : > { %vm2684_vm10 = vcmp.lt.s32.totalorder %v2683_v51, %v2206_v13  ;;  %v2724_v20 = vsel %vm2723_vm0, %v2722_v25, %v2079_v50  ;;  %v1737_v2 = vmin.f32 %v10083_v29, %v10189_v32  ;;  %v2222_v7 = vsel %vm1966_vm2, %v14983_v54, 256 }
 0x33c   : > { %v2685_v16 = vsel %vm2684_vm10, %v2683_v51, %v2206_v13  ;;  %vm1847_vm15 = vcmp.le.f32.partialorder %v15010_v9, %v10105_v48  ;;  %vm2725_vm5 = vcmp.lt.s32.totalorder %v2724_v20, %v2087_v43  ;;  %v2230_v60 = vsel %vm1974_vm13, %v14992_v58, 256  ;;  %v10233_v13 = vld [vmem:[%s13840_s2 + $0x8] sm:$0xff] }
 0x33d   : > { %vm2686_vm1 = vcmp.lt.s32.totalorder %v2685_v16, %v2214_v47  ;;  %v2095_v26 = vsel %vm1839_vm6, %v14935_v38, 256  ;;  %v2726_v24 = vsel %vm2725_vm5, %v2724_v20, %v2087_v43  ;;  %vm2625_vm8 = vcmp.lt.s32.totalorder %v2624_v33, %v10117_v59  ;;  %3728 = vmatmul.f32.vlgmr.msra.gmra.mxu3 %v10233_v13  ;;  %3670 = vmatmul.f32.vlgmr.msra.gmra.mxu1 %v10233_v13 }
 0x33e   : > { %v2687_v0 = vsel %vm2686_vm1, %v2685_v16, %v2214_v47  ;;  %vm1855_vm2 = vcmp.le.f32.partialorder %v15011_v56, %v10105_v48  ;;  %vm2727_vm14 = vcmp.lt.s32.totalorder %v2726_v24, %v2095_v26  ;;  %v2103_v42 = vsel %vm1847_vm15, %v14939_v57, 256  ;;  %v15013_v16 = vld [vmem:[#allocation63_spill] sm:$0xff] }
 0x33f   : > { %vm2688_vm3 = vcmp.lt.s32.totalorder %v2687_v0, %v2222_v7  ;;  %v2728_v15 = vsel %vm2727_vm14, %v2726_v24, %v2095_v26  ;;  %v1738_v23 = vrot.slane %v1737_v2, 4  ;;  %v2238_v46 = vsel %vm1982_vm9, %v14993_v30, 256  ;;  %v15016_v26 = vld [vmem:[#allocation20_spill] sm:$0xff] }
 0x340   : > { %v2689_v29 = vsel %vm2688_vm3, %v2687_v0, %v2222_v7  ;;  %vm1863_vm4 = vcmp.le.f32.partialorder %v15012_v19, %v10105_v48  ;;  %vm2729_vm12 = vcmp.lt.s32.totalorder %v2728_v15, %v2103_v42  ;;  %v2626_v47 = vsel %vm2625_vm8, %v2624_v33, %v10117_v59  ;;  %v15015_v0 = vld [vmem:[#allocation81_spill] sm:$0xff] }
 0x341   : > { %vm2690_vm13 = vcmp.lt.s32.totalorder %v2689_v29, %v2230_v60  ;;  %v2111_v40 = vsel %vm1855_vm2, %v14943_v1, 256  ;;  %v2730_v50 = vsel %vm2729_vm12, %v2728_v15, %v2103_v42  ;;  %v2246_v25 = vsel %vm1990_vm7, %v14994_v39, 256  ;;  %v15018_v15 = vld [vmem:[#allocation28_spill] sm:$0xff] }
 0x342   : > { %v2691_v51 = vsel %vm2690_vm13, %v2689_v29, %v2230_v60  ;;  %vm1871_vm10 = vcmp.le.f32.partialorder %v15013_v16, %v10105_v48  ;;  %vm2731_vm6 = vcmp.lt.s32.totalorder %v2730_v50, %v2111_v40  ;;  %v2119_v59 = vsel %vm1863_vm4, %v14946_v11, 256 }
 0x343   : > { %vm2692_vm9 = vcmp.lt.s32.totalorder %v2691_v51, %v2238_v46  ;;  %v2732_v33 = vsel %vm2731_vm6, %v2730_v50, %v2111_v40  ;;  %v1739_v20 = vmin.f32 %v1737_v2, %v1738_v23  ;;  %vm2627_vm0 = vcmp.lt.s32.totalorder %v2626_v47, %v10122_v37  ;;  %v10269_v23 = vld [vmem:[%s13840_s2 + $0x10] sm:$0xff]  ;;  %v15020_v50 = vld [vmem:[#allocation78_spill] sm:$0xff] }
 0x344   : > { %v2693_v43 = vsel %vm2692_vm9, %v2691_v51, %v2238_v46  ;;  %vm1879_vm7 = vcmp.le.f32.partialorder %v15014_v41, %v10105_v48  ;;  %vm2733_vm15 = vcmp.lt.s32.totalorder %v2732_v33, %v2119_v59  ;;  %v2254_v7 = vsel %vm1998_vm11, %v14995_v10, 256  ;;  %v15019_v46 = vld [vmem:[#allocation38_spill] sm:$0xff]  ;;  %3702 = vmatmul.f32.gmra.mxu2 %v10269_v23  ;;  %3644 = vmatmul.f32.gmra.mxu0 %v10269_v23  ;;  %v15022_v41 = vld [vmem:[#allocation49_spill] sm:$0xff] }
 0x345   : > { %vm2694_vm1 = vcmp.lt.s32.totalorder %v2693_v43, %v2246_v25  ;;  %v2127_v60 = vsel %vm1871_vm10, %v14950_v28, 256  ;;  %v2734_v2 = vsel %vm2733_vm15, %v2732_v33, %v2119_v59  ;;  %vm2013_vm5 = vcmp.le.f32.partialorder %v15015_v0, %v9898_v5 }
 0x346   : > { %v2695_v9 = vsel %vm2694_vm1, %v2693_v43, %v2246_v25  ;;  %vm1887_vm3 = vcmp.le.f32.partialorder %v15016_v26, %v10105_v48  ;;  %vm2735_vm2 = vcmp.lt.s32.totalorder %v2734_v2, %v2127_v60  ;;  %v2628_v24 = vsel %vm2627_vm0, %v2626_v47, %v10122_v37  ;;  %v10274_v37 = vld [vmem:[%s13840_s2 + $0x18] sm:$0xff]  ;;  %v15021_v25 = vld [vmem:[#allocation39_spill] sm:$0xff] }
 0x347   : > { %vm2696_vm8 = vcmp.lt.s32.totalorder %v2695_v9, %v2254_v7  ;;  %v2135_v56 = vsel %vm1879_vm7, %v14954_v52, 256  ;;  %v2736_v29 = vsel %vm2735_vm2, %v2734_v2, %v2127_v60  ;;  %v1740_v42 = vrot.slane %v1739_v20, 2  ;;  %3731 = vmatmul.f32.gmra.mxu3 %v10274_v37  ;;  %3673 = vmatmul.f32.gmra.mxu1 %v10274_v37  ;;  %v15023_v2 = vld [vmem:[#allocation43_spill] sm:$0xff]  ;;  %v15025_v26 = vld [vmem:[#allocation62_spill] sm:$0xff] }
 0x348   : > { %vm2006_vm11 = vcmp.le.f32.partialorder %v15017_v55, %v10000_v18  ;;  %vm1895_vm14 = vcmp.le.f32.partialorder %v15018_v15, %v10105_v48  ;;  %vm2737_vm13 = vcmp.lt.s32.totalorder %v2736_v29, %v2135_v56  ;;  %v2269_v19 = vsel %vm2013_vm5, %v15019_v46, 256  ;;  %v15026_v55 = vld [vmem:[#allocation127_spill] sm:$0xff] }
 0x349   : > { %v2697_v47 = vsel %vm2696_vm8, %v2695_v9, %v2254_v7  ;;  %v2143_v51 = vsel %vm1887_vm3, %v14957_v31, 256  ;;  %v2738_v40 = vsel %vm2737_vm13, %v2736_v29, %v2135_v56  ;;  %vm2021_vm4 = vcmp.le.f32.partialorder %v15020_v50, %v9898_v5  ;;  %v15027_v15 = vld [vmem:[#allocation71_spill] sm:$0xff] }
 0x34a   : > { %vm2629_vm12 = vcmp.lt.s32.totalorder %v2628_v24, %v2269_v19  ;;  %vm1903_vm9 = vcmp.le.f32.partialorder %v15021_v25, %v10105_v48  ;;  %vm2739_vm10 = vcmp.lt.s32.totalorder %v2738_v40, %v2143_v51  ;;  %v2262_v16 = vsel %vm2006_vm11, %v14997_v62, 256 }
 0x34b   : > { %v2151_v43 = vsel %vm1895_vm14, %v14960_v45, 256  ;;  %v2740_v59 = vsel %vm2739_vm10, %v2738_v40, %v2143_v51  ;;  %v1741_v33 = vmin.f32 %v1739_v20, %v1740_v42  ;;  %vm2698_vm6 = vcmp.lt.s32.totalorder %v2697_v47, %v2262_v16  ;;  %v15024_v20 = vld [vmem:[#allocation129_spill] sm:$0xff] }
 0x34c   : > { %vm1911_vm0 = vcmp.le.f32.partialorder %v15022_v41, %v10105_v48  ;;  %vm2741_vm1 = vcmp.lt.s32.totalorder %v2740_v59, %v2151_v43  ;;  %v2630_v7 = vsel %vm2629_vm12, %v2628_v24, %v2269_v19  ;;  %v2159_v9 = vsel %vm1903_vm9, %v14962_v63, 256  ;;  %v10307_v19 = vld [vmem:[%s13840_s2 + $0x20] sm:$0xff]  ;;  %v15028_v51 = vld [vmem:[#allocation29_spill] sm:$0xff] }
 0x34d   : > { %v2742_v60 = vsel %vm2741_vm1, %v2740_v59, %v2151_v43  ;;  %v2277_v0 = vsel %vm2021_vm4, %v15023_v2, 256  ;;  %vm2014_vm7 = vcmp.le.f32.partialorder %v15024_v20, %v10000_v18  ;;  %vm1919_vm15 = vcmp.le.f32.partialorder %v15025_v26, %v10105_v48  ;;  %3705 = vmatmul.f32.gmra.mxu2 %v10307_v19  ;;  %v15030_v43 = vld [vmem:[#allocation83_spill] sm:$0xff]  ;;  %3647 = vmatmul.f32.gmra.mxu0 %v10307_v19 }
 0x34e   : > { %vm2743_vm5 = vcmp.lt.s32.totalorder %v2742_v60, %v2159_v9  ;;  %v2699_v56 = vsel %vm2698_vm6, %v2697_v47, %v2262_v16  ;;  %v2167_v29 = vsel %vm1911_vm0, %v14964_v6, 256  ;;  %v1742_v24 = vrot.slane %v1741_v33, 1  ;;  %v10312_v47 = vld [vmem:[%s13840_s2 + $0x28] sm:$0xff]  ;;  %v15029_v16 = vld [vmem:[#allocation133_spill] sm:$0xff]  ;;  %v15031_v20 = vld [vmem:[#allocation51_spill] sm:$0xff] }
 0x34f   : > { %v2744_v42 = vsel %vm2743_vm5, %v2742_v60, %v2159_v9  ;;  %vm2029_vm8 = vcmp.le.f32.partialorder %v15026_v55, %v9898_v5  ;;  %vm2631_vm3 = vcmp.lt.s32.totalorder %v2630_v7, %v2277_v0  ;;  %vm1927_vm2 = vcmp.le.f32.partialorder %v15027_v15, %v10105_v48  ;;  %3734 = vmatmul.f32.gmra.mxu3 %v10312_v47  ;;  %v15033_v5 = vld [vmem:[#allocation107_spill] sm:$0xff]  ;;  %v15034_v55 = vld [vmem:[#allocation124_spill] sm:$0xff] }
 0x350   : > { %vm2745_vm11 = vcmp.lt.s32.totalorder %v2744_v42, %v2167_v29  ;;  %vm2022_vm14 = vcmp.le.f32.partialorder %v15028_v51, %v10000_v18  ;;  %v2270_v40 = vsel %vm2014_vm7, %v15019_v46, 256  ;;  %v2175_v50 = vsel %vm1919_vm15, %v14968_v21, 256  ;;  %3676 = vmatmul.f32.gmra.mxu1 %v10312_v47  ;;  %v15035_v51 = vld [vmem:[#allocation56_spill] sm:$0xff] }
 0x351   : > { %v2746_v25 = vsel %vm2745_vm11, %v2744_v42, %v2167_v29  ;;  %vm2030_vm13 = vcmp.le.f32.partialorder %v15029_v16, %v10000_v18  ;;  %vm2700_vm4 = vcmp.lt.s32.totalorder %v2699_v56, %v2270_v40  ;;  %vm1935_vm12 = vcmp.le.f32.partialorder %v15030_v43, %v10105_v48  ;;  %v15032_v42 = vld [vmem:[#allocation96_spill] sm:$0xff]  ;;  %v10362_v16 = vld [vmem:[%s13840_s2 + $0x38] sm:$0xff] }
 0x352   : > { %vm2747_vm9 = vcmp.lt.s32.totalorder %v2746_v25, %v2175_v50  ;;  %v2632_v59 = vsel %vm2631_vm3, %v2630_v7, %v2277_v0  ;;  %v2183_v41 = vsel %vm1927_vm2, %v14969_v35, 256  ;;  %v10325_v60 = vmin.f32 %v1741_v33, %v1742_v24 }
 0x353   : > { %v2748_v9 = vsel %vm2747_vm9, %v2746_v25, %v2175_v50  ;;  %v2285_v26 = vsel %vm2029_vm8, %v15031_v20, 256  ;;  %v2278_v29 = vsel %vm2022_vm14, %v15023_v2, 256  ;;  %vm1943_vm10 = vcmp.le.f32.partialorder %v15032_v42, %v10105_v48  ;;  %v15036_v50 = vld [vmem:[#allocation64_spill] sm:$0xff]  ;;  %v10357_v25 = vld [vmem:[%s13840_s2 + $0x30] sm:$0xff] }
 0x354   : > { %vm2749_vm6 = vcmp.lt.s32.totalorder %v2748_v9, %v2183_v41  ;;  %v2286_v33 = vsel %vm2030_vm13, %v15031_v20, 256  ;;  %v2701_v7 = vsel %vm2700_vm4, %v2699_v56, %v2270_v40  ;;  %v2191_v0 = vsel %vm1935_vm12, %v14970_v3, 256  ;;  %v15037_v56 = vld [vmem:[#allocation46_spill] sm:$0xff]  ;;  %v15038_v40 = vld [vmem:[#allocation84_spill] sm:$0xff] }
 0x355   : > { %v2750_v24 = vsel %vm2749_vm6, %v2748_v9, %v2183_v41  ;;  %vm2633_vm0 = vcmp.lt.s32.totalorder %v2632_v59, %v2285_v26  ;;  %vm1951_vm1 = vcmp.le.f32.partialorder %v15033_v5, %v10105_v48  ;;  %vm1959_vm7 = vcmp.le.f32.partialorder %v15034_v55, %v10105_v48  ;;  %v15039_v41 = vld [vmem:[#allocation128_spill] sm:$0xff]  ;;  %3708 = vmatmul.f32.gmra.mxu2 %v10357_v25  ;;  %v15042_v55 = vld [vmem:[#allocation11_spill] sm:$0xff] }
 0x356   : > { %vm2751_vm15 = vcmp.lt.s32.totalorder %v2750_v24, %v2191_v0  ;;  %v2199_v18 = vsel %vm1943_vm10, %v14972_v12, 256  ;;  %vm1784_vm5 = vcmp.le.f32.partialorder %v15035_v51, %v10325_v60  ;;  %vm1792_vm8 = vcmp.le.f32.partialorder %v15036_v50, %v10325_v60  ;;  %3650 = vmatmul.f32.gmra.mxu0 %v10357_v25  ;;  %v15043_v50 = vld [vmem:[#allocation110_spill] sm:$0xff] }
 0x357   : > { %v2752_v15 = vsel %vm2751_vm15, %v2750_v24, %v2191_v0  ;;  %vm2702_vm3 = vcmp.lt.s32.totalorder %v2701_v7, %v2278_v29  ;;  %vm1967_vm2 = vcmp.le.f32.partialorder %v15037_v56, %v10105_v48  ;;  %vm1975_vm11 = vcmp.le.f32.partialorder %v15038_v40, %v10105_v48  ;;  %v15040_v0 = vld [vmem:[#allocation131_spill] sm:$0xff]  ;;  %3737 = vmatmul.f32.gmra.mxu3 %v10362_v16 }
 0x358   : > { %vm2753_vm14 = vcmp.lt.s32.totalorder %v2752_v15, %v2199_v18  ;;  %v10364_v43 = vsel %vm2633_vm0, %v2632_v59, %v2285_v26  ;;  %vm1983_vm13 = vcmp.le.f32.partialorder %v15039_v41, %v10105_v48  ;;  %v2207_v9 = vsel %vm1951_vm1, %v14976_v8, 256  ;;  %3679 = vmatmul.f32.gmra.mxu1 %v10362_v16  ;;  %v15049_v41 = vld [vmem:[#allocation32_spill] sm:$0xff] }
 0x359   : > { %v2754_v42 = vsel %vm2753_vm14, %v2752_v15, %v2199_v18  ;;  %vm1991_vm4 = vcmp.le.f32.partialorder %v15040_v0, %v10105_v48  ;;  %v2040_v24 = vsel %vm1784_vm5, %v7890_v49, 256  ;;  %v2048_v5 = vsel %vm1792_vm8, %v7907_v36, 256  ;;  %v15041_v15 = vld [vmem:[#allocation88_spill] sm:$0xff] }
 0x35a   : > { %vm2755_vm12 = vcmp.lt.s32.totalorder %v2754_v42, %v2207_v9  ;;  %v2703_v59 = vsel %vm2702_vm3, %v2701_v7, %v2278_v29  ;;  %v2215_v26 = vsel %vm1959_vm7, %v14978_v34, 256  ;;  %vm1800_vm9 = vcmp.le.f32.partialorder %v15041_v15, %v10325_v60  ;;  %v15044_v15 = vld [vmem:[#allocation111_spill] sm:$0xff] }
 0x35b   : > { %v2756_v18 = vsel %vm2755_vm12, %v2754_v42, %v2207_v9  ;;  %v2635_v51 = vrot.slane %v10364_v43, 4  ;;  %vm1999_vm10 = vcmp.le.f32.partialorder %v9896_v44, %v10105_v48  ;;  %vm2007_vm6 = vcmp.le.f32.partialorder %v9926_v61, %v10105_v48 }
 0x35c   : > { %vm2757_vm0 = vcmp.lt.s32.totalorder %v2756_v18, %v2215_v26  ;;  %v2223_v29 = vsel %vm1967_vm2, %v14983_v54, 256  ;;  %vm1808_vm1 = vcmp.le.f32.partialorder %v15042_v55, %v10325_v60  ;;  %vm2786_vm7 = vcmp.lt.s32.totalorder %v2040_v24, %v2048_v5 }
 0x35d   : > { %v2758_v7 = vsel %vm2757_vm0, %v2756_v18, %v2215_v26  ;;  %vm2704_vm15 = vcmp.lt.s32.totalorder %v2703_v59, %v2286_v33  ;;  %vm2015_vm5 = vcmp.le.f32.partialorder %v15043_v50, %v10105_v48  ;;  %v2056_v9 = vsel %vm1800_vm9, %v7918_v27, 256  ;;  %v15045_v18 = vld [vmem:[#allocation86_spill] sm:$0xff]  ;;  %v15046_v27 = vld [vmem:[#allocation21_spill] sm:$0xff]  ;;  %3815 = vmatmul.f32.vlgmr.msrb.gmra.mxu2 %v10228_v22 }
 0x35e   : > { %vm2759_vm8 = vcmp.lt.s32.totalorder %v2758_v7, %v2223_v29  ;;  %v2787_v42 = vsel %vm2786_vm7, %v2040_v24, %v2048_v5  ;;  %vm2023_vm3 = vcmp.le.f32.partialorder %v15044_v15, %v10105_v48  ;;  %v2231_v56 = vsel %vm1975_vm11, %v14992_v58, 256  ;;  %3757 = vmatmul.f32.vlgmr.msrb.gmra.mxu0 %v10228_v22 }
 0x35f   : > { %v2760_v26 = vsel %vm2759_vm8, %v2758_v7, %v2223_v29  ;;  %vm1816_vm2 = vcmp.le.f32.partialorder %v15045_v18, %v10325_v60  ;;  %vm2788_vm14 = vcmp.lt.s32.totalorder %v2787_v42, %v2056_v9  ;;  %v2239_v55 = vsel %vm1983_vm13, %v14993_v30, 256  ;;  %3844 = vmatmul.f32.vlgmr.msrb.gmra.mxu3 %v10233_v13  ;;  %v15051_v18 = vld [vmem:[#allocation36_spill] sm:$0xff] }
 0x360   : > { %vm2761_vm12 = vcmp.lt.s32.totalorder %v2760_v26, %v2231_v56  ;;  %v2064_v24 = vsel %vm1808_vm1, %v14918_v53, 256  ;;  %v2789_v5 = vsel %vm2788_vm14, %v2787_v42, %v2056_v9  ;;  %v2705_v49 = vsel %vm2704_vm15, %v2703_v59, %v2286_v33  ;;  %v15050_v9 = vld [vmem:[#allocation95_spill] sm:$0xff]  ;;  %3786 = vmatmul.f32.vlgmr.msrb.gmra.mxu1 %v10233_v13 }
 0x361   : > { %v2762_v36 = vsel %vm2761_vm12, %v2760_v26, %v2231_v56  ;;  %vm1824_vm9 = vcmp.le.f32.partialorder %v15046_v27, %v10325_v60  ;;  %vm2790_vm11 = vcmp.lt.s32.totalorder %v2789_v5, %v2064_v24  ;;  %vm10415_vm0 = vcmp.lt.s32.totalorder %v10364_v43, %v2635_v51 }
 0x362   : > { %vm2031_vm13 = vcmp.le.f32.partialorder %v15049_v41, %v10105_v48  ;;  %vm2763_vm7 = vcmp.lt.s32.totalorder %v2762_v36, %v2239_v55  ;;  %v2072_v29 = vsel %vm1816_vm2, %v14922_v4, 256  ;;  %v2791_v7 = vsel %vm2790_vm11, %v2789_v5, %v2064_v24  ;;  %v15057_v48 = vld [vmem:[#allocation44_spill] sm:$0xff] }
 0x363   : > { %v2247_v33 = vsel %vm1991_vm4, %v14994_v39, 256  ;;  %v2764_v59 = vsel %vm2763_vm7, %v2762_v36, %v2239_v55  ;;  %vm1832_vm1 = vcmp.le.f32.partialorder %v15050_v9, %v10325_v60  ;;  %vm2792_vm15 = vcmp.lt.s32.totalorder %v2791_v7, %v2072_v29 }
 0x364   : > { %v2706_v42 = vrot.slane %v2705_v49, 4  ;;  %vm2765_vm8 = vcmp.lt.s32.totalorder %v2764_v59, %v2247_v33  ;;  %v2080_v56 = vsel %vm1824_vm9, %v14925_v14, 256  ;;  %v2793_v26 = vsel %vm2792_vm15, %v2791_v7, %v2072_v29  ;;  %v15052_v29 = vld [vmem:[#allocation60_spill] sm:$0xff] }
 0x365   : > { %v2255_v36 = vsel %vm1999_vm10, %v14995_v10, 256  ;;  %v2766_v0 = vsel %vm2765_vm8, %v2764_v59, %v2247_v33  ;;  %vm1840_vm4 = vcmp.le.f32.partialorder %v15051_v18, %v10325_v60  ;;  %vm2794_vm2 = vcmp.lt.s32.totalorder %v2793_v26, %v2080_v56  ;;  %v15053_v33 = vld [vmem:[#allocation76_spill] sm:$0xff]  ;;  %3818 = vmatmul.f32.gmra.mxu2 %v10269_v23 }
 0x366   : > { %v2637_v55 = vsel %vm10415_vm0, %v10364_v43, %v2635_v51  ;;  %vm2767_vm14 = vcmp.lt.s32.totalorder %v2766_v0, %v2255_v36  ;;  %v2088_v27 = vsel %vm1832_vm1, %v14930_v17, 256  ;;  %v2795_v24 = vsel %vm2794_vm2, %v2793_v26, %v2080_v56  ;;  %v15054_v26 = vld [vmem:[#allocation89_spill] sm:$0xff]  ;;  %3760 = vmatmul.f32.gmra.mxu0 %v10269_v23 }
 0x367   : > { %v2263_v5 = vsel %vm2007_vm6, %v14997_v62, 256  ;;  %v2768_v44 = vsel %vm2767_vm14, %v2766_v0, %v2255_v36  ;;  %vm1848_vm10 = vcmp.le.f32.partialorder %v15052_v29, %v10325_v60  ;;  %vm2796_vm12 = vcmp.lt.s32.totalorder %v2795_v24, %v2088_v27  ;;  %3847 = vmatmul.f32.gmra.mxu3 %v10274_v37  ;;  %v15056_v29 = vld [vmem:[#allocation35_spill] sm:$0xff] }
 0x368   : > { %vm2707_vm9 = vcmp.lt.s32.totalorder %v2705_v49, %v2706_v42  ;;  %vm2769_vm11 = vcmp.lt.s32.totalorder %v2768_v44, %v2263_v5  ;;  %v2096_v7 = vsel %vm1840_vm4, %v14935_v38, 256  ;;  %v2797_v40 = vsel %vm2796_vm12, %v2795_v24, %v2088_v27  ;;  %3789 = vmatmul.f32.gmra.mxu1 %v10274_v37 }
 0x369   : > { %v2271_v43 = vsel %vm2015_vm5, %v15019_v46, 256  ;;  %v2770_v51 = vsel %vm2769_vm11, %v2768_v44, %v2263_v5  ;;  %vm1856_vm0 = vcmp.le.f32.partialorder %v15053_v33, %v10325_v60  ;;  %vm2798_vm6 = vcmp.lt.s32.totalorder %v2797_v40, %v2096_v7  ;;  %v15058_v33 = vld [vmem:[#allocation55_spill] sm:$0xff] }
 0x36a   : > { %v2279_v61 = vsel %vm2023_vm3, %v15023_v2, 256  ;;  %vm2771_vm7 = vcmp.lt.s32.totalorder %v2770_v51, %v2271_v43  ;;  %v2104_v59 = vsel %vm1848_vm10, %v14939_v57, 256  ;;  %v2799_v9 = vsel %vm2798_vm6, %v2797_v40, %v2096_v7 }
 0x36b   : > { %v2708_v50 = vsel %vm2707_vm9, %v2705_v49, %v2706_v42  ;;  %v2772_v56 = vsel %vm2771_vm7, %v2770_v51, %v2271_v43  ;;  %vm1864_vm5 = vcmp.le.f32.partialorder %v15054_v26, %v10325_v60  ;;  %vm2800_vm1 = vcmp.lt.s32.totalorder %v2799_v9, %v2104_v59  ;;  %v15055_v42 = vld [vmem:[#allocation25_spill] sm:$0xff]  ;;  %v15059_v26 = vld [vmem:[#allocation68_spill] sm:$0xff] }
 0x36c   : > { %v2638_v36 = vrot.slane %v2637_v55, 2  ;;  %vm2773_vm15 = vcmp.lt.s32.totalorder %v2772_v56, %v2279_v61  ;;  %v2112_v0 = vsel %vm1856_vm0, %v14943_v1, 256  ;;  %v2801_v15 = vsel %vm2800_vm1, %v2799_v9, %v2104_v59 }
 0x36d   : > { %v2287_v18 = vsel %vm2031_vm13, %v15031_v20, 256  ;;  %v2774_v49 = vsel %vm2773_vm15, %v2772_v56, %v2279_v61  ;;  %vm1872_vm3 = vcmp.le.f32.partialorder %v15055_v42, %v10325_v60  ;;  %vm2802_vm8 = vcmp.lt.s32.totalorder %v2801_v15, %v2112_v0  ;;  %3821 = vmatmul.f32.gmra.mxu2 %v10307_v19 }
 0x36e   : > { %v2709_v27 = vrot.slane %v2708_v50, 2  ;;  %vm2775_vm4 = vcmp.lt.s32.totalorder %v2774_v49, %v2287_v18  ;;  %v2120_v24 = vsel %vm1864_vm5, %v14946_v11, 256  ;;  %v2803_v5 = vsel %vm2802_vm8, %v2801_v15, %v2112_v0  ;;  %3763 = vmatmul.f32.gmra.mxu0 %v10307_v19 }
 0x36f   : > { %v2776_v44 = vsel %vm2775_vm4, %v2774_v49, %v2287_v18  ;;  %vm1880_vm2 = vcmp.le.f32.partialorder %v15056_v29, %v10325_v60  ;;  %vm2804_vm14 = vcmp.lt.s32.totalorder %v2803_v5, %v2120_v24  ;;  %v2128_v7 = vsel %vm1872_vm3, %v14950_v28, 256  ;;  %3850 = vmatmul.f32.gmra.mxu3 %v10312_v47  ;;  %v15060_v49 = vld [vmem:[#allocation79_spill] sm:$0xff]  ;;  %v15062_v29 = vld [vmem:[#allocation5_spill] sm:$0xff] }
 0x370   : > { %v2805_v40 = vsel %vm2804_vm14, %v2803_v5, %v2120_v24  ;;  %vm2639_vm10 = vcmp.lt.s32.totalorder %v2637_v55, %v2638_v36  ;;  %vm1888_vm13 = vcmp.le.f32.partialorder %v15057_v48, %v10325_v60  ;;  %vm2710_vm9 = vcmp.lt.s32.totalorder %v2708_v50, %v2709_v27  ;;  %3792 = vmatmul.f32.gmra.mxu1 %v10312_v47  ;;  %v15063_v48 = vld [vmem:[#allocation120_spill] sm:$0xff] }
 0x371   : > { %vm2806_vm12 = vcmp.lt.s32.totalorder %v2805_v40, %v2128_v7  ;;  %v2777_v41 = vrot.slane %v2776_v44, 4  ;;  %v2136_v43 = vsel %vm1880_vm2, %v14954_v52, 256  ;;  %vm1896_vm11 = vcmp.le.f32.partialorder %v15058_v33, %v10325_v60 }
 0x372   : > { %v2807_v51 = vsel %vm2806_vm12, %v2805_v40, %v2128_v7  ;;  %v2640_v61 = vsel %vm2639_vm10, %v2637_v55, %v2638_v36  ;;  %v2144_v59 = vsel %vm1888_vm13, %v14957_v31, 256  ;;  %v2711_v56 = vsel %vm2710_vm9, %v2708_v50, %v2709_v27  ;;  %v15061_v50 = vld [vmem:[#allocation92_spill] sm:$0xff] }
 0x373   : > { %vm2808_vm0 = vcmp.lt.s32.totalorder %v2807_v51, %v2136_v43  ;;  %vm1904_vm6 = vcmp.le.f32.partialorder %v15059_v26, %v10325_v60  ;;  %vm2778_vm5 = vcmp.lt.s32.totalorder %v2776_v44, %v2777_v41  ;;  %v2152_v0 = vsel %vm1896_vm11, %v14960_v45, 256  ;;  %v15066_v26 = vld [vmem:[#allocation126_spill] sm:$0xff] }
 0x374   : > { %v2809_v9 = vsel %vm2808_vm0, %v2807_v51, %v2136_v43  ;;  %v2641_v18 = vrot.slane %v2640_v61, 1  ;;  %vm1912_vm1 = vcmp.le.f32.partialorder %v15060_v49, %v10325_v60  ;;  %v2712_v55 = vrot.slane %v2711_v56, 1  ;;  %v15064_v43 = vld [vmem:[#allocation77_spill] sm:$0xff] }
 0x375   : > { %vm2810_vm7 = vcmp.lt.s32.totalorder %v2809_v9, %v2144_v59  ;;  %v2160_v36 = vsel %vm1904_vm6, %v14962_v63, 256  ;;  %v2779_v24 = vsel %vm2778_vm5, %v2776_v44, %v2777_v41  ;;  %vm1920_vm3 = vcmp.le.f32.partialorder %v15061_v50, %v10325_v60  ;;  %3824 = vmatmul.f32.gmra.mxu2 %v10357_v25 }
 0x376   : > { %v2811_v15 = vsel %vm2810_vm7, %v2809_v9, %v2144_v59  ;;  %v2168_v27 = vsel %vm1912_vm1, %v14964_v6, 256  ;;  %vm2642_vm4 = vcmp.lt.s32.totalorder %v2640_v61, %v2641_v18  ;;  %vm1928_vm2 = vcmp.le.f32.partialorder %v15062_v29, %v10325_v60  ;;  %3766 = vmatmul.f32.gmra.mxu0 %v10357_v25  ;;  %v15065_v9 = vld [vmem:[#allocation69_spill] sm:$0xff] }
 0x377   : > { %vm2812_vm15 = vcmp.lt.s32.totalorder %v2811_v15, %v2152_v0  ;;  %3853 = vmatmul.f32.gmra.mxu3 %v10362_v16  ;;  %vm2713_vm10 = vcmp.lt.s32.totalorder %v2711_v56, %v2712_v55  ;;  %v2780_v44 = vrot.slane %v2779_v24, 2  ;;  %v2176_v7 = vsel %vm1920_vm3, %v14968_v21, 256 }
 0x378   : > { %v2813_v42 = vsel %vm2812_vm15, %v2811_v15, %v2152_v0  ;;  %3795 = vmatmul.f32.gmra.mxu1 %v10362_v16  ;;  %vm1936_vm13 = vcmp.le.f32.partialorder %v15063_v48, %v10325_v60  ;;  %v10508_v41 = vsel %vm2642_vm4, %v2640_v61, %v2641_v18  ;;  %vm1944_vm9 = vcmp.le.f32.partialorder %v15064_v43, %v10325_v60  ;;  %v15067_v0 = vld [vmem:[#allocation130_spill] sm:$0xff]  ;;  %v15068_v18 = vld [vmem:[#allocation132_spill] sm:$0xff] }
 0x379   : > { %vm2814_vm8 = vcmp.lt.s32.totalorder %v2813_v42, %v2160_v36  ;;  %v2184_v51 = vsel %vm1928_vm2, %v14969_v35, 256  ;;  %v10513_v59 = vsel %vm2713_vm10, %v2711_v56, %v2712_v55  ;;  %vm1952_vm11 = vcmp.le.f32.partialorder %v15065_v9, %v10325_v60  ;;  %v15069_v56 = vld [vmem:[#allocation134_spill] sm:$0xff]  ;;  %v15074_v43 = vld [vmem:[#allocation112_spill] sm:$0xff] }
 0x37a   : > { %v2815_v5 = vsel %vm2814_vm8, %v2813_v42, %v2160_v36  ;;  %vm1960_vm0 = vcmp.le.f32.partialorder %v15066_v26, %v10325_v60  ;;  %vm2781_vm7 = vcmp.lt.s32.totalorder %v2779_v24, %v2780_v44  ;;  %vm1968_vm5 = vcmp.le.f32.partialorder %v15067_v0, %v10325_v60  ;;  %v15070_v42 = vld [vmem:[#allocation74_spill] sm:$0xff] }
 0x37b   : > { %vm2816_vm14 = vcmp.lt.s32.totalorder %v2815_v5, %v2168_v27  ;;  %v2192_v61 = vsel %vm1936_vm13, %v14970_v3, 256  ;;  %vm1976_vm1 = vcmp.le.f32.partialorder %v15068_v18, %v10325_v60  ;;  %vm1984_vm15 = vcmp.le.f32.partialorder %v15069_v56, %v10325_v60  ;;  %v15075_v9 = vld [vmem:[#allocation94_spill] sm:$0xff] }
 0x37c   : > { %v2817_v40 = vsel %vm2816_vm14, %v2815_v5, %v2168_v27  ;;  %v2200_v49 = vsel %vm1944_vm9, %v14972_v12, 256  ;;  %vm2981_vm8 = vcmp.eq.s32.totalorder %v14962_v63, %v10508_v41  ;;  %vm14340_vm4 = vcmp.eq.s32.totalorder %v15031_v20, %v10508_v41  ;;  %v15072_v5 = vld [vmem:[#allocation90_spill] sm:$0xff] }
 0x37d   : > { %vm2818_vm12 = vcmp.lt.s32.totalorder %v2817_v40, %v2176_v7  ;;  %vm2982_vm2 = vcmp.eq.s32.totalorder %v14962_v63, %v10513_v59  ;;  %v10533_v36 = vsel %vm2781_vm7, %v2779_v24, %v2780_v44  ;;  %vm1992_vm14 = vcmp.le.f32.partialorder %v15070_v42, %v10325_v60 }
 0x37e   : > { %v2819_v33 = vsel %vm2818_vm12, %v2817_v40, %v2176_v7  ;;  %v15071_v50 = vmov 1.0   ;;  %vm14338_vm13 = vcmp.eq.s32.totalorder %v15031_v20, %v10513_v59  ;;  %v2208_v24 = vsel %vm1952_vm11, %v14976_v8, 256  ;;  %v15073_v7 = vld [vmem:[#allocation14_spill] sm:$0xff] }
 0x37f   : > { %vm2820_vm6 = vcmp.lt.s32.totalorder %v2819_v33, %v2184_v51  ;;  %6045 = vmatpush.msk.msra.mxu0 %vm2981_vm8, %v15071_v50  ;;  %6061 = vmatpush.msk.msra.mxu1 %vm14340_vm4, %v15071_v50  ;;  %vm2973_vm12 = vcmp.eq.s32.totalorder %v14960_v45, %v10508_v41  ;;  %vm14336_vm9 = vcmp.eq.s32.totalorder %v15023_v2, %v10508_v41  ;;  %v2216_v29 = vsel %vm1960_vm0, %v14978_v34, 256 }
 0x380   : > { %v2821_v15 = vsel %vm2820_vm6, %v2819_v33, %v2184_v51  ;;  %6077 = vmatpush.msk.msra.mxu2 %vm2982_vm2, %v15071_v50  ;;  %6093 = vmatpush.msk.msra.mxu3 %vm14338_vm13, %v15071_v50  ;;  %vm2000_vm11 = vcmp.le.f32.partialorder %v15072_v5, %v10325_v60  ;;  %vm14350_vm7 = vcmp.eq.s32.totalorder %v14960_v45, %v10513_v59  ;;  %v2224_v40 = vsel %vm1968_vm5, %v14983_v54, 256 }
 0x381   : > { %vm2822_vm3 = vcmp.lt.s32.totalorder %v2821_v15, %v2192_v61  ;;  %6046 = vmatpush.msk.msra.mxu0 %vm2973_vm12, %v15071_v50  ;;  %6062 = vmatpush.msk.msra.mxu1 %vm14336_vm9, %v15071_v50  ;;  %vm14339_vm9 = vcmp.eq.s32.totalorder %v15019_v46, %v10508_v41  ;;  %vm2008_vm0 = vcmp.le.f32.partialorder %v15073_v7, %v10325_v60  ;;  %v2232_v51 = vsel %vm1976_vm1, %v14992_v58, 256 }
 0x382   : > { %v2823_v55 = vsel %vm2822_vm3, %v2821_v15, %v2192_v61  ;;  %vm14337_vm3 = vcmp.eq.s32.totalorder %v15023_v2, %v10513_v59  ;;  %6078 = vmatpush.msk.msra.mxu2 %vm14350_vm7, %v15071_v50  ;;  %vm14341_vm13 = vcmp.eq.s32.totalorder %v15019_v46, %v10513_v59  ;;  %vm14343_vm4 = vcmp.eq.s32.totalorder %v14997_v62, %v10508_v41 }
 0x383   : > { %vm2824_vm10 = vcmp.lt.s32.totalorder %v2823_v55, %v2200_v49  ;;  %6094 = vmatpush.msk.msra.mxu3 %vm14337_vm3, %v15071_v50  ;;  %6063 = vmatpush.msk.msra.mxu1 %vm14339_vm9, %v15071_v50  ;;  %vm14342_vm3 = vcmp.eq.s32.totalorder %v14957_v31, %v10513_v59  ;;  %vm14344_vm9 = vcmp.eq.s32.totalorder %v14954_v52, %v10508_v41  ;;  %v2240_v26 = vsel %vm1984_vm15, %v14993_v30, 256 }
 0x384   : > { %v2825_v27 = vsel %vm2824_vm10, %v2823_v55, %v2200_v49  ;;  %vm14347_vm10 = vcmp.eq.s32.totalorder %v14957_v31, %v10508_v41  ;;  %6079 = vmatpush.msk.msra.mxu2 %vm14342_vm3, %v15071_v50  ;;  %vm2016_vm5 = vcmp.le.f32.partialorder %v15074_v43, %v10325_v60  ;;  %vm14345_vm3 = vcmp.eq.s32.totalorder %v14997_v62, %v10513_v59 }
 0x385   : > { %vm2826_vm6 = vcmp.lt.s32.totalorder %v2825_v27, %v2208_v24  ;;  %6047 = vmatpush.msk.msra.mxu0 %vm14347_vm10, %v15071_v50  ;;  %6095 = vmatpush.msk.msra.mxu3 %vm14341_vm13, %v15071_v50  ;;  %vm14346_vm13 = vcmp.eq.s32.totalorder %v14954_v52, %v10513_v59  ;;  %vm2024_vm1 = vcmp.le.f32.partialorder %v15075_v9, %v10325_v60  ;;  %v2248_v61 = vsel %vm1992_vm14, %v14994_v39, 256 }
 0x386   : > { %v2827_v44 = vsel %vm2826_vm6, %v2825_v27, %v2208_v24  ;;  %6064 = vmatpush.msk.msra.mxu1 %vm14343_vm4, %v15071_v50  ;;  %6080 = vmatpush.msk.msra.mxu2 %vm14346_vm13, %v15071_v50  ;;  %vm14349_vm4 = vcmp.eq.s32.totalorder %v14950_v28, %v10508_v41  ;;  %vm14352_vm13 = vcmp.eq.s32.totalorder %v14995_v10, %v10513_v59  ;;  %v2256_v18 = vsel %vm2000_vm11, %v14995_v10, 256 }
 0x387   : > { %vm2828_vm6 = vcmp.lt.s32.totalorder %v2827_v44, %v2216_v29  ;;  %6048 = vmatpush.msk.msra.mxu0 %vm14344_vm9, %v15071_v50  ;;  %6096 = vmatpush.msk.msra.mxu3 %vm14345_vm3, %v15071_v50  ;;  %vm14348_vm9 = vcmp.eq.s32.totalorder %v14995_v10, %v10508_v41  ;;  %vm14404_vm3 = vcmp.eq.s32.totalorder %v14950_v28, %v10513_v59  ;;  %v2264_v49 = vsel %vm2008_vm0, %v14997_v62, 256 }
 0x388   : > { %v2829_v48 = vsel %vm2828_vm6, %v2827_v44, %v2216_v29  ;;  %6065 = vmatpush.msk.msra.mxu1 %vm14348_vm9, %v15071_v50  ;;  %vm2032_vm10 = vcmp.le.f32.partialorder %v10189_v32, %v10325_v60  ;;  %6081 = vmatpush.msk.msra.mxu2 %vm14404_vm3, %v15071_v50  ;;  %vm14353_vm9 = vcmp.eq.s32.totalorder %v14946_v11, %v10508_v41  ;;  %v2272_v42 = vsel %vm2016_vm5, %v15019_v46, 256 }
 0x389   : > { %vm2830_vm6 = vcmp.lt.s32.totalorder %v2829_v48, %v2224_v40  ;;  %6049 = vmatpush.msk.msra.mxu0 %vm14349_vm4, %v15071_v50  ;;  %6097 = vmatpush.msk.msra.mxu3 %vm14352_vm13, %v15071_v50  ;;  %vm14351_vm4 = vcmp.eq.s32.totalorder %v14994_v39, %v10508_v41  ;;  %vm14403_vm15 = vcmp.eq.s32.totalorder %v14946_v11, %v10513_v59  ;;  %v2280_v27 = vsel %vm2024_vm1, %v15023_v2, 256 }
 0x38a   : > { %v2831_v33 = vsel %vm2830_vm6, %v2829_v48, %v2224_v40  ;;  %6066 = vmatpush.msk.msra.mxu1 %vm14351_vm4, %v15071_v50  ;;  %6082 = vmatpush.msk.msra.mxu2 %vm14403_vm15, %v15071_v50  ;;  %vm14356_vm4 = vcmp.eq.s32.totalorder %v14943_v1, %v10508_v41  ;;  %vm14354_vm13 = vcmp.eq.s32.totalorder %v14993_v30, %v10508_v41  ;;  %v2288_v29 = vsel %vm2032_vm10, %v15031_v20, 256  ;;  %v15078_v48 = vld [vmem:[#allocation109_spill] sm:$0xff] }
 0x38b   : > { %vm2832_vm6 = vcmp.lt.s32.totalorder %v2831_v33, %v2232_v51  ;;  %6050 = vmatpush.msk.msra.mxu0 %vm14353_vm9, %v15071_v50  ;;  %vm14399_vm14 = vcmp.eq.s32.totalorder %v14943_v1, %v10513_v59  ;;  %vm14361_vm11 = vcmp.eq.s32.totalorder %v14992_v58, %v10513_v59  ;;  %vm14364_vm0 = vcmp.eq.s32.totalorder %v14983_v54, %v10513_v59 }
 0x38c   : > { %v2833_v0 = vsel %vm2832_vm6, %v2831_v33, %v2232_v51  ;;  %vm14355_vm6 = vcmp.eq.s32.totalorder %v14994_v39, %v10513_v59  ;;  %6067 = vmatpush.msk.msra.mxu1 %vm14354_vm13, %v15071_v50  ;;  %6083 = vmatpush.msk.msra.mxu2 %vm14399_vm14, %v15071_v50  ;;  %vm14359_vm13 = vcmp.eq.s32.totalorder %v14939_v57, %v10508_v41  ;;  %v2783_v32 = vrot.slane %v10533_v36, 1  ;;  %v15079_v51 = vld [vmem:[#allocation108_spill] sm:$0xff] }
 0x38d   : > { %vm2834_vm7 = vcmp.lt.s32.totalorder %v2833_v0, %v2240_v26  ;;  %6098 = vmatpush.msk.msra.mxu3 %vm14355_vm6, %v15071_v50  ;;  %6051 = vmatpush.msk.msra.mxu0 %vm14356_vm4, %v15071_v50  ;;  %vm14357_vm6 = vcmp.eq.s32.totalorder %v14992_v58, %v10508_v41  ;;  %vm14365_vm5 = vcmp.eq.s32.totalorder %v14978_v34, %v10513_v59  ;;  %vm14459_vm3 = vcmask 1040384  }
 0x38e   : > { %v2835_v15 = vsel %vm2834_vm7, %v2833_v0, %v2240_v26  ;;  %vm14358_vm7 = vcmp.eq.s32.totalorder %v14993_v30, %v10513_v59  ;;  %6068 = vmatpush.msk.msra.mxu1 %vm14357_vm6, %v15071_v50  ;;  %vm14362_vm6 = vcmp.eq.s32.totalorder %v14935_v38, %v10508_v41  ;;  %vm14370_vm10 = vcmp.eq.s32.totalorder %v14922_v4, %v10508_v41  ;;  %v15080_v26 = vld [vmem:[#allocation10_spill] sm:$0xff] }
 0x38f   : > { %vm2836_vm9 = vcmp.lt.s32.totalorder %v2835_v15, %v2248_v61  ;;  %6099 = vmatpush.msk.msra.mxu3 %vm14358_vm7, %v15071_v50  ;;  %6052 = vmatpush.msk.msra.mxu0 %vm14359_vm13, %v15071_v50  ;;  %vm14360_vm7 = vcmp.eq.s32.totalorder %v14983_v54, %v10508_v41 }
 0x390   : > { %v2837_v56 = vsel %vm2836_vm9, %v2835_v15, %v2248_v61  ;;  %vm14396_vm9 = vcmp.eq.s32.totalorder %v14939_v57, %v10513_v59  ;;  %6069 = vmatpush.msk.msra.mxu1 %vm14360_vm7, %v15071_v50  ;;  %vm14393_vm7 = vcmp.eq.s32.totalorder %v14930_v17, %v10508_v41  ;;  %v15082_v15 = vld [vmem:[#allocation73_spill] sm:$0xff] }
 0x391   : > { %vm2838_vm4 = vcmp.lt.s32.totalorder %v2837_v56, %v2256_v18  ;;  %6084 = vmatpush.msk.msra.mxu2 %vm14396_vm9, %v15071_v50  ;;  %6100 = vmatpush.msk.msra.mxu3 %vm14361_vm11, %v15071_v50  ;;  %vm14363_vm11 = vcmp.eq.s32.totalorder %v14978_v34, %v10508_v41 }
 0x392   : > { %v2839_v55 = vsel %vm2838_vm4, %v2837_v56, %v2256_v18  ;;  %6053 = vmatpush.msk.msra.mxu0 %vm14362_vm6, %v15071_v50  ;;  %vm14395_vm4 = vcmp.eq.s32.totalorder %v14935_v38, %v10513_v59  ;;  %6070 = vmatpush.msk.msra.mxu1 %vm14363_vm11, %v15071_v50  ;;  %vm14367_vm11 = vcmp.eq.s32.totalorder %v14925_v14, %v10508_v41  ;;  %v4122_v18 = vrot.slane %v15082_v15, 6  ;;  %v15083_v56 = vld [vmem:[#allocation9_spill] sm:$0xff] }
 0x393   : > { %vm2840_vm13 = vcmp.lt.s32.totalorder %v2839_v55, %v2264_v49  ;;  %6085 = vmatpush.msk.msra.mxu2 %vm14395_vm4, %v15071_v50  ;;  %6101 = vmatpush.msk.msra.mxu3 %vm14364_vm0, %v15071_v50  ;;  %vm14366_vm0 = vcmp.eq.s32.totalorder %v14976_v8, %v10508_v41 }
 0x394   : > { %v2841_v24 = vsel %vm2840_vm13, %v2839_v55, %v2264_v49  ;;  %6054 = vmatpush.msk.msra.mxu0 %vm14393_vm7, %v15071_v50  ;;  %vm14392_vm13 = vcmp.eq.s32.totalorder %v14930_v17, %v10513_v59  ;;  %6071 = vmatpush.msk.msra.mxu1 %vm14366_vm0, %v15071_v50  ;;  %vm14369_vm0 = vcmp.eq.s32.totalorder %v14972_v12, %v10508_v41  ;;  %v4123_v49 = vrot.slane %v15083_v56, 5 }
 0x395   : > { %vm2842_vm6 = vcmp.lt.s32.totalorder %v2841_v24, %v2272_v42  ;;  %6086 = vmatpush.msk.msra.mxu2 %vm14392_vm13, %v15071_v50  ;;  %6102 = vmatpush.msk.msra.mxu3 %vm14365_vm5, %v15071_v50  ;;  %vm14368_vm5 = vcmp.eq.s32.totalorder %v14976_v8, %v10513_v59  ;;  %v4124_v55 = vrot.slane %v10508_v41, 4 }
 0x396   : > { %v2843_v5 = vsel %vm2842_vm6, %v2841_v24, %v2272_v42  ;;  %6055 = vmatpush.msk.msra.mxu0 %vm14367_vm11, %v15071_v50  ;;  %vm14375_vm6 = vcmp.eq.s32.totalorder %v14925_v14, %v10513_v59  ;;  %6072 = vmatpush.msk.msra.mxu1 %vm14369_vm0, %v15071_v50  ;;  %vm14374_vm0 = vcmp.eq.s32.totalorder %v14918_v53, %v10508_v41  ;;  %v4125_v42 = vrot.slane %v10513_v59, 3 }
 0x397   : > { %vm2844_vm1 = vcmp.lt.s32.totalorder %v2843_v5, %v2280_v27  ;;  %6087 = vmatpush.msk.msra.mxu2 %vm14375_vm6, %v15071_v50  ;;  %6103 = vmatpush.msk.msra.mxu3 %vm14368_vm5, %v15071_v50  ;;  %vm14371_vm5 = vcmp.eq.s32.totalorder %v14972_v12, %v10513_v59 }
 0x398   : > { %v2845_v60 = vsel %vm2844_vm1, %v2843_v5, %v2280_v27  ;;  %6056 = vmatpush.msk.msra.mxu0 %vm14370_vm10, %v15071_v50  ;;  %vm14372_vm1 = vcmp.eq.s32.totalorder %v14922_v4, %v10513_v59  ;;  %vm14373_vm10 = vcmp.eq.s32.totalorder %v14970_v3, %v10508_v41  ;;  %v15084_v5 = vld [vmem:[#allocation101_spill] sm:$0xff] }
 0x399   : > { %vm2846_vm11 = vcmp.lt.s32.totalorder %v2845_v60, %v2288_v29  ;;  %6088 = vmatpush.msk.msra.mxu2 %vm14372_vm1, %v15071_v50  ;;  %6104 = vmatpush.msk.msra.mxu3 %vm14371_vm5, %v15071_v50  ;;  %vm14376_vm5 = vcmp.eq.s32.totalorder %v14970_v3, %v10513_v59  ;;  %vm10891_vm1 = vcmp.lt.s32.totalorder %v10533_v36, %v2783_v32 }
 0x39a   : > { %v2847_v44 = vsel %vm2846_vm11, %v2845_v60, %v2288_v29  ;;  %6057 = vmatpush.msk.msra.mxu0 %vm14374_vm0, %v15071_v50  ;;  %6073 = vmatpush.msk.msra.mxu1 %vm14373_vm10, %v15071_v50  ;;  %vm14377_vm11 = vcmp.eq.s32.totalorder %v14918_v53, %v10513_v59  ;;  %vm14379_vm10 = vcmp.eq.s32.totalorder %v15078_v48, %v10508_v41 }
 0x39b   : > { %v2848_v7 = vrot.slane %v2847_v44, 4  ;;  %6089 = vmatpush.msk.msra.mxu2 %vm14377_vm11, %v15071_v50  ;;  %6105 = vmatpush.msk.msra.mxu3 %vm14376_vm5, %v15071_v50  ;;  %vm14378_vm0 = vcmp.eq.s32.totalorder %v14969_v35, %v10508_v41  ;;  %vm14383_vm5 = vcmp.eq.s32.totalorder %v15078_v48, %v10513_v59  ;;  %vm14380_vm11 = vcmp.eq.s32.totalorder %v14969_v35, %v10513_v59 }
 0x39c   : > { %6058 = vmatpush.msk.msra.mxu0 %vm14379_vm10, %v15071_v50  ;;  %6074 = vmatpush.msk.msra.mxu1 %vm14378_vm0, %v15071_v50  ;;  %vm14382_vm0 = vcmp.eq.s32.totalorder %v15079_v51, %v10508_v41  ;;  %vm14381_vm10 = vcmp.eq.s32.totalorder %v14968_v21, %v10508_v41  ;;  %v10946_v9 = vsel %vm10891_vm1, %v10533_v36, %v2783_v32 }
 0x39d   : > { %vm2849_vm6 = vcmp.lt.s32.totalorder %v2847_v44, %v2848_v7  ;;  %6090 = vmatpush.msk.msra.mxu2 %vm14383_vm5, %v15071_v50  ;;  %6106 = vmatpush.msk.msra.mxu3 %vm14380_vm11, %v15071_v50  ;;  %vm14384_vm11 = vcmp.eq.s32.totalorder %v14968_v21, %v10513_v59  ;;  %vm14387_vm1 = vcmp.eq.s32.totalorder %v15080_v26, %v10513_v59  ;;  %v4126_v24 = vrot.slane %v10946_v9, 2 }
 0x39e   : > { %v2850_v43 = vsel %vm2849_vm6, %v2847_v44, %v2848_v7  ;;  %6059 = vmatpush.msk.msra.mxu0 %vm14382_vm0, %v15071_v50  ;;  %6075 = vmatpush.msk.msra.mxu1 %vm14381_vm10, %v15071_v50  ;;  %vm14390_vm6 = vcmp.eq.s32.totalorder %v15079_v51, %v10513_v59  ;;  %vm14388_vm10 = vcmp.eq.s32.totalorder %v15080_v26, %v10508_v41 }
 0x39f   : > { %v2851_v33 = vrot.slane %v2850_v43, 2  ;;  %6091 = vmatpush.msk.msra.mxu2 %vm14390_vm6, %v15071_v50  ;;  %6107 = vmatpush.msk.msra.mxu3 %vm14384_vm11, %v15071_v50  ;;  %vm14385_vm0 = vcmp.eq.s32.totalorder %v14964_v6, %v10508_v41  ;;  %vm14386_vm11 = vcmp.eq.s32.totalorder %v14964_v6, %v10513_v59  ;;  %vm14400_vm4 = vcmp.eq.s32.totalorder %v14997_v62, %v10946_v9 }
 0x3a0   : > { %6060 = vmatpush.msk.msra.mxu0 %vm14388_vm10, %v15071_v50  ;;  %6076 = vmatpush.msk.msra.mxu1 %vm14385_vm0, %v15071_v50  ;;  %vm2983_vm0 = vcmp.eq.s32.totalorder %v14962_v63, %v10946_v9  ;;  %vm14391_vm10 = vcmp.eq.s32.totalorder %v15023_v2, %v10946_v9 }
 0x3a1   : > { %vm2852_vm5 = vcmp.lt.s32.totalorder %v2850_v43, %v2851_v33  ;;  %6092 = vmatpush.msk.msra.mxu2 %vm14387_vm1, %v15071_v50  ;;  %6108 = vmatpush.msk.msra.mxu3 %vm14386_vm11, %v15071_v50  ;;  %vm2975_vm1 = vcmp.eq.s32.totalorder %v14960_v45, %v10946_v9 }
 0x3a2   : > { %v2853_v36 = vsel %vm2852_vm5, %v2850_v43, %v2851_v33  ;;  %3931 = vmatmul.f32.vlgmr.msra.gmra.mxu2 %v10228_v22  ;;  %3960 = vmatmul.f32.vlgmr.msra.gmra.mxu3 %v10233_v13  ;;  %vm14389_vm5 = vcmp.eq.s32.totalorder %v15031_v20, %v10946_v9 }
 0x3a3   : > { %v2854_v0 = vrot.slane %v2853_v36, 1  ;;  %6109 = vmatpush.msk.msrb.mxu0 %vm2983_vm0, %v15071_v50  ;;  %6125 = vmatpush.msk.msrb.mxu1 %vm14389_vm5, %v15071_v50 }
 0x3a4   : > { %3873 = vmatmul.f32.vlgmr.msra.gmra.mxu0 %v10228_v22  ;;  %3902 = vmatmul.f32.vlgmr.msra.gmra.mxu1 %v10233_v13  ;;  %v15081_v22 = vld [vmem:[#allocation99_spill] sm:$0xff] }
 0x3a5   : > { %vm2855_vm11 = vcmp.lt.s32.totalorder %v2853_v36, %v2854_v0  ;;  %6110 = vmatpush.msk.msrb.mxu0 %vm2975_vm1, %v15071_v50  ;;  %6126 = vmatpush.msk.msrb.mxu1 %vm14391_vm10, %v15071_v50  ;;  %vm14397_vm10 = vcmp.eq.s32.totalorder %v15019_v46, %v10946_v9  ;;  %v4121_v13 = vrot.slane %v15081_v22, 7 }
 0x3a6   : > { %v11000_v61 = vsel %vm2855_vm11, %v2853_v36, %v2854_v0  ;;  %vm14418_vm11 = vcmp.eq.s32.totalorder %v14957_v31, %v10946_v9  ;;  %v6761_v0 = vld [vmem:[%s7022_s19] sm:$0xff] }
 0x3a7   : > { %vm2984_vm5 = vcmp.eq.s32.totalorder %v14962_v63, %v11000_v61  ;;  %vm14394_vm6 = vcmp.eq.s32.totalorder %v15031_v20, %v11000_v61  ;;  %vm14421_vm13 = vcmp.eq.s32.totalorder %v14960_v45, %v11000_v61  ;;  %vm14398_vm7 = vcmp.eq.s32.totalorder %v15023_v2, %v11000_v61  ;;  %6111 = vmatpush.msk.msrb.mxu0 %vm14418_vm11, %v15071_v50 }
 0x3a8   : > { %6141 = vmatpush.msk.msrb.mxu2 %vm2984_vm5, %v15071_v50  ;;  %6157 = vmatpush.msk.msrb.mxu3 %vm14394_vm6, %v15071_v50  ;;  %vm14414_vm6 = vcmp.eq.s32.totalorder %v14954_v52, %v10946_v9  ;;  %vm14415_vm9 = vcmp.eq.s32.totalorder %v14957_v31, %v11000_v61  ;;  %vm14402_vm14 = vcmp.eq.s32.totalorder %v14997_v62, %v11000_v61  ;;  %v4127_v27 = vrot.slane %v11000_v61, 1 }
 0x3a9   : > { %6127 = vmatpush.msk.msrb.mxu1 %vm14397_vm10, %v15071_v50  ;;  %vm14401_vm10 = vcmp.eq.s32.totalorder %v15019_v46, %v11000_v61  ;;  %6112 = vmatpush.msk.msrb.mxu0 %vm14414_vm6, %v15071_v50  ;;  %vm14408_vm15 = vcmp.eq.s32.totalorder %v14995_v10, %v11000_v61  ;;  %vm14429_vm6 = vcmask 1044484   ;;  %v4129_v29 = vsel %vm14459_vm3, %v15084_v5, %v4121_v13 }
 0x3aa   : > { %6142 = vmatpush.msk.msrb.mxu2 %vm14421_vm13, %v15071_v50  ;;  %6158 = vmatpush.msk.msrb.mxu3 %vm14398_vm7, %v15071_v50  ;;  %vm14407_vm7 = vcmp.eq.s32.totalorder %v14954_v52, %v11000_v61  ;;  %vm2927_vm11 = vcmp.eq.s32.totalorder %v14939_v57, %v10946_v9  ;;  %vm14428_vm13 = vcmask 1043456  }
 0x3ab   : > { %6128 = vmatpush.msk.msrb.mxu1 %vm14400_vm4, %v15071_v50  ;;  %3934 = vmatmul.f32.gmra.mxu2 %v10269_v23  ;;  %vm14406_vm4 = vcmp.eq.s32.totalorder %v14950_v28, %v10946_v9 }
 0x3ac   : > { %6143 = vmatpush.msk.msrb.mxu2 %vm14415_vm9, %v15071_v50  ;;  %6159 = vmatpush.msk.msrb.mxu3 %vm14401_vm10, %v15071_v50  ;;  %vm14405_vm10 = vcmp.eq.s32.totalorder %v14995_v10, %v10946_v9  ;;  %vm14424_vm9 = vcmask 1046534  }
 0x3ad   : > { %3963 = vmatmul.f32.gmra.mxu3 %v10274_v37  ;;  %6113 = vmatpush.msk.msrb.mxu0 %vm14406_vm4, %v15071_v50  ;;  %vm14410_vm4 = vcmp.eq.s32.totalorder %v14994_v39, %v10946_v9 }
 0x3ae   : > { %6144 = vmatpush.msk.msrb.mxu2 %vm14407_vm7, %v15071_v50  ;;  %6160 = vmatpush.msk.msrb.mxu3 %vm14402_vm14, %v15071_v50  ;;  %vm14409_vm14 = vcmp.eq.s32.totalorder %v14950_v28, %v11000_v61  ;;  %vm14422_vm7 = vcmask 1042434  }
 0x3af   : > { %6129 = vmatpush.msk.msrb.mxu1 %vm14405_vm10, %v15071_v50  ;;  %vm14411_vm10 = vcmp.eq.s32.totalorder %v14946_v11, %v10946_v9  ;;  %v4131_v32 = vsel %vm14422_vm7, %v4122_v18, %v4123_v49  ;;  %3876 = vmatmul.f32.gmra.mxu0 %v10269_v23  ;;  %vm14425_vm7 = vcmp.eq.s32.totalorder %v14992_v58, %v11000_v61  ;;  %v11402_v49 = vld [vmem:[%s13840_s2 + $0x30] sm:$0xff] }
 0x3b0   : > { %6145 = vmatpush.msk.msrb.mxu2 %vm14409_vm14, %v15071_v50  ;;  %6161 = vmatpush.msk.msrb.mxu3 %vm14408_vm15, %v15071_v50  ;;  %vm14413_vm15 = vcmp.eq.s32.totalorder %v14946_v11, %v11000_v61  ;;  %vm14412_vm14 = vcmp.eq.s32.totalorder %v14994_v39, %v11000_v61  ;;  %v4135_v23 = vsel %vm14429_vm6, %v4124_v55, %v4125_v42  ;;  %v11408_v55 = vld [vmem:[%s13840_s2 + $0x38] sm:$0xff] }
 0x3b1   : > { %6114 = vmatpush.msk.msrb.mxu0 %vm14411_vm10, %v15071_v50  ;;  %6130 = vmatpush.msk.msrb.mxu1 %vm14410_vm4, %v15071_v50  ;;  %vm14417_vm4 = vcmp.eq.s32.totalorder %v14943_v1, %v10946_v9  ;;  %vm14416_vm10 = vcmp.eq.s32.totalorder %v14993_v30, %v10946_v9  ;;  %vm14433_vm6 = vcmp.eq.s32.totalorder %v14930_v17, %v11000_v61 }
 0x3b2   : > { %6146 = vmatpush.msk.msrb.mxu2 %vm14413_vm15, %v15071_v50  ;;  %6162 = vmatpush.msk.msrb.mxu3 %vm14412_vm14, %v15071_v50  ;;  %vm14419_vm14 = vcmp.eq.s32.totalorder %v14943_v1, %v11000_v61  ;;  %vm14420_vm15 = vcmp.eq.s32.totalorder %v14993_v30, %v11000_v61 }
 0x3b3   : > { %6115 = vmatpush.msk.msrb.mxu0 %vm14417_vm4, %v15071_v50  ;;  %6131 = vmatpush.msk.msrb.mxu1 %vm14416_vm10, %v15071_v50  ;;  %vm4132_vm10 = vcmask 1041408   ;;  %vm14426_vm4 = vcmask 1045508  }
 0x3b4   : > { %6147 = vmatpush.msk.msrb.mxu2 %vm14419_vm14, %v15071_v50  ;;  %6163 = vmatpush.msk.msrb.mxu3 %vm14420_vm15, %v15071_v50  ;;  %vm14423_vm14 = vcmp.eq.s32.totalorder %v14992_v58, %v10946_v9  ;;  %vm2928_vm15 = vcmp.eq.s32.totalorder %v14939_v57, %v11000_v61  ;;  %v4133_v60 = vsel %vm4132_vm10, %v4129_v29, %v4131_v32  ;;  %v6764_v29 = vld [vmem:[%s7022_s19 + $0x8] sm:$0xff] }
 0x3b5   : > { %3905 = vmatmul.f32.gmra.mxu1 %v10274_v37  ;;  %6116 = vmatpush.msk.msrb.mxu0 %vm2927_vm11, %v15071_v50  ;;  %v4137_v37 = vsel %vm14424_vm9, %v4126_v24, %v4127_v27  ;;  %vm14427_vm9 = vcmp.eq.s32.totalorder %v14983_v54, %v10946_v9 }
 0x3b6   : > { %6132 = vmatpush.msk.msrb.mxu1 %vm14423_vm14, %v15071_v50  ;;  %6148 = vmatpush.msk.msrb.mxu2 %vm2928_vm15, %v15071_v50  ;;  %v4139_v44 = vsel %vm14426_vm4, %v4135_v23, %v4137_v37  ;;  %vm2919_vm14 = vcmp.eq.s32.totalorder %v14935_v38, %v10946_v9  ;;  %vm14430_vm4 = vcmp.eq.s32.totalorder %v14983_v54, %v11000_v61  ;;  %v6765_v23 = vld [vmem:[%s7022_s19 + $0x40] sm:$0xff] }
 0x3b7   : > { %6164 = vmatpush.msk.msrb.mxu3 %vm14425_vm7, %v15071_v50  ;;  %3937 = vmatmul.f32.gmra.mxu2 %v10307_v19  ;;  %v4141_v7 = vsel %vm14428_vm13, %v4133_v60, %v4139_v44  ;;  %vm2920_vm7 = vcmp.eq.s32.totalorder %v14935_v38, %v11000_v61  ;;  %vm14432_vm13 = vcmp.eq.s32.totalorder %v14978_v34, %v10946_v9  ;;  %v11282_v19 = vld [vmem:[%s13840_s2 + $0x20] sm:$0xff]  ;;  %v3642_v40 = vpop.f32.mrf.mxu0 }
 0x3b8   : > { %3966 = vmatmul.f32.gmra.mxu3 %v10312_v47  ;;  %6117 = vmatpush.msk.msrb.mxu0 %vm2919_vm14, %v15071_v50  ;;  %4142 = vst [vmem:[%s312_s22] sm:$0xff] %v4141_v7  ;;  %v11288_v47 = vld [vmem:[%s13840_s2 + $0x28] sm:$0xff]  ;;  %v6766_v7 = vld [vmem:[%s13840_s2] sm:$0xff] }
 0x3b9   : > { %6133 = vmatpush.msk.msrb.mxu1 %vm14427_vm9, %v15071_v50  ;;  %6149 = vmatpush.msk.msrb.mxu2 %vm2920_vm7, %v15071_v50  ;;  %vm14431_vm9 = vcmp.eq.s32.totalorder %v14930_v17, %v10946_v9 }
 0x3ba   : > { %6165 = vmatpush.msk.msrb.mxu3 %vm14430_vm4, %v15071_v50  ;;  %6118 = vmatpush.msk.msrb.mxu0 %vm14431_vm9, %v15071_v50  ;;  %vm14434_vm4 = vcmp.eq.s32.totalorder %v14978_v34, %v11000_v61  ;;  %vm14438_vm9 = vcmp.eq.s32.totalorder %v14925_v14, %v10946_v9  ;;  %v3671_v43 = vpop.f32.mrf.mxu1 }
 0x3bb   : > { %6134 = vmatpush.msk.msrb.mxu1 %vm14432_vm13, %v15071_v50  ;;  %6150 = vmatpush.msk.msrb.mxu2 %vm14433_vm6, %v15071_v50  ;;  %vm14435_vm13 = vcmp.eq.s32.totalorder %v14976_v8, %v10946_v9  ;;  %vm14437_vm6 = vcmp.eq.s32.totalorder %v14925_v14, %v11000_v61  ;;  %v3672_v33 = vadd.f32 %v3671_v43, %v3642_v40  ;;  %v6767_v40 = vld [vmem:[%s13840_s2 + $0x8] sm:$0xff] }
 0x3bc   : > { %6166 = vmatpush.msk.msrb.mxu3 %vm14434_vm4, %v15071_v50  ;;  %6119 = vmatpush.msk.msrb.mxu0 %vm14438_vm9, %v15071_v50  ;;  %vm14436_vm4 = vcmp.eq.s32.totalorder %v14976_v8, %v11000_v61  ;;  %vm14441_vm9 = vcmp.eq.s32.totalorder %v14972_v12, %v11000_v61 }
 0x3bd   : > { %6135 = vmatpush.msk.msrb.mxu1 %vm14435_vm13, %v15071_v50  ;;  %6151 = vmatpush.msk.msrb.mxu2 %vm14437_vm6, %v15071_v50  ;;  %vm14442_vm13 = vcmp.eq.s32.totalorder %v14922_v4, %v10946_v9  ;;  %vm14440_vm6 = vcmp.eq.s32.totalorder %v14922_v4, %v11000_v61  ;;  %4089 = vst [vmem:[%s11320_s18] sm:$0xff] %v3672_v33 }
 0x3be   : > { %6167 = vmatpush.msk.msrb.mxu3 %vm14436_vm4, %v15071_v50  ;;  %3879 = vmatmul.f32.gmra.mxu0 %v11282_v19  ;;  %vm14439_vm4 = vcmp.eq.s32.totalorder %v14972_v12, %v10946_v9  ;;  %v4143_v13 = vsub.f32 %v3672_v33, %v6761_v0 }
 0x3bf   : > { %3908 = vmatmul.f32.gmra.mxu1 %v11288_v47  ;;  %6120 = vmatpush.msk.msrb.mxu0 %vm14442_vm13, %v15071_v50  ;;  %vm14445_vm13 = vcmp.eq.s32.totalorder %v14970_v3, %v11000_v61 }
 0x3c0   : > { %6136 = vmatpush.msk.msrb.mxu1 %vm14439_vm4, %v15071_v50  ;;  %6152 = vmatpush.msk.msrb.mxu2 %vm14440_vm6, %v15071_v50  ;;  %vm14443_vm4 = vcmp.eq.s32.totalorder %v14918_v53, %v10946_v9  ;;  %vm14444_vm6 = vcmp.eq.s32.totalorder %v14970_v3, %v10946_v9  ;;  %v4175_v27 = vmul.f32 %v4143_v13, %v4143_v13 }
 0x3c1   : > { %6168 = vmatpush.msk.msrb.mxu3 %vm14441_vm9, %v15071_v50  ;;  %3940 = vmatmul.f32.gmra.mxu2 %v10357_v25  ;;  %vm14446_vm9 = vcmp.eq.s32.totalorder %v14918_v53, %v11000_v61  ;;  %v3700_v25 = vpop.f32.mrf.mxu2  ;;  %v3645_v18 = vpop.f32.mrf.mxu0 }
 0x3c2   : > { %3969 = vmatmul.f32.gmra.mxu3 %v10362_v16  ;;  %6121 = vmatpush.msk.msrb.mxu0 %vm14443_vm4, %v15071_v50  ;;  %vm14448_vm4 = vcmp.eq.s32.totalorder %v15078_v48, %v10946_v9  ;;  %v3729_v16 = vpop.f32.mrf.mxu3 }
 0x3c3   : > { %6137 = vmatpush.msk.msrb.mxu1 %vm14444_vm6, %v15071_v50  ;;  %6153 = vmatpush.msk.msrb.mxu2 %vm14446_vm9, %v15071_v50  ;;  %vm14447_vm6 = vcmp.eq.s32.totalorder %v14969_v35, %v10946_v9  ;;  %vm14449_vm9 = vcmp.eq.s32.totalorder %v14969_v35, %v11000_v61  ;;  %v3730_v36 = vadd.f32 %v3729_v16, %v3700_v25 }
 0x3c4   : > { %6169 = vmatpush.msk.msrb.mxu3 %vm14445_vm13, %v15071_v50  ;;  %6122 = vmatpush.msk.msrb.mxu0 %vm14448_vm4, %v15071_v50  ;;  %vm14450_vm13 = vcmp.eq.s32.totalorder %v15078_v48, %v11000_v61  ;;  %vm14452_vm4 = vcmp.eq.s32.totalorder %v14968_v21, %v10946_v9  ;;  %v3674_v42 = vpop.f32.mrf.mxu1 }
 0x3c5   : > { %6138 = vmatpush.msk.msrb.mxu1 %vm14447_vm6, %v15071_v50  ;;  %6154 = vmatpush.msk.msrb.mxu2 %vm14450_vm13, %v15071_v50  ;;  %vm14454_vm6 = vcmp.eq.s32.totalorder %v15079_v51, %v10946_v9  ;;  %vm14451_vm13 = vcmp.eq.s32.totalorder %v14968_v21, %v11000_v61  ;;  %4090 = vst [vmem:[%s11320_s18 + $0x8] sm:$0xff] %v3730_v36 }
 0x3c6   : > { %6170 = vmatpush.msk.msrb.mxu3 %vm14449_vm9, %v15071_v50  ;;  %6123 = vmatpush.msk.msrb.mxu0 %vm14454_vm6, %v15071_v50  ;;  %vm14453_vm9 = vcmp.eq.s32.totalorder %v15079_v51, %v11000_v61  ;;  %vm14457_vm6 = vcmp.eq.s32.totalorder %v14964_v6, %v11000_v61  ;;  %v3675_v24 = vadd.f32 %v3674_v42, %v3645_v18 }
 0x3c7   : > { %6139 = vmatpush.msk.msrb.mxu1 %vm14452_vm4, %v15071_v50  ;;  %6155 = vmatpush.msk.msrb.mxu2 %vm14453_vm9, %v15071_v50  ;;  %vm14455_vm4 = vcmp.eq.s32.totalorder %v14964_v6, %v10946_v9  ;;  %vm14458_vm9 = vcmp.eq.s32.totalorder %v15080_v26, %v11000_v61  ;;  %v4144_v32 = vsub.f32 %v3730_v36, %v6764_v29  ;;  %v6768_v36 = vld [vmem:[%s7022_s19 + $0x48] sm:$0xff]  ;;  %v6769_v29 = vld [vmem:[%s7022_s19 + $0x80] sm:$0xff] }
 0x3c8   : > { %6171 = vmatpush.msk.msrb.mxu3 %vm14451_vm13, %v15071_v50  ;;  %3882 = vmatmul.f32.gmra.mxu0 %v11402_v49  ;;  %vm14456_vm13 = vcmp.eq.s32.totalorder %v15080_v26, %v10946_v9  ;;  %4097 = vst [vmem:[%s11320_s18 + $0x40] sm:$0xff] %v3675_v24  ;;  %v4151_v37 = vsub.f32 %v3675_v24, %v6765_v23 }
 0x3c9   : > { %3911 = vmatmul.f32.gmra.mxu1 %v11408_v55  ;;  %6124 = vmatpush.msk.msrb.mxu0 %vm14456_vm13, %v15071_v50  ;;  %vm15086_vm13 = vcmp.eq.s32.totalorder %v14962_v63, %v15081_v22  ;;  %v3703_v60 = vpop.f32.mrf.mxu2  ;;  %v4176_v25 = vmul.f32 %v4144_v32, %v4144_v32 }
 0x3ca   : > { %6140 = vmatpush.msk.msrb.mxu1 %vm14455_vm4, %v15071_v50  ;;  %6156 = vmatpush.msk.msrb.mxu2 %vm14458_vm9, %v15071_v50  ;;  %vm15085_vm4 = vcmp.eq.s32.totalorder %v14962_v63, %v15084_v5  ;;  %v3732_v44 = vpop.f32.mrf.mxu3  ;;  %v4183_v43 = vmul.f32 %v4151_v37, %v4151_v37  ;;  %v3648_v13 = vpop.f32.mrf.mxu0  ;;  %vm15094_vm9 = vcmp.eq.s32.totalorder %v14957_v31, %v15081_v22 }
 0x3cb   : > { %6172 = vmatpush.msk.msrb.mxu3 %vm14457_vm6, %v15071_v50  ;;  %6173 = vmatpush.xpose.msk.msra.mxu0 %vm15085_vm4, %v15071_v50  ;;  %vm15087_vm6 = vcmp.eq.s32.totalorder %v14962_v63, %v15082_v15  ;;  %vm15088_vm4 = vcmp.eq.s32.totalorder %v14962_v63, %v15083_v56  ;;  %v3733_v33 = vadd.f32 %v3732_v44, %v3703_v60  ;;  %v6770_v60 = vld [vmem:[%s13840_s2 + $0x10] sm:$0xff]  ;;  %v6771_v44 = vld [vmem:[%s13840_s2 + $0x18] sm:$0xff] }
 0x3cc   : > { %6189 = vmatpush.xpose.msk.msra.mxu1 %vm15086_vm13, %v15071_v50  ;;  %6205 = vmatpush.xpose.msk.msra.mxu2 %vm15087_vm6, %v15071_v50  ;;  %vm15089_vm13 = vcmp.eq.s32.totalorder %v14960_v45, %v15084_v5  ;;  %vm15090_vm6 = vcmp.eq.s32.totalorder %v14960_v45, %v15081_v22  ;;  %v4207_v16 = vadd.f32 %v4183_v43, %v4175_v27 }
 0x3cd   : > { %6221 = vmatpush.xpose.msk.msra.mxu3 %vm15088_vm4, %v15071_v50  ;;  %4047 = vmatmul.f32.vlgmr.msrb.gmra.mxu2 %v6766_v7  ;;  %4098 = vst [vmem:[%s11320_s18 + $0x48] sm:$0xff] %v3733_v33  ;;  %v4152_v0 = vsub.f32 %v3733_v33, %v6768_v36  ;;  %vm15091_vm4 = vcmp.eq.s32.totalorder %v14960_v45, %v15082_v15  ;;  %v3677_v18 = vpop.f32.mrf.mxu1  ;;  %v6772_v33 = vld [vmem:[%s7022_s19 + $0x88] sm:$0xff] }
 0x3ce   : > { %4076 = vmatmul.f32.vlgmr.msrb.gmra.mxu3 %v6767_v40  ;;  %v3678_v24 = vadd.f32 %v3677_v18, %v3648_v13 }
 0x3cf   : > { %6174 = vmatpush.xpose.msk.msra.mxu0 %vm15089_vm13, %v15071_v50  ;;  %vm15092_vm13 = vcmp.eq.s32.totalorder %v14960_v45, %v15083_v56  ;;  %v4184_v42 = vmul.f32 %v4152_v0, %v4152_v0 }
 0x3d0   : > { %6190 = vmatpush.xpose.msk.msra.mxu1 %vm15090_vm6, %v15071_v50  ;;  %6206 = vmatpush.xpose.msk.msra.mxu2 %vm15091_vm4, %v15071_v50  ;;  %vm15093_vm6 = vcmp.eq.s32.totalorder %v14957_v31, %v15084_v5  ;;  %4105 = vst [vmem:[%s11320_s18 + $0x80] sm:$0xff] %v3678_v24  ;;  %v4159_v32 = vsub.f32 %v3678_v24, %v6769_v29 }
 0x3d1   : > { %6222 = vmatpush.xpose.msk.msra.mxu3 %vm15092_vm13, %v15071_v50  ;;  %3989 = vmatmul.f32.vlgmr.msrb.gmra.mxu0 %v6766_v7  ;;  %v4216_v27 = vadd.f32 %v4184_v42, %v4176_v25  ;;  %v3706_v23 = vpop.f32.mrf.mxu2  ;;  %vm15095_vm4 = vcmp.eq.s32.totalorder %v14957_v31, %v15082_v15  ;;  %vm15096_vm13 = vcmp.eq.s32.totalorder %v14957_v31, %v15083_v56  ;;  %v6773_v42 = vld [vmem:[%s7022_s19 + $0xc0] sm:$0xff] }
 0x3d2   : > { %4018 = vmatmul.f32.vlgmr.msrb.gmra.mxu1 %v6767_v40  ;;  %v3735_v37 = vpop.f32.mrf.mxu3  ;;  %v4191_v7 = vmul.f32 %v4159_v32, %v4159_v32 }
 0x3d3   : > { %6175 = vmatpush.xpose.msk.msra.mxu0 %vm15093_vm6, %v15071_v50  ;;  %v3736_v40 = vadd.f32 %v3735_v37, %v3706_v23  ;;  %vm15098_vm6 = vcmp.eq.s32.totalorder %v14954_v52, %v15081_v22  ;;  %v3651_v36 = vpop.f32.mrf.mxu0 }
 0x3d4   : > { %6191 = vmatpush.xpose.msk.msra.mxu1 %vm15094_vm9, %v15071_v50  ;;  %6207 = vmatpush.xpose.msk.msra.mxu2 %vm15095_vm4, %v15071_v50  ;;  %vm15097_vm9 = vcmp.eq.s32.totalorder %v14954_v52, %v15084_v5  ;;  %v4208_v43 = vadd.f32 %v4207_v16, %v4191_v7  ;;  %vm15099_vm4 = vcmp.eq.s32.totalorder %v14954_v52, %v15082_v15 }
 0x3d5   : > { %6223 = vmatpush.xpose.msk.msra.mxu3 %vm15096_vm13, %v15071_v50  ;;  %4050 = vmatmul.f32.gmra.mxu2 %v6770_v60  ;;  %4106 = vst [vmem:[%s11320_s18 + $0x88] sm:$0xff] %v3736_v40  ;;  %v4160_v25 = vsub.f32 %v3736_v40, %v6772_v33  ;;  %vm15100_vm13 = vcmp.eq.s32.totalorder %v14954_v52, %v15083_v56  ;;  %v3680_v0 = vpop.f32.mrf.mxu1 }
 0x3d6   : > { %4079 = vmatmul.f32.gmra.mxu3 %v6771_v44  ;;  %v3681_v16 = vadd.f32 %v3680_v0, %v3651_v36  ;;  %v6775_v0 = vld [vmem:[%s7022_s19 + $0x10] sm:$0xff] }
 0x3d7   : > { %6176 = vmatpush.xpose.msk.msra.mxu0 %vm15097_vm9, %v15071_v50  ;;  %v4192_v13 = vmul.f32 %v4160_v25, %v4160_v25  ;;  %vm15101_vm9 = vcmp.eq.s32.totalorder %v14950_v28, %v15084_v5 }
 0x3d8   : > { %6192 = vmatpush.xpose.msk.msra.mxu1 %vm15098_vm6, %v15071_v50  ;;  %6208 = vmatpush.xpose.msk.msra.mxu2 %vm15099_vm4, %v15071_v50  ;;  %vm15102_vm6 = vcmp.eq.s32.totalorder %v14950_v28, %v15081_v22  ;;  %4113 = vst [vmem:[%s11320_s18 + $0xc0] sm:$0xff] %v3681_v16  ;;  %v4167_v24 = vsub.f32 %v3681_v16, %v6773_v42 }
 0x3d9   : > { %6224 = vmatpush.xpose.msk.msra.mxu3 %vm15100_vm13, %v15071_v50  ;;  %3992 = vmatmul.f32.gmra.mxu0 %v6770_v60  ;;  %v4217_v18 = vadd.f32 %v4216_v27, %v4192_v13  ;;  %v3709_v29 = vpop.f32.mrf.mxu2  ;;  %vm15103_vm4 = vcmp.eq.s32.totalorder %v14950_v28, %v15082_v15  ;;  %vm15104_vm13 = vcmp.eq.s32.totalorder %v14950_v28, %v15083_v56  ;;  %v6774_v60 = vld [vmem:[%s7022_s19 + $0xc8] sm:$0xff] }
 0x3da   : > { %4021 = vmatmul.f32.gmra.mxu1 %v6771_v44  ;;  %v3738_v32 = vpop.f32.mrf.mxu3  ;;  %v4199_v27 = vmul.f32 %v4167_v24, %v4167_v24 }
 0x3db   : > { %6177 = vmatpush.xpose.msk.msra.mxu0 %vm15101_vm9, %v15071_v50  ;;  %v3739_v23 = vadd.f32 %v3738_v32, %v3709_v29  ;;  %vm15105_vm9 = vcmp.eq.s32.totalorder %v14946_v11, %v15084_v5  ;;  %v3758_v7 = vpop.f32.mrf.mxu0  ;;  %v6776_v29 = vld [vmem:[%s7022_s19 + $0x18] sm:$0xff] }
 0x3dc   : > { %6193 = vmatpush.xpose.msk.msra.mxu1 %vm15102_vm6, %v15071_v50  ;;  %6209 = vmatpush.xpose.msk.msra.mxu2 %vm15103_vm4, %v15071_v50  ;;  %vm15106_vm6 = vcmp.eq.s32.totalorder %v14946_v11, %v15081_v22  ;;  %v11548_v37 = vadd.f32 %v4208_v43, %v4199_v27  ;;  %vm15107_vm4 = vcmp.eq.s32.totalorder %v14946_v11, %v15082_v15 }
 0x3dd   : > { %6225 = vmatpush.xpose.msk.msra.mxu3 %vm15104_vm13, %v15071_v50  ;;  %4053 = vmatmul.f32.gmra.mxu2 %v11282_v19  ;;  %4114 = vst [vmem:[%s11320_s18 + $0xc8] sm:$0xff] %v3739_v23  ;;  %v4168_v44 = vsub.f32 %v3739_v23, %v6774_v60  ;;  %vm15108_vm13 = vcmp.eq.s32.totalorder %v14946_v11, %v15083_v56  ;;  %v3787_v40 = vpop.f32.mrf.mxu1 }
 0x3de   : > { %4082 = vmatmul.f32.gmra.mxu3 %v11288_v47  ;;  %v3788_v33 = vadd.f32 %v3787_v40, %v3758_v7 }
 0x3df   : > { %6178 = vmatpush.xpose.msk.msra.mxu0 %vm15105_vm9, %v15071_v50  ;;  %v4200_v43 = vmul.f32 %v4168_v44, %v4168_v44  ;;  %vm15109_vm9 = vcmp.eq.s32.totalorder %v14943_v1, %v15084_v5 }
 0x3e0   : > { %6194 = vmatpush.xpose.msk.msra.mxu1 %vm15106_vm6, %v15071_v50  ;;  %6210 = vmatpush.xpose.msk.msra.mxu2 %vm15107_vm4, %v15071_v50  ;;  %vm15110_vm6 = vcmp.eq.s32.totalorder %v14943_v1, %v15081_v22  ;;  %4091 = vst [vmem:[%s11320_s18 + $0x10] sm:$0xff] %v3788_v33  ;;  %vm15111_vm4 = vcmp.eq.s32.totalorder %v14943_v1, %v15082_v15 }
 0x3e1   : > { %6226 = vmatpush.xpose.msk.msra.mxu3 %vm15108_vm13, %v15071_v50  ;;  %3995 = vmatmul.f32.gmra.mxu0 %v11282_v19  ;;  %v11570_v25 = vadd.f32 %v4217_v18, %v4200_v43  ;;  %v3816_v19 = vpop.f32.mrf.mxu2  ;;  %vm15112_vm13 = vcmp.eq.s32.totalorder %v14943_v1, %v15083_v56  ;;  %v4145_v13 = vsub.f32 %v3788_v33, %v6775_v0  ;;  %v6778_v43 = vld [vmem:[%s7022_s19 + $0x58] sm:$0xff] }
 0x3e2   : > { %4024 = vmatmul.f32.gmra.mxu1 %v11288_v47  ;;  %v3845_v47 = vpop.f32.mrf.mxu3 }
 0x3e3   : > { %6179 = vmatpush.xpose.msk.msra.mxu0 %vm15109_vm9, %v15071_v50  ;;  %v3846_v36 = vadd.f32 %v3845_v47, %v3816_v19  ;;  %vm15113_vm9 = vcmp.eq.s32.totalorder %v14939_v57, %v15084_v5  ;;  %v3761_v16 = vpop.f32.mrf.mxu0  ;;  %v4177_v24 = vmul.f32 %v4145_v13, %v4145_v13 }
 0x3e4   : > { %6195 = vmatpush.xpose.msk.msra.mxu1 %vm15110_vm6, %v15071_v50  ;;  %6211 = vmatpush.xpose.msk.msra.mxu2 %vm15111_vm4, %v15071_v50  ;;  %vm15114_vm6 = vcmp.eq.s32.totalorder %v14939_v57, %v15081_v22  ;;  %vm15115_vm4 = vcmp.eq.s32.totalorder %v14939_v57, %v15082_v15 }
 0x3e5   : > { %6227 = vmatpush.xpose.msk.msra.mxu3 %vm15112_vm13, %v15071_v50  ;;  %4056 = vmatmul.f32.gmra.mxu2 %v11402_v49  ;;  %4092 = vst [vmem:[%s11320_s18 + $0x18] sm:$0xff] %v3846_v36  ;;  %vm15116_vm13 = vcmp.eq.s32.totalorder %v14939_v57, %v15083_v56  ;;  %v3790_v18 = vpop.f32.mrf.mxu1  ;;  %v4146_v32 = vsub.f32 %v3846_v36, %v6776_v29 }
 0x3e6   : > { %4085 = vmatmul.f32.gmra.mxu3 %v11408_v55  ;;  %v3791_v42 = vadd.f32 %v3790_v18, %v3761_v16  ;;  %v6779_v16 = vld [vmem:[%s7022_s19 + $0x90] sm:$0xff] }
 0x3e7   : > { %6180 = vmatpush.xpose.msk.msra.mxu0 %vm15113_vm9, %v15071_v50  ;;  %vm15117_vm9 = vcmp.eq.s32.totalorder %v14935_v38, %v15084_v5  ;;  %v4178_v7 = vmul.f32 %v4146_v32, %v4146_v32 }
 0x3e8   : > { %6196 = vmatpush.xpose.msk.msra.mxu1 %vm15114_vm6, %v15071_v50  ;;  %6212 = vmatpush.xpose.msk.msra.mxu2 %vm15115_vm4, %v15071_v50  ;;  %vm15118_vm6 = vcmp.eq.s32.totalorder %v14935_v38, %v15081_v22  ;;  %4099 = vst [vmem:[%s11320_s18 + $0x50] sm:$0xff] %v3791_v42  ;;  %vm15119_vm4 = vcmp.eq.s32.totalorder %v14935_v38, %v15082_v15 }
 0x3e9   : > { %6228 = vmatpush.xpose.msk.msra.mxu3 %vm15116_vm13, %v15071_v50  ;;  %3998 = vmatmul.f32.gmra.mxu0 %v11402_v49  ;;  %v6777_v49 = vld [vmem:[%s7022_s19 + $0x50] sm:$0xff]  ;;  %vm15120_vm13 = vcmp.eq.s32.totalorder %v14935_v38, %v15083_v56 }
 0x3ea   : > { %4027 = vmatmul.f32.gmra.mxu1 %v11408_v55  ;;  %v4153_v27 = vsub.f32 %v3791_v42, %v6777_v49  ;;  %v3819_v55 = vpop.f32.mrf.mxu2  ;;  %v3848_v23 = vpop.f32.mrf.mxu3 }
 0x3eb   : > { %6181 = vmatpush.xpose.msk.msra.mxu0 %vm15117_vm9, %v15071_v50  ;;  %v3849_v44 = vadd.f32 %v3848_v23, %v3819_v55  ;;  %vm15121_vm9 = vcmp.eq.s32.totalorder %v14930_v17, %v15084_v5  ;;  %v3764_v19 = vpop.f32.mrf.mxu0 }
 0x3ec   : > { %6197 = vmatpush.xpose.msk.msra.mxu1 %vm15118_vm6, %v15071_v50  ;;  %6213 = vmatpush.xpose.msk.msra.mxu2 %vm15119_vm4, %v15071_v50  ;;  %v4185_v60 = vmul.f32 %v4153_v27, %v4153_v27  ;;  %vm15122_vm6 = vcmp.eq.s32.totalorder %v14930_v17, %v15081_v22  ;;  %vm15123_vm4 = vcmp.eq.s32.totalorder %v14930_v17, %v15082_v15  ;;  %v11668_v27 = vld [vmem:[%s7022_s19 + $0x98] sm:$0xff] }
 0x3ed   : > { %6229 = vmatpush.xpose.msk.msra.mxu3 %vm15120_vm13, %v15071_v50  ;;  %4100 = vst [vmem:[%s11320_s18 + $0x58] sm:$0xff] %v3849_v44  ;;  %v4154_v33 = vsub.f32 %v3849_v44, %v6778_v43  ;;  %vm15124_vm13 = vcmp.eq.s32.totalorder %v14930_v17, %v15083_v56  ;;  %v3793_v47 = vpop.f32.mrf.mxu1  ;;  %v11689_v43 = vld [vmem:[%s7022_s19 + $0xd0] sm:$0xff] }
 0x3ee   : > { %v4225_v40 = vadd.f32 %v4185_v60, %v4177_v24  ;;  %v3794_v0 = vadd.f32 %v3793_v47, %v3764_v19 }
 0x3ef   : > { %6182 = vmatpush.xpose.msk.msra.mxu0 %vm15121_vm9, %v15071_v50  ;;  %v4186_v36 = vmul.f32 %v4154_v33, %v4154_v33  ;;  %vm15125_vm9 = vcmp.eq.s32.totalorder %v14925_v14, %v15084_v5 }
 0x3f0   : > { %6198 = vmatpush.xpose.msk.msra.mxu1 %vm15122_vm6, %v15071_v50  ;;  %6214 = vmatpush.xpose.msk.msra.mxu2 %vm15123_vm4, %v15071_v50  ;;  %vm15126_vm6 = vcmp.eq.s32.totalorder %v14925_v14, %v15081_v22  ;;  %4107 = vst [vmem:[%s11320_s18 + $0x90] sm:$0xff] %v3794_v0  ;;  %v4161_v18 = vsub.f32 %v3794_v0, %v6779_v16  ;;  %v11710_v16 = vld [vmem:[%s7022_s19 + $0xd8] sm:$0xff] }
 0x3f1   : > { %6230 = vmatpush.xpose.msk.msra.mxu3 %vm15124_vm13, %v15071_v50  ;;  %v4234_v13 = vadd.f32 %v4186_v36, %v4178_v7  ;;  %vm15127_vm4 = vcmp.eq.s32.totalorder %v14925_v14, %v15082_v15  ;;  %vm15128_vm13 = vcmp.eq.s32.totalorder %v14925_v14, %v15083_v56  ;;  %15139 = vst [vmem:[#allocation113_spill] sm:$0xff] %v11710_v16 }
 0x3f2   : > { %v3822_v42 = vpop.f32.mrf.mxu2  ;;  %v3851_v24 = vpop.f32.mrf.mxu3  ;;  %v4193_v29 = vmul.f32 %v4161_v18, %v4161_v18 }
 0x3f3   : > { %6183 = vmatpush.xpose.msk.msra.mxu0 %vm15125_vm9, %v15071_v50  ;;  %v3852_v32 = vadd.f32 %v3851_v24, %v3822_v42  ;;  %vm15129_vm9 = vcmp.eq.s32.totalorder %v14922_v4, %v15084_v5  ;;  %v3767_v23 = vpop.f32.mrf.mxu0 }
 0x3f4   : > { %6199 = vmatpush.xpose.msk.msra.mxu1 %vm15126_vm6, %v15071_v50  ;;  %6215 = vmatpush.xpose.msk.msra.mxu2 %vm15127_vm4, %v15071_v50  ;;  %vm15130_vm6 = vcmp.eq.s32.totalorder %v14922_v4, %v15081_v22  ;;  %v4226_v49 = vadd.f32 %v4225_v40, %v4193_v29  ;;  %vm15131_vm4 = vcmp.eq.s32.totalorder %v14922_v4, %v15082_v15  ;;  %v4219_v29 = vrot.slane %v11570_v25, 4 }
 0x3f5   : > { %6231 = vmatpush.xpose.msk.msra.mxu3 %vm15128_vm13, %v15071_v50  ;;  %4108 = vst [vmem:[%s11320_s18 + $0x98] sm:$0xff] %v3852_v32  ;;  %v4162_v55 = vsub.f32 %v3852_v32, %v11668_v27  ;;  %vm15132_vm13 = vcmp.eq.s32.totalorder %v14922_v4, %v15083_v56  ;;  %v3796_v60 = vpop.f32.mrf.mxu1  ;;  %v4210_v32 = vrot.slane %v11548_v37, 4 }
 0x3f6   : > { %v3797_v7 = vadd.f32 %v3796_v60, %v3767_v23 }
 0x3f7   : > { %6184 = vmatpush.xpose.msk.msra.mxu0 %vm15129_vm9, %v15071_v50  ;;  %v4194_v44 = vmul.f32 %v4162_v55, %v4162_v55  ;;  %vm15133_vm9 = vcmp.eq.s32.totalorder %v14918_v53, %v15084_v5 }
 0x3f8   : > { %6200 = vmatpush.xpose.msk.msra.mxu1 %vm15130_vm6, %v15071_v50  ;;  %6216 = vmatpush.xpose.msk.msra.mxu2 %vm15131_vm4, %v15071_v50  ;;  %vm15134_vm6 = vcmp.eq.s32.totalorder %v14918_v53, %v15081_v22  ;;  %4115 = vst [vmem:[%s11320_s18 + $0xd0] sm:$0xff] %v3797_v7  ;;  %v4169_v33 = vsub.f32 %v3797_v7, %v11689_v43 }
 0x3f9   : > { %6232 = vmatpush.xpose.msk.msra.mxu3 %vm15132_vm13, %v15071_v50  ;;  %v4235_v40 = vadd.f32 %v4234_v13, %v4194_v44  ;;  %vm15135_vm4 = vcmp.eq.s32.totalorder %v14918_v53, %v15082_v15  ;;  %vm15136_vm13 = vcmp.eq.s32.totalorder %v14918_v53, %v15083_v56 }
 0x3fa   : > { %v3825_v19 = vpop.f32.mrf.mxu2  ;;  %v3854_v47 = vpop.f32.mrf.mxu3  ;;  %v4201_v36 = vmul.f32 %v4169_v33, %v4169_v33 }
 0x3fb   : > { %6185 = vmatpush.xpose.msk.msra.mxu0 %vm15133_vm9, %v15071_v50  ;;  %v3855_v0 = vadd.f32 %v3854_v47, %v3825_v19  ;;  %vm15137_vm9 = vcmp.eq.s32.totalorder %v15078_v48, %v15084_v5 }
 0x3fc   : > { %6201 = vmatpush.xpose.msk.msra.mxu1 %vm15134_vm6, %v15071_v50  ;;  %6217 = vmatpush.xpose.msk.msra.mxu2 %vm15135_vm4, %v15071_v50  ;;  %vm15138_vm6 = vcmp.eq.s32.totalorder %v15078_v48, %v15081_v22  ;;  %v4227_v13 = vadd.f32 %v4226_v49, %v4201_v36  ;;  %vm15140_vm4 = vcmp.eq.s32.totalorder %v15078_v48, %v15082_v15 }
 0x3fd   : > { %6233 = vmatpush.xpose.msk.msra.mxu3 %vm15136_vm13, %v15071_v50  ;;  %4116 = vst [vmem:[%s11320_s18 + $0xd8] sm:$0xff] %v3855_v0  ;;  %v4170_v18 = vsub.f32 %v3855_v0, %v11710_v16  ;;  %vm15141_vm13 = vcmp.eq.s32.totalorder %v15078_v48, %v15083_v56  ;;  %v4220_v49 = vadd.f32 %v4219_v29, %v11570_v25 }
 0x3fe   : > { %v4228_v55 = vrot.slane %v4227_v13, 4  ;;  %v4211_v25 = vadd.f32 %v4210_v32, %v11548_v37 }
 0x3ff   : > { %6186 = vmatpush.xpose.msk.msra.mxu0 %vm15137_vm9, %v15071_v50  ;;  %v4202_v42 = vmul.f32 %v4170_v18, %v4170_v18  ;;  %vm15142_vm9 = vcmp.eq.s32.totalorder %v15079_v51, %v15084_v5  ;;  %v4221_v60 = vrot.slane %v4220_v49, 2 }
 0x400   : > { %6202 = vmatpush.xpose.msk.msra.mxu1 %vm15138_vm6, %v15071_v50  ;;  %6218 = vmatpush.xpose.msk.msra.mxu2 %vm15140_vm4, %v15071_v50  ;;  %vm15143_vm6 = vcmp.eq.s32.totalorder %v15079_v51, %v15081_v22  ;;  %vm15144_vm4 = vcmp.eq.s32.totalorder %v15079_v51, %v15082_v15  ;;  %v4229_v44 = vadd.f32 %v4228_v55, %v4227_v13  ;;  %v4212_v37 = vrot.slane %v4211_v25, 2 }
 0x401   : > { %6234 = vmatpush.xpose.msk.msra.mxu3 %vm15141_vm13, %v15071_v50  ;;  %v4236_v24 = vadd.f32 %v4235_v40, %v4202_v42  ;;  %vm15145_vm13 = vcmp.eq.s32.totalorder %v15079_v51, %v15083_v56  ;;  %v4222_v40 = vadd.f32 %v4221_v60, %v4220_v49 }
 0x402   : > { %v4230_v33 = vrot.slane %v4229_v44, 2  ;;  %v4213_v47 = vadd.f32 %v4212_v37, %v4211_v25 }
 0x403   : > { %6187 = vmatpush.xpose.msk.msra.mxu0 %vm15142_vm9, %v15071_v50  ;;  %vm15146_vm9 = vcmp.eq.s32.totalorder %v15080_v26, %v15084_v5  ;;  %v4237_v23 = vrot.slane %v4236_v24, 4  ;;  %v4223_v36 = vrot.slane %v4222_v40, 1 }
 0x404   : > { %6203 = vmatpush.xpose.msk.msra.mxu1 %vm15143_vm6, %v15071_v50  ;;  %6219 = vmatpush.xpose.msk.msra.mxu2 %vm15144_vm4, %v15071_v50  ;;  %vm15147_vm6 = vcmp.eq.s32.totalorder %v15080_v26, %v15081_v22  ;;  %vm15148_vm4 = vcmp.eq.s32.totalorder %v15080_v26, %v15082_v15  ;;  %v4231_v0 = vadd.f32 %v4230_v33, %v4229_v44  ;;  %v4214_v18 = vrot.slane %v4213_v47, 1 }
 0x405   : > { %6235 = vmatpush.xpose.msk.msra.mxu3 %vm15145_vm13, %v15071_v50  ;;  %vm15149_vm13 = vcmp.eq.s32.totalorder %v15080_v26, %v15083_v56  ;;  %v4238_v7 = vadd.f32 %v4237_v23, %v4236_v24  ;;  %v4224_v42 = vadd.f32 %v4223_v36, %v4222_v40 }
 0x406   : > { %v4232_v24 = vrot.slane %v4231_v0, 1  ;;  %v4215_v32 = vadd.f32 %v4214_v18, %v4213_v47 }
 0x407   : > { %6188 = vmatpush.xpose.msk.msra.mxu0 %vm15146_vm9, %v15071_v50  ;;  %vm15150_vm9 = vcmp.eq.s32.totalorder %v14960_v45, %v10513_v59  ;;  %v4239_v19 = vrot.slane %v4238_v7, 2  ;;  %v4287_v49 = vrot.slane %v4224_v42, 7 }
 0x408   : > { %6204 = vmatpush.xpose.msk.msra.mxu1 %vm15147_vm6, %v15071_v50  ;;  %6220 = vmatpush.xpose.msk.msra.mxu2 %vm15148_vm4, %v15071_v50  ;;  %vm15151_vm6 = vcmp.eq.s32.totalorder %v14960_v45, %v11000_v61  ;;  %vm15152_vm4 = vcmp.eq.s32.totalorder %v14957_v31, %v10508_v41  ;;  %v4233_v55 = vadd.f32 %v4232_v24, %v4231_v0 }
 0x409   : > { %6236 = vmatpush.xpose.msk.msra.mxu3 %vm15149_vm13, %v15071_v50  ;;  %vm15153_vm13 = vcmp.eq.s32.totalorder %v14957_v31, %v10513_v59  ;;  %v4240_v13 = vadd.f32 %v4239_v19, %v4238_v7  ;;  %v4294_v44 = vsel %vm14459_vm3, %v4215_v32, %v4287_v49  ;;  %vm15174_vm3 = vcmp.eq.s32.totalorder %v14939_v57, %v10513_v59 }
 0x40a   : > { %4319 = vmatmul.f32.vlgmr.msra.gmra.mxu0 %v15071_v50  ;;  %v4288_v25 = vrot.slane %v4233_v55, 6 }
 0x40b   : > { %6237 = vmatpush.xpose.msk.msrb.mxu0 %vm2981_vm8, %v15071_v50  ;;  %4359 = vmatmul.f32.vlgmr.msra.gmra.mxu2 %v15071_v50  ;;  %v4241_v29 = vrot.slane %v4240_v13, 1 }
 0x40c   : > { %6253 = vmatpush.xpose.msk.msrb.mxu1 %vm2982_vm2, %v15071_v50  ;;  %6269 = vmatpush.xpose.msk.msrb.mxu2 %vm2983_vm0, %v15071_v50 }
 0x40d   : > { %6285 = vmatpush.xpose.msk.msrb.mxu3 %vm2984_vm5, %v15071_v50  ;;  %4339 = vmatmul.f32.vlgmr.msra.gmra.mxu1 %v15071_v50  ;;  %v4242_v23 = vadd.f32 %v4241_v29, %v4240_v13 }
 0x40e   : > { %4379 = vmatmul.f32.vlgmr.msra.gmra.mxu3 %v15071_v50 }
 0x40f   : > { %6238 = vmatpush.xpose.msk.msrb.mxu0 %vm2973_vm12, %v15071_v50  ;;  %v4289_v60 = vrot.slane %v4242_v23, 5  ;;  %v11979_v23 = vld [vmem:[%s7022_s19 + $0x28] sm:$0xff] }
 0x410   : > { %6254 = vmatpush.xpose.msk.msrb.mxu1 %vm15150_vm9, %v15071_v50  ;;  %6270 = vmatpush.xpose.msk.msrb.mxu2 %vm2975_vm1, %v15071_v50  ;;  %vm15154_vm9 = vcmp.eq.s32.totalorder %v14957_v31, %v10946_v9  ;;  %15193 = vst [vmem:[#allocation40_spill] sm:$0xff] %v11979_v23 }
 0x411   : > { %6286 = vmatpush.xpose.msk.msrb.mxu3 %vm15151_vm6, %v15071_v50  ;;  %vm15155_vm6 = vcmp.eq.s32.totalorder %v14957_v31, %v11000_v61 }
 0x413   : > { %6239 = vmatpush.xpose.msk.msrb.mxu0 %vm15152_vm4, %v15071_v50  ;;  %vm15156_vm4 = vcmp.eq.s32.totalorder %v14954_v52, %v10508_v41 }
 0x414   : > { %6255 = vmatpush.xpose.msk.msrb.mxu1 %vm15153_vm13, %v15071_v50  ;;  %6271 = vmatpush.xpose.msk.msrb.mxu2 %vm15154_vm9, %v15071_v50  ;;  %vm15157_vm13 = vcmp.eq.s32.totalorder %v14954_v52, %v10513_v59  ;;  %vm15158_vm9 = vcmp.eq.s32.totalorder %v14954_v52, %v10946_v9 }
 0x415   : > { %6287 = vmatpush.xpose.msk.msrb.mxu3 %vm15155_vm6, %v15071_v50  ;;  %vm15159_vm6 = vcmp.eq.s32.totalorder %v14954_v52, %v11000_v61 }
 0x417   : > { %6240 = vmatpush.xpose.msk.msrb.mxu0 %vm15156_vm4, %v15071_v50  ;;  %vm15160_vm4 = vcmp.eq.s32.totalorder %v14950_v28, %v10508_v41 }
 0x418   : > { %6256 = vmatpush.xpose.msk.msrb.mxu1 %vm15157_vm13, %v15071_v50  ;;  %6272 = vmatpush.xpose.msk.msrb.mxu2 %vm15158_vm9, %v15071_v50  ;;  %vm15161_vm13 = vcmp.eq.s32.totalorder %v14950_v28, %v10513_v59  ;;  %vm15162_vm9 = vcmp.eq.s32.totalorder %v14950_v28, %v10946_v9 }
 0x419   : > { %6288 = vmatpush.xpose.msk.msrb.mxu3 %vm15159_vm6, %v15071_v50  ;;  %vm15163_vm6 = vcmp.eq.s32.totalorder %v14950_v28, %v11000_v61 }
 0x41b   : > { %6241 = vmatpush.xpose.msk.msrb.mxu0 %vm15160_vm4, %v15071_v50  ;;  %vm15164_vm4 = vcmp.eq.s32.totalorder %v14946_v11, %v10508_v41 }
 0x41c   : > { %6257 = vmatpush.xpose.msk.msrb.mxu1 %vm15161_vm13, %v15071_v50  ;;  %6273 = vmatpush.xpose.msk.msrb.mxu2 %vm15162_vm9, %v15071_v50  ;;  %vm15165_vm13 = vcmp.eq.s32.totalorder %v14946_v11, %v10513_v59  ;;  %vm15166_vm9 = vcmp.eq.s32.totalorder %v14946_v11, %v10946_v9 }
 0x41d   : > { %6289 = vmatpush.xpose.msk.msrb.mxu3 %vm15163_vm6, %v15071_v50  ;;  %vm15167_vm6 = vcmp.eq.s32.totalorder %v14946_v11, %v11000_v61 }
 0x41f   : > { %6242 = vmatpush.xpose.msk.msrb.mxu0 %vm15164_vm4, %v15071_v50  ;;  %vm15168_vm4 = vcmp.eq.s32.totalorder %v14943_v1, %v10508_v41 }
 0x420   : > { %6258 = vmatpush.xpose.msk.msrb.mxu1 %vm15165_vm13, %v15071_v50  ;;  %6274 = vmatpush.xpose.msk.msrb.mxu2 %vm15166_vm9, %v15071_v50  ;;  %vm15169_vm13 = vcmp.eq.s32.totalorder %v14943_v1, %v10513_v59  ;;  %vm15170_vm9 = vcmp.eq.s32.totalorder %v14943_v1, %v10946_v9 }
 0x421   : > { %6290 = vmatpush.xpose.msk.msrb.mxu3 %vm15167_vm6, %v15071_v50  ;;  %v3874_v7 = vpop.f32.mrf.mxu0  ;;  %v3903_v37 = vpop.f32.mrf.mxu1  ;;  %vm15171_vm6 = vcmp.eq.s32.totalorder %v14943_v1, %v11000_v61 }
 0x422   : > { %v3904_v40 = vadd.f32 %v3903_v37, %v3874_v7 }
 0x423   : > { %6243 = vmatpush.xpose.msk.msrb.mxu0 %vm15168_vm4, %v15071_v50  ;;  %vm15172_vm4 = vcmask 1042434  }
 0x424   : > { %6259 = vmatpush.xpose.msk.msrb.mxu1 %vm15169_vm13, %v15071_v50  ;;  %6275 = vmatpush.xpose.msk.msrb.mxu2 %vm15170_vm9, %v15071_v50  ;;  %4093 = vst [vmem:[%s11320_s18 + $0x20] sm:$0xff] %v3904_v40  ;;  %v4295_v33 = vsel %vm15172_vm4, %v4288_v25, %v4289_v60  ;;  %vm15173_vm13 = vcmp.eq.s32.totalorder %v14939_v57, %v10508_v41  ;;  %v11983_v60 = vld [vmem:[%s7022_s19 + $0x68] sm:$0xff] }
 0x425   : > { %6291 = vmatpush.xpose.msk.msrb.mxu3 %vm15171_vm6, %v15071_v50  ;;  %v3932_v19 = vpop.f32.mrf.mxu2  ;;  %v3961_v47 = vpop.f32.mrf.mxu3  ;;  %v11885_v36 = vsel %vm4132_vm10, %v4294_v44, %v4295_v33  ;;  %vm15176_vm10 = vcmp.eq.s32.totalorder %v14935_v38, %v10513_v59  ;;  %vm15177_vm9 = vcmp.eq.s32.totalorder %v14930_v17, %v10508_v41  ;;  %vm15178_vm6 = vcmp.eq.s32.totalorder %v14930_v17, %v10513_v59 }
 0x426   : > { %v3962_v0 = vadd.f32 %v3961_v47, %v3932_v19  ;;  %vm15179_vm4 = vcmp.eq.s32.totalorder %v14930_v17, %v10946_v9  ;;  %15194 = vst [vmem:[#allocation12_spill] sm:$0xff] %v11983_v60  ;;  %v11987_v19 = vld [vmem:[%s7022_s19 + $0x20] sm:$0xff] }
 0x427   : > { %6244 = vmatpush.xpose.msk.msrb.mxu0 %vm15173_vm13, %v15071_v50  ;;  %vm15180_vm13 = vcmp.eq.s32.totalorder %v14930_v17, %v11000_v61  ;;  %15195 = vst [vmem:[#allocation104_spill] sm:$0xff] %v11987_v19  ;;  %v4147_v47 = vsub.f32 %v3904_v40, %v11987_v19  ;;  %v12179_v19 = vld [vmem:[%s7022_s19 + $0x78] sm:$0xff] }
 0x428   : > { %6260 = vmatpush.xpose.msk.msrb.mxu1 %vm15174_vm3, %v15071_v50  ;;  %6276 = vmatpush.xpose.msk.msrb.mxu2 %vm2927_vm11, %v15071_v50  ;;  %4094 = vst [vmem:[%s11320_s18 + $0x28] sm:$0xff] %v3962_v0  ;;  %vm15175_vm3 = vcmp.eq.s32.totalorder %v14935_v38, %v10508_v41  ;;  %v4148_v25 = vsub.f32 %v3962_v0, %v11979_v23 }
 0x429   : > { %6292 = vmatpush.xpose.msk.msrb.mxu3 %vm2928_vm15, %v15071_v50  ;;  %15240 = vst [vmem:[#allocation22_spill] sm:$0xff] %v12179_v19 }
 0x42a   : > { %v4180_v40 = vmul.f32 %v4148_v25, %v4148_v25 }
 0x42b   : > { %6245 = vmatpush.xpose.msk.msrb.mxu0 %vm15175_vm3, %v15071_v50  ;;  %vm15181_vm3 = vcmp.eq.s32.totalorder %v14925_v14, %v10508_v41 }
 0x42c   : > { %6261 = vmatpush.xpose.msk.msrb.mxu1 %vm15176_vm10, %v15071_v50  ;;  %6277 = vmatpush.xpose.msk.msrb.mxu2 %vm2919_vm14, %v15071_v50  ;;  %vm15182_vm10 = vcmp.eq.s32.totalorder %v14925_v14, %v10513_v59  ;;  %v3877_v24 = vpop.f32.mrf.mxu0 }
 0x42d   : > { %6293 = vmatpush.xpose.msk.msrb.mxu3 %vm2920_vm7, %v15071_v50 }
 0x42e   : > { %v3935_v13 = vpop.f32.mrf.mxu2 }
 0x42f   : > { %6246 = vmatpush.xpose.msk.msrb.mxu0 %vm15177_vm9, %v15071_v50  ;;  %vm15183_vm9 = vcmp.eq.s32.totalorder %v14925_v14, %v10946_v9 }
 0x430   : > { %6262 = vmatpush.xpose.msk.msrb.mxu1 %vm15178_vm6, %v15071_v50  ;;  %6278 = vmatpush.xpose.msk.msrb.mxu2 %vm15179_vm4, %v15071_v50  ;;  %v3964_v18 = vpop.f32.mrf.mxu3  ;;  %vm15184_vm6 = vcmp.eq.s32.totalorder %v14925_v14, %v11000_v61  ;;  %vm15185_vm4 = vcmp.eq.s32.totalorder %v14922_v4, %v10508_v41 }
 0x431   : > { %6294 = vmatpush.xpose.msk.msrb.mxu3 %vm15180_vm13, %v15071_v50  ;;  %v3965_v42 = vadd.f32 %v3964_v18, %v3935_v13  ;;  %vm15186_vm13 = vcmp.eq.s32.totalorder %v14922_v4, %v10513_v59  ;;  %v11991_v13 = vld [vmem:[%s7022_s19 + $0x60] sm:$0xff] }
 0x432   : > { %v3906_v29 = vpop.f32.mrf.mxu1  ;;  %15196 = vst [vmem:[#allocation114_spill] sm:$0xff] %v11991_v13 }
 0x433   : > { %6247 = vmatpush.xpose.msk.msrb.mxu0 %vm15181_vm3, %v15071_v50  ;;  %v3907_v32 = vadd.f32 %v3906_v29, %v3877_v24  ;;  %4102 = vst [vmem:[%s11320_s18 + $0x68] sm:$0xff] %v3965_v42  ;;  %vm15187_vm3 = vcmp.eq.s32.totalorder %v14922_v4, %v10946_v9  ;;  %v4156_v44 = vsub.f32 %v3965_v42, %v11983_v60  ;;  %v12013_v42 = vld [vmem:[%s7022_s19 + $0xa8] sm:$0xff] }
 0x434   : > { %6263 = vmatpush.xpose.msk.msrb.mxu1 %vm15182_vm10, %v15071_v50  ;;  %6279 = vmatpush.xpose.msk.msrb.mxu2 %vm15183_vm9, %v15071_v50  ;;  %vm15188_vm10 = vcmp.eq.s32.totalorder %v14922_v4, %v11000_v61  ;;  %vm15189_vm9 = vcmp.eq.s32.totalorder %v14918_v53, %v10508_v41  ;;  %15201 = vst [vmem:[#allocation47_spill] sm:$0xff] %v12013_v42 }
 0x435   : > { %6295 = vmatpush.xpose.msk.msrb.mxu3 %vm15184_vm6, %v15071_v50  ;;  %4101 = vst [vmem:[%s11320_s18 + $0x60] sm:$0xff] %v3907_v32  ;;  %vm15190_vm6 = vcmp.eq.s32.totalorder %v14918_v53, %v10513_v59  ;;  %v4155_v18 = vsub.f32 %v3907_v32, %v11991_v13  ;;  %v4188_v0 = vmul.f32 %v4156_v44, %v4156_v44  ;;  %v12175_v13 = vld [vmem:[%s7022_s19 + $0x38] sm:$0xff] }
 0x436   : > { %v4179_v32 = vmul.f32 %v4147_v47, %v4147_v47  ;;  %15239 = vst [vmem:[#allocation66_spill] sm:$0xff] %v12175_v13 }
 0x437   : > { %6248 = vmatpush.xpose.msk.msrb.mxu0 %vm15185_vm4, %v15071_v50  ;;  %vm15191_vm4 = vcmp.eq.s32.totalorder %v14918_v53, %v10946_v9  ;;  %v4252_v25 = vadd.f32 %v4188_v0, %v4180_v40 }
 0x438   : > { %6264 = vmatpush.xpose.msk.msrb.mxu1 %vm15186_vm13, %v15071_v50  ;;  %6280 = vmatpush.xpose.msk.msrb.mxu2 %vm15187_vm3, %v15071_v50  ;;  %vm15192_vm13 = vcmp.eq.s32.totalorder %v14918_v53, %v11000_v61  ;;  %vm15197_vm3 = vcmp.eq.s32.totalorder %v15078_v48, %v10508_v41 }
 0x439   : > { %6296 = vmatpush.xpose.msk.msrb.mxu3 %vm15188_vm10, %v15071_v50  ;;  %vm15198_vm10 = vcmp.eq.s32.totalorder %v15078_v48, %v10513_v59 }
 0x43a   : > { %v3938_v49 = vpop.f32.mrf.mxu2 }
 0x43b   : > { %6249 = vmatpush.xpose.msk.msrb.mxu0 %vm15189_vm9, %v15071_v50  ;;  %v3967_v55 = vpop.f32.mrf.mxu3  ;;  %v3880_v7 = vpop.f32.mrf.mxu0  ;;  %vm15199_vm9 = vcmp.eq.s32.totalorder %v15078_v48, %v10946_v9 }
 0x43c   : > { %6265 = vmatpush.xpose.msk.msrb.mxu1 %vm15190_vm6, %v15071_v50  ;;  %6281 = vmatpush.xpose.msk.msrb.mxu2 %vm15191_vm4, %v15071_v50  ;;  %v3909_v37 = vpop.f32.mrf.mxu1  ;;  %v3968_v33 = vadd.f32 %v3967_v55, %v3938_v49  ;;  %vm15200_vm6 = vcmp.eq.s32.totalorder %v15078_v48, %v11000_v61  ;;  %v4187_v49 = vmul.f32 %v4155_v18, %v4155_v18  ;;  %v12017_v55 = vld [vmem:[%s7022_s19 + $0xa0] sm:$0xff] }
 0x43d   : > { %6297 = vmatpush.xpose.msk.msrb.mxu3 %vm15192_vm13, %v15071_v50  ;;  %v3910_v24 = vadd.f32 %v3909_v37, %v3880_v7  ;;  %15202 = vst [vmem:[#allocation115_spill] sm:$0xff] %v12017_v55  ;;  %vm15203_vm4 = vcmp.eq.s32.totalorder %v15079_v51, %v10508_v41  ;;  %vm15204_vm13 = vcmp.eq.s32.totalorder %v15079_v51, %v10513_v59 }
 0x43e   : > { %4110 = vst [vmem:[%s11320_s18 + $0xa8] sm:$0xff] %v3968_v33  ;;  %v4164_v29 = vsub.f32 %v3968_v33, %v12013_v42  ;;  %v4243_v37 = vadd.f32 %v4187_v49, %v4179_v32  ;;  %v12062_v49 = vld [vmem:[%s7022_s19 + $0xe8] sm:$0xff] }
 0x43f   : > { %6250 = vmatpush.xpose.msk.msrb.mxu0 %vm15197_vm3, %v15071_v50  ;;  %4109 = vst [vmem:[%s11320_s18 + $0xa0] sm:$0xff] %v3910_v24  ;;  %v4163_v7 = vsub.f32 %v3910_v24, %v12017_v55  ;;  %vm15205_vm3 = vcmp.eq.s32.totalorder %v15079_v51, %v10946_v9 }
 0x440   : > { %6266 = vmatpush.xpose.msk.msrb.mxu1 %vm15198_vm10, %v15071_v50  ;;  %6282 = vmatpush.xpose.msk.msrb.mxu2 %vm15199_vm9, %v15071_v50  ;;  %vm15206_vm10 = vcmp.eq.s32.totalorder %v15079_v51, %v11000_v61  ;;  %v4196_v44 = vmul.f32 %v4164_v29, %v4164_v29  ;;  %vm15207_vm9 = vcmp.eq.s32.totalorder %v15080_v26, %v10508_v41 }
 0x441   : > { %6298 = vmatpush.xpose.msk.msrb.mxu3 %vm15200_vm6, %v15071_v50  ;;  %v4195_v33 = vmul.f32 %v4163_v7, %v4163_v7  ;;  %vm15208_vm6 = vcmp.eq.s32.totalorder %v15080_v26, %v10513_v59  ;;  %15213 = vst [vmem:[#allocation103_spill] sm:$0xff] %v12062_v49 }
 0x442   : > { %v4253_v32 = vadd.f32 %v4252_v25, %v4196_v44  ;;  %v12075_v25 = vld [vmem:[%s7022_s19 + $0xe0] sm:$0xff] }
 0x443   : > { %6251 = vmatpush.xpose.msk.msrb.mxu0 %vm15203_vm4, %v15071_v50  ;;  %vm15209_vm4 = vcmp.eq.s32.totalorder %v15080_v26, %v10946_v9  ;;  %15216 = vst [vmem:[#allocation17_spill] sm:$0xff] %v12075_v25 }
 0x444   : > { %6267 = vmatpush.xpose.msk.msrb.mxu1 %vm15204_vm13, %v15071_v50  ;;  %6283 = vmatpush.xpose.msk.msrb.mxu2 %vm15205_vm3, %v15071_v50  ;;  %v3941_v47 = vpop.f32.mrf.mxu2  ;;  %vm15210_vm13 = vcmp.eq.s32.totalorder %v15080_v26, %v11000_v61  ;;  %vm15211_vm3 = vcmp.eq.s32.totalorder %v15031_v20, %v15084_v5 }
 0x445   : > { %6299 = vmatpush.xpose.msk.msrb.mxu3 %vm15206_vm10, %v15071_v50  ;;  %v3970_v18 = vpop.f32.mrf.mxu3  ;;  %v3883_v24 = vpop.f32.mrf.mxu0  ;;  %vm15212_vm10 = vcmp.eq.s32.totalorder %v15031_v20, %v15081_v22 }
 0x446   : > { %v3912_v40 = vpop.f32.mrf.mxu1  ;;  %v3971_v0 = vadd.f32 %v3970_v18, %v3941_v47  ;;  %v4244_v47 = vadd.f32 %v4243_v37, %v4195_v33 }
 0x447   : > { %6252 = vmatpush.xpose.msk.msrb.mxu0 %vm15207_vm9, %v15071_v50  ;;  %v3913_v29 = vadd.f32 %v3912_v40, %v3883_v24  ;;  %vm15214_vm9 = vcmp.eq.s32.totalorder %v15031_v20, %v15082_v15 }
 0x448   : > { %6268 = vmatpush.xpose.msk.msrb.mxu1 %vm15208_vm6, %v15071_v50  ;;  %6284 = vmatpush.xpose.msk.msrb.mxu2 %vm15209_vm4, %v15071_v50  ;;  %4118 = vst [vmem:[%s11320_s18 + $0xe8] sm:$0xff] %v3971_v0  ;;  %v4172_v7 = vsub.f32 %v3971_v0, %v12062_v49  ;;  %vm15215_vm6 = vcmp.eq.s32.totalorder %v15031_v20, %v15083_v56 }
 0x449   : > { %6300 = vmatpush.xpose.msk.msrb.mxu3 %vm15210_vm13, %v15071_v50  ;;  %4117 = vst [vmem:[%s11320_s18 + $0xe0] sm:$0xff] %v3913_v29  ;;  %v4171_v44 = vsub.f32 %v3913_v29, %v12075_v25  ;;  %vm15217_vm4 = vcmp.eq.s32.totalorder %v15023_v2, %v15084_v5  ;;  %vm15218_vm13 = vcmp.eq.s32.totalorder %v15023_v2, %v15081_v22 }
 0x44a   : > { %v4204_v18 = vmul.f32 %v4172_v7, %v4172_v7  ;;  %4399 = vmatmul.f32.vlgmr.msrb.gmra.mxu0 %v15071_v50 }
 0x44b   : > { %6301 = vmatpush.xpose.msk.msra.mxu0 %vm15211_vm3, %v15071_v50  ;;  %4439 = vmatmul.f32.vlgmr.msrb.gmra.mxu2 %v15071_v50  ;;  %v4203_v37 = vmul.f32 %v4171_v44, %v4171_v44  ;;  %vm15219_vm3 = vcmp.eq.s32.totalorder %v15023_v2, %v15082_v15 }
 0x44c   : > { %6317 = vmatpush.xpose.msk.msra.mxu1 %vm15212_vm10, %v15071_v50  ;;  %6333 = vmatpush.xpose.msk.msra.mxu2 %vm15214_vm9, %v15071_v50  ;;  %v4254_v33 = vadd.f32 %v4253_v32, %v4204_v18  ;;  %vm15220_vm10 = vcmp.eq.s32.totalorder %v15023_v2, %v15083_v56  ;;  %vm15221_vm9 = vcmp.eq.s32.totalorder %v15019_v46, %v15084_v5 }
 0x44d   : > { %6349 = vmatpush.xpose.msk.msra.mxu3 %vm15215_vm6, %v15071_v50  ;;  %4419 = vmatmul.f32.vlgmr.msrb.gmra.mxu1 %v15071_v50  ;;  %v4245_v24 = vadd.f32 %v4244_v47, %v4203_v37  ;;  %vm15222_vm6 = vcmp.eq.s32.totalorder %v15019_v46, %v15081_v22 }
 0x44e   : > { %4459 = vmatmul.f32.vlgmr.msrb.gmra.mxu3 %v15071_v50  ;;  %v4255_v40 = vrot.slane %v4254_v33, 4  ;;  %v3990_v29 = vpop.f32.mrf.mxu0 }
 0x44f   : > { %6302 = vmatpush.xpose.msk.msra.mxu0 %vm15217_vm4, %v15071_v50  ;;  %v4246_v0 = vrot.slane %v4245_v24, 4  ;;  %v4019_v32 = vpop.f32.mrf.mxu1  ;;  %vm15223_vm4 = vcmp.eq.s32.totalorder %v15019_v46, %v15082_v15 }
 0x450   : > { %6318 = vmatpush.xpose.msk.msra.mxu1 %vm15218_vm13, %v15071_v50  ;;  %6334 = vmatpush.xpose.msk.msra.mxu2 %vm15219_vm3, %v15071_v50  ;;  %v4256_v7 = vadd.f32 %v4255_v40, %v4254_v33  ;;  %v4020_v47 = vadd.f32 %v4019_v32, %v3990_v29  ;;  %vm15224_vm13 = vcmp.eq.s32.totalorder %v15019_v46, %v15083_v56  ;;  %v4048_v18 = vpop.f32.mrf.mxu2 }
 0x451   : > { %6350 = vmatpush.xpose.msk.msra.mxu3 %vm15220_vm10, %v15071_v50  ;;  %v4247_v44 = vadd.f32 %v4246_v0, %v4245_v24  ;;  %v4077_v37 = vpop.f32.mrf.mxu3  ;;  %vm15225_vm3 = vcmp.eq.s32.totalorder %v14997_v62, %v15084_v5  ;;  %vm15226_vm10 = vcmp.eq.s32.totalorder %v14997_v62, %v15081_v22 }
 0x452   : > { %4095 = vst [vmem:[%s11320_s18 + $0x30] sm:$0xff] %v4020_v47  ;;  %v4078_v33 = vadd.f32 %v4077_v37, %v4048_v18  ;;  %v4257_v49 = vrot.slane %v4256_v7, 2 }
 0x453   : > { %6303 = vmatpush.xpose.msk.msra.mxu0 %vm15221_vm9, %v15071_v50  ;;  %v4248_v40 = vrot.slane %v4247_v44, 2  ;;  %vm15227_vm9 = vcmp.eq.s32.totalorder %v14997_v62, %v15082_v15 }
 0x454   : > { %6319 = vmatpush.xpose.msk.msra.mxu1 %vm15222_vm6, %v15071_v50  ;;  %6335 = vmatpush.xpose.msk.msra.mxu2 %vm15223_vm4, %v15071_v50  ;;  %4096 = vst [vmem:[%s11320_s18 + $0x38] sm:$0xff] %v4078_v33  ;;  %vm15228_vm6 = vcmp.eq.s32.totalorder %v14997_v62, %v15083_v56  ;;  %v4258_v0 = vadd.f32 %v4257_v49, %v4256_v7 }
 0x455   : > { %6351 = vmatpush.xpose.msk.msra.mxu3 %vm15224_vm13, %v15071_v50  ;;  %v4249_v24 = vadd.f32 %v4248_v40, %v4247_v44  ;;  %vm15229_vm4 = vcmp.eq.s32.totalorder %v14995_v10, %v15084_v5  ;;  %vm15230_vm13 = vcmp.eq.s32.totalorder %v14995_v10, %v15081_v22  ;;  %v4150_v23 = vsub.f32 %v4078_v33, %v12175_v13  ;;  %v12205_v13 = vld [vmem:[%s7022_s19 + $0xb8] sm:$0xff] }
 0x456   : > { %v3993_v29 = vpop.f32.mrf.mxu0  ;;  %v4259_v40 = vrot.slane %v4258_v0, 1 }
 0x457   : > { %6304 = vmatpush.xpose.msk.msra.mxu0 %vm15225_vm3, %v15071_v50  ;;  %v4022_v32 = vpop.f32.mrf.mxu1  ;;  %vm15231_vm3 = vcmp.eq.s32.totalorder %v14995_v10, %v15082_v15  ;;  %v4250_v37 = vrot.slane %v4249_v24, 1 }
 0x458   : > { %6320 = vmatpush.xpose.msk.msra.mxu1 %vm15226_vm10, %v15071_v50  ;;  %6336 = vmatpush.xpose.msk.msra.mxu2 %vm15227_vm9, %v15071_v50  ;;  %v4023_v18 = vadd.f32 %v4022_v32, %v3993_v29  ;;  %vm15232_vm10 = vcmp.eq.s32.totalorder %v14995_v10, %v15083_v56  ;;  %v4051_v49 = vpop.f32.mrf.mxu2  ;;  %vm15233_vm9 = vcmp.eq.s32.totalorder %v14994_v39, %v15084_v5  ;;  %v12167_v29 = vld [vmem:[%s7022_s19 + $0x30] sm:$0xff] }
 0x459   : > { %6352 = vmatpush.xpose.msk.msra.mxu3 %vm15228_vm6, %v15071_v50  ;;  %v4080_v7 = vpop.f32.mrf.mxu3  ;;  %vm15234_vm6 = vcmp.eq.s32.totalorder %v14994_v39, %v15081_v22  ;;  %15237 = vst [vmem:[#allocation7_spill] sm:$0xff] %v12167_v29  ;;  %v4149_v32 = vsub.f32 %v4020_v47, %v12167_v29  ;;  %v4251_v25 = vadd.f32 %v4250_v37, %v4249_v24 }
 0x45a   : > { %4103 = vst [vmem:[%s11320_s18 + $0x70] sm:$0xff] %v4023_v18  ;;  %v4081_v44 = vadd.f32 %v4080_v7, %v4051_v49  ;;  %v12171_v49 = vld [vmem:[%s7022_s19 + $0x70] sm:$0xff]  ;;  %v4260_v42 = vadd.f32 %v4259_v40, %v4258_v0 }
 0x45b   : > { %6305 = vmatpush.xpose.msk.msra.mxu0 %vm15229_vm4, %v15071_v50  ;;  %vm15235_vm4 = vcmp.eq.s32.totalorder %v14994_v39, %v15082_v15  ;;  %15238 = vst [vmem:[#allocation117_spill] sm:$0xff] %v12171_v49  ;;  %v4157_v7 = vsub.f32 %v4023_v18, %v12171_v49  ;;  %v4181_v0 = vmul.f32 %v4149_v32, %v4149_v32  ;;  %v4290_v37 = vrot.slane %v4251_v25, 4 }
 0x45c   : > { %6321 = vmatpush.xpose.msk.msra.mxu1 %vm15230_vm13, %v15071_v50  ;;  %6337 = vmatpush.xpose.msk.msra.mxu2 %vm15231_vm3, %v15071_v50  ;;  %4104 = vst [vmem:[%s11320_s18 + $0x78] sm:$0xff] %v4081_v44  ;;  %vm15236_vm13 = vcmp.eq.s32.totalorder %v14994_v39, %v15083_v56  ;;  %v4158_v16 = vsub.f32 %v4081_v44, %v12179_v19  ;;  %v12200_v44 = vld [vmem:[%s7022_s19 + $0xb0] sm:$0xff]  ;;  %v4291_v40 = vrot.slane %v4260_v42, 3 }
 0x45d   : > { %6353 = vmatpush.xpose.msk.msra.mxu3 %vm15232_vm10, %v15071_v50  ;;  %vm15241_vm3 = vcmp.eq.s32.totalorder %v14993_v30, %v15084_v5  ;;  %vm15242_vm10 = vcmp.eq.s32.totalorder %v14993_v30, %v15081_v22  ;;  %v4189_v18 = vmul.f32 %v4157_v7, %v4157_v7  ;;  %v4182_v19 = vmul.f32 %v4150_v23, %v4150_v23 }
 0x45e   : > { %v3996_v55 = vpop.f32.mrf.mxu0  ;;  %v4190_v49 = vmul.f32 %v4158_v16, %v4158_v16 }
 0x45f   : > { %6306 = vmatpush.xpose.msk.msra.mxu0 %vm15233_vm9, %v15071_v50  ;;  %v4025_v60 = vpop.f32.mrf.mxu1  ;;  %vm15243_vm9 = vcmp.eq.s32.totalorder %v14993_v30, %v15082_v15  ;;  %v4261_v16 = vadd.f32 %v4189_v18, %v4181_v0 }
 0x460   : > { %6322 = vmatpush.xpose.msk.msra.mxu1 %vm15234_vm6, %v15071_v50  ;;  %6338 = vmatpush.xpose.msk.msra.mxu2 %vm15235_vm4, %v15071_v50  ;;  %v4026_v47 = vadd.f32 %v4025_v60, %v3996_v55  ;;  %vm15244_vm6 = vcmp.eq.s32.totalorder %v14993_v30, %v15083_v56  ;;  %v4054_v33 = vpop.f32.mrf.mxu2  ;;  %vm15245_vm4 = vcmp.eq.s32.totalorder %v14992_v58, %v15084_v5 }
 0x461   : > { %6354 = vmatpush.xpose.msk.msra.mxu3 %vm15236_vm13, %v15071_v50  ;;  %v4083_v24 = vpop.f32.mrf.mxu3  ;;  %vm15246_vm13 = vcmp.eq.s32.totalorder %v14992_v58, %v15081_v22  ;;  %v4270_v7 = vadd.f32 %v4190_v49, %v4182_v19 }
 0x462   : > { %4111 = vst [vmem:[%s11320_s18 + $0xb0] sm:$0xff] %v4026_v47  ;;  %v4165_v60 = vsub.f32 %v4026_v47, %v12200_v44  ;;  %v4084_v55 = vadd.f32 %v4083_v24, %v4054_v33  ;;  %v12245_v24 = vld [vmem:[%s7022_s19 + $0xf0] sm:$0xff] }
 0x463   : > { %6307 = vmatpush.xpose.msk.msra.mxu0 %vm15241_vm3, %v15071_v50  ;;  %vm15247_vm3 = vcmp.eq.s32.totalorder %v14992_v58, %v15082_v15 }
 0x464   : > { %6323 = vmatpush.xpose.msk.msra.mxu1 %vm15242_vm10, %v15071_v50  ;;  %6339 = vmatpush.xpose.msk.msra.mxu2 %vm15243_vm9, %v15071_v50  ;;  %4112 = vst [vmem:[%s11320_s18 + $0xb8] sm:$0xff] %v4084_v55  ;;  %v4166_v29 = vsub.f32 %v4084_v55, %v12205_v13  ;;  %vm15248_vm10 = vcmp.eq.s32.totalorder %v14992_v58, %v15083_v56  ;;  %vm15249_vm9 = vcmask 1044484  }
 0x465   : > { %6355 = vmatpush.xpose.msk.msra.mxu3 %vm15244_vm6, %v15071_v50  ;;  %v4197_v23 = vmul.f32 %v4165_v60, %v4165_v60  ;;  %v12225_v32 = vsel %vm15249_vm9, %v4290_v37, %v4291_v40  ;;  %vm15250_vm6 = vcmp.eq.s32.totalorder %v14983_v54, %v15084_v5  ;;  %v12250_v37 = vld [vmem:[%s7022_s19 + $0xf8] sm:$0xff]  ;;  %vm15255_vm9 = vcmp.eq.s32.totalorder %v14978_v34, %v15081_v22 }
 0x466   : > { %v3999_v42 = vpop.f32.mrf.mxu0  ;;  %v4198_v47 = vmul.f32 %v4166_v29, %v4166_v29 }
 0x467   : > { %6308 = vmatpush.xpose.msk.msra.mxu0 %vm15245_vm4, %v15071_v50  ;;  %v4028_v25 = vpop.f32.mrf.mxu1  ;;  %vm15251_vm4 = vcmp.eq.s32.totalorder %v14983_v54, %v15081_v22  ;;  %v4262_v49 = vadd.f32 %v4261_v16, %v4197_v23 }
 0x468   : > { %6324 = vmatpush.xpose.msk.msra.mxu1 %vm15246_vm13, %v15071_v50  ;;  %6340 = vmatpush.xpose.msk.msra.mxu2 %vm15247_vm3, %v15071_v50  ;;  %v4029_v33 = vadd.f32 %v4028_v25, %v3999_v42  ;;  %vm15252_vm13 = vcmp.eq.s32.totalorder %v14983_v54, %v15082_v15  ;;  %vm15253_vm3 = vcmp.eq.s32.totalorder %v14983_v54, %v15083_v56  ;;  %v4057_v19 = vpop.f32.mrf.mxu2 }
 0x469   : > { %6356 = vmatpush.xpose.msk.msra.mxu3 %vm15248_vm10, %v15071_v50  ;;  %v4086_v29 = vpop.f32.mrf.mxu3  ;;  %v4271_v60 = vadd.f32 %v4270_v7, %v4198_v47  ;;  %vm15254_vm10 = vcmp.eq.s32.totalorder %v14978_v34, %v15084_v5 }
 0x46a   : > { %4119 = vst [vmem:[%s11320_s18 + $0xf0] sm:$0xff] %v4029_v33  ;;  %v4173_v0 = vsub.f32 %v4029_v33, %v12245_v24  ;;  %v4087_v18 = vadd.f32 %v4086_v29, %v4057_v19 }
 0x46b   : > { %6309 = vmatpush.xpose.msk.msra.mxu0 %vm15250_vm6, %v15071_v50  ;;  %vm15256_vm6 = vcmp.eq.s32.totalorder %v14978_v34, %v15082_v15 }
 0x46c   : > { %6325 = vmatpush.xpose.msk.msra.mxu1 %vm15251_vm4, %v15071_v50  ;;  %6341 = vmatpush.xpose.msk.msra.mxu2 %vm15252_vm13, %v15071_v50  ;;  %v4205_v55 = vmul.f32 %v4173_v0, %v4173_v0  ;;  %4120 = vst [vmem:[%s11320_s18 + $0xf8] sm:$0xff] %v4087_v18  ;;  %v4174_v40 = vsub.f32 %v4087_v18, %v12250_v37  ;;  %s5401_s18 = sshll.u32 %s7014_s15, 3 }
 0x46d   : > { %6357 = vmatpush.xpose.msk.msra.mxu3 %vm15253_vm3, %v15071_v50  ;;  %vm15257_vm4 = vcmp.eq.s32.totalorder %v14978_v34, %v15083_v56  ;;  %vm15258_vm13 = vcmp.eq.s32.totalorder %v14976_v8, %v15084_v5  ;;  %vm15259_vm3 = vcmp.eq.s32.totalorder %v14976_v8, %v15081_v22  ;;  %s364_s16 = scalar_lea.vmem %s13843_s5, %s5401_s18  ;;  %s6691_s18 = sshll.u32 %s7014_s15, 6 }
 0x46e   : > { %v4263_v16 = vadd.f32 %v4262_v49, %v4205_v55  ;;  %v4206_v23 = vmul.f32 %v4174_v40, %v4174_v40  ;;  %s6686_s15 = sshll.u32 %s6901_s27, 3 }
 0x46f   : > { %6310 = vmatpush.xpose.msk.msra.mxu0 %vm15254_vm10, %v15071_v50  ;;  %vm15260_vm10 = vcmp.eq.s32.totalorder %v14976_v8, %v15082_v15  ;;  %s5183_s30 = scalar_lea.hbm %s13842_s4, %s6686_s15 }
 0x470   : > { %6326 = vmatpush.xpose.msk.msra.mxu1 %vm15255_vm9, %v15071_v50  ;;  %6342 = vmatpush.xpose.msk.msra.mxu2 %vm15256_vm6, %v15071_v50  ;;  %v4264_v42 = vrot.slane %v4263_v16, 4  ;;  %v4272_v25 = vadd.f32 %v4271_v60, %v4206_v23  ;;  %vm15261_vm9 = vcmp.eq.s32.totalorder %v14976_v8, %v15083_v56  ;;  %vm15262_vm6 = vcmp.eq.s32.totalorder %v14972_v12, %v15084_v5 }
 0x471   : > { %6358 = vmatpush.xpose.msk.msra.mxu3 %vm15257_vm4, %v15071_v50  ;;  %vm15263_vm4 = vcmp.eq.s32.totalorder %v14972_v12, %v15081_v22 }
 0x472   : > { %v4265_v7 = vadd.f32 %v4264_v42, %v4263_v16  ;;  %v4273_v47 = vrot.slane %v4272_v25, 4 }
 0x473   : > { %6311 = vmatpush.xpose.msk.msra.mxu0 %vm15258_vm13, %v15071_v50  ;;  %vm15264_vm13 = vcmp.eq.s32.totalorder %v14972_v12, %v15082_v15 }
 0x474   : > { %6327 = vmatpush.xpose.msk.msra.mxu1 %vm15259_vm3, %v15071_v50  ;;  %6343 = vmatpush.xpose.msk.msra.mxu2 %vm15260_vm10, %v15071_v50  ;;  %v4266_v33 = vrot.slane %v4265_v7, 2  ;;  %v4274_v19 = vadd.f32 %v4273_v47, %v4272_v25  ;;  %vm15265_vm3 = vcmp.eq.s32.totalorder %v14972_v12, %v15083_v56  ;;  %vm15266_vm10 = vcmp.eq.s32.totalorder %v14970_v3, %v15084_v5  ;;  %v12919_v47 = vld [vmem:[%s7022_s19 + $0x18] sm:$0xff] }
 0x475   : > { %6359 = vmatpush.xpose.msk.msra.mxu3 %vm15261_vm9, %v15071_v50  ;;  %vm15267_vm9 = vcmp.eq.s32.totalorder %v14970_v3, %v15081_v22 }
 0x476   : > { %v4267_v29 = vadd.f32 %v4266_v33, %v4265_v7  ;;  %v4275_v49 = vrot.slane %v4274_v19, 2  ;;  %v12923_v33 = vld [vmem:[%s7022_s19 + $0x8] sm:$0xff] }
 0x477   : > { %6312 = vmatpush.xpose.msk.msra.mxu0 %vm15262_vm6, %v15071_v50  ;;  %vm15268_vm6 = vcmp.eq.s32.totalorder %v14970_v3, %v15082_v15 }
 0x478   : > { %6328 = vmatpush.xpose.msk.msra.mxu1 %vm15263_vm4, %v15071_v50  ;;  %6344 = vmatpush.xpose.msk.msra.mxu2 %vm15264_vm13, %v15071_v50  ;;  %v4276_v0 = vadd.f32 %v4275_v49, %v4274_v19  ;;  %vm15269_vm4 = vcmp.eq.s32.totalorder %v14970_v3, %v15083_v56  ;;  %v4268_v18 = vrot.slane %v4267_v29, 1  ;;  %vm15270_vm13 = vcmp.eq.s32.totalorder %v14969_v35, %v15084_v5  ;;  %v12967_v19 = vld [vmem:[%s7022_s19 + $0x58] sm:$0xff]  ;;  %v13016_v49 = vld [vmem:[%s7022_s19 + $0x88] sm:$0xff] }
 0x479   : > { %6360 = vmatpush.xpose.msk.msra.mxu3 %vm15265_vm3, %v15071_v50  ;;  %vm15271_vm3 = vcmp.eq.s32.totalorder %v14969_v35, %v15081_v22 }
 0x47a   : > { %v4277_v60 = vrot.slane %v4276_v0, 1  ;;  %v4269_v55 = vadd.f32 %v4268_v18, %v4267_v29  ;;  %v12971_v29 = vld [vmem:[%s7022_s19 + $0x48] sm:$0xff] }
 0x47b   : > { %6313 = vmatpush.xpose.msk.msra.mxu0 %vm15266_vm10, %v15071_v50  ;;  %vm15272_vm10 = vcmp.eq.s32.totalorder %v14969_v35, %v15082_v15 }
 0x47c   : > { %6329 = vmatpush.xpose.msk.msra.mxu1 %vm15267_vm9, %v15071_v50  ;;  %6345 = vmatpush.xpose.msk.msra.mxu2 %vm15268_vm6, %v15071_v50  ;;  %vm15273_vm9 = vcmp.eq.s32.totalorder %v14969_v35, %v15083_v56  ;;  %v4278_v40 = vadd.f32 %v4277_v60, %v4276_v0  ;;  %vm15274_vm6 = vcmp.eq.s32.totalorder %v14968_v21, %v15084_v5  ;;  %v4292_v16 = vrot.slane %v4269_v55, 2 }
 0x47d   : > { %6361 = vmatpush.xpose.msk.msra.mxu3 %vm15269_vm4, %v15071_v50  ;;  %vm15275_vm4 = vcmp.eq.s32.totalorder %v14968_v21, %v15081_v22  ;;  %v15448_v0 = vlaneseq }
 0x47e   : > { %v4293_v23 = vrot.slane %v4278_v40, 1 }
 0x47f   : > { %6314 = vmatpush.xpose.msk.msra.mxu0 %vm15270_vm13, %v15071_v50  ;;  %vm15276_vm13 = vcmp.eq.s32.totalorder %v14968_v21, %v15082_v15 }
 0x480   : > { %6330 = vmatpush.xpose.msk.msra.mxu1 %vm15271_vm3, %v15071_v50  ;;  %6346 = vmatpush.xpose.msk.msra.mxu2 %vm15272_vm10, %v15071_v50  ;;  %vm15277_vm3 = vcmp.eq.s32.totalorder %v14968_v21, %v15083_v56  ;;  %vm15278_vm10 = vcmp.eq.s32.totalorder %v14964_v6, %v15084_v5 }
 0x481   : > { %6362 = vmatpush.xpose.msk.msra.mxu3 %vm15273_vm9, %v15071_v50  ;;  %vm15279_vm9 = vcmp.eq.s32.totalorder %v14964_v6, %v15081_v22 }
 0x483   : > { %6315 = vmatpush.xpose.msk.msra.mxu0 %vm15274_vm6, %v15071_v50  ;;  %vm15280_vm6 = vcmp.eq.s32.totalorder %v14964_v6, %v15082_v15 }
 0x484   : > { %6331 = vmatpush.xpose.msk.msra.mxu1 %vm15275_vm4, %v15071_v50  ;;  %6347 = vmatpush.xpose.msk.msra.mxu2 %vm15276_vm13, %v15071_v50  ;;  %vm15281_vm4 = vcmp.eq.s32.totalorder %v14964_v6, %v15083_v56  ;;  %vm15282_vm13 = vcmp.eq.s32.totalorder %v15031_v20, %v10508_v41 }
 0x485   : > { %6363 = vmatpush.xpose.msk.msra.mxu3 %vm15277_vm3, %v15071_v50  ;;  %vm15283_vm3 = vcmp.eq.s32.totalorder %v15031_v20, %v10513_v59 }
 0x487   : > { %6316 = vmatpush.xpose.msk.msra.mxu0 %vm15278_vm10, %v15071_v50  ;;  %vm15284_vm10 = vcmask 1046534  }
 0x488   : > { %6332 = vmatpush.xpose.msk.msra.mxu1 %vm15279_vm9, %v15071_v50  ;;  %6348 = vmatpush.xpose.msk.msra.mxu2 %vm15280_vm6, %v15071_v50  ;;  %v4298_v42 = vsel %vm15284_vm10, %v4292_v16, %v4293_v23  ;;  %vm15285_vm9 = vcmp.eq.s32.totalorder %v15031_v20, %v10946_v9  ;;  %vm15286_vm6 = vcmp.eq.s32.totalorder %v15031_v20, %v11000_v61 }
 0x489   : > { %6364 = vmatpush.xpose.msk.msra.mxu3 %vm15281_vm4, %v15071_v50  ;;  %vm15287_vm4 = vcmask 1045508   ;;  %vm15290_vm10 = vcmp.eq.s32.totalorder %v15023_v2, %v10513_v59 }
 0x48a   : > { %v4299_v25 = vsel %vm15287_vm4, %v12225_v32, %v4298_v42  ;;  %4479 = vmatmul.f32.vlgmr.msra.gmra.mxu0 %v15071_v50  ;;  %vm15293_vm4 = vcmp.eq.s32.totalorder %v15019_v46, %v10508_v41  ;;  %v12915_v32 = vld [vmem:[%s7022_s19] sm:$0xff] }
 0x48b   : > { %6365 = vmatpush.xpose.msk.msrb.mxu0 %vm15282_vm13, %v15071_v50  ;;  %4519 = vmatmul.f32.vlgmr.msra.gmra.mxu2 %v15071_v50  ;;  %vm15288_vm13 = vcmask 1043456  }
 0x48c   : > { %6381 = vmatpush.xpose.msk.msrb.mxu1 %vm15283_vm3, %v15071_v50  ;;  %6397 = vmatpush.xpose.msk.msrb.mxu2 %vm15285_vm9, %v15071_v50  ;;  %v4300_v7 = vsel %vm15288_vm13, %v11885_v36, %v4299_v25  ;;  %vm15289_vm3 = vcmp.eq.s32.totalorder %v15023_v2, %v10508_v41  ;;  %vm15291_vm9 = vcmp.eq.s32.totalorder %v15023_v2, %v10946_v9  ;;  %v12911_v36 = vld [vmem:[%s7022_s19 + $0x10] sm:$0xff] }
 0x48d   : > { %6413 = vmatpush.xpose.msk.msrb.mxu3 %vm15286_vm6, %v15071_v50  ;;  %4499 = vmatmul.f32.vlgmr.msra.gmra.mxu1 %v15071_v50  ;;  %4302 = vst [vmem:[%s364_s16] sm:$0xff] %v4300_v7  ;;  %vm15292_vm6 = vcmp.eq.s32.totalorder %v15023_v2, %v11000_v61  ;;  %vm15294_vm13 = vcmp.eq.s32.totalorder %v15019_v46, %v10513_v59  ;;  %s13780_s16 = scalar_lea.vmem %s13845_s7, %s6691_s18  ;;  %s5150_s18 = scalar_lea.sflag [#allocation3], %s310_s20 }
 0x48e   : > { %4539 = vmatmul.f32.vlgmr.msra.gmra.mxu3 %v15071_v50 }
 0x48f   : > { %6366 = vmatpush.xpose.msk.msrb.mxu0 %vm15289_vm3, %v15071_v50  ;;  %vm15295_vm3 = vcmp.eq.s32.totalorder %v15019_v46, %v10946_v9 }
 0x490   : > { %6382 = vmatpush.xpose.msk.msrb.mxu1 %vm15290_vm10, %v15071_v50  ;;  %6398 = vmatpush.xpose.msk.msrb.mxu2 %vm15291_vm9, %v15071_v50  ;;  %vm15296_vm10 = vcmp.eq.s32.totalorder %v15019_v46, %v11000_v61  ;;  %vm15297_vm9 = vcmp.eq.s32.totalorder %v14997_v62, %v10508_v41 }
 0x491   : > { %6414 = vmatpush.xpose.msk.msrb.mxu3 %vm15292_vm6, %v15071_v50  ;;  %vm15298_vm6 = vcmp.eq.s32.totalorder %v14997_v62, %v10513_v59 }
 0x493   : > { %6367 = vmatpush.xpose.msk.msrb.mxu0 %vm15293_vm4, %v15071_v50  ;;  %vm15299_vm4 = vcmp.eq.s32.totalorder %v14997_v62, %v10946_v9 }
 0x494   : > { %6383 = vmatpush.xpose.msk.msrb.mxu1 %vm15294_vm13, %v15071_v50  ;;  %6399 = vmatpush.xpose.msk.msrb.mxu2 %vm15295_vm3, %v15071_v50  ;;  %vm15300_vm13 = vcmp.eq.s32.totalorder %v14997_v62, %v11000_v61  ;;  %vm15301_vm3 = vcmp.eq.s32.totalorder %v14995_v10, %v10508_v41 }
 0x495   : > { %6415 = vmatpush.xpose.msk.msrb.mxu3 %vm15296_vm10, %v15071_v50  ;;  %vm15302_vm10 = vcmp.eq.s32.totalorder %v14995_v10, %v10513_v59 }
 0x497   : > { %6368 = vmatpush.xpose.msk.msrb.mxu0 %vm15297_vm9, %v15071_v50  ;;  %vm15303_vm9 = vcmp.eq.s32.totalorder %v14995_v10, %v10946_v9 }
 0x498   : > { %6384 = vmatpush.xpose.msk.msrb.mxu1 %vm15298_vm6, %v15071_v50  ;;  %6400 = vmatpush.xpose.msk.msrb.mxu2 %vm15299_vm4, %v15071_v50  ;;  %vm15304_vm6 = vcmp.eq.s32.totalorder %v14995_v10, %v11000_v61  ;;  %vm15305_vm4 = vcmp.eq.s32.totalorder %v14994_v39, %v10508_v41 }
 0x499   : > { %6416 = vmatpush.xpose.msk.msrb.mxu3 %vm15300_vm13, %v15071_v50  ;;  %vm15306_vm13 = vcmp.eq.s32.totalorder %v14994_v39, %v10513_v59 }
 0x49b   : > { %6369 = vmatpush.xpose.msk.msrb.mxu0 %vm15301_vm3, %v15071_v50  ;;  %vm15307_vm3 = vcmp.eq.s32.totalorder %v14994_v39, %v10946_v9 }
 0x49c   : > { %6385 = vmatpush.xpose.msk.msrb.mxu1 %vm15302_vm10, %v15071_v50  ;;  %6401 = vmatpush.xpose.msk.msrb.mxu2 %vm15303_vm9, %v15071_v50  ;;  %vm15308_vm10 = vcmp.eq.s32.totalorder %v14994_v39, %v11000_v61  ;;  %vm15309_vm9 = vcmp.eq.s32.totalorder %v14993_v30, %v10508_v41 }
 0x49d   : > { %6417 = vmatpush.xpose.msk.msrb.mxu3 %vm15304_vm6, %v15071_v50  ;;  %vm15310_vm6 = vcmp.eq.s32.totalorder %v14993_v30, %v10513_v59 }
 0x49f   : > { %6370 = vmatpush.xpose.msk.msrb.mxu0 %vm15305_vm4, %v15071_v50  ;;  %vm15311_vm4 = vcmp.eq.s32.totalorder %v14993_v30, %v10946_v9 }
 0x4a0   : > { %6386 = vmatpush.xpose.msk.msrb.mxu1 %vm15306_vm13, %v15071_v50  ;;  %6402 = vmatpush.xpose.msk.msrb.mxu2 %vm15307_vm3, %v15071_v50  ;;  %vm15312_vm13 = vcmp.eq.s32.totalorder %v14993_v30, %v11000_v61  ;;  %vm15313_vm3 = vcmp.eq.s32.totalorder %v14992_v58, %v10508_v41 }
 0x4a1   : > { %6418 = vmatpush.xpose.msk.msrb.mxu3 %vm15308_vm10, %v15071_v50  ;;  %vm15314_vm10 = vcmp.eq.s32.totalorder %v14992_v58, %v10513_v59 }
 0x4a3   : > { %6371 = vmatpush.xpose.msk.msrb.mxu0 %vm15309_vm9, %v15071_v50  ;;  %vm15315_vm9 = vcmp.eq.s32.totalorder %v14992_v58, %v10946_v9 }
 0x4a4   : > { %6387 = vmatpush.xpose.msk.msrb.mxu1 %vm15310_vm6, %v15071_v50  ;;  %6403 = vmatpush.xpose.msk.msrb.mxu2 %vm15311_vm4, %v15071_v50  ;;  %vm15316_vm6 = vcmp.eq.s32.totalorder %v14992_v58, %v11000_v61  ;;  %vm15317_vm4 = vcmp.eq.s32.totalorder %v14983_v54, %v10508_v41 }
 0x4a5   : > { %6419 = vmatpush.xpose.msk.msrb.mxu3 %vm15312_vm13, %v15071_v50  ;;  %vm15318_vm13 = vcmp.eq.s32.totalorder %v14983_v54, %v10513_v59 }
 0x4a7   : > { %6372 = vmatpush.xpose.msk.msrb.mxu0 %vm15313_vm3, %v15071_v50  ;;  %vm15319_vm3 = vcmp.eq.s32.totalorder %v14983_v54, %v10946_v9 }
 0x4a8   : > { %6388 = vmatpush.xpose.msk.msrb.mxu1 %vm15314_vm10, %v15071_v50  ;;  %6404 = vmatpush.xpose.msk.msrb.mxu2 %vm15315_vm9, %v15071_v50  ;;  %vm15320_vm10 = vcmp.eq.s32.totalorder %v14983_v54, %v11000_v61  ;;  %vm15321_vm9 = vcmp.eq.s32.totalorder %v14978_v34, %v10508_v41 }
 0x4a9   : > { %6420 = vmatpush.xpose.msk.msrb.mxu3 %vm15316_vm6, %v15071_v50  ;;  %vm15322_vm6 = vcmp.eq.s32.totalorder %v14978_v34, %v10513_v59 }
 0x4ab   : > { %6373 = vmatpush.xpose.msk.msrb.mxu0 %vm15317_vm4, %v15071_v50  ;;  %vm15323_vm4 = vcmp.eq.s32.totalorder %v14978_v34, %v10946_v9 }
 0x4ac   : > { %6389 = vmatpush.xpose.msk.msrb.mxu1 %vm15318_vm13, %v15071_v50  ;;  %6405 = vmatpush.xpose.msk.msrb.mxu2 %vm15319_vm3, %v15071_v50  ;;  %vm15324_vm13 = vcmp.eq.s32.totalorder %v14978_v34, %v11000_v61  ;;  %vm15325_vm3 = vcmp.eq.s32.totalorder %v14976_v8, %v10508_v41 }
 0x4ad   : > { %6421 = vmatpush.xpose.msk.msrb.mxu3 %vm15320_vm10, %v15071_v50  ;;  %vm15326_vm10 = vcmp.eq.s32.totalorder %v14976_v8, %v10513_v59 }
 0x4af   : > { %6374 = vmatpush.xpose.msk.msrb.mxu0 %vm15321_vm9, %v15071_v50  ;;  %vm15327_vm9 = vcmp.eq.s32.totalorder %v14976_v8, %v10946_v9 }
 0x4b0   : > { %6390 = vmatpush.xpose.msk.msrb.mxu1 %vm15322_vm6, %v15071_v50  ;;  %6406 = vmatpush.xpose.msk.msrb.mxu2 %vm15323_vm4, %v15071_v50  ;;  %vm15328_vm6 = vcmp.eq.s32.totalorder %v14976_v8, %v11000_v61  ;;  %vm15329_vm4 = vcmp.eq.s32.totalorder %v14972_v12, %v10508_v41 }
 0x4b1   : > { %6422 = vmatpush.xpose.msk.msrb.mxu3 %vm15324_vm13, %v15071_v50  ;;  %vm15330_vm13 = vcmp.eq.s32.totalorder %v14972_v12, %v10513_v59 }
 0x4b3   : > { %6375 = vmatpush.xpose.msk.msrb.mxu0 %vm15325_vm3, %v15071_v50  ;;  %vm15331_vm3 = vcmp.eq.s32.totalorder %v14972_v12, %v10946_v9 }
 0x4b4   : > { %6391 = vmatpush.xpose.msk.msrb.mxu1 %vm15326_vm10, %v15071_v50  ;;  %6407 = vmatpush.xpose.msk.msrb.mxu2 %vm15327_vm9, %v15071_v50  ;;  %vm15332_vm10 = vcmp.eq.s32.totalorder %v14972_v12, %v11000_v61  ;;  %vm15333_vm9 = vcmp.eq.s32.totalorder %v14970_v3, %v10508_v41 }
 0x4b5   : > { %6423 = vmatpush.xpose.msk.msrb.mxu3 %vm15328_vm6, %v15071_v50  ;;  %vm15334_vm6 = vcmp.eq.s32.totalorder %v14970_v3, %v10513_v59 }
 0x4b7   : > { %6376 = vmatpush.xpose.msk.msrb.mxu0 %vm15329_vm4, %v15071_v50  ;;  %vm15335_vm4 = vcmp.eq.s32.totalorder %v14970_v3, %v10946_v9 }
 0x4b8   : > { %6392 = vmatpush.xpose.msk.msrb.mxu1 %vm15330_vm13, %v15071_v50  ;;  %6408 = vmatpush.xpose.msk.msrb.mxu2 %vm15331_vm3, %v15071_v50  ;;  %vm15336_vm13 = vcmp.eq.s32.totalorder %v14970_v3, %v11000_v61  ;;  %vm15337_vm3 = vcmp.eq.s32.totalorder %v14969_v35, %v10508_v41 }
 0x4b9   : > { %6424 = vmatpush.xpose.msk.msrb.mxu3 %vm15332_vm10, %v15071_v50  ;;  %vm15338_vm10 = vcmp.eq.s32.totalorder %v14969_v35, %v10513_v59 }
 0x4bb   : > { %6377 = vmatpush.xpose.msk.msrb.mxu0 %vm15333_vm9, %v15071_v50  ;;  %vm15339_vm9 = vcmp.eq.s32.totalorder %v14969_v35, %v10946_v9 }
 0x4bc   : > { %6393 = vmatpush.xpose.msk.msrb.mxu1 %vm15334_vm6, %v15071_v50  ;;  %6409 = vmatpush.xpose.msk.msrb.mxu2 %vm15335_vm4, %v15071_v50  ;;  %vm15340_vm6 = vcmp.eq.s32.totalorder %v14969_v35, %v11000_v61  ;;  %vm15341_vm4 = vcmp.eq.s32.totalorder %v14968_v21, %v10508_v41 }
 0x4bd   : > { %6425 = vmatpush.xpose.msk.msrb.mxu3 %vm15336_vm13, %v15071_v50  ;;  %vm15342_vm13 = vcmp.eq.s32.totalorder %v14968_v21, %v10513_v59 }
 0x4bf   : > { %6378 = vmatpush.xpose.msk.msrb.mxu0 %vm15337_vm3, %v15071_v50  ;;  %vm15343_vm3 = vcmp.eq.s32.totalorder %v14968_v21, %v10946_v9 }
 0x4c0   : > { %6394 = vmatpush.xpose.msk.msrb.mxu1 %vm15338_vm10, %v15071_v50  ;;  %6410 = vmatpush.xpose.msk.msrb.mxu2 %vm15339_vm9, %v15071_v50  ;;  %vm15344_vm10 = vcmp.eq.s32.totalorder %v14968_v21, %v11000_v61  ;;  %vm15345_vm9 = vcmp.eq.s32.totalorder %v14964_v6, %v10508_v41 }
 0x4c1   : > { %6426 = vmatpush.xpose.msk.msrb.mxu3 %vm15340_vm6, %v15071_v50  ;;  %vm15346_vm6 = vcmp.eq.s32.totalorder %v14964_v6, %v10513_v59 }
 0x4c3   : > { %6379 = vmatpush.xpose.msk.msrb.mxu0 %vm15341_vm4, %v15071_v50  ;;  %vm15347_vm4 = vcmp.eq.s32.totalorder %v14964_v6, %v10946_v9 }
 0x4c4   : > { %6395 = vmatpush.xpose.msk.msrb.mxu1 %vm15342_vm13, %v15071_v50  ;;  %6411 = vmatpush.xpose.msk.msrb.mxu2 %vm15343_vm3, %v15071_v50  ;;  %vm15348_vm13 = vcmp.eq.s32.totalorder %v14964_v6, %v11000_v61  ;;  %vm15349_vm3 = vcmp.eq.s32.totalorder %v14962_v63, %v15084_v5 }
 0x4c5   : > { %6427 = vmatpush.xpose.msk.msrb.mxu3 %vm15344_vm10, %v15071_v50  ;;  %vm15350_vm10 = vcmp.eq.s32.totalorder %v14962_v63, %v15081_v22 }
 0x4c7   : > { %6380 = vmatpush.xpose.msk.msrb.mxu0 %vm15345_vm9, %v15071_v50  ;;  %vm15351_vm9 = vcmp.eq.s32.totalorder %v14962_v63, %v15082_v15 }
 0x4c8   : > { %6396 = vmatpush.xpose.msk.msrb.mxu1 %vm15346_vm6, %v15071_v50  ;;  %6412 = vmatpush.xpose.msk.msrb.mxu2 %vm15347_vm4, %v15071_v50  ;;  %vm15352_vm6 = vcmp.eq.s32.totalorder %v14962_v63, %v15083_v56  ;;  %vm15353_vm4 = vcmp.eq.s32.totalorder %v14960_v45, %v15084_v5  ;;  %v12963_v63 = vld [vmem:[%s7022_s19 + $0x40] sm:$0xff] }
 0x4c9   : > { %6428 = vmatpush.xpose.msk.msrb.mxu3 %vm15348_vm13, %v15071_v50  ;;  %vm15354_vm13 = vcmp.eq.s32.totalorder %v14960_v45, %v15081_v22 }
 0x4ca   : > { %4559 = vmatmul.f32.vlgmr.msrb.gmra.mxu0 %v15071_v50 }
 0x4cb   : > { %6429 = vmatpush.xpose.msk.msra.mxu0 %vm15349_vm3, %v15071_v50  ;;  %4599 = vmatmul.f32.vlgmr.msrb.gmra.mxu2 %v15071_v50  ;;  %vm15355_vm3 = vcmp.eq.s32.totalorder %v14960_v45, %v15082_v15 }
 0x4cc   : > { %6445 = vmatpush.xpose.msk.msra.mxu1 %vm15350_vm10, %v15071_v50  ;;  %6461 = vmatpush.xpose.msk.msra.mxu2 %vm15351_vm9, %v15071_v50  ;;  %vm15356_vm10 = vcmp.eq.s32.totalorder %v14960_v45, %v15083_v56  ;;  %vm15357_vm9 = vcmp.eq.s32.totalorder %v14957_v31, %v15084_v5 }
 0x4cd   : > { %6477 = vmatpush.xpose.msk.msra.mxu3 %vm15352_vm6, %v15071_v50  ;;  %4579 = vmatmul.f32.vlgmr.msrb.gmra.mxu1 %v15071_v50  ;;  %vm15358_vm6 = vcmp.eq.s32.totalorder %v14957_v31, %v15081_v22 }
 0x4ce   : > { %4619 = vmatmul.f32.vlgmr.msrb.gmra.mxu3 %v15071_v50 }
 0x4cf   : > { %6430 = vmatpush.xpose.msk.msra.mxu0 %vm15353_vm4, %v15071_v50  ;;  %vm15359_vm4 = vcmp.eq.s32.totalorder %v14957_v31, %v15082_v15 }
 0x4d0   : > { %6446 = vmatpush.xpose.msk.msra.mxu1 %vm15354_vm13, %v15071_v50  ;;  %6462 = vmatpush.xpose.msk.msra.mxu2 %vm15355_vm3, %v15071_v50  ;;  %vm15360_vm13 = vcmp.eq.s32.totalorder %v14957_v31, %v15083_v56  ;;  %vm15361_vm3 = vcmp.eq.s32.totalorder %v14954_v52, %v15084_v5 }
 0x4d1   : > { %6478 = vmatpush.xpose.msk.msra.mxu3 %vm15356_vm10, %v15071_v50  ;;  %vm15362_vm10 = vcmp.eq.s32.totalorder %v14954_v52, %v15081_v22 }
 0x4d3   : > { %6431 = vmatpush.xpose.msk.msra.mxu0 %vm15357_vm9, %v15071_v50  ;;  %vm15363_vm9 = vcmp.eq.s32.totalorder %v14954_v52, %v15082_v15 }
 0x4d4   : > { %6447 = vmatpush.xpose.msk.msra.mxu1 %vm15358_vm6, %v15071_v50  ;;  %6463 = vmatpush.xpose.msk.msra.mxu2 %vm15359_vm4, %v15071_v50  ;;  %vm15364_vm6 = vcmp.eq.s32.totalorder %v14954_v52, %v15083_v56  ;;  %vm15365_vm4 = vcmp.eq.s32.totalorder %v14950_v28, %v15084_v5 }
 0x4d5   : > { %6479 = vmatpush.xpose.msk.msra.mxu3 %vm15360_vm13, %v15071_v50  ;;  %vm15366_vm13 = vcmp.eq.s32.totalorder %v14950_v28, %v15081_v22 }
 0x4d7   : > { %6432 = vmatpush.xpose.msk.msra.mxu0 %vm15361_vm3, %v15071_v50  ;;  %vm15367_vm3 = vcmp.eq.s32.totalorder %v14950_v28, %v15082_v15 }
 0x4d8   : > { %6448 = vmatpush.xpose.msk.msra.mxu1 %vm15362_vm10, %v15071_v50  ;;  %6464 = vmatpush.xpose.msk.msra.mxu2 %vm15363_vm9, %v15071_v50  ;;  %vm15368_vm10 = vcmp.eq.s32.totalorder %v14950_v28, %v15083_v56  ;;  %vm15369_vm9 = vcmp.eq.s32.totalorder %v14946_v11, %v15084_v5 }
 0x4d9   : > { %6480 = vmatpush.xpose.msk.msra.mxu3 %vm15364_vm6, %v15071_v50  ;;  %vm15370_vm6 = vcmp.eq.s32.totalorder %v14946_v11, %v15081_v22 }
 0x4db   : > { %6433 = vmatpush.xpose.msk.msra.mxu0 %vm15365_vm4, %v15071_v50  ;;  %vm15371_vm4 = vcmp.eq.s32.totalorder %v14946_v11, %v15082_v15 }
 0x4dc   : > { %6449 = vmatpush.xpose.msk.msra.mxu1 %vm15366_vm13, %v15071_v50  ;;  %6465 = vmatpush.xpose.msk.msra.mxu2 %vm15367_vm3, %v15071_v50  ;;  %vm15372_vm13 = vcmp.eq.s32.totalorder %v14946_v11, %v15083_v56  ;;  %vm15373_vm3 = vcmp.eq.s32.totalorder %v14943_v1, %v15084_v5 }
 0x4dd   : > { %6481 = vmatpush.xpose.msk.msra.mxu3 %vm15368_vm10, %v15071_v50  ;;  %vm15374_vm10 = vcmp.eq.s32.totalorder %v14943_v1, %v15081_v22 }
 0x4df   : > { %6434 = vmatpush.xpose.msk.msra.mxu0 %vm15369_vm9, %v15071_v50  ;;  %vm15375_vm9 = vcmp.eq.s32.totalorder %v14943_v1, %v15082_v15 }
 0x4e0   : > { %6450 = vmatpush.xpose.msk.msra.mxu1 %vm15370_vm6, %v15071_v50  ;;  %6466 = vmatpush.xpose.msk.msra.mxu2 %vm15371_vm4, %v15071_v50  ;;  %vm15376_vm6 = vcmp.eq.s32.totalorder %v14943_v1, %v15083_v56  ;;  %vm15377_vm4 = vcmp.eq.s32.totalorder %v14939_v57, %v15084_v5 }
 0x4e1   : > { %6482 = vmatpush.xpose.msk.msra.mxu3 %vm15372_vm13, %v15071_v50  ;;  %vm15378_vm13 = vcmp.eq.s32.totalorder %v14939_v57, %v15081_v22 }
 0x4e3   : > { %6435 = vmatpush.xpose.msk.msra.mxu0 %vm15373_vm3, %v15071_v50  ;;  %vm15379_vm3 = vcmp.eq.s32.totalorder %v14939_v57, %v15082_v15 }
 0x4e4   : > { %6451 = vmatpush.xpose.msk.msra.mxu1 %vm15374_vm10, %v15071_v50  ;;  %6467 = vmatpush.xpose.msk.msra.mxu2 %vm15375_vm9, %v15071_v50  ;;  %vm15380_vm10 = vcmp.eq.s32.totalorder %v14939_v57, %v15083_v56  ;;  %vm15381_vm9 = vcmp.eq.s32.totalorder %v14935_v38, %v15084_v5 }
 0x4e5   : > { %6483 = vmatpush.xpose.msk.msra.mxu3 %vm15376_vm6, %v15071_v50  ;;  %vm15382_vm6 = vcmp.eq.s32.totalorder %v14935_v38, %v15081_v22 }
 0x4e7   : > { %6436 = vmatpush.xpose.msk.msra.mxu0 %vm15377_vm4, %v15071_v50  ;;  %vm15383_vm4 = vcmp.eq.s32.totalorder %v14935_v38, %v15082_v15 }
 0x4e8   : > { %6452 = vmatpush.xpose.msk.msra.mxu1 %vm15378_vm13, %v15071_v50  ;;  %6468 = vmatpush.xpose.msk.msra.mxu2 %vm15379_vm3, %v15071_v50  ;;  %vm15384_vm13 = vcmp.eq.s32.totalorder %v14935_v38, %v15083_v56  ;;  %vm15385_vm3 = vcmp.eq.s32.totalorder %v14930_v17, %v15084_v5 }
 0x4e9   : > { %6484 = vmatpush.xpose.msk.msra.mxu3 %vm15380_vm10, %v15071_v50  ;;  %vm15386_vm10 = vcmp.eq.s32.totalorder %v14930_v17, %v15081_v22 }
 0x4eb   : > { %6437 = vmatpush.xpose.msk.msra.mxu0 %vm15381_vm9, %v15071_v50  ;;  %vm15387_vm9 = vcmp.eq.s32.totalorder %v14930_v17, %v15082_v15 }
 0x4ec   : > { %6453 = vmatpush.xpose.msk.msra.mxu1 %vm15382_vm6, %v15071_v50  ;;  %6469 = vmatpush.xpose.msk.msra.mxu2 %vm15383_vm4, %v15071_v50  ;;  %vm15388_vm6 = vcmp.eq.s32.totalorder %v14930_v17, %v15083_v56  ;;  %vm15389_vm4 = vcmp.eq.s32.totalorder %v14925_v14, %v15084_v5 }
 0x4ed   : > { %6485 = vmatpush.xpose.msk.msra.mxu3 %vm15384_vm13, %v15071_v50  ;;  %vm15390_vm13 = vcmp.eq.s32.totalorder %v14925_v14, %v15081_v22 }
 0x4ef   : > { %6438 = vmatpush.xpose.msk.msra.mxu0 %vm15385_vm3, %v15071_v50  ;;  %vm15391_vm3 = vcmp.eq.s32.totalorder %v14925_v14, %v15082_v15 }
 0x4f0   : > { %6454 = vmatpush.xpose.msk.msra.mxu1 %vm15386_vm10, %v15071_v50  ;;  %6470 = vmatpush.xpose.msk.msra.mxu2 %vm15387_vm9, %v15071_v50  ;;  %vm15392_vm10 = vcmp.eq.s32.totalorder %v14925_v14, %v15083_v56  ;;  %vm15393_vm9 = vcmp.eq.s32.totalorder %v14922_v4, %v15084_v5 }
 0x4f1   : > { %6486 = vmatpush.xpose.msk.msra.mxu3 %vm15388_vm6, %v15071_v50  ;;  %vm15394_vm6 = vcmp.eq.s32.totalorder %v14922_v4, %v15081_v22 }
 0x4f3   : > { %6439 = vmatpush.xpose.msk.msra.mxu0 %vm15389_vm4, %v15071_v50  ;;  %vm15395_vm4 = vcmp.eq.s32.totalorder %v14922_v4, %v15082_v15 }
 0x4f4   : > { %6455 = vmatpush.xpose.msk.msra.mxu1 %vm15390_vm13, %v15071_v50  ;;  %6471 = vmatpush.xpose.msk.msra.mxu2 %vm15391_vm3, %v15071_v50  ;;  %vm15396_vm13 = vcmp.eq.s32.totalorder %v14922_v4, %v15083_v56  ;;  %vm15397_vm3 = vcmp.eq.s32.totalorder %v14918_v53, %v15084_v5 }
 0x4f5   : > { %6487 = vmatpush.xpose.msk.msra.mxu3 %vm15392_vm10, %v15071_v50  ;;  %vm15398_vm10 = vcmp.eq.s32.totalorder %v14918_v53, %v15081_v22 }
 0x4f7   : > { %6440 = vmatpush.xpose.msk.msra.mxu0 %vm15393_vm9, %v15071_v50  ;;  %vm15399_vm9 = vcmp.eq.s32.totalorder %v14918_v53, %v15082_v15 }
 0x4f8   : > { %6456 = vmatpush.xpose.msk.msra.mxu1 %vm15394_vm6, %v15071_v50  ;;  %6472 = vmatpush.xpose.msk.msra.mxu2 %vm15395_vm4, %v15071_v50  ;;  %vm15400_vm6 = vcmp.eq.s32.totalorder %v14918_v53, %v15083_v56  ;;  %vm15401_vm4 = vcmp.eq.s32.totalorder %v15078_v48, %v15084_v5 }
 0x4f9   : > { %6488 = vmatpush.xpose.msk.msra.mxu3 %vm15396_vm13, %v15071_v50  ;;  %vm15402_vm13 = vcmp.eq.s32.totalorder %v15078_v48, %v15081_v22 }
 0x4fb   : > { %6441 = vmatpush.xpose.msk.msra.mxu0 %vm15397_vm3, %v15071_v50  ;;  %vm15403_vm3 = vcmp.eq.s32.totalorder %v15078_v48, %v15082_v15 }
 0x4fc   : > { %6457 = vmatpush.xpose.msk.msra.mxu1 %vm15398_vm10, %v15071_v50  ;;  %6473 = vmatpush.xpose.msk.msra.mxu2 %vm15399_vm9, %v15071_v50  ;;  %vm15404_vm10 = vcmp.eq.s32.totalorder %v15078_v48, %v15083_v56  ;;  %vm15405_vm9 = vcmp.eq.s32.totalorder %v15079_v51, %v15084_v5 }
 0x4fd   : > { %6489 = vmatpush.xpose.msk.msra.mxu3 %vm15400_vm6, %v15071_v50  ;;  %vm15406_vm6 = vcmp.eq.s32.totalorder %v15079_v51, %v15081_v22 }
 0x4ff   : > { %6442 = vmatpush.xpose.msk.msra.mxu0 %vm15401_vm4, %v15071_v50  ;;  %vm15407_vm4 = vcmp.eq.s32.totalorder %v15079_v51, %v15082_v15 }
 0x500   : > { %6458 = vmatpush.xpose.msk.msra.mxu1 %vm15402_vm13, %v15071_v50  ;;  %6474 = vmatpush.xpose.msk.msra.mxu2 %vm15403_vm3, %v15071_v50  ;;  %vm15408_vm13 = vcmp.eq.s32.totalorder %v15079_v51, %v15083_v56  ;;  %vm15409_vm3 = vcmp.eq.s32.totalorder %v15080_v26, %v15084_v5 }
 0x501   : > { %6490 = vmatpush.xpose.msk.msra.mxu3 %vm15404_vm10, %v15071_v50  ;;  %vm15410_vm10 = vcmp.eq.s32.totalorder %v15080_v26, %v15081_v22 }
 0x503   : > { %6443 = vmatpush.xpose.msk.msra.mxu0 %vm15405_vm9, %v15071_v50  ;;  %vm15411_vm9 = vcmp.eq.s32.totalorder %v15080_v26, %v15082_v15 }
 0x504   : > { %6459 = vmatpush.xpose.msk.msra.mxu1 %vm15406_vm6, %v15071_v50  ;;  %6475 = vmatpush.xpose.msk.msra.mxu2 %vm15407_vm4, %v15071_v50  ;;  %vm15412_vm6 = vcmp.eq.s32.totalorder %v15080_v26, %v15083_v56  ;;  %vm15419_vm4 = vcmp.eq.s32.totalorder %v14954_v52, %v10508_v41 }
 0x505   : > { %6491 = vmatpush.xpose.msk.msra.mxu3 %vm15408_vm13, %v15071_v50  ;;  %vm15420_vm13 = vcmp.eq.s32.totalorder %v14954_v52, %v10513_v59 }
 0x507   : > { %6444 = vmatpush.xpose.msk.msra.mxu0 %vm15409_vm3, %v15071_v50  ;;  %vm15421_vm3 = vcmp.eq.s32.totalorder %v14954_v52, %v10946_v9 }
 0x508   : > { %6460 = vmatpush.xpose.msk.msra.mxu1 %vm15410_vm10, %v15071_v50  ;;  %6476 = vmatpush.xpose.msk.msra.mxu2 %vm15411_vm9, %v15071_v50  ;;  %vm15422_vm10 = vcmp.eq.s32.totalorder %v14954_v52, %v11000_v61  ;;  %vm15423_vm9 = vcmp.eq.s32.totalorder %v14950_v28, %v10508_v41  ;;  %v13007_v52 = vld [vmem:[%s7022_s19 + $0x90] sm:$0xff] }
 0x509   : > { %6492 = vmatpush.xpose.msk.msra.mxu3 %vm15412_vm6, %v15071_v50  ;;  %vm15424_vm6 = vcmp.eq.s32.totalorder %v14950_v28, %v10513_v59 }
 0x50a   : > { %4639 = vmatmul.f32.vlgmr.msra.gmra.mxu0 %v12915_v32 }
 0x50b   : > { %6493 = vmatpush.xpose.msk.msrb.mxu0 %vm2981_vm8, %v15071_v50  ;;  %4697 = vmatmul.f32.vlgmr.msra.gmra.mxu2 %v12911_v36  ;;  %vm15413_vm8 = vcmp.eq.s32.totalorder %v14960_v45, %v10513_v59 }
 0x50c   : > { %6509 = vmatpush.xpose.msk.msrb.mxu1 %vm2982_vm2, %v15071_v50  ;;  %6525 = vmatpush.xpose.msk.msrb.mxu2 %vm2983_vm0, %v15071_v50  ;;  %vm15414_vm2 = vcmp.eq.s32.totalorder %v14960_v45, %v11000_v61  ;;  %vm15415_vm0 = vcmp.eq.s32.totalorder %v14957_v31, %v10508_v41  ;;  %v12959_v45 = vld [vmem:[%s7022_s19 + $0x50] sm:$0xff] }
 0x50d   : > { %6541 = vmatpush.xpose.msk.msrb.mxu3 %vm2984_vm5, %v15071_v50  ;;  %4668 = vmatmul.f32.vlgmr.msra.gmra.mxu1 %v12923_v33  ;;  %vm15417_vm5 = vcmp.eq.s32.totalorder %v14957_v31, %v10946_v9 }
 0x50e   : > { %4726 = vmatmul.f32.vlgmr.msra.gmra.mxu3 %v12919_v47 }
 0x50f   : > { %6494 = vmatpush.xpose.msk.msrb.mxu0 %vm2973_vm12, %v15071_v50  ;;  %vm15416_vm12 = vcmp.eq.s32.totalorder %v14957_v31, %v10513_v59 }
 0x510   : > { %6510 = vmatpush.xpose.msk.msrb.mxu1 %vm15413_vm8, %v15071_v50  ;;  %6526 = vmatpush.xpose.msk.msrb.mxu2 %vm2975_vm1, %v15071_v50  ;;  %vm15418_vm1 = vcmp.eq.s32.totalorder %v14957_v31, %v11000_v61  ;;  %vm15425_vm8 = vcmp.eq.s32.totalorder %v14950_v28, %v10946_v9  ;;  %v13011_v31 = vld [vmem:[%s7022_s19 + $0x80] sm:$0xff] }
 0x511   : > { %6542 = vmatpush.xpose.msk.msrb.mxu3 %vm15414_vm2, %v15071_v50  ;;  %vm15426_vm2 = vcmp.eq.s32.totalorder %v14950_v28, %v11000_v61  ;;  %v15435_v28 = vld [vmem:[#allocation113_spill] sm:$0xff] }
 0x512   : > { %4642 = vmatmul.f32.gmra.mxu0 %v12963_v63 }
 0x513   : > { %6495 = vmatpush.xpose.msk.msrb.mxu0 %vm15415_vm0, %v15071_v50  ;;  %4700 = vmatmul.f32.gmra.mxu2 %v12959_v45  ;;  %vm15427_vm0 = vcmp.eq.s32.totalorder %v14946_v11, %v10508_v41 }
 0x514   : > { %6511 = vmatpush.xpose.msk.msrb.mxu1 %vm15416_vm12, %v15071_v50  ;;  %6527 = vmatpush.xpose.msk.msrb.mxu2 %vm15417_vm5, %v15071_v50  ;;  %vm15428_vm12 = vcmp.eq.s32.totalorder %v14946_v11, %v10513_v59  ;;  %vm15429_vm5 = vcmp.eq.s32.totalorder %v14946_v11, %v10946_v9 }
 0x515   : > { %6543 = vmatpush.xpose.msk.msrb.mxu3 %vm15418_vm1, %v15071_v50  ;;  %4671 = vmatmul.f32.gmra.mxu1 %v12971_v29  ;;  %vm15430_vm1 = vcmp.eq.s32.totalorder %v14946_v11, %v11000_v61  ;;  %v13053_v11 = vld [vmem:[%s7022_s19 + $0xc0] sm:$0xff] }
 0x516   : > { %4729 = vmatmul.f32.gmra.mxu3 %v12967_v19 }
 0x517   : > { %6496 = vmatpush.xpose.msk.msrb.mxu0 %vm15419_vm4, %v15071_v50  ;;  %vm15431_vm4 = vcmp.eq.s32.totalorder %v14943_v1, %v10508_v41 }
 0x518   : > { %6512 = vmatpush.xpose.msk.msrb.mxu1 %vm15420_vm13, %v15071_v50  ;;  %6528 = vmatpush.xpose.msk.msrb.mxu2 %vm15421_vm3, %v15071_v50  ;;  %vm15432_vm13 = vcmp.eq.s32.totalorder %v14943_v1, %v10513_v59  ;;  %vm15433_vm3 = vcmp.eq.s32.totalorder %v14943_v1, %v10946_v9 }
 0x519   : > { %6544 = vmatpush.xpose.msk.msrb.mxu3 %vm15422_vm10, %v15071_v50  ;;  %vm15434_vm10 = vcmp.eq.s32.totalorder %v14943_v1, %v11000_v61  ;;  %v4340_v1 = vpop.f32.mrf.mxu1 }
 0x51a   : > { %4645 = vmatmul.f32.gmra.mxu0 %v13011_v31 }
 0x51b   : > { %6497 = vmatpush.xpose.msk.msrb.mxu0 %vm15423_vm9, %v15071_v50  ;;  %4703 = vmatmul.f32.gmra.mxu2 %v13007_v52  ;;  %vm15436_vm9 = vcmp.eq.s32.totalorder %v14939_v57, %v10508_v41 }
 0x51c   : > { %6513 = vmatpush.xpose.msk.msrb.mxu1 %vm15424_vm6, %v15071_v50  ;;  %6529 = vmatpush.xpose.msk.msrb.mxu2 %vm15425_vm8, %v15071_v50  ;;  %vm15437_vm6 = vcmp.eq.s32.totalorder %v14939_v57, %v10513_v59  ;;  %vm15438_vm8 = vcmp.eq.s32.totalorder %v14935_v38, %v10508_v41  ;;  %v4320_v57 = vpop.f32.mrf.mxu0 }
 0x51d   : > { %6545 = vmatpush.xpose.msk.msrb.mxu3 %vm15426_vm2, %v15071_v50  ;;  %4674 = vmatmul.f32.gmra.mxu1 %v13016_v49  ;;  %vm15439_vm2 = vcmp.eq.s32.totalorder %v14935_v38, %v10513_v59  ;;  %v4380_v38 = vpop.f32.mrf.mxu3  ;;  %v4341_v16 = vadd.f32 %v4340_v1, %v4320_v57  ;;  %v15475_v1 = vld [vmem:[#allocation7_spill] sm:$0xff]  ;;  %v15476_v57 = vld [vmem:[#allocation104_spill] sm:$0xff] }
 0x51e   : > { %4732 = vmatmul.f32.gmra.mxu3 %v11668_v27  ;;  %v13058_v27 = vld [vmem:[%s7022_s19 + $0xc8] sm:$0xff] }
 0x51f   : > { %6498 = vmatpush.xpose.msk.msrb.mxu0 %vm15427_vm0, %v15071_v50  ;;  %vm15444_vm0 = vcmp.eq.s32.totalorder %v14925_v14, %v10508_v41 }
 0x520   : > { %6514 = vmatpush.xpose.msk.msrb.mxu1 %vm15428_vm12, %v15071_v50  ;;  %6530 = vmatpush.xpose.msk.msrb.mxu2 %vm15429_vm5, %v15071_v50  ;;  %vm15445_vm12 = vcmp.eq.s32.totalorder %v14925_v14, %v10513_v59  ;;  %vm15446_vm5 = vcmp.eq.s32.totalorder %v14925_v14, %v10946_v9 }
 0x521   : > { %6546 = vmatpush.xpose.msk.msrb.mxu3 %vm15430_vm1, %v15071_v50  ;;  %vm15447_vm1 = vcmp.eq.s32.totalorder %v14925_v14, %v11000_v61  ;;  %v6912_v14 = vmov 0.0  }
 0x522   : > { %4648 = vmatmul.f32.gmra.mxu0 %v13053_v11 }
 0x523   : > { %6499 = vmatpush.xpose.msk.msrb.mxu0 %vm15431_vm4, %v15071_v50  ;;  %4706 = vmatmul.f32.gmra.mxu2 %v11689_v43  ;;  %v4360_v43 = vpop.f32.mrf.mxu2  ;;  %vm13132_vm4 = vcmp.lt.s32.totalorder %v15448_v0, 256  ;;  %v15478_v0 = vld [vmem:[#allocation40_spill] sm:$0xff] }
 0x524   : > { %6515 = vmatpush.xpose.msk.msrb.mxu1 %vm15432_vm13, %v15071_v50  ;;  %6531 = vmatpush.xpose.msk.msrb.mxu2 %vm15433_vm3, %v15071_v50  ;;  %vm15451_vm13 = vcmp.eq.s32.totalorder %v14922_v4, %v10508_v41  ;;  %vm15452_vm3 = vcmp.eq.s32.totalorder %v14922_v4, %v10513_v59  ;;  %5095 = vst.msk [vmem:[%s13129_s10] sm:$0x3] %vm13132_vm4, %v6912_v14  ;;  %v4400_v60 = vpop.f32.mrf.mxu0 }
 0x525   : > { %6547 = vmatpush.xpose.msk.msrb.mxu3 %vm15434_vm10, %v15071_v50  ;;  %4677 = vmatmul.f32.gmra.mxu1 %v13058_v27  ;;  %vm15453_vm10 = vcmp.eq.s32.totalorder %v14922_v4, %v10946_v9  ;;  %v4361_v25 = vadd.f32 %v4360_v43, %v4341_v16 }
 0x526   : > { %4735 = vmatmul.f32.gmra.mxu3 %v15435_v28 }
 0x527   : > { %6500 = vmatpush.xpose.msk.msrb.mxu0 %vm15436_vm9, %v15071_v50  ;;  %vm15454_vm9 = vcmp.eq.s32.totalorder %v14922_v4, %v11000_v61  ;;  %v4460_v4 = vpop.f32.mrf.mxu3  ;;  %v4381_v28 = vadd.f32 %v4380_v38, %v4361_v25  ;;  %v15477_v38 = vld [vmem:[#allocation66_spill] sm:$0xff]  ;;  %v15487_v25 = vld [vmem:[#allocation117_spill] sm:$0xff] }
 0x528   : > { %6516 = vmatpush.xpose.msk.msrb.mxu1 %vm15437_vm6, %v15071_v50  ;;  %6532 = vmatpush.xpose.msk.msrb.mxu2 %vm2927_vm11, %v15071_v50  ;;  %vm15441_vm11 = vcmp.eq.s32.totalorder %v14930_v17, %v10513_v59  ;;  %vm15455_vm6 = vcmp.eq.s32.totalorder %v14918_v53, %v10508_v41 }
 0x529   : > { %6548 = vmatpush.xpose.msk.msrb.mxu3 %vm2928_vm15, %v15071_v50  ;;  %vm15440_vm15 = vcmp.eq.s32.totalorder %v14930_v17, %v10508_v41 }
 0x52b   : > { %6501 = vmatpush.xpose.msk.msrb.mxu0 %vm15438_vm8, %v15071_v50  ;;  %v4440_v55 = vpop.f32.mrf.mxu2  ;;  %vm15456_vm8 = vcmp.eq.s32.totalorder %v14918_v53, %v10513_v59 }
 0x52c   : > { %6517 = vmatpush.xpose.msk.msrb.mxu1 %vm15439_vm2, %v15071_v50  ;;  %6533 = vmatpush.xpose.msk.msrb.mxu2 %vm2919_vm14, %v15071_v50  ;;  %vm15442_vm14 = vcmp.eq.s32.totalorder %v14930_v17, %v10946_v9  ;;  %vm15457_vm2 = vcmp.eq.s32.totalorder %v14918_v53, %v10946_v9 }
 0x52d   : > { %6549 = vmatpush.xpose.msk.msrb.mxu3 %vm2920_vm7, %v15071_v50  ;;  %vm15443_vm7 = vcmp.eq.s32.totalorder %v14930_v17, %v11000_v61  ;;  %v4420_v17 = vpop.f32.mrf.mxu1 }
 0x52f   : > { %6502 = vmatpush.xpose.msk.msrb.mxu0 %vm15440_vm15, %v15071_v50  ;;  %vm15458_vm15 = vcmp.eq.s32.totalorder %v14918_v53, %v11000_v61  ;;  %v4480_v53 = vpop.f32.mrf.mxu0  ;;  %v4540_v7 = vpop.f32.mrf.mxu3 }
 0x530   : > { %6518 = vmatpush.xpose.msk.msrb.mxu1 %vm15441_vm11, %v15071_v50  ;;  %6534 = vmatpush.xpose.msk.msrb.mxu2 %vm15442_vm14, %v15071_v50  ;;  %vm15459_vm11 = vcmp.eq.s32.totalorder %v15078_v48, %v10508_v41  ;;  %vm15460_vm14 = vcmp.eq.s32.totalorder %v15078_v48, %v10513_v59 }
 0x531   : > { %6550 = vmatpush.xpose.msk.msrb.mxu3 %vm15443_vm7, %v15071_v50  ;;  %vm15461_vm7 = vcmp.eq.s32.totalorder %v15078_v48, %v10946_v9 }
 0x533   : > { %6503 = vmatpush.xpose.msk.msrb.mxu0 %vm15444_vm0, %v15071_v50  ;;  %vm15462_vm0 = vcmp.eq.s32.totalorder %v15078_v48, %v11000_v61  ;;  %v4520_v42 = vpop.f32.mrf.mxu2 }
 0x534   : > { %6519 = vmatpush.xpose.msk.msrb.mxu1 %vm15445_vm12, %v15071_v50  ;;  %6535 = vmatpush.xpose.msk.msrb.mxu2 %vm15446_vm5, %v15071_v50  ;;  %vm15463_vm12 = vcmp.eq.s32.totalorder %v15079_v51, %v10508_v41  ;;  %vm15464_vm5 = vcmp.eq.s32.totalorder %v15079_v51, %v10513_v59 }
 0x535   : > { %6551 = vmatpush.xpose.msk.msrb.mxu3 %vm15447_vm1, %v15071_v50  ;;  %v4500_v40 = vpop.f32.mrf.mxu1  ;;  %vm15465_vm1 = vcmp.eq.s32.totalorder %v15079_v51, %v10946_v9 }
 0x536   : > { %v4501_v23 = vadd.f32 %v4500_v40, %v4480_v53 }
 0x537   : > { %6504 = vmatpush.xpose.msk.msrb.mxu0 %vm15451_vm13, %v15071_v50  ;;  %vm15466_vm13 = vcmp.eq.s32.totalorder %v15079_v51, %v11000_v61 }
 0x538   : > { %6520 = vmatpush.xpose.msk.msrb.mxu1 %vm15452_vm3, %v15071_v50  ;;  %6536 = vmatpush.xpose.msk.msrb.mxu2 %vm15453_vm10, %v15071_v50  ;;  %v4521_v48 = vadd.f32 %v4520_v42, %v4501_v23  ;;  %vm15467_vm3 = vcmp.eq.s32.totalorder %v15080_v26, %v10508_v41  ;;  %vm15468_vm10 = vcmp.eq.s32.totalorder %v15080_v26, %v10513_v59 }
 0x539   : > { %6552 = vmatpush.xpose.msk.msrb.mxu3 %vm15454_vm9, %v15071_v50  ;;  %vm15469_vm9 = vcmp.eq.s32.totalorder %v15080_v26, %v10946_v9 }
 0x53a   : > { %v4541_v51 = vadd.f32 %v4540_v7, %v4521_v48  ;;  %v15488_v48 = vld [vmem:[#allocation114_spill] sm:$0xff] }
 0x53b   : > { %6505 = vmatpush.xpose.msk.msrb.mxu0 %vm15455_vm6, %v15071_v50  ;;  %vm15470_vm6 = vcmp.eq.s32.totalorder %v15080_v26, %v11000_v61  ;;  %v4401_v26 = vadd.f32 %v4400_v60, %v4381_v28  ;;  %v15489_v7 = vld [vmem:[#allocation22_spill] sm:$0xff]  ;;  %v15490_v28 = vld [vmem:[#allocation12_spill] sm:$0xff] }
 0x53c   : > { %6521 = vmatpush.xpose.msk.msrb.mxu1 %vm15456_vm8, %v15071_v50  ;;  %6537 = vmatpush.xpose.msk.msrb.mxu2 %vm15457_vm2, %v15071_v50  ;;  %vm15471_vm8 = vcmp.eq.s32.totalorder %v15031_v20, %v15084_v5  ;;  %vm15472_vm2 = vcmp.eq.s32.totalorder %v15031_v20, %v15081_v22 }
 0x53d   : > { %6553 = vmatpush.xpose.msk.msrb.mxu3 %vm15458_vm15, %v15071_v50  ;;  %vm15473_vm15 = vcmp.eq.s32.totalorder %v15031_v20, %v15082_v15  ;;  %v4421_v40 = vadd.f32 %v4420_v17, %v4401_v26  ;;  %v5104_v26 = vld [vmem:[%s13129_s10] sm:$0x3] }
 0x53f   : > { %6506 = vmatpush.xpose.msk.msrb.mxu0 %vm15459_vm11, %v15071_v50  ;;  %vm15474_vm11 = vcmp.eq.s32.totalorder %v15031_v20, %v15083_v56  ;;  %v4441_v53 = vadd.f32 %v4440_v55, %v4421_v40 }
 0x540   : > { %6522 = vmatpush.xpose.msk.msrb.mxu1 %vm15460_vm14, %v15071_v50  ;;  %6538 = vmatpush.xpose.msk.msrb.mxu2 %vm15461_vm7, %v15071_v50  ;;  %vm15479_vm14 = vcmp.eq.s32.totalorder %v15023_v2, %v15084_v5  ;;  %vm15480_vm7 = vcmp.eq.s32.totalorder %v15023_v2, %v15081_v22 }
 0x541   : > { %6554 = vmatpush.xpose.msk.msrb.mxu3 %vm15462_vm0, %v15071_v50  ;;  %vm15481_vm0 = vcmp.eq.s32.totalorder %v15023_v2, %v15082_v15 }
 0x543   : > { %6507 = vmatpush.xpose.msk.msrb.mxu0 %vm15463_vm12, %v15071_v50  ;;  %vm15482_vm12 = vcmp.eq.s32.totalorder %v15023_v2, %v15083_v56 }
 0x544   : > { %6523 = vmatpush.xpose.msk.msrb.mxu1 %vm15464_vm5, %v15071_v50  ;;  %6539 = vmatpush.xpose.msk.msrb.mxu2 %vm15465_vm1, %v15071_v50  ;;  %vm15483_vm5 = vcmp.eq.s32.totalorder %v15019_v46, %v15084_v5  ;;  %vm15484_vm1 = vcmp.eq.s32.totalorder %v15019_v46, %v15081_v22 }
 0x545   : > { %6555 = vmatpush.xpose.msk.msrb.mxu3 %vm15466_vm13, %v15071_v50  ;;  %vm15485_vm13 = vcmp.eq.s32.totalorder %v15019_v46, %v15082_v15 }
 0x547   : > { %6508 = vmatpush.xpose.msk.msrb.mxu0 %vm15467_vm3, %v15071_v50  ;;  %v4560_v43 = vpop.f32.mrf.mxu0  ;;  %vm15486_vm3 = vcmp.eq.s32.totalorder %v15019_v46, %v15083_v56 }
 0x548   : > { %6524 = vmatpush.xpose.msk.msrb.mxu1 %vm15468_vm10, %v15071_v50  ;;  %6540 = vmatpush.xpose.msk.msrb.mxu2 %vm15469_vm9, %v15071_v50  ;;  %v4561_v14 = vadd.f32 %v4560_v43, %v4541_v51  ;;  %vm15491_vm10 = vcmp.eq.s32.totalorder %v14997_v62, %v15084_v5  ;;  %vm15492_vm9 = vcmp.eq.s32.totalorder %v14997_v62, %v15081_v22 }
 0x549   : > { %6556 = vmatpush.xpose.msk.msrb.mxu3 %vm15470_vm6, %v15071_v50  ;;  %vm15493_vm6 = vcmp.eq.s32.totalorder %v14997_v62, %v15082_v15  ;;  %v4461_v51 = vadd.f32 %v4460_v4, %v4441_v53  ;;  %v15500_v4 = vld [vmem:[#allocation115_spill] sm:$0xff] }
 0x54a   : > { %4755 = vmatmul.f32.vlgmr.msrb.gmra.mxu0 %v15476_v57  ;;  %v4580_v60 = vpop.f32.mrf.mxu1 }
 0x54b   : > { %6557 = vmatpush.xpose.msk.msra.mxu0 %vm15471_vm8, %v15071_v50  ;;  %4813 = vmatmul.f32.vlgmr.msrb.gmra.mxu2 %v15475_v1  ;;  %v4581_v16 = vadd.f32 %v4580_v60, %v4561_v14  ;;  %vm15494_vm8 = vcmp.eq.s32.totalorder %v14997_v62, %v15083_v56 }
 0x54c   : > { %6573 = vmatpush.xpose.msk.msra.mxu1 %vm15472_vm2, %v15071_v50  ;;  %6589 = vmatpush.xpose.msk.msra.mxu2 %vm15473_vm15, %v15071_v50  ;;  %vm15495_vm2 = vcmask 1040384   ;;  %vm15496_vm15 = vcmp.eq.s32.totalorder %v14995_v10, %v15084_v5 }
 0x54d   : > { %6605 = vmatpush.xpose.msk.msra.mxu3 %vm15474_vm11, %v15071_v50  ;;  %4784 = vmatmul.f32.vlgmr.msrb.gmra.mxu1 %v15478_v0  ;;  %vm15497_vm11 = vcmp.eq.s32.totalorder %v14995_v10, %v15081_v22 }
 0x54e   : > { %4842 = vmatmul.f32.vlgmr.msrb.gmra.mxu3 %v15477_v38  ;;  %v4600_v17 = vpop.f32.mrf.mxu2  ;;  %v15501_v38 = vld [vmem:[#allocation47_spill] sm:$0xff] }
 0x54f   : > { %6558 = vmatpush.xpose.msk.msra.mxu0 %vm15479_vm14, %v15071_v50  ;;  %v4601_v23 = vadd.f32 %v4600_v17, %v4581_v16  ;;  %vm15498_vm14 = vcmp.eq.s32.totalorder %v14995_v10, %v15082_v15 }
 0x550   : > { %6574 = vmatpush.xpose.msk.msra.mxu1 %vm15480_vm7, %v15071_v50  ;;  %6590 = vmatpush.xpose.msk.msra.mxu2 %vm15481_vm0, %v15071_v50  ;;  %vm15499_vm7 = vcmp.eq.s32.totalorder %v14995_v10, %v15083_v56  ;;  %vm15502_vm0 = vcmp.eq.s32.totalorder %v14994_v39, %v15084_v5 }
 0x551   : > { %6606 = vmatpush.xpose.msk.msra.mxu3 %vm15482_vm12, %v15071_v50  ;;  %v4620_v42 = vpop.f32.mrf.mxu3  ;;  %vm15503_vm12 = vcmp.eq.s32.totalorder %v14994_v39, %v15081_v22 }
 0x552   : > { %4758 = vmatmul.f32.gmra.mxu0 %v15488_v48  ;;  %v4621_v55 = vadd.f32 %v4620_v42, %v4601_v23  ;;  %v6823_v42 = vld [vmem:[%s7022_s19 + $0xa0] sm:$0xff] }
 0x553   : > { %6559 = vmatpush.xpose.msk.msra.mxu0 %vm15483_vm5, %v15071_v50  ;;  %4816 = vmatmul.f32.gmra.mxu2 %v15487_v25  ;;  %vm15504_vm5 = vcmp.eq.s32.totalorder %v14994_v39, %v15082_v15  ;;  %v6824_v25 = vld [vmem:[%s7022_s19 + $0xa8] sm:$0xff] }
 0x554   : > { %6575 = vmatpush.xpose.msk.msra.mxu1 %vm15484_vm1, %v15071_v50  ;;  %6591 = vmatpush.xpose.msk.msra.mxu2 %vm15485_vm13, %v15071_v50  ;;  %v5107_v1 = vrot.slane %v4621_v55, 7  ;;  %vm15506_vm1 = vcmp.eq.s32.totalorder %v14993_v30, %v15084_v5  ;;  %vm15507_vm13 = vcmp.eq.s32.totalorder %v14993_v30, %v15081_v22 }
 0x555   : > { %6607 = vmatpush.xpose.msk.msra.mxu3 %vm15486_vm3, %v15071_v50  ;;  %4787 = vmatmul.f32.gmra.mxu1 %v15490_v28  ;;  %vm15508_vm3 = vcmp.eq.s32.totalorder %v14993_v30, %v15082_v15  ;;  %v6826_v28 = vld [vmem:[%s7022_s19 + $0xb8] sm:$0xff] }
 0x556   : > { %4845 = vmatmul.f32.gmra.mxu3 %v15489_v7  ;;  %v5108_v57 = vsel %vm15495_vm2, %v4461_v51, %v5107_v1  ;;  %vm15515_vm2 = vcmp.eq.s32.totalorder %v14992_v58, %v15083_v56  ;;  %v6825_v7 = vld [vmem:[%s7022_s19 + $0xb0] sm:$0xff] }
 0x557   : > { %6560 = vmatpush.xpose.msk.msra.mxu0 %vm15491_vm10, %v15071_v50  ;;  %v5110_v43 = vadd.f32 %v5108_v57, %v5104_v26  ;;  %vm15509_vm10 = vcmp.eq.s32.totalorder %v14993_v30, %v15083_v56 }
 0x558   : > { %6576 = vmatpush.xpose.msk.msra.mxu1 %vm15492_vm9, %v15071_v50  ;;  %6592 = vmatpush.xpose.msk.msra.mxu2 %vm15493_vm6, %v15071_v50  ;;  %vm15512_vm9 = vcmp.eq.s32.totalorder %v14992_v58, %v15084_v5  ;;  %vm15513_vm6 = vcmp.eq.s32.totalorder %v14992_v58, %v15081_v22 }
 0x559   : > { %6608 = vmatpush.xpose.msk.msra.mxu3 %vm15494_vm8, %v15071_v50  ;;  %5115 = vst.msk [vmem:[%s13129_s10] sm:$0x3] %vm13132_vm4, %v5110_v43  ;;  %vm15505_vm4 = vcmp.eq.s32.totalorder %v14994_v39, %v15083_v56  ;;  %vm15514_vm8 = vcmp.eq.s32.totalorder %v14992_v58, %v15082_v15  ;;  %s5187_s10 = sshll.u32 %s5183_s30, 4  ;;  %s5188_s10 = int_to_ptr.hbm [resolvable:$true] %s5187_s10 }
 0x55a   : > { %4761 = vmatmul.f32.gmra.mxu0 %v15500_v4  ;;  %s6845_s12 = sshra.s32 %s5188_s10, 4  ;;  %s6846_s12 = int_to_ptr.hbm [resolvable:$true] %s6845_s12 }
 0x55b   : > { %6561 = vmatpush.xpose.msk.msra.mxu0 %vm15496_vm15, %v15071_v50  ;;  %4819 = vmatmul.f32.gmra.mxu2 %v12200_v44  ;;  %v15511_v44 = vld [vmem:[#allocation103_spill] sm:$0xff]  ;;  %vm15516_vm15 = vcmp.eq.s32.totalorder %v14983_v54, %v15084_v5  ;;  %s6847_s17 = scalar_lea.hbm %s6846_s12, 8  ;;  %p6852_p1 = scmp.lt.s32.totalorder %s6846_s12, %s13842_s4 }
 0x55c   : > { %6577 = vmatpush.xpose.msk.msra.mxu1 %vm15497_vm11, %v15071_v50  ;;  %6593 = vmatpush.xpose.msk.msra.mxu2 %vm15498_vm14, %v15071_v50  ;;  %vm15517_vm11 = vcmp.eq.s32.totalorder %v14983_v54, %v15081_v22  ;;  %vm15518_vm14 = vcmp.eq.s32.totalorder %v14983_v54, %v15082_v15  ;;  %p6848_p12 = scmp.ne.s32.totalorder %s6846_s12, %s6847_s17  ;;  %p6853_p2 = scmp.lt.s32.totalorder %s6851_s23, %s6847_s17 }
 0x55d   : > { %6609 = vmatpush.xpose.msk.msra.mxu3 %vm15499_vm7, %v15071_v50  ;;  %4790 = vmatmul.f32.gmra.mxu1 %v15501_v38  ;;  %vm15519_vm7 = vcmp.eq.s32.totalorder %v14983_v54, %v15083_v56 }
 0x55e   : > { %4848 = vmatmul.f32.gmra.mxu3 %v12205_v13  ;;  %v15510_v13 = vld [vmem:[#allocation17_spill] sm:$0xff]  ;;  %p6849_p13 = pnand %p6848_p12, %p6993_p4  ;;  %p6854_p3 = por %p6853_p2, %p6852_p1 }
 0x55f   : > { %6562 = vmatpush.xpose.msk.msra.mxu0 %vm15502_vm0, %v15071_v50  ;;  %vm15520_vm0 = vcmp.eq.s32.totalorder %v14978_v34, %v15084_v5 }
 0x560   : > { %6578 = vmatpush.xpose.msk.msra.mxu1 %vm15503_vm12, %v15071_v50  ;;  %6594 = vmatpush.xpose.msk.msra.mxu2 %vm15504_vm5, %v15071_v50  ;;  %vm15521_vm12 = vcmp.eq.s32.totalorder %v14978_v34, %v15081_v22  ;;  %vm15522_vm5 = vcmp.eq.s32.totalorder %v14978_v34, %v15082_v15  ;;  %p6850_p0 = pneg %p6849_p13 }
 0x561   : > { %6610 = vmatpush.xpose.msk.msra.mxu3 %vm15505_vm4, %v15071_v50  ;;  %vm15523_vm4 = vcmp.eq.s32.totalorder %v14978_v34, %v15083_v56 }
 0x562   : > { %4764 = vmatmul.f32.gmra.mxu0 %v15510_v13  ;;  %p6855_p5 = pnand %p6854_p3, %p6850_p0 }
 0x563   : > { %6563 = vmatpush.xpose.msk.msra.mxu0 %vm15506_vm1, %v15071_v50  ;;  %4822 = vmatmul.f32.gmra.mxu2 %v12245_v24  ;;  %vm15524_vm1 = vcmp.eq.s32.totalorder %v14976_v8, %v15084_v5 }
 0x564   : > { %6579 = vmatpush.xpose.msk.msra.mxu1 %vm15507_vm13, %v15071_v50  ;;  %6595 = vmatpush.xpose.msk.msra.mxu2 %vm15508_vm3, %v15071_v50  ;;  %vm15525_vm13 = vcmp.eq.s32.totalorder %v14976_v8, %v15081_v22  ;;  %vm15526_vm3 = vcmp.eq.s32.totalorder %v14976_v8, %v15082_v15 }
 0x565   : > { %6611 = vmatpush.xpose.msk.msra.mxu3 %vm15509_vm10, %v15071_v50  ;;  %4793 = vmatmul.f32.gmra.mxu1 %v15511_v44  ;;  %vm15527_vm10 = vcmp.eq.s32.totalorder %v14976_v8, %v15083_v56  ;;  %v6827_v44 = vld [vmem:[%s7022_s19 + $0xe0] sm:$0xff] }
 0x566   : > { %4851 = vmatmul.f32.gmra.mxu3 %v12250_v37 }
 0x567   : > { %6564 = vmatpush.xpose.msk.msra.mxu0 %vm15512_vm9, %v15071_v50  ;;  %vm15528_vm9 = vcmp.eq.s32.totalorder %v14972_v12, %v15084_v5 }
 0x568   : > { %6580 = vmatpush.xpose.msk.msra.mxu1 %vm15513_vm6, %v15071_v50  ;;  %6596 = vmatpush.xpose.msk.msra.mxu2 %vm15514_vm8, %v15071_v50  ;;  %vm15529_vm6 = vcmp.eq.s32.totalorder %v14972_v12, %v15081_v22  ;;  %vm15530_vm8 = vcmp.eq.s32.totalorder %v14972_v12, %v15082_v15 }
 0x569   : > { %6612 = vmatpush.xpose.msk.msra.mxu3 %vm15515_vm2, %v15071_v50  ;;  %vm15531_vm2 = vcmp.eq.s32.totalorder %v14972_v12, %v15083_v56 }
 0x56b   : > { %6565 = vmatpush.xpose.msk.msra.mxu0 %vm15516_vm15, %v15071_v50  ;;  %vm15532_vm15 = vcmp.eq.s32.totalorder %v14970_v3, %v15084_v5 }
 0x56c   : > { %6581 = vmatpush.xpose.msk.msra.mxu1 %vm15517_vm11, %v15071_v50  ;;  %6597 = vmatpush.xpose.msk.msra.mxu2 %vm15518_vm14, %v15071_v50  ;;  %vm15533_vm11 = vcmp.eq.s32.totalorder %v14970_v3, %v15081_v22  ;;  %vm15534_vm14 = vcmp.eq.s32.totalorder %v14970_v3, %v15082_v15 }
 0x56d   : > { %6613 = vmatpush.xpose.msk.msra.mxu3 %vm15519_vm7, %v15071_v50  ;;  %vm15535_vm7 = vcmp.eq.s32.totalorder %v14970_v3, %v15083_v56 }
 0x56f   : > { %6566 = vmatpush.xpose.msk.msra.mxu0 %vm15520_vm0, %v15071_v50  ;;  %vm15536_vm0 = vcmp.eq.s32.totalorder %v14969_v35, %v15084_v5 }
 0x570   : > { %6582 = vmatpush.xpose.msk.msra.mxu1 %vm15521_vm12, %v15071_v50  ;;  %6598 = vmatpush.xpose.msk.msra.mxu2 %vm15522_vm5, %v15071_v50  ;;  %vm15537_vm12 = vcmp.eq.s32.totalorder %v14969_v35, %v15081_v22  ;;  %vm15538_vm5 = vcmp.eq.s32.totalorder %v14969_v35, %v15082_v15 }
 0x571   : > { %6614 = vmatpush.xpose.msk.msra.mxu3 %vm15523_vm4, %v15071_v50  ;;  %vm15539_vm4 = vcmp.eq.s32.totalorder %v14969_v35, %v15083_v56 }
 0x573   : > { %6567 = vmatpush.xpose.msk.msra.mxu0 %vm15524_vm1, %v15071_v50  ;;  %vm15540_vm1 = vcmp.eq.s32.totalorder %v14968_v21, %v15084_v5 }
 0x574   : > { %6583 = vmatpush.xpose.msk.msra.mxu1 %vm15525_vm13, %v15071_v50  ;;  %6599 = vmatpush.xpose.msk.msra.mxu2 %vm15526_vm3, %v15071_v50  ;;  %vm15541_vm13 = vcmp.eq.s32.totalorder %v14968_v21, %v15081_v22  ;;  %vm15542_vm3 = vcmp.eq.s32.totalorder %v14968_v21, %v15082_v15 }
 0x575   : > { %6615 = vmatpush.xpose.msk.msra.mxu3 %vm15527_vm10, %v15071_v50  ;;  %vm15543_vm10 = vcmp.eq.s32.totalorder %v14968_v21, %v15083_v56 }
 0x577   : > { %6568 = vmatpush.xpose.msk.msra.mxu0 %vm15528_vm9, %v15071_v50  ;;  %vm15544_vm9 = vcmp.eq.s32.totalorder %v14964_v6, %v15084_v5 }
 0x578   : > { %6584 = vmatpush.xpose.msk.msra.mxu1 %vm15529_vm6, %v15071_v50  ;;  %6600 = vmatpush.xpose.msk.msra.mxu2 %vm15530_vm8, %v15071_v50  ;;  %vm15545_vm6 = vcmp.eq.s32.totalorder %v14964_v6, %v15081_v22  ;;  %vm15546_vm8 = vcmp.eq.s32.totalorder %v14964_v6, %v15082_v15 }
 0x579   : > { %6616 = vmatpush.xpose.msk.msra.mxu3 %vm15531_vm2, %v15071_v50  ;;  %vm15547_vm2 = vcmp.eq.s32.totalorder %v14964_v6, %v15083_v56 }
 0x57b   : > { %6569 = vmatpush.xpose.msk.msra.mxu0 %vm15532_vm15, %v15071_v50  ;;  %vm15548_vm15 = vcmp.eq.s32.totalorder %v15031_v20, %v10508_v41 }
 0x57c   : > { %6585 = vmatpush.xpose.msk.msra.mxu1 %vm15533_vm11, %v15071_v50  ;;  %6601 = vmatpush.xpose.msk.msra.mxu2 %vm15534_vm14, %v15071_v50  ;;  %vm15549_vm11 = vcmp.eq.s32.totalorder %v15031_v20, %v10513_v59  ;;  %vm15550_vm14 = vcmp.eq.s32.totalorder %v15031_v20, %v10946_v9 }
 0x57d   : > { %6617 = vmatpush.xpose.msk.msra.mxu3 %vm15535_vm7, %v15071_v50  ;;  %vm15551_vm7 = vcmp.eq.s32.totalorder %v15031_v20, %v11000_v61 }
 0x57f   : > { %6570 = vmatpush.xpose.msk.msra.mxu0 %vm15536_vm0, %v15071_v50  ;;  %vm15552_vm0 = vcmp.eq.s32.totalorder %v15023_v2, %v10508_v41 }
 0x580   : > { %6586 = vmatpush.xpose.msk.msra.mxu1 %vm15537_vm12, %v15071_v50  ;;  %6602 = vmatpush.xpose.msk.msra.mxu2 %vm15538_vm5, %v15071_v50  ;;  %vm15553_vm12 = vcmp.eq.s32.totalorder %v15023_v2, %v10513_v59  ;;  %vm15554_vm5 = vcmp.eq.s32.totalorder %v15023_v2, %v10946_v9 }
 0x581   : > { %6618 = vmatpush.xpose.msk.msra.mxu3 %vm15539_vm4, %v15071_v50  ;;  %vm15555_vm4 = vcmp.eq.s32.totalorder %v15023_v2, %v11000_v61  ;;  %v6814_v2 = vld [vmem:[%s7022_s19 + $0xd8] sm:$0xff] }
 0x583   : > { %6571 = vmatpush.xpose.msk.msra.mxu0 %vm15540_vm1, %v15071_v50  ;;  %vm15556_vm1 = vcmp.eq.s32.totalorder %v15019_v46, %v10508_v41 }
 0x584   : > { %6587 = vmatpush.xpose.msk.msra.mxu1 %vm15541_vm13, %v15071_v50  ;;  %6603 = vmatpush.xpose.msk.msra.mxu2 %vm15542_vm3, %v15071_v50  ;;  %vm15557_vm13 = vcmp.eq.s32.totalorder %v15019_v46, %v10513_v59  ;;  %vm15558_vm3 = vcmp.eq.s32.totalorder %v15019_v46, %v10946_v9 }
 0x585   : > { %6619 = vmatpush.xpose.msk.msra.mxu3 %vm15543_vm10, %v15071_v50  ;;  %vm15559_vm10 = vcmp.eq.s32.totalorder %v15019_v46, %v11000_v61  ;;  %v6813_v46 = vld [vmem:[%s7022_s19 + $0xd0] sm:$0xff] }
 0x587   : > { %6572 = vmatpush.xpose.msk.msra.mxu0 %vm15544_vm9, %v15071_v50  ;;  %vm15560_vm9 = vcmp.eq.s32.totalorder %v14997_v62, %v10508_v41 }
 0x588   : > { %6588 = vmatpush.xpose.msk.msra.mxu1 %vm15545_vm6, %v15071_v50  ;;  %6604 = vmatpush.xpose.msk.msra.mxu2 %vm15546_vm8, %v15071_v50  ;;  %vm15561_vm6 = vcmp.eq.s32.totalorder %v14997_v62, %v10513_v59  ;;  %vm15562_vm8 = vcmp.eq.s32.totalorder %v14997_v62, %v10946_v9 }
 0x589   : > { %6620 = vmatpush.xpose.msk.msra.mxu3 %vm15547_vm2, %v15071_v50  ;;  %vm15563_vm2 = vcmp.eq.s32.totalorder %v14997_v62, %v11000_v61  ;;  %v6812_v62 = vld [vmem:[%s7022_s19 + $0x98] sm:$0xff] }
 0x58a   : > { %4871 = vmatmul.f32.vlgmr.msra.gmra.mxu0 %v12915_v32  ;;  %v6815_v32 = vld [vmem:[%s7022_s19 + $0x20] sm:$0xff] }
 0x58b   : > { %6621 = vmatpush.xpose.msk.msrb.mxu0 %vm15548_vm15, %v15071_v50  ;;  %4929 = vmatmul.f32.vlgmr.msra.gmra.mxu2 %v12911_v36  ;;  %vm15564_vm15 = vcmp.eq.s32.totalorder %v14995_v10, %v10508_v41 }
 0x58c   : > { %6637 = vmatpush.xpose.msk.msrb.mxu1 %vm15549_vm11, %v15071_v50  ;;  %6653 = vmatpush.xpose.msk.msrb.mxu2 %vm15550_vm14, %v15071_v50  ;;  %vm15565_vm11 = vcmp.eq.s32.totalorder %v14995_v10, %v10513_v59  ;;  %vm15566_vm14 = vcmp.eq.s32.totalorder %v14995_v10, %v10946_v9 }
 0x58d   : > { %6669 = vmatpush.xpose.msk.msrb.mxu3 %vm15551_vm7, %v15071_v50  ;;  %4900 = vmatmul.f32.vlgmr.msra.gmra.mxu1 %v12923_v33  ;;  %vm15567_vm7 = vcmp.eq.s32.totalorder %v14995_v10, %v11000_v61  ;;  %v4669_v10 = vpop.f32.mrf.mxu1 }
 0x58e   : > { %4958 = vmatmul.f32.vlgmr.msra.gmra.mxu3 %v12919_v47  ;;  %v6817_v47 = vld [vmem:[%s7022_s19 + $0x30] sm:$0xff] }
 0x58f   : > { %6622 = vmatpush.xpose.msk.msrb.mxu0 %vm15552_vm0, %v15071_v50  ;;  %vm15568_vm0 = vcmp.eq.s32.totalorder %v14994_v39, %v10508_v41 }
 0x590   : > { %6638 = vmatpush.xpose.msk.msrb.mxu1 %vm15553_vm12, %v15071_v50  ;;  %6654 = vmatpush.xpose.msk.msrb.mxu2 %vm15554_vm5, %v15071_v50  ;;  %vm15569_vm12 = vcmp.eq.s32.totalorder %v14994_v39, %v10513_v59  ;;  %vm15570_vm5 = vcmp.eq.s32.totalorder %v14994_v39, %v10946_v9 }
 0x591   : > { %6670 = vmatpush.xpose.msk.msrb.mxu3 %vm15555_vm4, %v15071_v50  ;;  %vm15571_vm4 = vcmp.eq.s32.totalorder %v14994_v39, %v11000_v61  ;;  %v4640_v39 = vpop.f32.mrf.mxu0  ;;  %v4727_v20 = vpop.f32.mrf.mxu3 }
 0x592   : > { %4874 = vmatmul.f32.gmra.mxu0 %v12963_v63 }
 0x593   : > { %6623 = vmatpush.xpose.msk.msrb.mxu0 %vm15556_vm1, %v15071_v50  ;;  %4932 = vmatmul.f32.gmra.mxu2 %v12959_v45  ;;  %vm15572_vm1 = vcmp.eq.s32.totalorder %v14993_v30, %v10508_v41 }
 0x594   : > { %6639 = vmatpush.xpose.msk.msrb.mxu1 %vm15557_vm13, %v15071_v50  ;;  %6655 = vmatpush.xpose.msk.msrb.mxu2 %vm15558_vm3, %v15071_v50  ;;  %vm15573_vm13 = vcmp.eq.s32.totalorder %v14993_v30, %v10513_v59  ;;  %vm15574_vm3 = vcmp.eq.s32.totalorder %v14993_v30, %v10946_v9 }
 0x595   : > { %6671 = vmatpush.xpose.msk.msrb.mxu3 %vm15559_vm10, %v15071_v50  ;;  %4903 = vmatmul.f32.gmra.mxu1 %v12971_v29  ;;  %vm15575_vm10 = vcmp.eq.s32.totalorder %v14993_v30, %v11000_v61  ;;  %v4698_v30 = vpop.f32.mrf.mxu2  ;;  %v4672_v22 = vpop.f32.mrf.mxu1  ;;  %v6819_v29 = vld [vmem:[%s7022_s19 + $0x60] sm:$0xff] }
 0x596   : > { %4961 = vmatmul.f32.gmra.mxu3 %v12967_v19 }
 0x597   : > { %6624 = vmatpush.xpose.msk.msrb.mxu0 %vm15560_vm9, %v15071_v50  ;;  %vm15576_vm9 = vcmp.eq.s32.totalorder %v14992_v58, %v10508_v41 }
 0x598   : > { %6640 = vmatpush.xpose.msk.msrb.mxu1 %vm15561_vm6, %v15071_v50  ;;  %6656 = vmatpush.xpose.msk.msrb.mxu2 %vm15562_vm8, %v15071_v50  ;;  %vm15577_vm6 = vcmp.eq.s32.totalorder %v14992_v58, %v10513_v59  ;;  %vm15578_vm8 = vcmp.eq.s32.totalorder %v14992_v58, %v10946_v9 }
 0x599   : > { %6672 = vmatpush.xpose.msk.msrb.mxu3 %vm15563_vm2, %v15071_v50  ;;  %vm15579_vm2 = vcmp.eq.s32.totalorder %v14992_v58, %v11000_v61  ;;  %v4643_v58 = vpop.f32.mrf.mxu0 }
 0x59a   : > { %4877 = vmatmul.f32.gmra.mxu0 %v13011_v31  ;;  %v4673_v36 = vadd.f32 %v4672_v22, %v4643_v58 }
 0x59b   : > { %6625 = vmatpush.xpose.msk.msrb.mxu0 %vm15564_vm15, %v15071_v50  ;;  %4935 = vmatmul.f32.gmra.mxu2 %v13007_v52  ;;  %vm15580_vm15 = vcmp.eq.s32.totalorder %v14983_v54, %v10508_v41  ;;  %v6820_v52 = vld [vmem:[%s7022_s19 + $0x68] sm:$0xff] }
 0x59c   : > { %6641 = vmatpush.xpose.msk.msrb.mxu1 %vm15565_vm11, %v15071_v50  ;;  %6657 = vmatpush.xpose.msk.msrb.mxu2 %vm15566_vm14, %v15071_v50  ;;  %vm15581_vm11 = vcmp.eq.s32.totalorder %v14983_v54, %v10513_v59  ;;  %vm15582_vm14 = vcmp.eq.s32.totalorder %v14983_v54, %v10946_v9 }
 0x59d   : > { %6673 = vmatpush.xpose.msk.msrb.mxu3 %vm15567_vm7, %v15071_v50  ;;  %4906 = vmatmul.f32.gmra.mxu1 %v13016_v49  ;;  %vm15583_vm7 = vcmp.eq.s32.totalorder %v14983_v54, %v11000_v61  ;;  %v4730_v54 = vpop.f32.mrf.mxu3  ;;  %v4675_v15 = vpop.f32.mrf.mxu1  ;;  %v6821_v49 = vld [vmem:[%s7022_s19 + $0x70] sm:$0xff] }
 0x59e   : > { %4964 = vmatmul.f32.gmra.mxu3 %v6812_v62  ;;  %v6828_v62 = vld [vmem:[%s7022_s19 + $0xe8] sm:$0xff] }
 0x59f   : > { %6626 = vmatpush.xpose.msk.msrb.mxu0 %vm15568_vm0, %v15071_v50  ;;  %vm15584_vm0 = vcmp.eq.s32.totalorder %v14978_v34, %v10508_v41 }
 0x5a0   : > { %6642 = vmatpush.xpose.msk.msrb.mxu1 %vm15569_vm12, %v15071_v50  ;;  %6658 = vmatpush.xpose.msk.msrb.mxu2 %vm15570_vm5, %v15071_v50  ;;  %vm15585_vm12 = vcmp.eq.s32.totalorder %v14978_v34, %v10513_v59  ;;  %vm15586_vm5 = vcmp.eq.s32.totalorder %v14978_v34, %v10946_v9 }
 0x5a1   : > { %6674 = vmatpush.xpose.msk.msrb.mxu3 %vm15571_vm4, %v15071_v50  ;;  %vm15587_vm4 = vcmp.eq.s32.totalorder %v14978_v34, %v11000_v61  ;;  %v4701_v34 = vpop.f32.mrf.mxu2 }
 0x5a2   : > { %4880 = vmatmul.f32.gmra.mxu0 %v13053_v11  ;;  %v4702_v45 = vadd.f32 %v4701_v34, %v4673_v36  ;;  %v6822_v11 = vld [vmem:[%s7022_s19 + $0x78] sm:$0xff] }
 0x5a3   : > { %6627 = vmatpush.xpose.msk.msrb.mxu0 %vm15572_vm1, %v15071_v50  ;;  %4938 = vmatmul.f32.gmra.mxu2 %v6813_v46  ;;  %vm15588_vm1 = vcmp.eq.s32.totalorder %v14976_v8, %v10508_v41  ;;  %v6830_v46 = vld [vmem:[%s7022_s19 + $0xf8] sm:$0xff] }
 0x5a4   : > { %6643 = vmatpush.xpose.msk.msrb.mxu1 %vm15573_vm13, %v15071_v50  ;;  %6659 = vmatpush.xpose.msk.msrb.mxu2 %vm15574_vm3, %v15071_v50  ;;  %vm15589_vm13 = vcmp.eq.s32.totalorder %v14976_v8, %v10513_v59  ;;  %vm15590_vm3 = vcmp.eq.s32.totalorder %v14976_v8, %v10946_v9  ;;  %v4731_v63 = vadd.f32 %v4730_v54, %v4702_v45 }
 0x5a5   : > { %6675 = vmatpush.xpose.msk.msrb.mxu3 %vm15575_vm10, %v15071_v50  ;;  %4909 = vmatmul.f32.gmra.mxu1 %v13058_v27  ;;  %vm15591_vm10 = vcmp.eq.s32.totalorder %v14976_v8, %v11000_v61  ;;  %v4646_v8 = vpop.f32.mrf.mxu0  ;;  %v4733_v56 = vpop.f32.mrf.mxu3 }
 0x5a6   : > { %4967 = vmatmul.f32.gmra.mxu3 %v6814_v2  ;;  %v4678_v24 = vpop.f32.mrf.mxu1  ;;  %v4676_v19 = vadd.f32 %v4675_v15, %v4646_v8 }
 0x5a7   : > { %6628 = vmatpush.xpose.msk.msrb.mxu0 %vm15576_vm9, %v15071_v50  ;;  %vm15592_vm9 = vcmp.eq.s32.totalorder %v14972_v12, %v10508_v41 }
 0x5a8   : > { %6644 = vmatpush.xpose.msk.msrb.mxu1 %vm15577_vm6, %v15071_v50  ;;  %6660 = vmatpush.xpose.msk.msrb.mxu2 %vm15578_vm8, %v15071_v50  ;;  %vm15593_vm6 = vcmp.eq.s32.totalorder %v14972_v12, %v10513_v59  ;;  %vm15594_vm8 = vcmp.eq.s32.totalorder %v14972_v12, %v10946_v9 }
 0x5a9   : > { %6676 = vmatpush.xpose.msk.msrb.mxu3 %vm15579_vm2, %v15071_v50  ;;  %vm15595_vm2 = vcmp.eq.s32.totalorder %v14972_v12, %v11000_v61  ;;  %v4704_v12 = vpop.f32.mrf.mxu2 }
 0x5aa   : > { %v4705_v14 = vadd.f32 %v4704_v12, %v4676_v19 }
 0x5ab   : > { %6629 = vmatpush.xpose.msk.msrb.mxu0 %vm15580_vm15, %v15071_v50  ;;  %vm15596_vm15 = vcmp.eq.s32.totalorder %v14970_v3, %v10508_v41 }
 0x5ac   : > { %6645 = vmatpush.xpose.msk.msrb.mxu1 %vm15581_vm11, %v15071_v50  ;;  %6661 = vmatpush.xpose.msk.msrb.mxu2 %vm15582_vm14, %v15071_v50  ;;  %vm15597_vm11 = vcmp.eq.s32.totalorder %v14970_v3, %v10513_v59  ;;  %vm15598_vm14 = vcmp.eq.s32.totalorder %v14970_v3, %v10946_v9  ;;  %v4734_v53 = vadd.f32 %v4733_v56, %v4705_v14 }
 0x5ad   : > { %6677 = vmatpush.xpose.msk.msrb.mxu3 %vm15583_vm7, %v15071_v50  ;;  %vm15599_vm7 = vcmp.eq.s32.totalorder %v14970_v3, %v11000_v61  ;;  %v4670_v3 = vadd.f32 %v4669_v10, %v4640_v39  ;;  %v4649_v5 = vpop.f32.mrf.mxu0  ;;  %v6829_v10 = vld [vmem:[%s7022_s19 + $0xf0] sm:$0xff] }
 0x5ae   : > { %v4679_v23 = vadd.f32 %v4678_v24, %v4649_v5 }
 0x5af   : > { %6630 = vmatpush.xpose.msk.msrb.mxu0 %vm15584_vm0, %v15071_v50  ;;  %vm15600_vm0 = vcmp.eq.s32.totalorder %v14969_v35, %v10508_v41 }
 0x5b0   : > { %6646 = vmatpush.xpose.msk.msrb.mxu1 %vm15585_vm12, %v15071_v50  ;;  %6662 = vmatpush.xpose.msk.msrb.mxu2 %vm15586_vm5, %v15071_v50  ;;  %vm15601_vm12 = vcmp.eq.s32.totalorder %v14969_v35, %v10513_v59  ;;  %vm15602_vm5 = vcmp.eq.s32.totalorder %v14969_v35, %v10946_v9 }
 0x5b1   : > { %6678 = vmatpush.xpose.msk.msrb.mxu3 %vm15587_vm4, %v15071_v50  ;;  %vm15603_vm4 = vcmp.eq.s32.totalorder %v14969_v35, %v11000_v61  ;;  %v4699_v35 = vadd.f32 %v4698_v30, %v4670_v3 }
 0x5b3   : > { %6631 = vmatpush.xpose.msk.msrb.mxu0 %vm15588_vm1, %v15071_v50  ;;  %vm15604_vm1 = vcmp.eq.s32.totalorder %v14968_v21, %v10508_v41  ;;  %v4728_v37 = vadd.f32 %v4727_v20, %v4699_v35 }
 0x5b4   : > { %6647 = vmatpush.xpose.msk.msrb.mxu1 %vm15589_vm13, %v15071_v50  ;;  %6663 = vmatpush.xpose.msk.msrb.mxu2 %vm15590_vm3, %v15071_v50  ;;  %vm15605_vm13 = vcmp.eq.s32.totalorder %v14968_v21, %v10513_v59  ;;  %vm15606_vm3 = vcmp.eq.s32.totalorder %v14968_v21, %v10946_v9 }
 0x5b5   : > { %6679 = vmatpush.xpose.msk.msrb.mxu3 %vm15591_vm10, %v15071_v50  ;;  %vm15607_vm10 = vcmp.eq.s32.totalorder %v14968_v21, %v11000_v61  ;;  %v4707_v21 = vpop.f32.mrf.mxu2 }
 0x5b6   : > { %v4708_v1 = vadd.f32 %v4707_v21, %v4679_v23 }
 0x5b7   : > { %6632 = vmatpush.xpose.msk.msrb.mxu0 %vm15592_vm9, %v15071_v50  ;;  %vm15608_vm9 = vcmp.eq.s32.totalorder %v14964_v6, %v10508_v41  ;;  %v4736_v41 = vpop.f32.mrf.mxu3 }
 0x5b8   : > { %6648 = vmatpush.xpose.msk.msrb.mxu1 %vm15593_vm6, %v15071_v50  ;;  %6664 = vmatpush.xpose.msk.msrb.mxu2 %vm15594_vm8, %v15071_v50  ;;  %vm15609_vm6 = vcmp.eq.s32.totalorder %v14964_v6, %v10513_v59  ;;  %vm15610_vm8 = vcmp.eq.s32.totalorder %v14964_v6, %v10946_v9  ;;  %v6816_v59 = vld [vmem:[%s7022_s19 + $0x28] sm:$0xff]  ;;  %v6818_v9 = vld [vmem:[%s7022_s19 + $0x38] sm:$0xff]  ;;  %v4737_v13 = vadd.f32 %v4736_v41, %v4708_v1 }
 0x5b9   : > { %6680 = vmatpush.xpose.msk.msrb.mxu3 %vm15595_vm2, %v15071_v50  ;;  %vm15611_vm2 = vcmp.eq.s32.totalorder %v14964_v6, %v11000_v61 }
 0x5bb   : > { %6633 = vmatpush.xpose.msk.msrb.mxu0 %vm15596_vm15, %v15071_v50 }
 0x5bc   : > { %6649 = vmatpush.xpose.msk.msrb.mxu1 %vm15597_vm11, %v15071_v50  ;;  %6665 = vmatpush.xpose.msk.msrb.mxu2 %vm15598_vm14, %v15071_v50 }
 0x5bd   : > { %6681 = vmatpush.xpose.msk.msrb.mxu3 %vm15599_vm7, %v15071_v50 }
 0x5bf   : > { %6634 = vmatpush.xpose.msk.msrb.mxu0 %vm15600_vm0, %v15071_v50 }
 0x5c0   : > { %6650 = vmatpush.xpose.msk.msrb.mxu1 %vm15601_vm12, %v15071_v50  ;;  %6666 = vmatpush.xpose.msk.msrb.mxu2 %vm15602_vm5, %v15071_v50 }
 0x5c1   : > { %6682 = vmatpush.xpose.msk.msrb.mxu3 %vm15603_vm4, %v15071_v50 }
 0x5c3   : > { %6635 = vmatpush.xpose.msk.msrb.mxu0 %vm15604_vm1, %v15071_v50 }
 0x5c4   : > { %6651 = vmatpush.xpose.msk.msrb.mxu1 %vm15605_vm13, %v15071_v50  ;;  %6667 = vmatpush.xpose.msk.msrb.mxu2 %vm15606_vm3, %v15071_v50 }
 0x5c5   : > { %6683 = vmatpush.xpose.msk.msrb.mxu3 %vm15607_vm10, %v15071_v50 }
 0x5c7   : > { %6636 = vmatpush.xpose.msk.msrb.mxu0 %vm15608_vm9, %v15071_v50  ;;  %v4756_v33 = vpop.f32.mrf.mxu0 }
 0x5c8   : > { %6652 = vmatpush.xpose.msk.msrb.mxu1 %vm15609_vm6, %v15071_v50  ;;  %6668 = vmatpush.xpose.msk.msrb.mxu2 %vm15610_vm8, %v15071_v50  ;;  %v4757_v6 = vadd.f32 %v4756_v33, %v4728_v37 }
 0x5c9   : > { %6684 = vmatpush.xpose.msk.msrb.mxu3 %vm15611_vm2, %v15071_v50 }
 0x5ca   : > { %4987 = vmatmul.f32.vlgmr.msrb.gmra.mxu0 %v6815_v32  ;;  %v4785_v50 = vpop.f32.mrf.mxu1 }
 0x5cb   : > { %5016 = vmatmul.f32.vlgmr.msrb.gmra.mxu1 %v6816_v59  ;;  %5045 = vmatmul.f32.vlgmr.msrb.gmra.mxu2 %v6817_v47  ;;  %v4786_v61 = vadd.f32 %v4785_v50, %v4757_v6 }
 0x5cc   : > { %5074 = vmatmul.f32.vlgmr.msrb.gmra.mxu3 %v6818_v9 }
 0x5ce   : > { %v4814_v31 = vpop.f32.mrf.mxu2 }
 0x5cf   : > { %v4815_v27 = vadd.f32 %v4814_v31, %v4786_v61  ;;  %v4759_v0 = vpop.f32.mrf.mxu0 }
 0x5d0   : > { %v4760_v40 = vadd.f32 %v4759_v0, %v4731_v63 }
 0x5d1   : > { %v4843_v18 = vpop.f32.mrf.mxu3 }
 0x5d2   : > { %4990 = vmatmul.f32.gmra.mxu0 %v6819_v29  ;;  %v4844_v60 = vadd.f32 %v4843_v18, %v4815_v27  ;;  %v4788_v16 = vpop.f32.mrf.mxu1 }
 0x5d3   : > { %5019 = vmatmul.f32.gmra.mxu1 %v6820_v52  ;;  %5048 = vmatmul.f32.gmra.mxu2 %v6821_v49  ;;  %v4789_v17 = vadd.f32 %v4788_v16, %v4760_v40 }
 0x5d4   : > { %5077 = vmatmul.f32.gmra.mxu3 %v6822_v11  ;;  %5132 = vst [vmem:[%s13780_s16] sm:$0xff] %v4844_v60 }
 0x5d6   : > { %v4817_v48 = vpop.f32.mrf.mxu2 }
 0x5d7   : > { %v4818_v55 = vadd.f32 %v4817_v48, %v4789_v17  ;;  %v4762_v26 = vpop.f32.mrf.mxu0 }
 0x5d8   : > { %v4763_v43 = vadd.f32 %v4762_v26, %v4734_v53 }
 0x5d9   : > { %v4846_v51 = vpop.f32.mrf.mxu3 }
 0x5da   : > { %4993 = vmatmul.f32.gmra.mxu0 %v6823_v42  ;;  %v4847_v57 = vadd.f32 %v4846_v51, %v4818_v55  ;;  %v4791_v4 = vpop.f32.mrf.mxu1 }
 0x5db   : > { %5022 = vmatmul.f32.gmra.mxu1 %v6824_v25  ;;  %5051 = vmatmul.f32.gmra.mxu2 %v6825_v7  ;;  %v4792_v38 = vadd.f32 %v4791_v4, %v4763_v43 }
 0x5dc   : > { %5080 = vmatmul.f32.gmra.mxu3 %v6826_v28  ;;  %5134 = vst [vmem:[%s13780_s16 + $0x10] sm:$0xff] %v4847_v57 }
 0x5de   : > { %v4820_v39 = vpop.f32.mrf.mxu2 }
 0x5df   : > { %v4821_v2 = vadd.f32 %v4820_v39, %v4792_v38  ;;  %v4765_v20 = vpop.f32.mrf.mxu0 }
 0x5e0   : > { %v4766_v22 = vadd.f32 %v4765_v20, %v4737_v13 }
 0x5e1   : > { %v4849_v30 = vpop.f32.mrf.mxu3 }
 0x5e2   : > { %4996 = vmatmul.f32.gmra.mxu0 %v6827_v44  ;;  %v4850_v58 = vadd.f32 %v4849_v30, %v4821_v2  ;;  %v4794_v34 = vpop.f32.mrf.mxu1 }
 0x5e3   : > { %5025 = vmatmul.f32.gmra.mxu1 %v6828_v62  ;;  %5054 = vmatmul.f32.gmra.mxu2 %v6829_v10  ;;  %v4795_v54 = vadd.f32 %v4794_v34, %v4766_v22 }
 0x5e4   : > { %5083 = vmatmul.f32.gmra.mxu3 %v6830_v46  ;;  %5136 = vst [vmem:[%s13780_s16 + $0x20] sm:$0xff] %v4850_v58 }
 0x5e6   : > { %v4823_v8 = vpop.f32.mrf.mxu2 }
 0x5e7   : > { %v4824_v15 = vadd.f32 %v4823_v8, %v4795_v54 }
 0x5e9   : > { %v4852_v12 = vpop.f32.mrf.mxu3 }
 0x5ea   : > { %v4853_v56 = vadd.f32 %v4852_v12, %v4824_v15 }
 0x5ec   : > { %5138 = vst [vmem:[%s13780_s16 + $0x30] sm:$0xff] %v4853_v56 }
 0x5ed   : > { %6858 = shalt.err (!%p6855_p5)
}
 0x5ee   : > { %6692 = dma.vmem_to_hbm [thread:$0]  (%p6993_p4), %s5186_s8, 128, %s5188_s10, %s5150_s18  }
 0x607   : > { %v4872_v3 = vpop.f32.mrf.mxu0 }
 0x60a   : > { %v4901_v5 = vpop.f32.mrf.mxu1 }
 0x60b   : > { %v4902_v6 = vadd.f32 %v4901_v5, %v4872_v3 }
 0x60e   : > { %v4930_v24 = vpop.f32.mrf.mxu2 }
 0x60f   : > { %v4875_v21 = vpop.f32.mrf.mxu0  ;;  %v4931_v50 = vadd.f32 %v4930_v24, %v4902_v6 }
 0x611   : > { %v4959_v35 = vpop.f32.mrf.mxu3 }
 0x612   : > { %v4904_v37 = vpop.f32.mrf.mxu1  ;;  %v4960_v19 = vadd.f32 %v4959_v35, %v4931_v50 }
 0x613   : > { %v4905_v29 = vadd.f32 %v4904_v37, %v4875_v21 }
 0x616   : > { %v4933_v36 = vpop.f32.mrf.mxu2 }
 0x617   : > { %v4878_v32 = vpop.f32.mrf.mxu0  ;;  %v4934_v11 = vadd.f32 %v4933_v36, %v4905_v29 }
 0x619   : > { %v4962_v41 = vpop.f32.mrf.mxu3 }
 0x61a   : > { %v4907_v59 = vpop.f32.mrf.mxu1  ;;  %v4963_v14 = vadd.f32 %v4962_v41, %v4934_v11 }
 0x61b   : > { %v4908_v60 = vadd.f32 %v4907_v59, %v4878_v32 }
 0x61e   : > { %v4936_v47 = vpop.f32.mrf.mxu2 }
 0x61f   : > { %v4881_v33 = vpop.f32.mrf.mxu0  ;;  %v4937_v42 = vadd.f32 %v4936_v47, %v4908_v60 }
 0x621   : > { %v4965_v9 = vpop.f32.mrf.mxu3 }
 0x622   : > { %v4910_v45 = vpop.f32.mrf.mxu1  ;;  %v4966_v28 = vadd.f32 %v4965_v9, %v4937_v42 }
 0x623   : > { %v4911_v55 = vadd.f32 %v4910_v45, %v4881_v33 }
 0x626   : > { %v4939_v61 = vpop.f32.mrf.mxu2 }
 0x627   : > { %v4940_v4 = vadd.f32 %v4939_v61, %v4911_v55 }
 0x629   : > { %v4968_v63 = vpop.f32.mrf.mxu3 }
 0x62a   : > { %v4969_v62 = vadd.f32 %v4968_v63, %v4940_v4 }
 0x647   : > { %v4988_v52 = vpop.f32.mrf.mxu0 }
 0x648   : > { %v5017_v31 = vpop.f32.mrf.mxu1  ;;  %v4989_v49 = vadd.f32 %v4988_v52, %v4960_v19 }
 0x64a   : > { %v5018_v27 = vadd.f32 %v5017_v31, %v4989_v49 }
 0x64e   : > { %v5046_v18 = vpop.f32.mrf.mxu2 }
 0x64f   : > { %v5075_v0 = vpop.f32.mrf.mxu3  ;;  %v5047_v40 = vadd.f32 %v5046_v18, %v5018_v27  ;;  %v4991_v16 = vpop.f32.mrf.mxu0 }
 0x650   : > { %v5020_v17 = vpop.f32.mrf.mxu1  ;;  %v4992_v53 = vadd.f32 %v4991_v16, %v4963_v14 }
 0x651   : > { %v5076_v23 = vadd.f32 %v5075_v0, %v5047_v40 }
 0x652   : > { %v5021_v25 = vadd.f32 %v5020_v17, %v4992_v53 }
 0x653   : > { %5133 = vst [vmem:[%s13780_s16 + $0x8] sm:$0xff] %v5076_v23 }
 0x656   : > { %v5049_v48 = vpop.f32.mrf.mxu2 }
 0x657   : > { %v5078_v7 = vpop.f32.mrf.mxu3  ;;  %v5050_v51 = vadd.f32 %v5049_v48, %v5021_v25  ;;  %v4994_v26 = vpop.f32.mrf.mxu0 }
 0x658   : > { %v5023_v1 = vpop.f32.mrf.mxu1  ;;  %v4995_v57 = vadd.f32 %v4994_v26, %v4966_v28 }
 0x659   : > { %v5079_v43 = vadd.f32 %v5078_v7, %v5050_v51 }
 0x65a   : > { %v5024_v38 = vadd.f32 %v5023_v1, %v4995_v57 }
 0x65b   : > { %5135 = vst [vmem:[%s13780_s16 + $0x18] sm:$0xff] %v5079_v43 }
 0x65e   : > { %v5052_v13 = vpop.f32.mrf.mxu2 }
 0x65f   : > { %v5081_v44 = vpop.f32.mrf.mxu3  ;;  %v5053_v39 = vadd.f32 %v5052_v13, %v5024_v38  ;;  %v4997_v10 = vpop.f32.mrf.mxu0 }
 0x660   : > { %v4998_v46 = vadd.f32 %v4997_v10, %v4969_v62  ;;  %v5026_v30 = vpop.f32.mrf.mxu1 }
 0x661   : > { %v5082_v2 = vadd.f32 %v5081_v44, %v5053_v39 }
 0x662   : > { %v5027_v20 = vadd.f32 %v5026_v30, %v4998_v46 }
 0x663   : > { %5137 = vst [vmem:[%s13780_s16 + $0x28] sm:$0xff] %v5082_v2 }
 0x666   : > { %v5055_v58 = vpop.f32.mrf.mxu2 }
 0x667   : > { %v5084_v22 = vpop.f32.mrf.mxu3  ;;  %v5056_v34 = vadd.f32 %v5055_v58, %v5027_v20 }
 0x669   : > { %v5085_v54 = vadd.f32 %v5084_v22, %v5056_v34 }
 0x66b   : > { %5139 = vst [vmem:[%s13780_s16 + $0x38] sm:$0xff] %v5085_v54 }
 0x66c PF: > { %p6698_p4 = scmp.ge.s32.totalorder %s6909_s29, 2  ;;  %s5221_s0 = sand.u32 1, %s6889_s24  }
 0x66d   : > { %s5222_s11 = scalar_lea.sflag [#allocation3], %s5221_s0 }
 0x66e   : > { %p6695_p6 = pnand %p6698_p4, %p7000_p8 }
 0x670   : > { %p6696_p7 = pneg %p6695_p6 }
 0x672   : > { %6884 = dma.done.wait (%p6696_p7), %s5222_s11, 128  }
 0x673   : > { %6886 = vsyncadd (%p6696_p7), %s5222_s11, 4294967168  ;;  %s21_s29 = sadd.s32 1, %s6909_s29   ;;  %s15612_s24 = smov %s6893_s25 }
 0x674   : > { %p18_p9 = scmp.ge.s32.totalorder %s21_s29, 4   ;;  %s15613_s25 = smov %s6897_s26 }
 0x675   : > { %s15614_s26 = smov %s7006_s14  ;;  %s15615_s27 = smov %s6905_s28 }
 0x676   : > { %s15616_s28 = smov %s15618_s9  ;;  %20 = sbr.rel (!%p18_p9) target bundleno = 6 (0x6), region = 119 }
 0x67b   :  { %5254 = vsyncpa [#allocation3], 1 }
 0x67c   :  { %5256 = vsyncpa [#allocation3 + $0x1], 1 }

</bundles_post_ra>
